<compile_context>
chip_gen: v5e
topology: v5e:2x2
jax: 0.10.0
libtpu: 0.0.40
codegen_flags: <defaults>
</compile_context>

<pallas_src>
import numpy as np
import jax
import jax.numpy as jnp
from jax.experimental import pallas as pl
from jax.experimental.pallas import tpu as pltpu

IMG_SHAPE = (1, 28, 28)
IN_PLANE = 100
PAD_IN = 128                       # latent dim padded to a full lane group
OUT_DIM = int(np.prod(IMG_SHAPE))  # 784
PAD_OUT = 896                      # 7 * 128 (lane-dense final matmul)
BN_EPS = 0.8
LRELU_SLOPE = 0.2
HIDDEN = [128, 256, 512, 1024]


# ----------------------------- Pallas kernel --------------------------------

def _gmlp_kernel(x_ref,
                 w1_ref, g1_ref, bt1_ref,
                 w2_hbm, g2_ref, bt2_ref,
                 w3_hbm, g3_ref, bt3_ref,
                 w4_hbm, g4_ref, bt4_ref,
                 w5_hbm, b5_ref,
                 o_ref,
                 xpad_ref, w2_vmem, w3_vmem, w4_vmem, w5_vmem, dma_sem):
    """Whole generator forward: 4x (Linear+BN+LeakyReLU) + Linear+Tanh."""

    # Kick off HBM->VMEM DMAs for the large weights (layers 2..5) immediately
    # so the transfers overlap with earlier-layer compute instead of
    # serializing ahead of the body (the default all-VMEM-input behavior).
    copies = []
    for i, (src, dst) in enumerate(((w2_hbm, w2_vmem), (w3_hbm, w3_vmem),
                                    (w4_hbm, w4_vmem), (w5_hbm, w5_vmem))):
        cp = pltpu.make_async_copy(src, dst, dma_sem.at[i])
        cp.start()
        copies.append(cp)

    def block(h_bf16, w_ref, g_ref, beta_ref):
        # Linear (bf16 MXU, f32 accumulate).  No bias: it cancels under the
        # training-mode BatchNorm that follows.
        y = jnp.dot(h_bf16, w_ref[...], preferred_element_type=jnp.float32)
        # One-pass batch statistics over the batch axis (biased variance).
        # Safe w.r.t. cancellation because eps=0.8 dominates.
        # TODO(synk): for batch tiles in the thousands, compute these two
        # reductions as ones-row matmuls to ride the idle MXU instead of XLU.
        inv_n = jnp.float32(1.0 / y.shape[0])
        mean = jnp.sum(y, axis=0, keepdims=True) * inv_n           # (1, F)
        mean_sq = jnp.sum(y * y, axis=0, keepdims=True) * inv_n    # (1, F)
        var = mean_sq - mean * mean
        # Fold BN into a single scale/shift pass over the (N, F) tile.
        scale = g_ref[...] * jax.lax.rsqrt(var + BN_EPS)           # (1, F)
        shift = beta_ref[...] - mean * scale                       # (1, F)
        z = y * scale + shift
        z = jnp.maximum(z, LRELU_SLOPE * z)                        # LeakyReLU
        return z.astype(jnp.bfloat16)

    # Pad the latent 100 -> 128 inside the kernel (W1 rows 100:128 are zero,
    # so pad values only need to be finite -> zero-fill the scratch first).
    xpad_ref[...] = jnp.zeros_like(xpad_ref)
    xpad_ref[:, :IN_PLANE] = x_ref[...].astype(jnp.bfloat16)
    h = xpad_ref[...]                                              # (N,128) bf16

    h = block(h, w1_ref, g1_ref, bt1_ref)
    copies[0].wait()
    h = block(h, w2_vmem, g2_ref, bt2_ref)
    copies[1].wait()
    h = block(h, w3_vmem, g3_ref, bt3_ref)
    copies[2].wait()
    h = block(h, w4_vmem, g4_ref, bt4_ref)
    copies[3].wait()
    y = jnp.dot(h, w5_vmem[...],
                preferred_element_type=jnp.float32) + b5_ref[...]  # (N,896) f32
    # Slice the zero-padded tail off before tanh and store lane-masked tail.
    o_ref[...] = jnp.tanh(y[:, :OUT_DIM])                          # (N,784) f32


def _vmem_spec():
    return pl.BlockSpec(memory_space=pltpu.MemorySpace.VMEM)


def _hbm_spec():
    return pl.BlockSpec(memory_space=pl.ANY)


# ------------------------- Parameter initialization -------------------------

def init_params(key, in_plane=IN_PLANE, img_shape=IMG_SHAPE):
    """PyTorch-style init; weights stored transposed (in, out), bf16, padded.

    Linear: W ~ U(-1/sqrt(fan_in), 1/sqrt(fan_in)).  The hidden-layer biases
    b1..b4 are not materialized (they cancel under training-mode BatchNorm).
    BatchNorm: gamma = 1, beta = 0.  Returns a flat tuple in the kernel's
    argument order (after x).
    """
    dims = [in_plane] + HIDDEN
    out_dim = int(np.prod(img_shape))
    flat = []

    for i in range(4):
        f_in, f_out = dims[i], dims[i + 1]
        key, kw = jax.random.split(key)
        bound = 1.0 / np.sqrt(f_in)
        w = jax.random.uniform(kw, (f_in, f_out), jnp.float32, -bound, bound)
        if i == 0:
            # Zero-pad the contracted (latent) dim 100 -> 128.
            w = jnp.zeros((PAD_IN, f_out), jnp.float32).at[:f_in, :].set(w)
        gamma = jnp.ones((1, f_out), jnp.float32)
        beta = jnp.zeros((1, f_out), jnp.float32)
        flat += [w.astype(jnp.bfloat16), gamma, beta]

    key, kw, kb = jax.random.split(key, 3)
    bound = 1.0 / np.sqrt(dims[-1])
    w = jax.random.uniform(kw, (dims[-1], out_dim), jnp.float32, -bound, bound)
    b = jax.random.uniform(kb, (1, out_dim), jnp.float32, -bound, bound)
    # Zero-pad the output dim 784 -> 896 (the kernel slices it back off).
    w_pad = jnp.zeros((dims[-1], PAD_OUT), jnp.float32).at[:, :out_dim].set(w)
    b_pad = jnp.zeros((1, PAD_OUT), jnp.float32).at[:, :out_dim].set(b)
    flat += [w_pad.astype(jnp.bfloat16), b_pad]
    return tuple(flat)


# --------------------------------- Forward ----------------------------------

@jax.jit
def g_mlp_forward(params, x):
    n = x.shape[0]

    in_specs = [
        _vmem_spec(),                                # x (N, 100) f32
        _vmem_spec(), _vmem_spec(), _vmem_spec(),    # w1, gamma1, beta1
        _hbm_spec(),  _vmem_spec(), _vmem_spec(),    # w2 (HBM), gamma2, beta2
        _hbm_spec(),  _vmem_spec(), _vmem_spec(),    # w3 (HBM), gamma3, beta3
        _hbm_spec(),  _vmem_spec(), _vmem_spec(),    # w4 (HBM), gamma4, beta4
        _hbm_spec(),  _vmem_spec(),                  # w5 (HBM), b5
    ]
    scratch_shapes = [
        pltpu.VMEM((n, PAD_IN), jnp.bfloat16),           # padded latent
        pltpu.VMEM((PAD_IN, HIDDEN[1]), jnp.bfloat16),   # w2 landing buffer
        pltpu.VMEM((HIDDEN[1], HIDDEN[2]), jnp.bfloat16),
        pltpu.VMEM((HIDDEN[2], HIDDEN[3]), jnp.bfloat16),
        pltpu.VMEM((HIDDEN[3], PAD_OUT), jnp.bfloat16),
        pltpu.SemaphoreType.DMA((4,)),
    ]

    out = pl.pallas_call(
        _gmlp_kernel,
        out_shape=jax.ShapeDtypeStruct((n, OUT_DIM), jnp.float32),
        in_specs=in_specs,
        out_specs=_vmem_spec(),
        scratch_shapes=scratch_shapes,
        compiler_params=pltpu.CompilerParams(
            # ~3.5 MB live (weights + activations); 32 MiB is safe on
            # v5e/v6e and within the v7x scoped default.
            vmem_limit_bytes=32 * 1024 * 1024),
    )(x, *params)

    # Contiguous reshape only (no slice/copy) -> NCHW (N, 1, 28, 28).
    return out.reshape((n,) + IMG_SHAPE)


# ----------------------------------- Main ------------------------------------

if __name__ == "__main__":
    key = jax.random.PRNGKey(0)
    key, kx = jax.random.split(key)

    batch = 16  # multiple of 16: inter-layer bf16 activations pack (16,128)
    x = jax.random.normal(kx, (batch, IN_PLANE), jnp.float32)   # latent noise

    params = init_params(jax.random.PRNGKey(0))

    img = g_mlp_forward(params, x)
    img = jax.block_until_ready(img)

    assert img.shape == (batch,) + IMG_SHAPE, img.shape
    assert img.dtype == jnp.float32
    assert bool(jnp.all(jnp.isfinite(img)))
    # Tanh output must lie in [-1, 1].
    assert bool(jnp.all(jnp.abs(img) <= 1.0 + 1e-6))

    print("KERNEL_OK")
</pallas_src>

<mosaic_0001>
module attributes {stable_mosaic.version = 11 : i64} {
  func.func @_gmlp_kernel(%arg0: memref<16x100xf32, #tpu.memory_space<vmem>>, %arg1: memref<128x128xbf16, #tpu.memory_space<vmem>>, %arg2: memref<1x128xf32, #tpu.memory_space<vmem>>, %arg3: memref<1x128xf32, #tpu.memory_space<vmem>>, %arg4: memref<128x256xbf16, #tpu.memory_space<any>>, %arg5: memref<1x256xf32, #tpu.memory_space<vmem>>, %arg6: memref<1x256xf32, #tpu.memory_space<vmem>>, %arg7: memref<256x512xbf16, #tpu.memory_space<any>>, %arg8: memref<1x512xf32, #tpu.memory_space<vmem>>, %arg9: memref<1x512xf32, #tpu.memory_space<vmem>>, %arg10: memref<512x1024xbf16, #tpu.memory_space<any>>, %arg11: memref<1x1024xf32, #tpu.memory_space<vmem>>, %arg12: memref<1x1024xf32, #tpu.memory_space<vmem>>, %arg13: memref<1024x896xbf16, #tpu.memory_space<any>>, %arg14: memref<1x896xf32, #tpu.memory_space<vmem>>, %arg15: memref<16x784xf32, #tpu.memory_space<vmem>>, %arg16: memref<16x128xbf16, #tpu.memory_space<vmem>>, %arg17: memref<128x256xbf16, #tpu.memory_space<vmem>>, %arg18: memref<256x512xbf16, #tpu.memory_space<vmem>>, %arg19: memref<512x1024xbf16, #tpu.memory_space<vmem>>, %arg20: memref<1024x896xbf16, #tpu.memory_space<vmem>>, %arg21: memref<4x!tpu.dma_semaphore, #tpu.memory_space<semaphore_mem>>) attributes {dimension_semantics = [], scalar_prefetch = 0 : i64, scratch_operands = 6 : i64, tpu.core_type = #tpu.core_type<tc>} {
    %c0_i32 = arith.constant 0 : i32
    %0 = tpu.memref_slice %arg21[%c0_i32] : memref<4x!tpu.dma_semaphore, #tpu.memory_space<semaphore_mem>> -> memref<1x!tpu.dma_semaphore, #tpu.memory_space<semaphore_mem>>
    %1 = tpu.memref_squeeze %0 : memref<1x!tpu.dma_semaphore, #tpu.memory_space<semaphore_mem>> -> memref<!tpu.dma_semaphore, #tpu.memory_space<semaphore_mem>>
    tpu.enqueue_dma source(%arg4 : memref<128x256xbf16, #tpu.memory_space<any>>) target(%arg17 : memref<128x256xbf16, #tpu.memory_space<vmem>>) target_semaphore(%1 : memref<!tpu.dma_semaphore, #tpu.memory_space<semaphore_mem>>)
    %c1_i32 = arith.constant 1 : i32
    %2 = tpu.memref_slice %arg21[%c1_i32] : memref<4x!tpu.dma_semaphore, #tpu.memory_space<semaphore_mem>> -> memref<1x!tpu.dma_semaphore, #tpu.memory_space<semaphore_mem>>
    %3 = tpu.memref_squeeze %2 : memref<1x!tpu.dma_semaphore, #tpu.memory_space<semaphore_mem>> -> memref<!tpu.dma_semaphore, #tpu.memory_space<semaphore_mem>>
    tpu.enqueue_dma source(%arg7 : memref<256x512xbf16, #tpu.memory_space<any>>) target(%arg18 : memref<256x512xbf16, #tpu.memory_space<vmem>>) target_semaphore(%3 : memref<!tpu.dma_semaphore, #tpu.memory_space<semaphore_mem>>)
    %c2_i32 = arith.constant 2 : i32
    %4 = tpu.memref_slice %arg21[%c2_i32] : memref<4x!tpu.dma_semaphore, #tpu.memory_space<semaphore_mem>> -> memref<1x!tpu.dma_semaphore, #tpu.memory_space<semaphore_mem>>
    %5 = tpu.memref_squeeze %4 : memref<1x!tpu.dma_semaphore, #tpu.memory_space<semaphore_mem>> -> memref<!tpu.dma_semaphore, #tpu.memory_space<semaphore_mem>>
    tpu.enqueue_dma source(%arg10 : memref<512x1024xbf16, #tpu.memory_space<any>>) target(%arg19 : memref<512x1024xbf16, #tpu.memory_space<vmem>>) target_semaphore(%5 : memref<!tpu.dma_semaphore, #tpu.memory_space<semaphore_mem>>)
    %c3_i32 = arith.constant 3 : i32
    %6 = tpu.memref_slice %arg21[%c3_i32] : memref<4x!tpu.dma_semaphore, #tpu.memory_space<semaphore_mem>> -> memref<1x!tpu.dma_semaphore, #tpu.memory_space<semaphore_mem>>
    %7 = tpu.memref_squeeze %6 : memref<1x!tpu.dma_semaphore, #tpu.memory_space<semaphore_mem>> -> memref<!tpu.dma_semaphore, #tpu.memory_space<semaphore_mem>>
    tpu.enqueue_dma source(%arg13 : memref<1024x896xbf16, #tpu.memory_space<any>>) target(%arg20 : memref<1024x896xbf16, #tpu.memory_space<vmem>>) target_semaphore(%7 : memref<!tpu.dma_semaphore, #tpu.memory_space<semaphore_mem>>)
    %cst = arith.constant 0.000000e+00 : bf16
    %8 = vector.broadcast %cst : bf16 to vector<16x128xbf16>
    %c0 = arith.constant 0 : index
    %c0_0 = arith.constant 0 : index
    %9 = vector.load %arg16[%c0, %c0_0] : memref<16x128xbf16, #tpu.memory_space<vmem>>, vector<16x128xbf16>
    tpu.vector_store %arg16[%c0, %c0_0], %8 {strides = array<i32>} : memref<16x128xbf16, #tpu.memory_space<vmem>>, vector<16x128xbf16>,
    %c0_1 = arith.constant 0 : index
    %c0_2 = arith.constant 0 : index
    %10 = vector.load %arg0[%c0_1, %c0_2] : memref<16x100xf32, #tpu.memory_space<vmem>>, vector<16x100xf32>
    %11 = arith.truncf %10 : vector<16x100xf32> to vector<16x100xbf16>
    %c0_3 = arith.constant 0 : index
    %c0_4 = arith.constant 0 : index
    %12 = vector.load %arg16[%c0_3, %c0_4] : memref<16x128xbf16, #tpu.memory_space<vmem>>, vector<16x100xbf16>
    tpu.vector_store %arg16[%c0_3, %c0_4], %11 {strides = array<i32>} : memref<16x128xbf16, #tpu.memory_space<vmem>>, vector<16x100xbf16>,
    %c0_5 = arith.constant 0 : index
    %c0_6 = arith.constant 0 : index
    %13 = vector.load %arg16[%c0_5, %c0_6] : memref<16x128xbf16, #tpu.memory_space<vmem>>, vector<16x128xbf16>
    %c0_7 = arith.constant 0 : index
    %c0_8 = arith.constant 0 : index
    %14 = vector.load %arg1[%c0_7, %c0_8] : memref<128x128xbf16, #tpu.memory_space<vmem>>, vector<128x128xbf16>
    %cst_9 = arith.constant dense<0.000000e+00> : vector<16x128xf32>
    %15 = tpu.matmul %13, %14, %cst_9 {dimension_numbers = #tpu.dot_dimension_numbers<[1], [0], [0], [1], [0, 0, 1, 1], [], []>} : vector<16x128xbf16>, vector<128x128xbf16>, vector<16x128xf32> -> vector<16x128xf32>
    %cst_10 = arith.constant dense<0.000000e+00> : vector<128xf32>
    %16 = vector.multi_reduction <add>, %15, %cst_10 [0] : vector<16x128xf32> to vector<128xf32>
    %17 = vector.shape_cast %16 : vector<128xf32> to vector<1x128xf32>
    %cst_11 = arith.constant 6.250000e-02 : f32
    %18 = vector.broadcast %cst_11 : f32 to vector<1x128xf32>
    %19 = arith.mulf %17, %18 : vector<1x128xf32>
    %20 = arith.mulf %15, %15 : vector<16x128xf32>
    %cst_12 = arith.constant dense<0.000000e+00> : vector<128xf32>
    %21 = vector.multi_reduction <add>, %20, %cst_12 [0] : vector<16x128xf32> to vector<128xf32>
    %22 = vector.shape_cast %21 : vector<128xf32> to vector<1x128xf32>
    %cst_13 = arith.constant 6.250000e-02 : f32
    %23 = vector.broadcast %cst_13 : f32 to vector<1x128xf32>
    %24 = arith.mulf %22, %23 : vector<1x128xf32>
    %25 = arith.mulf %19, %19 : vector<1x128xf32>
    %26 = arith.subf %24, %25 : vector<1x128xf32>
    %c0_14 = arith.constant 0 : index
    %c0_15 = arith.constant 0 : index
    %27 = vector.load %arg2[%c0_14, %c0_15] : memref<1x128xf32, #tpu.memory_space<vmem>>, vector<1x128xf32>
    %cst_16 = arith.constant 8.000000e-01 : f32
    %28 = vector.broadcast %cst_16 : f32 to vector<1x128xf32>
    %29 = arith.addf %26, %28 : vector<1x128xf32>
    %30 = math.rsqrt %29 : vector<1x128xf32>
    %31 = arith.mulf %27, %30 : vector<1x128xf32>
    %c0_17 = arith.constant 0 : index
    %c0_18 = arith.constant 0 : index
    %32 = vector.load %arg3[%c0_17, %c0_18] : memref<1x128xf32, #tpu.memory_space<vmem>>, vector<1x128xf32>
    %33 = arith.mulf %19, %31 : vector<1x128xf32>
    %34 = arith.subf %32, %33 : vector<1x128xf32>
    %35 = vector.broadcast %31 : vector<1x128xf32> to vector<16x128xf32>
    %36 = arith.mulf %15, %35 : vector<16x128xf32>
    %37 = vector.broadcast %34 : vector<1x128xf32> to vector<16x128xf32>
    %38 = arith.addf %36, %37 : vector<16x128xf32>
    %cst_19 = arith.constant 2.000000e-01 : f32
    %39 = vector.broadcast %cst_19 : f32 to vector<16x128xf32>
    %40 = arith.mulf %39, %38 : vector<16x128xf32>
    %41 = arith.maximumf %38, %40 : vector<16x128xf32>
    %42 = arith.truncf %41 : vector<16x128xf32> to vector<16x128xbf16>
    %c0_i32_20 = arith.constant 0 : i32
    %43 = tpu.memref_slice %arg21[%c0_i32_20] : memref<4x!tpu.dma_semaphore, #tpu.memory_space<semaphore_mem>> -> memref<1x!tpu.dma_semaphore, #tpu.memory_space<semaphore_mem>>
    %44 = tpu.memref_squeeze %43 : memref<1x!tpu.dma_semaphore, #tpu.memory_space<semaphore_mem>> -> memref<!tpu.dma_semaphore, #tpu.memory_space<semaphore_mem>>
    tpu.wait_dma2 semaphore(%44 : memref<!tpu.dma_semaphore, #tpu.memory_space<semaphore_mem>>) src(%arg4 : memref<128x256xbf16, #tpu.memory_space<any>>) dst(%arg17 : memref<128x256xbf16, #tpu.memory_space<vmem>>)
    %c0_21 = arith.constant 0 : index
    %c0_22 = arith.constant 0 : index
    %45 = vector.load %arg17[%c0_21, %c0_22] : memref<128x256xbf16, #tpu.memory_space<vmem>>, vector<128x256xbf16>
    %cst_23 = arith.constant dense<0.000000e+00> : vector<16x256xf32>
    %46 = tpu.matmul %42, %45, %cst_23 {dimension_numbers = #tpu.dot_dimension_numbers<[1], [0], [0], [1], [0, 0, 1, 1], [], []>} : vector<16x128xbf16>, vector<128x256xbf16>, vector<16x256xf32> -> vector<16x256xf32>
    %cst_24 = arith.constant dense<0.000000e+00> : vector<256xf32>
    %47 = vector.multi_reduction <add>, %46, %cst_24 [0] : vector<16x256xf32> to vector<256xf32>
    %48 = vector.shape_cast %47 : vector<256xf32> to vector<1x256xf32>
    %cst_25 = arith.constant 6.250000e-02 : f32
    %49 = vector.broadcast %cst_25 : f32 to vector<1x256xf32>
    %50 = arith.mulf %48, %49 : vector<1x256xf32>
    %51 = arith.mulf %46, %46 : vector<16x256xf32>
    %cst_26 = arith.constant dense<0.000000e+00> : vector<256xf32>
    %52 = vector.multi_reduction <add>, %51, %cst_26 [0] : vector<16x256xf32> to vector<256xf32>
    %53 = vector.shape_cast %52 : vector<256xf32> to vector<1x256xf32>
    %cst_27 = arith.constant 6.250000e-02 : f32
    %54 = vector.broadcast %cst_27 : f32 to vector<1x256xf32>
    %55 = arith.mulf %53, %54 : vector<1x256xf32>
    %56 = arith.mulf %50, %50 : vector<1x256xf32>
    %57 = arith.subf %55, %56 : vector<1x256xf32>
    %c0_28 = arith.constant 0 : index
    %c0_29 = arith.constant 0 : index
    %58 = vector.load %arg5[%c0_28, %c0_29] : memref<1x256xf32, #tpu.memory_space<vmem>>, vector<1x256xf32>
    %cst_30 = arith.constant 8.000000e-01 : f32
    %59 = vector.broadcast %cst_30 : f32 to vector<1x256xf32>
    %60 = arith.addf %57, %59 : vector<1x256xf32>
    %61 = math.rsqrt %60 : vector<1x256xf32>
    %62 = arith.mulf %58, %61 : vector<1x256xf32>
    %c0_31 = arith.constant 0 : index
    %c0_32 = arith.constant 0 : index
    %63 = vector.load %arg6[%c0_31, %c0_32] : memref<1x256xf32, #tpu.memory_space<vmem>>, vector<1x256xf32>
    %64 = arith.mulf %50, %62 : vector<1x256xf32>
    %65 = arith.subf %63, %64 : vector<1x256xf32>
    %66 = vector.broadcast %62 : vector<1x256xf32> to vector<16x256xf32>
    %67 = arith.mulf %46, %66 : vector<16x256xf32>
    %68 = vector.broadcast %65 : vector<1x256xf32> to vector<16x256xf32>
    %69 = arith.addf %67, %68 : vector<16x256xf32>
    %cst_33 = arith.constant 2.000000e-01 : f32
    %70 = vector.broadcast %cst_33 : f32 to vector<16x256xf32>
    %71 = arith.mulf %70, %69 : vector<16x256xf32>
    %72 = arith.maximumf %69, %71 : vector<16x256xf32>
    %73 = arith.truncf %72 : vector<16x256xf32> to vector<16x256xbf16>
    %c1_i32_34 = arith.constant 1 : i32
    %74 = tpu.memref_slice %arg21[%c1_i32_34] : memref<4x!tpu.dma_semaphore, #tpu.memory_space<semaphore_mem>> -> memref<1x!tpu.dma_semaphore, #tpu.memory_space<semaphore_mem>>
    %75 = tpu.memref_squeeze %74 : memref<1x!tpu.dma_semaphore, #tpu.memory_space<semaphore_mem>> -> memref<!tpu.dma_semaphore, #tpu.memory_space<semaphore_mem>>
    tpu.wait_dma2 semaphore(%75 : memref<!tpu.dma_semaphore, #tpu.memory_space<semaphore_mem>>) src(%arg7 : memref<256x512xbf16, #tpu.memory_space<any>>) dst(%arg18 : memref<256x512xbf16, #tpu.memory_space<vmem>>)
    %c0_35 = arith.constant 0 : index
    %c0_36 = arith.constant 0 : index
    %76 = vector.load %arg18[%c0_35, %c0_36] : memref<256x512xbf16, #tpu.memory_space<vmem>>, vector<256x512xbf16>
    %cst_37 = arith.constant dense<0.000000e+00> : vector<16x512xf32>
    %77 = tpu.matmul %73, %76, %cst_37 {dimension_numbers = #tpu.dot_dimension_numbers<[1], [0], [0], [1], [0, 0, 1, 1], [], []>} : vector<16x256xbf16>, vector<256x512xbf16>, vector<16x512xf32> -> vector<16x512xf32>
    %cst_38 = arith.constant dense<0.000000e+00> : vector<512xf32>
    %78 = vector.multi_reduction <add>, %77, %cst_38 [0] : vector<16x512xf32> to vector<512xf32>
    %79 = vector.shape_cast %78 : vector<512xf32> to vector<1x512xf32>
    %cst_39 = arith.constant 6.250000e-02 : f32
    %80 = vector.broadcast %cst_39 : f32 to vector<1x512xf32>
    %81 = arith.mulf %79, %80 : vector<1x512xf32>
    %82 = arith.mulf %77, %77 : vector<16x512xf32>
    %cst_40 = arith.constant dense<0.000000e+00> : vector<512xf32>
    %83 = vector.multi_reduction <add>, %82, %cst_40 [0] : vector<16x512xf32> to vector<512xf32>
    %84 = vector.shape_cast %83 : vector<512xf32> to vector<1x512xf32>
    %cst_41 = arith.constant 6.250000e-02 : f32
    %85 = vector.broadcast %cst_41 : f32 to vector<1x512xf32>
    %86 = arith.mulf %84, %85 : vector<1x512xf32>
    %87 = arith.mulf %81, %81 : vector<1x512xf32>
    %88 = arith.subf %86, %87 : vector<1x512xf32>
    %c0_42 = arith.constant 0 : index
    %c0_43 = arith.constant 0 : index
    %89 = vector.load %arg8[%c0_42, %c0_43] : memref<1x512xf32, #tpu.memory_space<vmem>>, vector<1x512xf32>
    %cst_44 = arith.constant 8.000000e-01 : f32
    %90 = vector.broadcast %cst_44 : f32 to vector<1x512xf32>
    %91 = arith.addf %88, %90 : vector<1x512xf32>
    %92 = math.rsqrt %91 : vector<1x512xf32>
    %93 = arith.mulf %89, %92 : vector<1x512xf32>
    %c0_45 = arith.constant 0 : index
    %c0_46 = arith.constant 0 : index
    %94 = vector.load %arg9[%c0_45, %c0_46] : memref<1x512xf32, #tpu.memory_space<vmem>>, vector<1x512xf32>
    %95 = arith.mulf %81, %93 : vector<1x512xf32>
    %96 = arith.subf %94, %95 : vector<1x512xf32>
    %97 = vector.broadcast %93 : vector<1x512xf32> to vector<16x512xf32>
    %98 = arith.mulf %77, %97 : vector<16x512xf32>
    %99 = vector.broadcast %96 : vector<1x512xf32> to vector<16x512xf32>
    %100 = arith.addf %98, %99 : vector<16x512xf32>
    %cst_47 = arith.constant 2.000000e-01 : f32
    %101 = vector.broadcast %cst_47 : f32 to vector<16x512xf32>
    %102 = arith.mulf %101, %100 : vector<16x512xf32>
    %103 = arith.maximumf %100, %102 : vector<16x512xf32>
    %104 = arith.truncf %103 : vector<16x512xf32> to vector<16x512xbf16>
    %c2_i32_48 = arith.constant 2 : i32
    %105 = tpu.memref_slice %arg21[%c2_i32_48] : memref<4x!tpu.dma_semaphore, #tpu.memory_space<semaphore_mem>> -> memref<1x!tpu.dma_semaphore, #tpu.memory_space<semaphore_mem>>
    %106 = tpu.memref_squeeze %105 : memref<1x!tpu.dma_semaphore, #tpu.memory_space<semaphore_mem>> -> memref<!tpu.dma_semaphore, #tpu.memory_space<semaphore_mem>>
    tpu.wait_dma2 semaphore(%106 : memref<!tpu.dma_semaphore, #tpu.memory_space<semaphore_mem>>) src(%arg10 : memref<512x1024xbf16, #tpu.memory_space<any>>) dst(%arg19 : memref<512x1024xbf16, #tpu.memory_space<vmem>>)
    %c0_49 = arith.constant 0 : index
    %c0_50 = arith.constant 0 : index
    %107 = vector.load %arg19[%c0_49, %c0_50] : memref<512x1024xbf16, #tpu.memory_space<vmem>>, vector<512x1024xbf16>
    %cst_51 = arith.constant dense<0.000000e+00> : vector<16x1024xf32>
    %108 = tpu.matmul %104, %107, %cst_51 {dimension_numbers = #tpu.dot_dimension_numbers<[1], [0], [0], [1], [0, 0, 1, 1], [], []>} : vector<16x512xbf16>, vector<512x1024xbf16>, vector<16x1024xf32> -> vector<16x1024xf32>
    %cst_52 = arith.constant dense<0.000000e+00> : vector<1024xf32>
    %109 = vector.multi_reduction <add>, %108, %cst_52 [0] : vector<16x1024xf32> to vector<1024xf32>
    %110 = vector.shape_cast %109 : vector<1024xf32> to vector<1x1024xf32>
    %cst_53 = arith.constant 6.250000e-02 : f32
    %111 = vector.broadcast %cst_53 : f32 to vector<1x1024xf32>
    %112 = arith.mulf %110, %111 : vector<1x1024xf32>
    %113 = arith.mulf %108, %108 : vector<16x1024xf32>
    %cst_54 = arith.constant dense<0.000000e+00> : vector<1024xf32>
    %114 = vector.multi_reduction <add>, %113, %cst_54 [0] : vector<16x1024xf32> to vector<1024xf32>
    %115 = vector.shape_cast %114 : vector<1024xf32> to vector<1x1024xf32>
    %cst_55 = arith.constant 6.250000e-02 : f32
    %116 = vector.broadcast %cst_55 : f32 to vector<1x1024xf32>
    %117 = arith.mulf %115, %116 : vector<1x1024xf32>
    %118 = arith.mulf %112, %112 : vector<1x1024xf32>
    %119 = arith.subf %117, %118 : vector<1x1024xf32>
    %c0_56 = arith.constant 0 : index
    %c0_57 = arith.constant 0 : index
    %120 = vector.load %arg11[%c0_56, %c0_57] : memref<1x1024xf32, #tpu.memory_space<vmem>>, vector<1x1024xf32>
    %cst_58 = arith.constant 8.000000e-01 : f32
    %121 = vector.broadcast %cst_58 : f32 to vector<1x1024xf32>
    %122 = arith.addf %119, %121 : vector<1x1024xf32>
    %123 = math.rsqrt %122 : vector<1x1024xf32>
    %124 = arith.mulf %120, %123 : vector<1x1024xf32>
    %c0_59 = arith.constant 0 : index
    %c0_60 = arith.constant 0 : index
    %125 = vector.load %arg12[%c0_59, %c0_60] : memref<1x1024xf32, #tpu.memory_space<vmem>>, vector<1x1024xf32>
    %126 = arith.mulf %112, %124 : vector<1x1024xf32>
    %127 = arith.subf %125, %126 : vector<1x1024xf32>
    %128 = vector.broadcast %124 : vector<1x1024xf32> to vector<16x1024xf32>
    %129 = arith.mulf %108, %128 : vector<16x1024xf32>
    %130 = vector.broadcast %127 : vector<1x1024xf32> to vector<16x1024xf32>
    %131 = arith.addf %129, %130 : vector<16x1024xf32>
    %cst_61 = arith.constant 2.000000e-01 : f32
    %132 = vector.broadcast %cst_61 : f32 to vector<16x1024xf32>
    %133 = arith.mulf %132, %131 : vector<16x1024xf32>
    %134 = arith.maximumf %131, %133 : vector<16x1024xf32>
    %135 = arith.truncf %134 : vector<16x1024xf32> to vector<16x1024xbf16>
    %c3_i32_62 = arith.constant 3 : i32
    %136 = tpu.memref_slice %arg21[%c3_i32_62] : memref<4x!tpu.dma_semaphore, #tpu.memory_space<semaphore_mem>> -> memref<1x!tpu.dma_semaphore, #tpu.memory_space<semaphore_mem>>
    %137 = tpu.memref_squeeze %136 : memref<1x!tpu.dma_semaphore, #tpu.memory_space<semaphore_mem>> -> memref<!tpu.dma_semaphore, #tpu.memory_space<semaphore_mem>>
    tpu.wait_dma2 semaphore(%137 : memref<!tpu.dma_semaphore, #tpu.memory_space<semaphore_mem>>) src(%arg13 : memref<1024x896xbf16, #tpu.memory_space<any>>) dst(%arg20 : memref<1024x896xbf16, #tpu.memory_space<vmem>>)
    %c0_63 = arith.constant 0 : index
    %c0_64 = arith.constant 0 : index
    %138 = vector.load %arg20[%c0_63, %c0_64] : memref<1024x896xbf16, #tpu.memory_space<vmem>>, vector<1024x896xbf16>
    %cst_65 = arith.constant dense<0.000000e+00> : vector<16x896xf32>
    %139 = tpu.matmul %135, %138, %cst_65 {dimension_numbers = #tpu.dot_dimension_numbers<[1], [0], [0], [1], [0, 0, 1, 1], [], []>} : vector<16x1024xbf16>, vector<1024x896xbf16>, vector<16x896xf32> -> vector<16x896xf32>
    %c0_66 = arith.constant 0 : index
    %c0_67 = arith.constant 0 : index
    %140 = vector.load %arg14[%c0_66, %c0_67] : memref<1x896xf32, #tpu.memory_space<vmem>>, vector<1x896xf32>
    %141 = vector.broadcast %140 : vector<1x896xf32> to vector<16x896xf32>
    %142 = arith.addf %139, %141 : vector<16x896xf32>
    %143 = vector.extract_strided_slice %142 {offsets = [0, 0], sizes = [16, 784], strides = [1, 1]} : vector<16x896xf32> to vector<16x784xf32>
    %144 = math.tanh %143 : vector<16x784xf32>
    %c0_68 = arith.constant 0 : index
    %c0_69 = arith.constant 0 : index
    %145 = vector.load %arg15[%c0_68, %c0_69] : memref<16x784xf32, #tpu.memory_space<vmem>>, vector<16x784xf32>
    tpu.vector_store %arg15[%c0_68, %c0_69], %144 {strides = array<i32>} : memref<16x784xf32, #tpu.memory_space<vmem>>, vector<16x784xf32>,
    return
  }
}

</mosaic_0001>

<bundles_post_ra>
// kernel: g_mlp_forward.1
= control target key start
LH: loop header
LB: loop body
LE: loop exit
PB: predicated region body
PF: predicated region fallthrough
CT: control target
= control target key end

     0   :  { %20 = vsyncpa [#allocation9], 0  ;;  %s12528_s0 = inlined_call_operand.hbm [shape: f32[16,100], index: 0, kind: input, shape index: {}]   ;;  %s12529_s1 = inlined_call_operand.hbm [shape: bf16[128,128], index: 1, kind: input, shape index: {}]   ;;  %s12530_s2 = inlined_call_operand.hbm [shape: f32[1,128], index: 2, kind: input, shape index: {}]   ;;  %s12531_s3 = inlined_call_operand.hbm [shape: f32[1,128], index: 3, kind: input, shape index: {}]   ;;  %s12532_s4 = inlined_call_operand.hbm [shape: bf16[128,256], index: 4, kind: input, shape index: {}]   ;;  %s12533_s5 = inlined_call_operand.hbm [shape: f32[1,256], index: 5, kind: input, shape index: {}]   ;;  %s12534_s6 = inlined_call_operand.hbm [shape: f32[1,256], index: 6, kind: input, shape index: {}]   ;;  %s12535_s7 = inlined_call_operand.hbm [shape: bf16[256,512], index: 7, kind: input, shape index: {}]   ;;  %s12536_s8 = inlined_call_operand.hbm [shape: f32[1,512], index: 8, kind: input, shape index: {}]   ;;  %s12537_s9 = inlined_call_operand.hbm [shape: f32[1,512], index: 9, kind: input, shape index: {}]   ;;  %s12538_s10 = inlined_call_operand.hbm [shape: bf16[512,1024], index: 10, kind: input, shape index: {}]   ;;  %s12539_s11 = inlined_call_operand.hbm [shape: f32[1,1024], index: 11, kind: input, shape index: {}]   ;;  %s12540_s12 = inlined_call_operand.hbm [shape: f32[1,1024], index: 12, kind: input, shape index: {}]   ;;  %s12541_s13 = inlined_call_operand.hbm [shape: bf16[1024,896], index: 13, kind: input, shape index: {}]   ;;  %s12542_s14 = inlined_call_operand.hbm [shape: f32[1,896], index: 14, kind: input, shape index: {}]   ;;  %s12543_s15 = inlined_call_operand.vmem [shape: f32[16,784], index: 15, kind: output, shape index: {}]  }
   0x1   :  { %21 = vsyncpa [#allocation11], 0 }
   0x2   :  { %22 = vsyncpa [#allocation14], 0 }
   0x3   :  { %23 = vsyncpa [#allocation17], 0 }
   0x4   :  { %24 = vsyncpa [#allocation20], 0  ;;  %s43_s20 = sshll.u32 %s12529_s1, 4  ;;  %s44_s20 = int_to_ptr.hbm [resolvable:$true] %s43_s20 }
   0x5   :  { %25 = vsyncpa [#allocation23], 0  ;;  %s11861_s21 = smov [#allocation10]   ;;  %s68_s25 = sshll.u32 %s12531_s3, 4  ;;  %s69_s25 = int_to_ptr.hbm [resolvable:$true] %s68_s25 }
   0x6   :  { %s45_s22 = sshll.u32 %s11861_s21, 4  ;;  %s11862_s26 = smov 64   ;;  %s46_s22 = int_to_ptr.vmem [resolvable:$true] %s45_s22 }
   0x7   :  { %s11863_s27 = smov 4   ;;  %s11864_s28 = smov [#allocation13]  }
   0x8   :  { %51 = dma.hbm_to_vmem [thread:$0]  %s44_s20, 1024, %s46_s22, [#allocation11], %s11862_s26, %s11862_s26, %s11863_s27  }
   0x9   :  { %s70_s29 = sshll.u32 %s11864_s28, 4  ;;  %s90_s17 = sshll.u32 %s12534_s6, 4  ;;  %s71_s29 = int_to_ptr.vmem [resolvable:$true] %s70_s29  ;;  %s91_s17 = int_to_ptr.hbm [resolvable:$true] %s90_s17 }
   0xa   :  { %73 = dma.hbm_to_vmem [thread:$0]  %s69_s25, 16, %s71_s29, [#allocation14]  }
   0xb   :  { %s112_s19 = sshll.u32 %s12537_s9, 4  ;;  %s11865_s21 = smov [#allocation16]   ;;  %s113_s19 = int_to_ptr.hbm [resolvable:$true] %s112_s19 }
   0xc   :  { %s92_s23 = sshll.u32 %s11865_s21, 4  ;;  %s11866_s3 = smov [#allocation19]   ;;  %s93_s23 = int_to_ptr.vmem [resolvable:$true] %s92_s23 }
   0xd   :  { %95 = dma.hbm_to_vmem [thread:$0]  %s91_s17, 32, %s93_s23, [#allocation17]  }
   0xe   :  { %s114_s20 = sshll.u32 %s11866_s3, 4  ;;  %s134_s26 = sshll.u32 %s12540_s12, 4  ;;  %s115_s20 = int_to_ptr.vmem [resolvable:$true] %s114_s20  ;;  %s135_s26 = int_to_ptr.hbm [resolvable:$true] %s134_s26 }
   0xf   :  { %117 = dma.hbm_to_vmem [thread:$0]  %s113_s19, 64, %s115_s20, [#allocation20]  }
  0x10   :  { %s30_s27 = sshll.u32 %s12528_s0, 4  ;;  %s11867_s28 = smov [#allocation22]   ;;  %s31_s27 = int_to_ptr.hbm [resolvable:$true] %s30_s27 }
  0x11   :  { %s136_s9 = sshll.u32 %s11867_s28, 4  ;;  %s11868_s29 = smov [#allocation8]   ;;  %s137_s9 = int_to_ptr.vmem [resolvable:$true] %s136_s9 }
  0x12   :  { %139 = dma.hbm_to_vmem [thread:$0]  %s135_s26, 128, %s137_s9, [#allocation23]  }
  0x13   :  { %s32_s30 = sshll.u32 %s11868_s29, 4  ;;  %s11869_s16 = smov 128   ;;  %s33_s30 = int_to_ptr.vmem [resolvable:$true] %s32_s30 }
  0x14   :  { %s11870_s17 = smov 8   ;;  %s57_s18 = sshll.u32 %s12530_s2, 4  ;;  %s58_s18 = int_to_ptr.hbm [resolvable:$true] %s57_s18 }
  0x15   :  { %38 = dma.hbm_to_vmem [thread:$0]  %s31_s27, 256, %s33_s30, [#allocation9], %s11869_s16, %s11869_s16, %s11870_s17  }
  0x16   :  { %s11871_s19 = smov [#allocation12]   ;;  %s79_s3 = sshll.u32 %s12533_s5, 4  ;;  %s80_s3 = int_to_ptr.hbm [resolvable:$true] %s79_s3 }
  0x17   :  { %s59_s21 = sshll.u32 %s11871_s19, 4  ;;  %s11872_s20 = smov [#allocation15]   ;;  %s60_s21 = int_to_ptr.vmem [resolvable:$true] %s59_s21 }
  0x18   :  { %62 = dma.hbm_to_vmem [thread:$0]  %s58_s18, 16, %s60_s21, [#allocation11]  }
  0x19   :  { %s81_s22 = sshll.u32 %s11872_s20, 4  ;;  %s101_s6 = sshll.u32 %s12536_s8, 4  ;;  %s82_s22 = int_to_ptr.vmem [resolvable:$true] %s81_s22  ;;  %s102_s6 = int_to_ptr.hbm [resolvable:$true] %s101_s6 }
  0x1a   :  { %84 = dma.hbm_to_vmem [thread:$0]  %s80_s3, 32, %s82_s22, [#allocation14]  }
  0x1b   :  { %s123_s27 = sshll.u32 %s12539_s11, 4  ;;  %s11873_s28 = smov [#allocation18]   ;;  %s124_s27 = int_to_ptr.hbm [resolvable:$true] %s123_s27 }
  0x1c   :  { %s103_s9 = sshll.u32 %s11873_s28, 4  ;;  %s11874_s5 = smov [#allocation21]   ;;  %s104_s9 = int_to_ptr.vmem [resolvable:$true] %s103_s9 }
  0x1d   :  { %106 = dma.hbm_to_vmem [thread:$0]  %s102_s6, 64, %s104_s9, [#allocation17]  }
  0x1e   :  { %s125_s29 = sshll.u32 %s11874_s5, 4  ;;  %s145_s17 = sshll.u32 %s12542_s14, 4  ;;  %s126_s29 = int_to_ptr.vmem [resolvable:$true] %s125_s29  ;;  %s146_s17 = int_to_ptr.hbm [resolvable:$true] %s145_s17 }
  0x1f   :  { %128 = dma.hbm_to_vmem [thread:$0]  %s124_s27, 128, %s126_s29, [#allocation20]  }
  0x20   :  { %s11875_s8 = smov [#allocation24]  }
  0x21   :  { %s147_s1 = sshll.u32 %s11875_s8, 4  ;;  %s148_s1 = int_to_ptr.vmem [resolvable:$true] %s147_s1 }
  0x22   :  { %150 = dma.hbm_to_vmem [thread:$0]  %s146_s17, 112, %s148_s1, [#allocation23]  }
  0x23   :  { %11841 = dma.done.wait [#allocation9], 256  }
  0x24   :  { %11842 = vsyncadd [#allocation9], 4294967040 }
  0x25   :  { %11843 = dma.done.wait [#allocation11], 1040  }
  0x26   :  { %11844 = vsyncadd [#allocation11], 4294966256 }
  0x27   :  { %11845 = dma.done.wait [#allocation14], 48  }
  0x28   :  { %11846 = vsyncadd [#allocation14], 4294967248 }
  0x29   :  { %11847 = dma.done.wait [#allocation17], 96  }
  0x2a   :  { %11848 = vsyncadd [#allocation17], 4294967200 }
  0x2b   :  { %11849 = dma.done.wait [#allocation20], 192  }
  0x2c   :  { %11850 = vsyncadd [#allocation20], 4294967104 }
  0x2d   :  { %11851 = dma.done.wait [#allocation23], 240  }
  0x2e   :  { %11852 = vsyncadd [#allocation23], 4294967056  ;;  %v11876_v0 = vmov 0   ;;  %v10616_v1 = vld [vmem:[#allocation10 + $0x38] sm:$0xff]  ;;  %v10615_v2 = vld [vmem:[#allocation10 + $0x30] sm:$0xff]  ;;  %vm257_vm0 = vcmask 814080  }
  0x2f   :  { %251 = vst [vmem:[#allocation2] sm:$0xf] %v11876_v0  ;;  %332 = vmatpush.bf16.msra.mxu0 %v10616_v1  ;;  %v253_v3 = vld [vmem:[#allocation8] sm:$0xff]  ;;  %v254_v4 = vld [vmem:[#allocation8 + $0x8] sm:$0xff]  ;;  %v10614_v7 = vld [vmem:[#allocation10 + $0x28] sm:$0xff]  ;;  %s203_s12 = sshll.u32 %s12532_s4, 4  ;;  %s204_s12 = int_to_ptr.hbm [resolvable:$true] %s203_s12 }
  0x30   :  { %252 = vst [vmem:[#allocation2 + $0x4] sm:$0xf] %v11876_v0  ;;  %v255_v5 = vpack.c.bf16 %v253_v3, %v253_v3  ;;  %v256_v6 = vpack.c.bf16 %v254_v4, %v254_v4  ;;  %v10613_v8 = vld [vmem:[#allocation10 + $0x20] sm:$0xff]  ;;  %v10612_v9 = vld [vmem:[#allocation10 + $0x18] sm:$0xff]  ;;  %v10611_v10 = vld [vmem:[#allocation10 + $0x10] sm:$0xff]  ;;  %s11877_s18 = smov [#allocation3]  }
  0x31   :  { %v10610_v11 = vld [vmem:[#allocation10 + $0x8] sm:$0xff]  ;;  %v10609_v12 = vld [vmem:[#allocation10] sm:$0xff]  ;;  %s205_s19 = sshll.u32 %s11877_s18, 4  ;;  %s217_s23 = sshll.u32 %s12535_s7, 4  ;;  %s206_s19 = int_to_ptr.vmem [resolvable:$true] %s205_s19  ;;  %s218_s23 = int_to_ptr.hbm [resolvable:$true] %s217_s23 }
  0x32   :  { %258 = vst.msk [vmem:[#allocation2] sm:$0xf] %vm257_vm0, %v255_v5  ;;  %208 = dma.hbm_to_vmem [thread:$0]  %s204_s12, 2048, %s206_s19, [#allocation7]  ;;  %v366_v42 = vld [vmem:[#allocation12] sm:$0x1] }
  0x33   :  { %333 = vmatpush.bf16.msra.mxu0 %v10615_v2  ;;  %259 = vst.msk [vmem:[#allocation2 + $0x4] sm:$0xf] %vm257_vm0, %v256_v6  ;;  %s11878_s3 = smov [#allocation4]   ;;  %s231_s26 = sshll.u32 %s12538_s10, 4  ;;  %v379_v46 = vld [vmem:[#allocation13] sm:$0x1]  ;;  %s232_s26 = int_to_ptr.hbm [resolvable:$true] %s231_s26 }
  0x34   :  { %s219_s20 = sshll.u32 %s11878_s3, 4  ;;  %s11879_s4 = smov [#allocation5]   ;;  %s220_s20 = int_to_ptr.vmem [resolvable:$true] %s219_s20 }
  0x35   :  { %222 = dma.hbm_to_vmem [thread:$0]  %s218_s23, 8192, %s220_s20, [#allocation7 + $0x1] }
  0x36   :  { %s233_s6 = sshll.u32 %s11879_s4, 4  ;;  %s245_s27 = sshll.u32 %s12541_s13, 4  ;;  %s234_s6 = int_to_ptr.vmem [resolvable:$true] %s233_s6  ;;  %s246_s27 = int_to_ptr.hbm [resolvable:$true] %s245_s27 }
  0x37   :  { %334 = vmatpush.bf16.msra.mxu0 %v10614_v7  ;;  %236 = dma.hbm_to_vmem [thread:$0]  %s232_s26, 32768, %s234_s6, [#allocation7 + $0x2] }
  0x38   :  { %s11880_s7 = smov [#allocation6]  }
  0x39   :  { %s247_s28 = sshll.u32 %s11880_s7, 4  ;;  %s248_s28 = int_to_ptr.vmem [resolvable:$true] %s247_s28 }
  0x3a   :  { %v10608_v13 = vld [vmem:[#allocation2] sm:$0xff]  ;;  %250 = dma.hbm_to_vmem [thread:$0]  %s246_s27, 57344, %s248_s28, [#allocation7 + $0x3] }
  0x3b   :  { %335 = vmatpush.bf16.msra.mxu0 %v10613_v8 }
  0x3f   :  { %336 = vmatpush.bf16.msra.mxu0 %v10612_v9 }
  0x43   :  { %337 = vmatpush.bf16.msra.mxu0 %v10611_v10 }
  0x47   :  { %338 = vmatpush.bf16.msra.mxu0 %v10610_v11 }
  0x4b   :  { %339 = vmatpush.bf16.msra.mxu0 %v10609_v12 }
  0x4e   :  { %340 = vmatmul.bf16.vlgmr.msra.gmra.mxu0 %v10608_v13 }
  0xcb   :  { %v341_v14 = vpop.f32.mrf.mxu0 }
  0xcc   :  { %v354_v16 = vmul.f32 %v341_v14, %v341_v14 }
  0xd3   :  { %v343_v15 = vpop.f32.mrf.mxu0 }
  0xd4   :  { %v346_v17 = vadd.f32 %v343_v15, %v341_v14  ;;  %v355_v18 = vmul.f32 %v343_v15, %v343_v15 }
  0xd6   :  { %v347_v19 = vrot.slane %v346_v17, 4  ;;  %v356_v20 = vadd.f32 %v355_v18, %v354_v16 }
  0xd8   :  { %v348_v21 = vadd.f32 %v347_v19, %v346_v17  ;;  %v357_v22 = vrot.slane %v356_v20, 4 }
  0xda   :  { %v349_v23 = vrot.slane %v348_v21, 2  ;;  %v358_v24 = vadd.f32 %v357_v22, %v356_v20 }
  0xdc   :  { %v350_v25 = vadd.f32 %v349_v23, %v348_v21  ;;  %v359_v26 = vrot.slane %v358_v24, 2 }
  0xde   :  { %v351_v27 = vrot.slane %v350_v25, 1  ;;  %v360_v28 = vadd.f32 %v359_v26, %v358_v24 }
  0xe0   :  { %v352_v29 = vadd.f32 %v351_v27, %v350_v25  ;;  %v361_v30 = vrot.slane %v360_v28, 1 }
  0xe2   :  { %v353_v31 = vmul.f32 0.0625, %v352_v29  ;;  %v362_v32 = vadd.f32 %v361_v30, %v360_v28 }
  0xe4   :  { %v363_v33 = vmul.f32 0.0625, %v362_v32  ;;  %v364_v34 = vmul.f32 %v353_v31, %v353_v31 }
  0xe6   :  { %v365_v35 = vsub.f32 %v363_v33, %v364_v34 }
  0xe8   :  { %v367_v36 = vadd.f32 0.8, %v365_v35 }
  0xea   :  { %11421 = vrsqrt.f32 %v367_v36  ;;  %vm374_vm2 = vweird.f32 %v367_v36 }
  0xf0   :  { %v11422_v37 = vpop.eup %11421 }
  0xf1   :  { %v369_v38 = vmul.f32 %v11422_v37, %v367_v36  ;;  %vm375_vm1 = vweird.f32 %v11422_v37 }
  0xf2   :  { %vm376_vm3 = vmor %vm374_vm2, %vm375_vm1 }
  0xf3   :  { %v370_v39 = vmul.f32 %v11422_v37, %v369_v38 }
  0xf5   :  { %v371_v40 = vmul.f32 0.5, %v370_v39 }
  0xf7   :  { %v372_v41 = vsub.f32 1.5, %v371_v40 }
  0xf9   :  { %v373_v43 = vmul.f32 %v11422_v37, %v372_v41 }
  0xfb   :  { %v377_v44 = vsel %vm376_vm3, %v11422_v37, %v373_v43 }
  0xfc   :  { %v378_v45 = vmul.f32 %v377_v44, %v366_v42 }
  0xfe   :  { %v380_v47 = vmul.f32 %v378_v45, %v353_v31  ;;  %v383_v48 = vperm.slane %v378_v45, 0 }
 0x100   :  { %v381_v49 = vsub.f32 %v379_v46, %v380_v47  ;;  %v385_v50 = vmul.f32 %v383_v48, %v341_v14  ;;  %v386_v51 = vmul.f32 %v383_v48, %v343_v15 }
 0x102   :  { %v388_v52 = vperm.slane %v381_v49, 0 }
 0x104   :  { %v390_v53 = vadd.f32 %v388_v52, %v385_v50  ;;  %v391_v54 = vadd.f32 %v388_v52, %v386_v51 }
 0x106   :  { %v392_v55 = vmul.f32 0.2, %v390_v53  ;;  %v393_v56 = vmul.f32 0.2, %v391_v54 }
 0x108   :  { %v394_v57 = vmax.f32 %v390_v53, %v392_v55  ;;  %v395_v58 = vmax.f32 %v391_v54, %v393_v56 }
 0x10a   :  { %v12006_v59 = vpack.c.bf16 %v395_v58, %v394_v57 }
 0x10b   :  { %11853 = dma.done.wait [#allocation7], 2048 }
 0x10c   :  { %11854 = vsyncadd [#allocation7], 4294965248  ;;  %v7526_v60 = vld [vmem:[#allocation3 + $0x70] sm:$0xf]  ;;  %v10632_v61 = vld [vmem:[#allocation3 + $0x74] sm:$0xf0] }
 0x10d   :  { %v10631_v62 = vld [vmem:[#allocation3 + $0x74] sm:$0xf]  ;;  %v7527_v63 = vor.u32 %v10632_v61, %v7526_v60  ;;  %v7528_v0 = vld [vmem:[#allocation3 + $0x78] sm:$0xf0]  ;;  %v7518_v1 = vld [vmem:[#allocation3 + $0x60] sm:$0xf] }
 0x10e   :  { %v10630_v2 = vld [vmem:[#allocation3 + $0x64] sm:$0xf0]  ;;  %v7531_v3 = vor.u32 %v10631_v62, %v7528_v0  ;;  %v10629_v4 = vld [vmem:[#allocation3 + $0x64] sm:$0xf]  ;;  %v7520_v5 = vld [vmem:[#allocation3 + $0x68] sm:$0xf0] }
 0x10f   :  { %497 = vmatpush.bf16.msra.mxu1 %v7527_v63  ;;  %v7519_v6 = vor.u32 %v10630_v2, %v7518_v1  ;;  %v7523_v7 = vor.u32 %v10629_v4, %v7520_v5  ;;  %v7510_v8 = vld [vmem:[#allocation3 + $0x50] sm:$0xf]  ;;  %v10628_v9 = vld [vmem:[#allocation3 + $0x54] sm:$0xf0]  ;;  %v10627_v10 = vld [vmem:[#allocation3 + $0x54] sm:$0xf] }
 0x110   :  { %511 = vmatpush.bf16.msra.mxu2 %v7531_v3  ;;  %v7512_v11 = vld [vmem:[#allocation3 + $0x58] sm:$0xf0]  ;;  %v7511_v12 = vor.u32 %v10628_v9, %v7510_v8  ;;  %v7502_v14 = vld [vmem:[#allocation3 + $0x40] sm:$0xf]  ;;  %v10626_v15 = vld [vmem:[#allocation3 + $0x44] sm:$0xf0] }
 0x111   :  { %v7515_v13 = vor.u32 %v10627_v10, %v7512_v11  ;;  %v10625_v16 = vld [vmem:[#allocation3 + $0x44] sm:$0xf]  ;;  %v7504_v17 = vld [vmem:[#allocation3 + $0x48] sm:$0xf0]  ;;  %v7503_v18 = vor.u32 %v10626_v15, %v7502_v14  ;;  %v7494_v20 = vld [vmem:[#allocation3 + $0x30] sm:$0xf] }
 0x112   :  { %v7507_v19 = vor.u32 %v10625_v16, %v7504_v17  ;;  %v10624_v21 = vld [vmem:[#allocation3 + $0x34] sm:$0xf0]  ;;  %v10623_v22 = vld [vmem:[#allocation3 + $0x34] sm:$0xf]  ;;  %v7496_v23 = vld [vmem:[#allocation3 + $0x38] sm:$0xf0] }
 0x113   :  { %498 = vmatpush.bf16.msra.mxu1 %v7519_v6  ;;  %v7495_v24 = vor.u32 %v10624_v21, %v7494_v20  ;;  %v7499_v25 = vor.u32 %v10623_v22, %v7496_v23  ;;  %v7486_v26 = vld [vmem:[#allocation3 + $0x20] sm:$0xf]  ;;  %v10622_v27 = vld [vmem:[#allocation3 + $0x24] sm:$0xf0]  ;;  %v10621_v28 = vld [vmem:[#allocation3 + $0x24] sm:$0xf] }
 0x114   :  { %512 = vmatpush.bf16.msra.mxu2 %v7523_v7  ;;  %v7488_v29 = vld [vmem:[#allocation3 + $0x28] sm:$0xf0]  ;;  %v7487_v30 = vor.u32 %v10622_v27, %v7486_v26  ;;  %v7478_v32 = vld [vmem:[#allocation3 + $0x10] sm:$0xf]  ;;  %v10620_v33 = vld [vmem:[#allocation3 + $0x14] sm:$0xf0] }
 0x115   :  { %v7491_v31 = vor.u32 %v10621_v28, %v7488_v29  ;;  %v10619_v34 = vld [vmem:[#allocation3 + $0x14] sm:$0xf]  ;;  %v7480_v35 = vld [vmem:[#allocation3 + $0x18] sm:$0xf0]  ;;  %v7479_v36 = vor.u32 %v10620_v33, %v7478_v32  ;;  %v7470_v38 = vld [vmem:[#allocation3] sm:$0xf] }
 0x116   :  { %v7483_v37 = vor.u32 %v10619_v34, %v7480_v35  ;;  %v10618_v39 = vld [vmem:[#allocation3 + $0x4] sm:$0xf0]  ;;  %v10617_v40 = vld [vmem:[#allocation3 + $0x4] sm:$0xf]  ;;  %v7472_v41 = vld [vmem:[#allocation3 + $0x8] sm:$0xf0] }
 0x117   :  { %499 = vmatpush.bf16.msra.mxu1 %v7511_v12  ;;  %v7471_v42 = vor.u32 %v10618_v39, %v7470_v38  ;;  %v7475_v43 = vor.u32 %v10617_v40, %v7472_v41  ;;  %vm591_vm9 = vcmask 1040384   ;;  %v565_v39 = vld [vmem:[#allocation15] sm:$0x3] }
 0x118   :  { %513 = vmatpush.bf16.msra.mxu2 %v7515_v13 }
 0x11b   :  { %500 = vmatpush.bf16.msra.mxu1 %v7503_v18 }
 0x11c   :  { %514 = vmatpush.bf16.msra.mxu2 %v7507_v19 }
 0x11f   :  { %501 = vmatpush.bf16.msra.mxu1 %v7495_v24 }
 0x120   :  { %515 = vmatpush.bf16.msra.mxu2 %v7499_v25 }
 0x123   :  { %502 = vmatpush.bf16.msra.mxu1 %v7487_v30 }
 0x124   :  { %516 = vmatpush.bf16.msra.mxu2 %v7491_v31 }
 0x127   :  { %503 = vmatpush.bf16.msra.mxu1 %v7479_v36 }
 0x128   :  { %517 = vmatpush.bf16.msra.mxu2 %v7483_v37 }
 0x12b   :  { %504 = vmatpush.bf16.msra.mxu1 %v7471_v42 }
 0x12c   :  { %518 = vmatpush.bf16.msra.mxu2 %v7475_v43 }
 0x12e   :  { %505 = vmatmul.bf16.vlgmr.msra.gmra.mxu1 %v12006_v59 }
 0x12f   :  { %519 = vmatmul.bf16.vlgmr.msra.gmra.mxu2 %v12006_v59 }
 0x1ab   :  { %v12010_v44 = vpop.f32.mrf.mxu1 }
 0x1ac   :  { %v541_v45 = vmul.f32 %v12010_v44, %v12010_v44 }
 0x1b2   :  { %v12014_v46 = vpop.f32.mrf.mxu2 }
 0x1b3   :  { %v12016_v47 = vpop.f32.mrf.mxu1  ;;  %v542_v57 = vmul.f32 %v12014_v46, %v12014_v46 }
 0x1b4   :  { %v525_v48 = vadd.f32 %v12016_v47, %v12010_v44  ;;  %v543_v49 = vmul.f32 %v12016_v47, %v12016_v47 }
 0x1b6   :  { %v526_v50 = vrot.slane %v525_v48, 4  ;;  %v545_v51 = vadd.f32 %v543_v49, %v541_v45 }
 0x1b8   :  { %v527_v52 = vadd.f32 %v526_v50, %v525_v48  ;;  %v546_v53 = vrot.slane %v545_v51, 4  ;;  %v595_v50 = vld [vmem:[#allocation16] sm:$0x3] }
 0x1ba   :  { %v528_v54 = vrot.slane %v527_v52, 2  ;;  %v547_v55 = vadd.f32 %v546_v53, %v545_v51  ;;  %v12022_v56 = vpop.f32.mrf.mxu2 }
 0x1bb   :  { %v532_v58 = vadd.f32 %v12022_v56, %v12014_v46  ;;  %v544_v59 = vmul.f32 %v12022_v56, %v12022_v56 }
 0x1bc   :  { %v529_v60 = vadd.f32 %v528_v54, %v527_v52  ;;  %v548_v61 = vrot.slane %v547_v55, 2 }
 0x1bd   :  { %v533_v62 = vrot.slane %v532_v58, 4  ;;  %v552_v63 = vadd.f32 %v544_v59, %v542_v57 }
 0x1be   :  { %v530_v0 = vrot.slane %v529_v60, 1  ;;  %v549_v1 = vadd.f32 %v548_v61, %v547_v55 }
 0x1bf   :  { %v534_v2 = vadd.f32 %v533_v62, %v532_v58  ;;  %v553_v3 = vrot.slane %v552_v63, 4 }
 0x1c0   :  { %v531_v4 = vadd.f32 %v530_v0, %v529_v60  ;;  %v550_v5 = vrot.slane %v549_v1, 1 }
 0x1c1   :  { %v535_v6 = vrot.slane %v534_v2, 2  ;;  %v554_v7 = vadd.f32 %v553_v3, %v552_v63 }
 0x1c2   :  { %v539_v8 = vmul.f32 0.0625, %v531_v4  ;;  %v551_v9 = vadd.f32 %v550_v5, %v549_v1 }
 0x1c3   :  { %v536_v10 = vadd.f32 %v535_v6, %v534_v2  ;;  %v555_v11 = vrot.slane %v554_v7, 2 }
 0x1c4   :  { %v559_v12 = vmul.f32 0.0625, %v551_v9  ;;  %v561_v13 = vmul.f32 %v539_v8, %v539_v8 }
 0x1c5   :  { %v537_v14 = vrot.slane %v536_v10, 1  ;;  %v556_v15 = vadd.f32 %v555_v11, %v554_v7 }
 0x1c6   :  { %v563_v16 = vsub.f32 %v559_v12, %v561_v13 }
 0x1c7   :  { %v538_v17 = vadd.f32 %v537_v14, %v536_v10  ;;  %v557_v18 = vrot.slane %v556_v15, 1 }
 0x1c8   :  { %v566_v19 = vadd.f32 0.8, %v563_v16 }
 0x1c9   :  { %v540_v20 = vmul.f32 0.0625, %v538_v17  ;;  %v558_v21 = vadd.f32 %v557_v18, %v556_v15 }
 0x1ca   :  { %11423 = vrsqrt.f32 %v566_v19  ;;  %vm574_vm8 = vweird.f32 %v566_v19 }
 0x1cb   :  { %v560_v22 = vmul.f32 0.0625, %v558_v21  ;;  %v562_v23 = vmul.f32 %v540_v20, %v540_v20 }
 0x1cd   :  { %v564_v24 = vsub.f32 %v560_v22, %v562_v23 }
 0x1cf   :  { %v567_v25 = vadd.f32 0.8, %v564_v24 }
 0x1d0   :  { %v11424_v26 = vpop.eup %11423 }
 0x1d1   :  { %v569_v27 = vmul.f32 %v11424_v26, %v566_v19  ;;  %11425 = vrsqrt.f32 %v567_v25  ;;  %vm575_vm5 = vweird.f32 %v11424_v26  ;;  %vm584_vm6 = vweird.f32 %v567_v25 }
 0x1d2   :  { %vm576_vm10 = vmor %vm574_vm8, %vm575_vm5 }
 0x1d3   :  { %v570_v28 = vmul.f32 %v11424_v26, %v569_v27 }
 0x1d5   :  { %v571_v30 = vmul.f32 0.5, %v570_v28 }
 0x1d7   :  { %v11426_v29 = vpop.eup %11425  ;;  %v572_v33 = vsub.f32 1.5, %v571_v30 }
 0x1d8   :  { %v579_v31 = vmul.f32 %v11426_v29, %v567_v25  ;;  %vm585_vm4 = vweird.f32 %v11426_v29 }
 0x1d9   :  { %v573_v36 = vmul.f32 %v11424_v26, %v572_v33  ;;  %vm586_vm7 = vmor %vm584_vm6, %vm585_vm4 }
 0x1da   :  { %v580_v32 = vmul.f32 %v11426_v29, %v579_v31 }
 0x1db   :  { %v577_v41 = vsel %vm576_vm10, %v11424_v26, %v573_v36 }
 0x1dc   :  { %v581_v34 = vmul.f32 0.5, %v580_v32 }
 0x1de   :  { %v582_v35 = vsub.f32 1.5, %v581_v34 }
 0x1e0   :  { %v583_v37 = vmul.f32 %v11426_v29, %v582_v35 }
 0x1e2   :  { %v587_v38 = vsel %vm586_vm7, %v11426_v29, %v583_v37 }
 0x1e3   :  { %v590_v40 = vrot.slane %v587_v38, 7 }
 0x1e5   :  { %v592_v42 = vsel %vm591_vm9, %v577_v41, %v590_v40 }
 0x1e6   :  { %v594_v43 = vmul.f32 %v592_v42, %v565_v39 }
 0x1e8   :  { %v597_v45 = vperm.slane %v594_v43, 0  ;;  %v598_v48 = vperm.slane %v594_v43, 1 }
 0x1ea   :  { %v602_v49 = vmul.f32 %v598_v48, %v540_v20  ;;  %v601_v51 = vmul.f32 %v597_v45, %v539_v8  ;;  %v609_v55 = vmul.f32 %v597_v45, %v12010_v44  ;;  %v610_v57 = vmul.f32 %v598_v48, %v12014_v46 }
 0x1eb   :  { %v611_v58 = vmul.f32 %v597_v45, %v12016_v47  ;;  %v612_v59 = vmul.f32 %v598_v48, %v12022_v56 }
 0x1ec   :  { %v605_v52 = vrot.slane %v602_v49, 7 }
 0x1ee   :  { %v606_v53 = vsel %vm591_vm9, %v601_v51, %v605_v52 }
 0x1ef   :  { %v608_v54 = vsub.f32 %v595_v50, %v606_v53 }
 0x1f1   :  { %v614_v60 = vperm.slane %v608_v54, 0  ;;  %v615_v61 = vperm.slane %v608_v54, 1 }
 0x1f3   :  { %v618_v62 = vadd.f32 %v614_v60, %v609_v55  ;;  %v619_v63 = vadd.f32 %v615_v61, %v610_v57  ;;  %v620_v0 = vadd.f32 %v614_v60, %v611_v58  ;;  %v621_v1 = vadd.f32 %v615_v61, %v612_v59 }
 0x1f5   :  { %v622_v2 = vmul.f32 0.2, %v618_v62  ;;  %v623_v3 = vmul.f32 0.2, %v619_v63  ;;  %v624_v4 = vmul.f32 0.2, %v620_v0 }
 0x1f6   :  { %v625_v5 = vmul.f32 0.2, %v621_v1 }
 0x1f7   :  { %v626_v6 = vmax.f32 %v618_v62, %v622_v2  ;;  %v627_v7 = vmax.f32 %v619_v63, %v623_v3  ;;  %v628_v8 = vmax.f32 %v620_v0, %v624_v4 }
 0x1f8   :  { %v629_v44 = vmax.f32 %v621_v1, %v625_v5 }
 0x1f9   :  { %v12036_v9 = vpack.c.bf16 %v628_v8, %v626_v6 }
 0x1fa   :  { %v12038_v46 = vpack.c.bf16 %v629_v44, %v627_v7 }
 0x1fb   :  { %11855 = dma.done.wait [#allocation7 + $0x1], 8192 }
 0x1fc   :  { %11856 = vsyncadd [#allocation7 + $0x1], 4294959104  ;;  %v7646_v47 = vld [vmem:[#allocation4 + $0xe0] sm:$0xf]  ;;  %v10663_v56 = vld [vmem:[#allocation4 + $0xec] sm:$0xf0] }
 0x1fd   :  { %v7774_v10 = vld [vmem:[#allocation4 + $0x1e0] sm:$0xf]  ;;  %v7647_v11 = vor.u32 %v10663_v56, %v7646_v47  ;;  %v10695_v12 = vld [vmem:[#allocation4 + $0x1ec] sm:$0xf0]  ;;  %v10661_v13 = vld [vmem:[#allocation4 + $0xe4] sm:$0xf] }
 0x1fe   :  { %v7648_v14 = vld [vmem:[#allocation4 + $0xf0] sm:$0xf0]  ;;  %v7775_v15 = vor.u32 %v10695_v12, %v7774_v10  ;;  %v10693_v17 = vld [vmem:[#allocation4 + $0x1e4] sm:$0xf]  ;;  %v7630_v19 = vld [vmem:[#allocation4 + $0xc0] sm:$0xf] }
 0x1ff   :  { %v7651_v16 = vor.u32 %v10661_v13, %v7648_v14  ;;  %v7776_v18 = vld [vmem:[#allocation4 + $0x1f0] sm:$0xf0]  ;;  %1020 = vmatpush.bf16.msra.mxu3 %v7647_v11  ;;  %v10659_v21 = vld [vmem:[#allocation4 + $0xcc] sm:$0xf0]  ;;  %v7758_v22 = vld [vmem:[#allocation4 + $0x1c0] sm:$0xf] }
 0x200   :  { %v7779_v20 = vor.u32 %v10693_v17, %v7776_v18  ;;  %v10691_v23 = vld [vmem:[#allocation4 + $0x1cc] sm:$0xf0]  ;;  %1034 = vmatpush.bf16.msrb.mxu0 %v7775_v15  ;;  %v7631_v24 = vor.u32 %v10659_v21, %v7630_v19  ;;  %v10657_v26 = vld [vmem:[#allocation4 + $0xc4] sm:$0xf]  ;;  %v7632_v27 = vld [vmem:[#allocation4 + $0xd0] sm:$0xf0] }
 0x201   :  { %1048 = vmatpush.bf16.msrb.mxu1 %v7651_v16  ;;  %v7759_v25 = vor.u32 %v10691_v23, %v7758_v22  ;;  %v10689_v28 = vld [vmem:[#allocation4 + $0x1c4] sm:$0xf]  ;;  %v7635_v29 = vor.u32 %v10657_v26, %v7632_v27  ;;  %v7760_v30 = vld [vmem:[#allocation4 + $0x1d0] sm:$0xf0]  ;;  %v7614_v31 = vld [vmem:[#allocation4 + $0xa0] sm:$0xf] }
 0x202   :  { %1062 = vmatpush.bf16.msrb.mxu2 %v7779_v20  ;;  %v10655_v32 = vld [vmem:[#allocation4 + $0xac] sm:$0xf0]  ;;  %v7763_v33 = vor.u32 %v10689_v28, %v7760_v30  ;;  %v7742_v34 = vld [vmem:[#allocation4 + $0x1a0] sm:$0xf]  ;;  %v10653_v36 = vld [vmem:[#allocation4 + $0xa4] sm:$0xf] }
 0x203   :  { %v10687_v35 = vld [vmem:[#allocation4 + $0x1ac] sm:$0xf0]  ;;  %1021 = vmatpush.bf16.msra.mxu3 %v7631_v24  ;;  %v7615_v37 = vor.u32 %v10655_v32, %v7614_v31  ;;  %v7616_v38 = vld [vmem:[#allocation4 + $0xb0] sm:$0xf0]  ;;  %v10685_v39 = vld [vmem:[#allocation4 + $0x1a4] sm:$0xf] }
 0x204   :  { %v7744_v40 = vld [vmem:[#allocation4 + $0x1b0] sm:$0xf0]  ;;  %1035 = vmatpush.bf16.msrb.mxu0 %v7759_v25  ;;  %v7743_v41 = vor.u32 %v10687_v35, %v7742_v34  ;;  %v7619_v42 = vor.u32 %v10653_v36, %v7616_v38  ;;  %v7598_v43 = vld [vmem:[#allocation4 + $0x80] sm:$0xf]  ;;  %v10651_v45 = vld [vmem:[#allocation4 + $0x8c] sm:$0xf0] }
 0x205   :  { %1049 = vmatpush.bf16.msrb.mxu1 %v7635_v29  ;;  %v7726_v48 = vld [vmem:[#allocation4 + $0x180] sm:$0xf]  ;;  %v7747_v49 = vor.u32 %v10685_v39, %v7744_v40  ;;  %v10683_v50 = vld [vmem:[#allocation4 + $0x18c] sm:$0xf0]  ;;  %v10649_v51 = vld [vmem:[#allocation4 + $0x84] sm:$0xf]  ;;  %v7599_v55 = vor.u32 %v10651_v45, %v7598_v43 }
 0x206   :  { %1063 = vmatpush.bf16.msrb.mxu2 %v7763_v33  ;;  %v7600_v52 = vld [vmem:[#allocation4 + $0x90] sm:$0xf0]  ;;  %v10681_v53 = vld [vmem:[#allocation4 + $0x184] sm:$0xf]  ;;  %v7727_v57 = vor.u32 %v10683_v50, %v7726_v48  ;;  %v7582_v59 = vld [vmem:[#allocation4 + $0x60] sm:$0xf] }
 0x207   :  { %v7728_v54 = vld [vmem:[#allocation4 + $0x190] sm:$0xf0]  ;;  %1022 = vmatpush.bf16.msra.mxu3 %v7615_v37  ;;  %v7603_v58 = vor.u32 %v10649_v51, %v7600_v52  ;;  %v10647_v60 = vld [vmem:[#allocation4 + $0x6c] sm:$0xf0]  ;;  %v7710_v61 = vld [vmem:[#allocation4 + $0x160] sm:$0xf] }
 0x208   :  { %1036 = vmatpush.bf16.msrb.mxu0 %v7743_v41  ;;  %v7731_v62 = vor.u32 %v10681_v53, %v7728_v54  ;;  %v10679_v63 = vld [vmem:[#allocation4 + $0x16c] sm:$0xf0]  ;;  %v10645_v0 = vld [vmem:[#allocation4 + $0x64] sm:$0xf]  ;;  %v7584_v1 = vld [vmem:[#allocation4 + $0x70] sm:$0xf0]  ;;  %v7583_v4 = vor.u32 %v10647_v60, %v7582_v59 }
 0x209   :  { %1050 = vmatpush.bf16.msrb.mxu1 %v7619_v42  ;;  %v10677_v2 = vld [vmem:[#allocation4 + $0x164] sm:$0xf]  ;;  %v7712_v3 = vld [vmem:[#allocation4 + $0x170] sm:$0xf0]  ;;  %v7711_v5 = vor.u32 %v10679_v63, %v7710_v61  ;;  %v7587_v6 = vor.u32 %v10645_v0, %v7584_v1  ;;  %v7566_v7 = vld [vmem:[#allocation4 + $0x40] sm:$0xf] }
 0x20a   :  { %1064 = vmatpush.bf16.msrb.mxu2 %v7747_v49  ;;  %v10643_v8 = vld [vmem:[#allocation4 + $0x4c] sm:$0xf0]  ;;  %v7694_v44 = vld [vmem:[#allocation4 + $0x140] sm:$0xf]  ;;  %v7715_v47 = vor.u32 %v10677_v2, %v7712_v3  ;;  %v10641_v10 = vld [vmem:[#allocation4 + $0x44] sm:$0xf] }
 0x20b   :  { %1023 = vmatpush.bf16.msra.mxu3 %v7599_v55  ;;  %v10675_v56 = vld [vmem:[#allocation4 + $0x14c] sm:$0xf0]  ;;  %v7568_v11 = vld [vmem:[#allocation4 + $0x50] sm:$0xf0]  ;;  %v10673_v12 = vld [vmem:[#allocation4 + $0x144] sm:$0xf]  ;;  %v7567_v14 = vor.u32 %v10643_v8, %v7566_v7 }
 0x20c   :  { %1037 = vmatpush.bf16.msrb.mxu0 %v7727_v57  ;;  %v7696_v13 = vld [vmem:[#allocation4 + $0x150] sm:$0xf0]  ;;  %v7695_v15 = vor.u32 %v10675_v56, %v7694_v44  ;;  %v7571_v16 = vor.u32 %v10641_v10, %v7568_v11  ;;  %v7550_v17 = vld [vmem:[#allocation4 + $0x20] sm:$0xf]  ;;  %v10639_v18 = vld [vmem:[#allocation4 + $0x2c] sm:$0xf0] }
 0x20d   :  { %1051 = vmatpush.bf16.msrb.mxu1 %v7603_v58  ;;  %v7678_v19 = vld [vmem:[#allocation4 + $0x120] sm:$0xf]  ;;  %v7699_v20 = vor.u32 %v10673_v12, %v7696_v13  ;;  %v10671_v21 = vld [vmem:[#allocation4 + $0x12c] sm:$0xf0]  ;;  %v10637_v22 = vld [vmem:[#allocation4 + $0x24] sm:$0xf]  ;;  %v7551_v26 = vor.u32 %v10639_v18, %v7550_v17 }
 0x20e   :  { %1065 = vmatpush.bf16.msrb.mxu2 %v7731_v62  ;;  %v7552_v23 = vld [vmem:[#allocation4 + $0x30] sm:$0xf0]  ;;  %v10669_v24 = vld [vmem:[#allocation4 + $0x124] sm:$0xf]  ;;  %v7534_v27 = vld [vmem:[#allocation4] sm:$0xf]  ;;  %v7679_v29 = vor.u32 %v10671_v21, %v7678_v19 }
 0x20f   :  { %1024 = vmatpush.bf16.msra.mxu3 %v7583_v4  ;;  %v7680_v25 = vld [vmem:[#allocation4 + $0x130] sm:$0xf0]  ;;  %v10635_v28 = vld [vmem:[#allocation4 + $0xc] sm:$0xf0]  ;;  %v7555_v30 = vor.u32 %v10637_v22, %v7552_v23  ;;  %v7662_v31 = vld [vmem:[#allocation4 + $0x100] sm:$0xf] }
 0x210   :  { %1038 = vmatpush.bf16.msrb.mxu0 %v7711_v5  ;;  %v10667_v32 = vld [vmem:[#allocation4 + $0x10c] sm:$0xf0]  ;;  %v10633_v33 = vld [vmem:[#allocation4 + $0x4] sm:$0xf]  ;;  %v7683_v34 = vor.u32 %v10669_v24, %v7680_v25  ;;  %v7536_v35 = vld [vmem:[#allocation4 + $0x10] sm:$0xf0]  ;;  %v7535_v41 = vor.u32 %v10635_v28, %v7534_v27 }
 0x211   :  { %1052 = vmatpush.bf16.msrb.mxu1 %v7587_v6  ;;  %v10665_v36 = vld [vmem:[#allocation4 + $0x104] sm:$0xf]  ;;  %v7664_v37 = vld [vmem:[#allocation4 + $0x110] sm:$0xf0]  ;;  %v7654_v38 = vld [vmem:[#allocation4 + $0xe8] sm:$0xf]  ;;  %v7663_v48 = vor.u32 %v10667_v32, %v7662_v31  ;;  %v7539_v49 = vor.u32 %v10633_v33, %v7536_v35 }
 0x212   :  { %1066 = vmatpush.bf16.msrb.mxu2 %v7715_v47  ;;  %v10664_v39 = vld [vmem:[#allocation4 + $0xf4] sm:$0xf0]  ;;  %v7782_v40 = vld [vmem:[#allocation4 + $0x1e8] sm:$0xf]  ;;  %v10662_v43 = vld [vmem:[#allocation4 + $0xec] sm:$0xf]  ;;  %v7667_v52 = vor.u32 %v10665_v36, %v7664_v37 }
 0x213   :  { %1025 = vmatpush.bf16.msra.mxu3 %v7567_v14  ;;  %v10696_v42 = vld [vmem:[#allocation4 + $0x1f4] sm:$0xf0]  ;;  %v7656_v45 = vld [vmem:[#allocation4 + $0xf8] sm:$0xf0]  ;;  %v10694_v50 = vld [vmem:[#allocation4 + $0x1ec] sm:$0xf]  ;;  %v7655_v53 = vor.u32 %v10664_v39, %v7654_v38 }
 0x214   :  { %1039 = vmatpush.bf16.msrb.mxu0 %v7695_v15  ;;  %v7784_v51 = vld [vmem:[#allocation4 + $0x1f8] sm:$0xf0]  ;;  %v7783_v54 = vor.u32 %v10696_v42, %v7782_v40  ;;  %v7659_v55 = vor.u32 %v10662_v43, %v7656_v45  ;;  %v7638_v57 = vld [vmem:[#allocation4 + $0xc8] sm:$0xf]  ;;  %v10660_v58 = vld [vmem:[#allocation4 + $0xd4] sm:$0xf0] }
 0x215   :  { %1053 = vmatpush.bf16.msrb.mxu1 %v7571_v16  ;;  %v7766_v59 = vld [vmem:[#allocation4 + $0x1c8] sm:$0xf]  ;;  %v7787_v60 = vor.u32 %v10694_v50, %v7784_v51  ;;  %v10692_v61 = vld [vmem:[#allocation4 + $0x1d4] sm:$0xf0]  ;;  %v10658_v62 = vld [vmem:[#allocation4 + $0xcc] sm:$0xf]  ;;  %v7639_v2 = vor.u32 %v10660_v58, %v7638_v57 }
 0x216   :  { %1067 = vmatpush.bf16.msrb.mxu2 %v7699_v20  ;;  %v7640_v63 = vld [vmem:[#allocation4 + $0xd8] sm:$0xf0]  ;;  %v10690_v0 = vld [vmem:[#allocation4 + $0x1cc] sm:$0xf]  ;;  %v7767_v3 = vor.u32 %v10692_v61, %v7766_v59  ;;  %v7622_v5 = vld [vmem:[#allocation4 + $0xa8] sm:$0xf] }
 0x217   :  { %1026 = vmatpush.bf16.msra.mxu3 %v7551_v26  ;;  %v7768_v1 = vld [vmem:[#allocation4 + $0x1d8] sm:$0xf0]  ;;  %v7643_v4 = vor.u32 %v10658_v62, %v7640_v63  ;;  %v10656_v6 = vld [vmem:[#allocation4 + $0xb4] sm:$0xf0]  ;;  %v7750_v7 = vld [vmem:[#allocation4 + $0x1a8] sm:$0xf] }
 0x218   :  { %1040 = vmatpush.bf16.msrb.mxu0 %v7679_v29  ;;  %v7771_v8 = vor.u32 %v10690_v0, %v7768_v1  ;;  %v10688_v44 = vld [vmem:[#allocation4 + $0x1b4] sm:$0xf0]  ;;  %v10654_v47 = vld [vmem:[#allocation4 + $0xac] sm:$0xf]  ;;  %v7624_v56 = vld [vmem:[#allocation4 + $0xb8] sm:$0xf0]  ;;  %v7623_v12 = vor.u32 %v10656_v6, %v7622_v5 }
 0x219   :  { %1054 = vmatpush.bf16.msrb.mxu1 %v7555_v30  ;;  %v10686_v10 = vld [vmem:[#allocation4 + $0x1ac] sm:$0xf]  ;;  %v7752_v11 = vld [vmem:[#allocation4 + $0x1b8] sm:$0xf0]  ;;  %v7751_v13 = vor.u32 %v10688_v44, %v7750_v7  ;;  %v7627_v14 = vor.u32 %v10654_v47, %v7624_v56  ;;  %v7606_v15 = vld [vmem:[#allocation4 + $0x88] sm:$0xf] }
 0x21a   :  { %1068 = vmatpush.bf16.msrb.mxu2 %v7683_v34  ;;  %v10652_v16 = vld [vmem:[#allocation4 + $0x94] sm:$0xf0]  ;;  %v7734_v17 = vld [vmem:[#allocation4 + $0x188] sm:$0xf]  ;;  %v7755_v18 = vor.u32 %v10686_v10, %v7752_v11  ;;  %v10650_v20 = vld [vmem:[#allocation4 + $0x8c] sm:$0xf] }
 0x21b   :  { %1027 = vmatpush.bf16.msra.mxu3 %v7535_v41  ;;  %v10684_v19 = vld [vmem:[#allocation4 + $0x194] sm:$0xf0]  ;;  %v7608_v21 = vld [vmem:[#allocation4 + $0x98] sm:$0xf0]  ;;  %v10682_v22 = vld [vmem:[#allocation4 + $0x18c] sm:$0xf]  ;;  %v7607_v24 = vor.u32 %v10652_v16, %v7606_v15 }
 0x21c   :  { %1041 = vmatpush.bf16.msrb.mxu0 %v7663_v48  ;;  %v7736_v23 = vld [vmem:[#allocation4 + $0x198] sm:$0xf0]  ;;  %v7735_v25 = vor.u32 %v10684_v19, %v7734_v17  ;;  %v7611_v26 = vor.u32 %v10650_v20, %v7608_v21  ;;  %v7590_v27 = vld [vmem:[#allocation4 + $0x68] sm:$0xf]  ;;  %v10648_v28 = vld [vmem:[#allocation4 + $0x74] sm:$0xf0] }
 0x21d   :  { %1055 = vmatpush.bf16.msrb.mxu1 %v7539_v49  ;;  %v7718_v29 = vld [vmem:[#allocation4 + $0x168] sm:$0xf]  ;;  %v7739_v30 = vor.u32 %v10682_v22, %v7736_v23  ;;  %v10680_v31 = vld [vmem:[#allocation4 + $0x174] sm:$0xf0]  ;;  %v10646_v32 = vld [vmem:[#allocation4 + $0x6c] sm:$0xf]  ;;  %v7591_v36 = vor.u32 %v10648_v28, %v7590_v27 }
 0x21e   :  { %1069 = vmatpush.bf16.msrb.mxu2 %v7667_v52  ;;  %1028 = vmatmul.bf16.vlgmr.msra.gmra.mxu3 %v12036_v9  ;;  %v7592_v33 = vld [vmem:[#allocation4 + $0x78] sm:$0xf0]  ;;  %v10678_v34 = vld [vmem:[#allocation4 + $0x16c] sm:$0xf]  ;;  %v7719_v37 = vor.u32 %v10680_v31, %v7718_v29  ;;  %v7574_v39 = vld [vmem:[#allocation4 + $0x48] sm:$0xf] }
 0x21f   :  { %1076 = vmatpush.bf16.msrb.mxu3 %v7655_v53  ;;  %1042 = vmatmul.bf16.vlgmr.msrb.gmra.mxu0 %v12038_v46  ;;  %v7720_v35 = vld [vmem:[#allocation4 + $0x178] sm:$0xf0]  ;;  %v7595_v38 = vor.u32 %v10646_v32, %v7592_v33  ;;  %v10644_v40 = vld [vmem:[#allocation4 + $0x54] sm:$0xf0]  ;;  %v7702_v41 = vld [vmem:[#allocation4 + $0x148] sm:$0xf] }
 0x220   :  { %1090 = vmatpush.bf16.msra.mxu0 %v7783_v54  ;;  %1056 = vmatmul.bf16.vlgmr.msrb.gmra.mxu1 %v12036_v9  ;;  %v7723_v42 = vor.u32 %v10678_v34, %v7720_v35  ;;  %v10676_v43 = vld [vmem:[#allocation4 + $0x154] sm:$0xf0]  ;;  %v10642_v45 = vld [vmem:[#allocation4 + $0x4c] sm:$0xf]  ;;  %v7576_v48 = vld [vmem:[#allocation4 + $0x58] sm:$0xf0]  ;;  %v7575_v51 = vor.u32 %v10644_v40, %v7574_v39 }
 0x221   :  { %1104 = vmatpush.bf16.msra.mxu1 %v7659_v55  ;;  %1070 = vmatmul.bf16.vlgmr.msrb.gmra.mxu2 %v12038_v46  ;;  %v10674_v49 = vld [vmem:[#allocation4 + $0x14c] sm:$0xf]  ;;  %v7704_v50 = vld [vmem:[#allocation4 + $0x158] sm:$0xf0]  ;;  %v7703_v52 = vor.u32 %v10676_v43, %v7702_v41  ;;  %v7579_v53 = vor.u32 %v10642_v45, %v7576_v48  ;;  %v7558_v54 = vld [vmem:[#allocation4 + $0x28] sm:$0xf] }
 0x222   :  { %1118 = vmatpush.bf16.msra.mxu2 %v7787_v60  ;;  %v10640_v55 = vld [vmem:[#allocation4 + $0x34] sm:$0xf0]  ;;  %v7686_v57 = vld [vmem:[#allocation4 + $0x128] sm:$0xf]  ;;  %v7707_v58 = vor.u32 %v10674_v49, %v7704_v50  ;;  %v10638_v60 = vld [vmem:[#allocation4 + $0x2c] sm:$0xf] }
 0x223   :  { %1077 = vmatpush.bf16.msrb.mxu3 %v7639_v2  ;;  %v10672_v59 = vld [vmem:[#allocation4 + $0x134] sm:$0xf0]  ;;  %v7560_v61 = vld [vmem:[#allocation4 + $0x38] sm:$0xf0]  ;;  %v10670_v62 = vld [vmem:[#allocation4 + $0x12c] sm:$0xf]  ;;  %v7559_v0 = vor.u32 %v10640_v55, %v7558_v54 }
 0x224   :  { %1091 = vmatpush.bf16.msra.mxu0 %v7767_v3  ;;  %v7688_v63 = vld [vmem:[#allocation4 + $0x138] sm:$0xf0]  ;;  %v7687_v1 = vor.u32 %v10672_v59, %v7686_v57  ;;  %v7563_v2 = vor.u32 %v10638_v60, %v7560_v61  ;;  %v7542_v3 = vld [vmem:[#allocation4 + $0x8] sm:$0xf]  ;;  %v10668_v7 = vld [vmem:[#allocation4 + $0x114] sm:$0xf0] }
 0x225   :  { %1105 = vmatpush.bf16.msra.mxu1 %v7643_v4  ;;  %v10636_v4 = vld [vmem:[#allocation4 + $0x14] sm:$0xf0]  ;;  %v7670_v5 = vld [vmem:[#allocation4 + $0x108] sm:$0xf]  ;;  %v7691_v6 = vor.u32 %v10670_v62, %v7688_v63  ;;  %v7544_v44 = vld [vmem:[#allocation4 + $0x18] sm:$0xf0] }
 0x226   :  { %1119 = vmatpush.bf16.msra.mxu2 %v7771_v8  ;;  %v10634_v8 = vld [vmem:[#allocation4 + $0xc] sm:$0xf]  ;;  %v7672_v56 = vld [vmem:[#allocation4 + $0x118] sm:$0xf0]  ;;  %v7543_v10 = vor.u32 %v10636_v4, %v7542_v3  ;;  %v7671_v11 = vor.u32 %v10668_v7, %v7670_v5  ;;  %vm12545_vm6 = vcmask 1042434   ;;  %vm12544_vm8 = vcmask 1041408  }
 0x227   :  { %1078 = vmatpush.bf16.msrb.mxu3 %v7623_v12  ;;  %v10666_v47 = vld [vmem:[#allocation4 + $0x10c] sm:$0xf]  ;;  %v7547_v12 = vor.u32 %v10634_v8, %v7544_v44 }
 0x228   :  { %1092 = vmatpush.bf16.msra.mxu0 %v7751_v13  ;;  %v7675_v13 = vor.u32 %v10666_v47, %v7672_v56 }
 0x229   :  { %1106 = vmatpush.bf16.msra.mxu1 %v7627_v14 }
 0x22a   :  { %1120 = vmatpush.bf16.msra.mxu2 %v7755_v18 }
 0x22b   :  { %1079 = vmatpush.bf16.msrb.mxu3 %v7607_v24 }
 0x22c   :  { %1093 = vmatpush.bf16.msra.mxu0 %v7735_v25 }
 0x22d   :  { %1107 = vmatpush.bf16.msra.mxu1 %v7611_v26 }
 0x22e   :  { %1121 = vmatpush.bf16.msra.mxu2 %v7739_v30 }
 0x22f   :  { %1080 = vmatpush.bf16.msrb.mxu3 %v7591_v36 }
 0x230   :  { %1094 = vmatpush.bf16.msra.mxu0 %v7719_v37 }
 0x231   :  { %1108 = vmatpush.bf16.msra.mxu1 %v7595_v38 }
 0x232   :  { %1122 = vmatpush.bf16.msra.mxu2 %v7723_v42 }
 0x233   :  { %1081 = vmatpush.bf16.msrb.mxu3 %v7575_v51 }
 0x234   :  { %1095 = vmatpush.bf16.msra.mxu0 %v7703_v52 }
 0x235   :  { %1109 = vmatpush.bf16.msra.mxu1 %v7579_v53 }
 0x236   :  { %1123 = vmatpush.bf16.msra.mxu2 %v7707_v58 }
 0x237   :  { %1082 = vmatpush.bf16.msrb.mxu3 %v7559_v0 }
 0x238   :  { %1096 = vmatpush.bf16.msra.mxu0 %v7687_v1 }
 0x239   :  { %1110 = vmatpush.bf16.msra.mxu1 %v7563_v2 }
 0x23a   :  { %1124 = vmatpush.bf16.msra.mxu2 %v7691_v6 }
 0x23b   :  { %1083 = vmatpush.bf16.msrb.mxu3 %v7543_v10 }
 0x23c   :  { %1097 = vmatpush.bf16.msra.mxu0 %v7671_v11 }
 0x23d   :  { %1111 = vmatpush.bf16.msra.mxu1 %v7547_v12 }
 0x23e   :  { %1125 = vmatpush.bf16.msra.mxu2 %v7675_v13  ;;  %1084 = vmatmul.bf16.vlgmr.msrb.gmra.mxu3 %v12036_v9 }
 0x23f   :  { %1098 = vmatmul.bf16.vlgmr.msra.gmra.mxu0 %v12038_v46 }
 0x240   :  { %1112 = vmatmul.bf16.vlgmr.msra.gmra.mxu1 %v12036_v9 }
 0x241   :  { %1126 = vmatmul.bf16.vlgmr.msra.gmra.mxu2 %v12038_v46 }
 0x29c   :  { %v1043_v14 = vpop.f32.mrf.mxu0 }
 0x29d   :  { %v1057_v15 = vpop.f32.mrf.mxu1 }
 0x2a1   :  { %v1029_v16 = vpop.f32.mrf.mxu3 }
 0x2a2   :  { %v12048_v18 = vadd.f32 %v1043_v14, %v1029_v16 }
 0x2a4   :  { %v1071_v17 = vpop.f32.mrf.mxu2  ;;  %v1045_v20 = vpop.f32.mrf.mxu0  ;;  %v1164_v25 = vmul.f32 %v12048_v18, %v12048_v18 }
 0x2a5   :  { %v12050_v19 = vadd.f32 %v1071_v17, %v1057_v15  ;;  %v1059_v21 = vpop.f32.mrf.mxu1 }
 0x2a7   :  { %v1165_v9 = vmul.f32 %v12050_v19, %v12050_v19 }
 0x2a9   :  { %v1031_v22 = vpop.f32.mrf.mxu3 }
 0x2aa   :  { %v12052_v23 = vadd.f32 %v1045_v20, %v1031_v22 }
 0x2ac   :  { %v1073_v24 = vpop.f32.mrf.mxu2  ;;  %v1132_v26 = vadd.f32 %v12052_v23, %v12048_v18  ;;  %v1168_v27 = vmul.f32 %v12052_v23, %v12052_v23 }
 0x2ad   :  { %v12058_v46 = vadd.f32 %v1073_v24, %v1059_v21 }
 0x2ae   :  { %v1172_v30 = vadd.f32 %v1168_v27, %v1164_v25  ;;  %v1133_v33 = vrot.slane %v1132_v26, 4 }
 0x2af   :  { %v1139_v28 = vadd.f32 %v12058_v46, %v12050_v19  ;;  %v1169_v29 = vmul.f32 %v12058_v46, %v12058_v46 }
 0x2b0   :  { %v1173_v36 = vrot.slane %v1172_v30, 4  ;;  %v1134_v39 = vadd.f32 %v1133_v33, %v1132_v26 }
 0x2b1   :  { %v1140_v31 = vrot.slane %v1139_v28, 4  ;;  %v1179_v32 = vadd.f32 %v1169_v29, %v1165_v9 }
 0x2b2   :  { %v1174_v42 = vadd.f32 %v1173_v36, %v1172_v30  ;;  %v1135_v43 = vrot.slane %v1134_v39, 2 }
 0x2b3   :  { %v1141_v34 = vadd.f32 %v1140_v31, %v1139_v28  ;;  %v1180_v35 = vrot.slane %v1179_v32, 4 }
 0x2b4   :  { %v1175_v49 = vrot.slane %v1174_v42, 2  ;;  %v1136_v50 = vadd.f32 %v1135_v43, %v1134_v39 }
 0x2b5   :  { %v1142_v37 = vrot.slane %v1141_v34, 2  ;;  %v1181_v38 = vadd.f32 %v1180_v35, %v1179_v32 }
 0x2b6   :  { %v1176_v55 = vadd.f32 %v1175_v49, %v1174_v42  ;;  %v1137_v58 = vrot.slane %v1136_v50, 1 }
 0x2b7   :  { %v1143_v40 = vadd.f32 %v1142_v37, %v1141_v34  ;;  %v1182_v41 = vrot.slane %v1181_v38, 2 }
 0x2b8   :  { %v1177_v62 = vrot.slane %v1176_v55, 1  ;;  %v1138_v63 = vadd.f32 %v1137_v58, %v1136_v50 }
 0x2b9   :  { %v1144_v45 = vrot.slane %v1143_v40, 1  ;;  %v1183_v48 = vadd.f32 %v1182_v41, %v1181_v38 }
 0x2ba   :  { %v1178_v5 = vadd.f32 %v1177_v62, %v1176_v55  ;;  %v12076_v7 = vmul.f32 0.0625, %v1138_v63 }
 0x2bb   :  { %v1145_v52 = vadd.f32 %v1144_v45, %v1143_v40  ;;  %v1184_v53 = vrot.slane %v1183_v48, 1 }
 0x2bc   :  { %v1099_v51 = vpop.f32.mrf.mxu0  ;;  %v1200_v14 = vmul.f32 0.0625, %v1178_v5  ;;  %v1204_v17 = vmul.f32 %v12076_v7, %v12076_v7 }
 0x2bd   :  { %v1113_v57 = vpop.f32.mrf.mxu1  ;;  %v12068_v60 = vmul.f32 0.0625, %v1145_v52  ;;  %v1185_v61 = vadd.f32 %v1184_v53, %v1183_v48 }
 0x2be   :  { %v1208_v30 = vsub.f32 %v1200_v14, %v1204_v17 }
 0x2bf   :  { %v1201_v1 = vmul.f32 0.0625, %v1185_v61  ;;  %v1205_v2 = vmul.f32 %v12068_v60, %v12068_v60 }
 0x2c0   :  { %v12096_v39 = vadd.f32 0.8, %v1208_v30 }
 0x2c1   :  { %v1085_v54 = vpop.f32.mrf.mxu3  ;;  %v1209_v12 = vsub.f32 %v1201_v1, %v1205_v2 }
 0x2c2   :  { %v12070_v0 = vadd.f32 %v1099_v51, %v1085_v54  ;;  %vm1223_vm5 = vweird.f32 %v12096_v39 }
 0x2c3   :  { %v1214_v9 = vadd.f32 0.8, %v1209_v12 }
 0x2c4   :  { %v1127_v59 = vpop.f32.mrf.mxu2  ;;  %v1101_v3 = vpop.f32.mrf.mxu0  ;;  %v1166_v47 = vmul.f32 %v12070_v0, %v12070_v0 }
 0x2c5   :  { %v12078_v8 = vadd.f32 %v1127_v59, %v1113_v57  ;;  %v1115_v56 = vpop.f32.mrf.mxu1  ;;  %11427 = vrsqrt.f32 %v1214_v9  ;;  %vm1233_vm13 = vweird.f32 %v1214_v9 }
 0x2c6   :  { %11429 = vrsqrt.f32 %v12096_v39 }
 0x2c7   :  { %v1167_v20 = vmul.f32 %v12078_v8, %v12078_v8 }
 0x2c9   :  { %v1087_v4 = vpop.f32.mrf.mxu3 }
 0x2ca   :  { %v12074_v6 = vadd.f32 %v1101_v3, %v1087_v4 }
 0x2cb   :  { %v11428_v51 = vpop.eup %11427 }
 0x2cc   :  { %v1129_v44 = vpop.f32.mrf.mxu2  ;;  %v1146_v10 = vadd.f32 %v12074_v6, %v12070_v0  ;;  %v1170_v11 = vmul.f32 %v12074_v6, %v12074_v6  ;;  %v1228_v59 = vmul.f32 %v11428_v51, %v1214_v9  ;;  %v11430_v2 = vpop.eup %11429  ;;  %vm1234_vm11 = vweird.f32 %v11428_v51 }
 0x2cd   :  { %v12086_v13 = vadd.f32 %v1129_v44, %v1115_v56  ;;  %v1218_v44 = vmul.f32 %v11430_v2, %v12096_v39  ;;  %vm1235_vm14 = vmor %vm1233_vm13, %vm1234_vm11  ;;  %vm1224_vm2 = vweird.f32 %v11430_v2 }
 0x2ce   :  { %v1147_v15 = vrot.slane %v1146_v10, 4  ;;  %v1186_v16 = vadd.f32 %v1170_v11, %v1166_v47  ;;  %v1229_v4 = vmul.f32 %v11428_v51, %v1228_v59  ;;  %vm1225_vm7 = vmor %vm1223_vm5, %vm1224_vm2  ;;  %v1271_v59 = vld [vmem:[#allocation19] sm:$0xf] }
 0x2cf   :  { %v1153_v21 = vadd.f32 %v12086_v13, %v12078_v8  ;;  %v1171_v22 = vmul.f32 %v12086_v13, %v12086_v13 }
 0x2d0   :  { %v1148_v24 = vadd.f32 %v1147_v15, %v1146_v10  ;;  %v1187_v25 = vrot.slane %v1186_v16, 4  ;;  %v1230_v47 = vmul.f32 0.5, %v1229_v4  ;;  %v1219_v10 = vmul.f32 %v11430_v2, %v1218_v44 }
 0x2d1   :  { %v1154_v26 = vrot.slane %v1153_v21, 4  ;;  %v1193_v27 = vadd.f32 %v1171_v22, %v1167_v20 }
 0x2d2   :  { %v1149_v28 = vrot.slane %v1148_v24, 2  ;;  %v1188_v29 = vadd.f32 %v1187_v25, %v1186_v16  ;;  %v1231_v12 = vsub.f32 1.5, %v1230_v47  ;;  %v1220_v16 = vmul.f32 0.5, %v1219_v10 }
 0x2d3   :  { %v1155_v31 = vadd.f32 %v1154_v26, %v1153_v21  ;;  %v1194_v32 = vrot.slane %v1193_v27, 4 }
 0x2d4   :  { %v1150_v33 = vadd.f32 %v1149_v28, %v1148_v24  ;;  %v1189_v34 = vrot.slane %v1188_v29, 2  ;;  %v1232_v21 = vmul.f32 %v11428_v51, %v1231_v12  ;;  %v1221_v25 = vsub.f32 1.5, %v1220_v16 }
 0x2d5   :  { %v1156_v35 = vrot.slane %v1155_v31, 2  ;;  %v1195_v36 = vadd.f32 %v1194_v32, %v1193_v27 }
 0x2d6   :  { %v1151_v37 = vrot.slane %v1150_v33, 1  ;;  %v1190_v38 = vadd.f32 %v1189_v34, %v1188_v29  ;;  %v1236_v28 = vsel %vm1235_vm14, %v11428_v51, %v1232_v21 }
 0x2d7   :  { %v1157_v40 = vadd.f32 %v1156_v35, %v1155_v31  ;;  %v1196_v41 = vrot.slane %v1195_v36, 2  ;;  %v1222_v31 = vmul.f32 %v11430_v2, %v1221_v25  ;;  %v1261_v34 = vrot.slane %v1236_v28, 7 }
 0x2d8   :  { %v1152_v42 = vadd.f32 %v1151_v37, %v1150_v33  ;;  %v1191_v43 = vrot.slane %v1190_v38, 1 }
 0x2d9   :  { %v1158_v45 = vrot.slane %v1157_v40, 1  ;;  %v1197_v48 = vadd.f32 %v1196_v41, %v1195_v36  ;;  %v1212_v36 = vld [vmem:[#allocation18] sm:$0xf]  ;;  %v1226_v37 = vsel %vm1225_vm7, %v11430_v2, %v1222_v31 }
 0x2da   :  { %v12098_v49 = vmul.f32 0.0625, %v1152_v42  ;;  %v1192_v50 = vadd.f32 %v1191_v43, %v1190_v38  ;;  %v1264_v38 = vsel %vm591_vm9, %v1226_v37, %v1261_v34 }
 0x2db   :  { %v1159_v52 = vadd.f32 %v1158_v45, %v1157_v40  ;;  %v1198_v53 = vrot.slane %v1197_v48, 1 }
 0x2dc   :  { %v1202_v54 = vmul.f32 0.0625, %v1192_v50  ;;  %v1206_v55 = vmul.f32 %v12098_v49, %v12098_v49 }
 0x2dd   :  { %v12103_v57 = vmul.f32 0.0625, %v1159_v52  ;;  %v1199_v58 = vadd.f32 %v1198_v53, %v1197_v48 }
 0x2de   :  { %v1210_v61 = vsub.f32 %v1202_v54, %v1206_v55 }
 0x2df   :  { %v1203_v62 = vmul.f32 0.0625, %v1199_v58  ;;  %v1207_v63 = vmul.f32 %v12103_v57, %v12103_v57 }
 0x2e0   :  { %v1215_v1 = vadd.f32 0.8, %v1210_v61 }
 0x2e1   :  { %v1211_v3 = vsub.f32 %v1203_v62, %v1207_v63 }
 0x2e2   :  { %11431 = vrsqrt.f32 %v1215_v1  ;;  %vm1243_vm15 = vweird.f32 %v1215_v1 }
 0x2e3   :  { %v1216_v5 = vadd.f32 0.8, %v1211_v3 }
 0x2e5   :  { %11433 = vrsqrt.f32 %v1216_v5  ;;  %vm1253_vm3 = vweird.f32 %v1216_v5 }
 0x2e8   :  { %v11432_v56 = vpop.eup %11431 }
 0x2e9   :  { %v1238_v11 = vmul.f32 %v11432_v56, %v1215_v1  ;;  %vm1244_vm12 = vweird.f32 %v11432_v56 }
 0x2ea   :  { %vm1245_vm0 = vmor %vm1243_vm15, %vm1244_vm12 }
 0x2eb   :  { %v11434_v14 = vpop.eup %11433  ;;  %v1239_v15 = vmul.f32 %v11432_v56, %v1238_v11 }
 0x2ec   :  { %v1248_v17 = vmul.f32 %v11434_v14, %v1216_v5  ;;  %vm1254_vm1 = vweird.f32 %v11434_v14 }
 0x2ed   :  { %v1240_v20 = vmul.f32 0.5, %v1239_v15  ;;  %vm1255_vm4 = vmor %vm1253_vm3, %vm1254_vm1 }
 0x2ee   :  { %v1249_v22 = vmul.f32 %v11434_v14, %v1248_v17 }
 0x2ef   :  { %v1241_v24 = vsub.f32 1.5, %v1240_v20 }
 0x2f0   :  { %v1250_v26 = vmul.f32 0.5, %v1249_v22 }
 0x2f1   :  { %v1242_v27 = vmul.f32 %v11432_v56, %v1241_v24 }
 0x2f2   :  { %v1251_v29 = vsub.f32 1.5, %v1250_v26 }
 0x2f3   :  { %v1246_v30 = vsel %vm1245_vm0, %v11432_v56, %v1242_v27 }
 0x2f4   :  { %v1252_v32 = vmul.f32 %v11434_v14, %v1251_v29  ;;  %v1262_v33 = vrot.slane %v1246_v30, 6 }
 0x2f6   :  { %v1256_v35 = vsel %vm1255_vm4, %v11434_v14, %v1252_v32 }
 0x2f7   :  { %v1263_v9 = vrot.slane %v1256_v35, 5 }
 0x2f9   :  { %v1266_v40 = vsel %vm12545_vm6, %v1262_v33, %v1263_v9 }
 0x2fa   :  { %v1268_v41 = vsel %vm12544_vm8, %v1264_v38, %v1266_v40 }
 0x2fb   :  { %v1270_v42 = vmul.f32 %v1268_v41, %v1212_v36 }
 0x2fd   :  { %v1273_v43 = vperm.slane %v1270_v42, 0  ;;  %v1274_v45 = vperm.slane %v1270_v42, 1  ;;  %v1275_v48 = vperm.slane %v1270_v42, 2  ;;  %v1276_v50 = vperm.slane %v1270_v42, 3 }
 0x2ff   :  { %v1282_v39 = vmul.f32 %v1274_v45, %v12068_v60  ;;  %v1283_v51 = vmul.f32 %v1275_v48, %v12098_v49  ;;  %v1284_v52 = vmul.f32 %v1276_v50, %v12103_v57  ;;  %v1281_v53 = vmul.f32 %v1273_v43, %v12076_v7 }
 0x300   :  { %v1297_v2 = vmul.f32 %v1273_v43, %v12048_v18  ;;  %v1298_v60 = vmul.f32 %v1274_v45, %v12050_v19  ;;  %v1299_v49 = vmul.f32 %v1275_v48, %v12070_v0  ;;  %v1300_v57 = vmul.f32 %v1276_v50, %v12078_v8 }
 0x301   :  { %v1289_v54 = vrot.slane %v1282_v39, 7  ;;  %v1290_v55 = vrot.slane %v1283_v51, 6  ;;  %v1291_v58 = vrot.slane %v1284_v52, 5  ;;  %v1301_v44 = vmul.f32 %v1273_v43, %v12052_v23 }
 0x302   :  { %v1302_v47 = vmul.f32 %v1274_v45, %v12058_v46  ;;  %v1303_v56 = vmul.f32 %v1275_v48, %v12074_v6  ;;  %v1304_v10 = vmul.f32 %v1276_v50, %v12086_v13 }
 0x303   :  { %v1292_v61 = vsel %vm591_vm9, %v1281_v53, %v1289_v54  ;;  %v1293_v62 = vsel %vm12545_vm6, %v1290_v55, %v1291_v58 }
 0x304   :  { %v1294_v63 = vsel %vm12544_vm8, %v1292_v61, %v1293_v62 }
 0x305   :  { %v1296_v1 = vsub.f32 %v1271_v59, %v1294_v63 }
 0x307   :  { %v1306_v7 = vperm.slane %v1296_v1, 0  ;;  %v1307_v3 = vperm.slane %v1296_v1, 1  ;;  %v1308_v4 = vperm.slane %v1296_v1, 2  ;;  %v1309_v5 = vperm.slane %v1296_v1, 3 }
 0x309   :  { %v1314_v11 = vadd.f32 %v1306_v7, %v1297_v2  ;;  %v1315_v18 = vadd.f32 %v1307_v3, %v1298_v60  ;;  %v1316_v12 = vadd.f32 %v1308_v4, %v1299_v49  ;;  %v1317_v19 = vadd.f32 %v1309_v5, %v1300_v57 }
 0x30a   :  { %v1318_v14 = vadd.f32 %v1306_v7, %v1301_v44  ;;  %v1319_v0 = vadd.f32 %v1307_v3, %v1302_v47  ;;  %v1320_v15 = vadd.f32 %v1308_v4, %v1303_v56  ;;  %v1321_v8 = vadd.f32 %v1309_v5, %v1304_v10 }
 0x30b   :  { %v1322_v16 = vmul.f32 0.2, %v1314_v11  ;;  %v1323_v17 = vmul.f32 0.2, %v1315_v18  ;;  %v1324_v20 = vmul.f32 0.2, %v1316_v12 }
 0x30c   :  { %v1325_v21 = vmul.f32 0.2, %v1317_v19  ;;  %v1326_v22 = vmul.f32 0.2, %v1318_v14  ;;  %v1327_v23 = vmul.f32 0.2, %v1319_v0 }
 0x30d   :  { %v1328_v24 = vmul.f32 0.2, %v1320_v15  ;;  %v1329_v46 = vmul.f32 0.2, %v1321_v8  ;;  %v1330_v25 = vmax.f32 %v1314_v11, %v1322_v16  ;;  %v1331_v6 = vmax.f32 %v1315_v18, %v1323_v17 }
 0x30e   :  { %v1332_v26 = vmax.f32 %v1316_v12, %v1324_v20  ;;  %v1333_v13 = vmax.f32 %v1317_v19, %v1325_v21  ;;  %v1334_v27 = vmax.f32 %v1318_v14, %v1326_v22  ;;  %v1335_v28 = vmax.f32 %v1319_v0, %v1327_v23 }
 0x30f   :  { %v1336_v29 = vmax.f32 %v1320_v15, %v1328_v24  ;;  %v1337_v30 = vmax.f32 %v1321_v8, %v1329_v46 }
 0x310   :  { %v12127_v31 = vpack.c.bf16 %v1334_v27, %v1330_v25  ;;  %v12129_v32 = vpack.c.bf16 %v1335_v28, %v1331_v6 }
 0x311   :  { %v12131_v33 = vpack.c.bf16 %v1336_v29, %v1332_v26  ;;  %v12133_v34 = vpack.c.bf16 %v1337_v30, %v1333_v13 }
 0x312   :  { %11857 = dma.done.wait [#allocation7 + $0x2], 32768 }
 0x313   :  { %11858 = vsyncadd [#allocation7 + $0x2], 4294934528  ;;  %v8014_v35 = vld [vmem:[#allocation5 + $0x1c0] sm:$0xf] }
 0x314   :  { %v10757_v9 = vld [vmem:[#allocation5 + $0x1dc] sm:$0xf0] }
 0x315   :  { %v8270_v36 = vld [vmem:[#allocation5 + $0x3c0] sm:$0xf]  ;;  %v8015_v37 = vor.u32 %v10757_v9, %v8014_v35 }
 0x316   :  { %v10821_v38 = vld [vmem:[#allocation5 + $0x3dc] sm:$0xf0] }
 0x317   :  { %v8526_v40 = vld [vmem:[#allocation5 + $0x5c0] sm:$0xf]  ;;  %v8271_v42 = vor.u32 %v10821_v38, %v8270_v36  ;;  %2882 = vmatpush.bf16.msra.mxu3 %v8015_v37 }
 0x318   :  { %v10885_v41 = vld [vmem:[#allocation5 + $0x5dc] sm:$0xf0] }
 0x319   :  { %v8527_v43 = vor.u32 %v10885_v41, %v8526_v40  ;;  %v8782_v45 = vld [vmem:[#allocation5 + $0x7c0] sm:$0xf]  ;;  %2896 = vmatpush.bf16.msrb.mxu0 %v8271_v42 }
 0x31a   :  { %v10949_v48 = vld [vmem:[#allocation5 + $0x7dc] sm:$0xf0] }
 0x31b   :  { %v7982_v50 = vld [vmem:[#allocation5 + $0x180] sm:$0xf]  ;;  %v8783_v39 = vor.u32 %v10949_v48, %v8782_v45  ;;  %2910 = vmatpush.bf16.msrb.mxu1 %v8527_v43 }
 0x31c   :  { %v10749_v51 = vld [vmem:[#allocation5 + $0x19c] sm:$0xf0] }
 0x31d   :  { %v8238_v52 = vld [vmem:[#allocation5 + $0x380] sm:$0xf]  ;;  %v7983_v54 = vor.u32 %v10749_v51, %v7982_v50  ;;  %2924 = vmatpush.bf16.msrb.mxu2 %v8783_v39 }
 0x31e   :  { %v10813_v53 = vld [vmem:[#allocation5 + $0x39c] sm:$0xf0] }
 0x31f   :  { %v8239_v55 = vor.u32 %v10813_v53, %v8238_v52  ;;  %v8494_v58 = vld [vmem:[#allocation5 + $0x580] sm:$0xf]  ;;  %2883 = vmatpush.bf16.msra.mxu3 %v7983_v54 }
 0x320   :  { %v10877_v59 = vld [vmem:[#allocation5 + $0x59c] sm:$0xf0] }
 0x321   :  { %v8750_v61 = vld [vmem:[#allocation5 + $0x780] sm:$0xf]  ;;  %v8495_v62 = vor.u32 %v10877_v59, %v8494_v58  ;;  %2897 = vmatpush.bf16.msrb.mxu0 %v8239_v55 }
 0x322   :  { %v10941_v63 = vld [vmem:[#allocation5 + $0x79c] sm:$0xf0] }
 0x323   :  { %v7950_v1 = vld [vmem:[#allocation5 + $0x140] sm:$0xf]  ;;  %v8751_v60 = vor.u32 %v10941_v63, %v8750_v61  ;;  %2911 = vmatpush.bf16.msrb.mxu1 %v8495_v62 }
 0x324   :  { %v10741_v2 = vld [vmem:[#allocation5 + $0x15c] sm:$0xf0] }
 0x325   :  { %v8206_v49 = vld [vmem:[#allocation5 + $0x340] sm:$0xf]  ;;  %v7951_v3 = vor.u32 %v10741_v2, %v7950_v1  ;;  %2925 = vmatpush.bf16.msrb.mxu2 %v8751_v60 }
 0x326   :  { %v10805_v57 = vld [vmem:[#allocation5 + $0x35c] sm:$0xf0] }
 0x327   :  { %v8462_v7 = vld [vmem:[#allocation5 + $0x540] sm:$0xf]  ;;  %v8207_v47 = vor.u32 %v10805_v57, %v8206_v49  ;;  %2884 = vmatpush.bf16.msra.mxu3 %v7951_v3 }
 0x328   :  { %v10869_v4 = vld [vmem:[#allocation5 + $0x55c] sm:$0xf0] }
 0x329   :  { %v8718_v5 = vld [vmem:[#allocation5 + $0x740] sm:$0xf]  ;;  %v8463_v56 = vor.u32 %v10869_v4, %v8462_v7  ;;  %2898 = vmatpush.bf16.msrb.mxu0 %v8207_v47  ;;  %v8016_v47 = vld [vmem:[#allocation5 + $0x1e0] sm:$0xf0] }
 0x32a   :  { %v10933_v44 = vld [vmem:[#allocation5 + $0x75c] sm:$0xf0] }
 0x32b   :  { %v7918_v10 = vld [vmem:[#allocation5 + $0x100] sm:$0xf]  ;;  %v8719_v12 = vor.u32 %v10933_v44, %v8718_v5  ;;  %2912 = vmatpush.bf16.msrb.mxu1 %v8463_v56  ;;  %v10753_v44 = vld [vmem:[#allocation5 + $0x1c4] sm:$0xf] }
 0x32c   :  { %v10733_v11 = vld [vmem:[#allocation5 + $0x11c] sm:$0xf0]  ;;  %v10817_v56 = vld [vmem:[#allocation5 + $0x3c4] sm:$0xf] }
 0x32d   :  { %v8174_v18 = vld [vmem:[#allocation5 + $0x300] sm:$0xf]  ;;  %v7919_v16 = vor.u32 %v10733_v11, %v7918_v10  ;;  %2926 = vmatpush.bf16.msrb.mxu2 %v8719_v12  ;;  %v8272_v11 = vld [vmem:[#allocation5 + $0x3e0] sm:$0xf0] }
 0x32e   :  { %v10797_v19 = vld [vmem:[#allocation5 + $0x31c] sm:$0xf0]  ;;  %v8528_v12 = vld [vmem:[#allocation5 + $0x5e0] sm:$0xf0] }
 0x32f   :  { %v8430_v14 = vld [vmem:[#allocation5 + $0x500] sm:$0xf]  ;;  %v8175_v17 = vor.u32 %v10797_v19, %v8174_v18  ;;  %2885 = vmatpush.bf16.msra.mxu3 %v7919_v16  ;;  %v10881_v18 = vld [vmem:[#allocation5 + $0x5c4] sm:$0xf]  ;;  %v8019_v16 = vor.u32 %v10753_v44, %v8016_v47 }
 0x330   :  { %v10861_v0 = vld [vmem:[#allocation5 + $0x51c] sm:$0xf0] }
 0x331   :  { %v8686_v15 = vld [vmem:[#allocation5 + $0x700] sm:$0xf]  ;;  %v8431_v20 = vor.u32 %v10861_v0, %v8430_v14  ;;  %2899 = vmatpush.bf16.msrb.mxu0 %v8175_v17  ;;  %v10945_v0 = vld [vmem:[#allocation5 + $0x7c4] sm:$0xf]  ;;  %v8275_v17 = vor.u32 %v10817_v56, %v8272_v11 }
 0x332   :  { %v10925_v8 = vld [vmem:[#allocation5 + $0x71c] sm:$0xf0]  ;;  %v7856_v11 = vld [vmem:[#allocation5 + $0xa0] sm:$0xf0] }
 0x333   :  { %v7886_v21 = vld [vmem:[#allocation5 + $0xc0] sm:$0xf]  ;;  %v8687_v24 = vor.u32 %v10925_v8, %v8686_v15  ;;  %2913 = vmatpush.bf16.msrb.mxu1 %v8431_v20  ;;  %v8784_v15 = vld [vmem:[#allocation5 + $0x7e0] sm:$0xf0]  ;;  %v8531_v20 = vor.u32 %v10881_v18, %v8528_v12 }
 0x334   :  { %v10725_v22 = vld [vmem:[#allocation5 + $0xdc] sm:$0xf0]  ;;  %v10777_v18 = vld [vmem:[#allocation5 + $0x284] sm:$0xf] }
 0x335   :  { %v8142_v23 = vld [vmem:[#allocation5 + $0x2c0] sm:$0xf]  ;;  %v7887_v27 = vor.u32 %v10725_v22, %v7886_v21  ;;  %2927 = vmatpush.bf16.msrb.mxu2 %v8687_v24  ;;  %v10745_v21 = vld [vmem:[#allocation5 + $0x184] sm:$0xf]  ;;  %v8787_v24 = vor.u32 %v10945_v0, %v8784_v15 }
 0x336   :  { %v10789_v46 = vld [vmem:[#allocation5 + $0x2dc] sm:$0xf0]  ;;  %v7984_v22 = vld [vmem:[#allocation5 + $0x1a0] sm:$0xf0] }
 0x337   :  { %v8398_v25 = vld [vmem:[#allocation5 + $0x4c0] sm:$0xf]  ;;  %v8143_v28 = vor.u32 %v10789_v46, %v8142_v23  ;;  %2886 = vmatpush.bf16.msra.mxu3 %v7887_v27  ;;  %v10809_v23 = vld [vmem:[#allocation5 + $0x384] sm:$0xf]  ;;  %v7987_v27 = vor.u32 %v10745_v21, %v7984_v22 }
 0x338   :  { %v10853_v6 = vld [vmem:[#allocation5 + $0x4dc] sm:$0xf0]  ;;  %v8240_v46 = vld [vmem:[#allocation5 + $0x3a0] sm:$0xf0] }
 0x339   :  { %v8654_v26 = vld [vmem:[#allocation5 + $0x6c0] sm:$0xf]  ;;  %v8399_v29 = vor.u32 %v10853_v6, %v8398_v25  ;;  %2900 = vmatpush.bf16.msrb.mxu0 %v8143_v28  ;;  %v10873_v25 = vld [vmem:[#allocation5 + $0x584] sm:$0xf]  ;;  %v8243_v28 = vor.u32 %v10809_v23, %v8240_v46 }
 0x33a   :  { %v10917_v13 = vld [vmem:[#allocation5 + $0x6dc] sm:$0xf0]  ;;  %v8496_v6 = vld [vmem:[#allocation5 + $0x5a0] sm:$0xf0] }
 0x33b   :  { %v7854_v30 = vld [vmem:[#allocation5 + $0x80] sm:$0xf]  ;;  %v8655_v36 = vor.u32 %v10917_v13, %v8654_v26  ;;  %2914 = vmatpush.bf16.msrb.mxu1 %v8399_v29  ;;  %v10937_v26 = vld [vmem:[#allocation5 + $0x784] sm:$0xf]  ;;  %v8499_v29 = vor.u32 %v10873_v25, %v8496_v6 }
 0x33c   :  { %v10717_v35 = vld [vmem:[#allocation5 + $0x9c] sm:$0xf0]  ;;  %v8752_v13 = vld [vmem:[#allocation5 + $0x7a0] sm:$0xf0] }
 0x33d   :  { %v8110_v9 = vld [vmem:[#allocation5 + $0x280] sm:$0xf]  ;;  %v7855_v43 = vor.u32 %v10717_v35, %v7854_v30  ;;  %2928 = vmatpush.bf16.msrb.mxu2 %v8655_v36  ;;  %v10737_v30 = vld [vmem:[#allocation5 + $0x144] sm:$0xf]  ;;  %v8755_v36 = vor.u32 %v10937_v26, %v8752_v13 }
 0x33e   :  { %v10781_v37 = vld [vmem:[#allocation5 + $0x29c] sm:$0xf0]  ;;  %v7952_v35 = vld [vmem:[#allocation5 + $0x160] sm:$0xf0] }
 0x33f   :  { %v8366_v38 = vld [vmem:[#allocation5 + $0x480] sm:$0xf]  ;;  %v8111_v45 = vor.u32 %v10781_v37, %v8110_v9  ;;  %2887 = vmatpush.bf16.msra.mxu3 %v7855_v43  ;;  %v10801_v9 = vld [vmem:[#allocation5 + $0x344] sm:$0xf]  ;;  %v7955_v43 = vor.u32 %v10737_v30, %v7952_v35 }
 0x340   :  { %v10845_v40 = vld [vmem:[#allocation5 + $0x49c] sm:$0xf0]  ;;  %v8208_v37 = vld [vmem:[#allocation5 + $0x360] sm:$0xf0] }
 0x341   :  { %v8622_v41 = vld [vmem:[#allocation5 + $0x680] sm:$0xf]  ;;  %v8367_v48 = vor.u32 %v10845_v40, %v8366_v38  ;;  %2901 = vmatpush.bf16.msrb.mxu0 %v8111_v45  ;;  %v10865_v38 = vld [vmem:[#allocation5 + $0x544] sm:$0xf]  ;;  %v8211_v45 = vor.u32 %v10801_v9, %v8208_v37 }
 0x342   :  { %v10909_v42 = vld [vmem:[#allocation5 + $0x69c] sm:$0xf0]  ;;  %v8464_v40 = vld [vmem:[#allocation5 + $0x560] sm:$0xf0] }
 0x343   :  { %v7822_v50 = vld [vmem:[#allocation5 + $0x40] sm:$0xf]  ;;  %v8623_v52 = vor.u32 %v10909_v42, %v8622_v41  ;;  %2915 = vmatpush.bf16.msrb.mxu1 %v8367_v48  ;;  %v10929_v41 = vld [vmem:[#allocation5 + $0x744] sm:$0xf]  ;;  %v8467_v48 = vor.u32 %v10865_v38, %v8464_v40 }
 0x344   :  { %v10709_v39 = vld [vmem:[#allocation5 + $0x5c] sm:$0xf0]  ;;  %v8720_v42 = vld [vmem:[#allocation5 + $0x760] sm:$0xf0] }
 0x345   :  { %v8078_v51 = vld [vmem:[#allocation5 + $0x240] sm:$0xf]  ;;  %v7823_v61 = vor.u32 %v10709_v39, %v7822_v50  ;;  %2929 = vmatpush.bf16.msrb.mxu2 %v8623_v52  ;;  %v10729_v50 = vld [vmem:[#allocation5 + $0x104] sm:$0xf]  ;;  %v8723_v52 = vor.u32 %v10929_v41, %v8720_v42 }
 0x346   :  { %v10773_v53 = vld [vmem:[#allocation5 + $0x25c] sm:$0xf0]  ;;  %v7920_v39 = vld [vmem:[#allocation5 + $0x120] sm:$0xf0] }
 0x347   :  { %v8334_v54 = vld [vmem:[#allocation5 + $0x440] sm:$0xf]  ;;  %v8079_v1 = vor.u32 %v10773_v53, %v8078_v51  ;;  %2888 = vmatpush.bf16.msra.mxu3 %v7823_v61  ;;  %v10793_v51 = vld [vmem:[#allocation5 + $0x304] sm:$0xf]  ;;  %v7923_v61 = vor.u32 %v10729_v50, %v7920_v39  ;;  %v10822_v39 = vld [vmem:[#allocation5 + $0x3e4] sm:$0xf0] }
 0x348   :  { %v10837_v55 = vld [vmem:[#allocation5 + $0x45c] sm:$0xf0]  ;;  %v8176_v53 = vld [vmem:[#allocation5 + $0x320] sm:$0xf0] }
 0x349   :  { %v8590_v58 = vld [vmem:[#allocation5 + $0x640] sm:$0xf]  ;;  %v8335_v2 = vor.u32 %v10837_v55, %v8334_v54  ;;  %2902 = vmatpush.bf16.msrb.mxu0 %v8079_v1  ;;  %v10857_v54 = vld [vmem:[#allocation5 + $0x504] sm:$0xf] }
 0x34a   :  { %v10901_v59 = vld [vmem:[#allocation5 + $0x65c] sm:$0xf0]  ;;  %v8432_v55 = vld [vmem:[#allocation5 + $0x520] sm:$0xf0] }
 0x34b   :  { %v7790_v62 = vld [vmem:[#allocation5] sm:$0xf]  ;;  %v8591_v7 = vor.u32 %v10901_v59, %v8590_v58  ;;  %2916 = vmatpush.bf16.msrb.mxu1 %v8335_v2  ;;  %v10921_v58 = vld [vmem:[#allocation5 + $0x704] sm:$0xf] }
 0x34c   :  { %v10701_v63 = vld [vmem:[#allocation5 + $0x1c] sm:$0xf0]  ;;  %v8688_v59 = vld [vmem:[#allocation5 + $0x720] sm:$0xf0] }
 0x34d   :  { %v8046_v60 = vld [vmem:[#allocation5 + $0x200] sm:$0xf]  ;;  %v7791_v10 = vor.u32 %v10701_v63, %v7790_v62  ;;  %2930 = vmatpush.bf16.msrb.mxu2 %v8591_v7  ;;  %v8179_v62 = vor.u32 %v10793_v51, %v8176_v53  ;;  %v8435_v63 = vor.u32 %v10857_v54, %v8432_v55  ;;  %v10721_v1 = vld [vmem:[#allocation5 + $0xc4] sm:$0xf]  ;;  %v8534_v51 = vld [vmem:[#allocation5 + $0x5c8] sm:$0xf] }
 0x34e   :  { %v10765_v49 = vld [vmem:[#allocation5 + $0x21c] sm:$0xf0]  ;;  %v7888_v2 = vld [vmem:[#allocation5 + $0xe0] sm:$0xf0]  ;;  %v8790_v55 = vld [vmem:[#allocation5 + $0x7c8] sm:$0xf] }
 0x34f   :  { %v8302_v57 = vld [vmem:[#allocation5 + $0x400] sm:$0xf]  ;;  %v8047_v19 = vor.u32 %v10765_v49, %v8046_v60  ;;  %2889 = vmatpush.bf16.msra.mxu3 %v7791_v10  ;;  %v10785_v60 = vld [vmem:[#allocation5 + $0x2c4] sm:$0xf]  ;;  %v8691_v49 = vor.u32 %v10921_v58, %v8688_v59  ;;  %v7891_v44 = vor.u32 %v10721_v1, %v7888_v2  ;;  %v10950_v58 = vld [vmem:[#allocation5 + $0x7e4] sm:$0xf0] }
 0x350   :  { %v10829_v3 = vld [vmem:[#allocation5 + $0x41c] sm:$0xf0]  ;;  %v10849_v7 = vld [vmem:[#allocation5 + $0x4c4] sm:$0xf]  ;;  %v7990_v1 = vld [vmem:[#allocation5 + $0x188] sm:$0xf] }
 0x351   :  { %v8558_v4 = vld [vmem:[#allocation5 + $0x600] sm:$0xf]  ;;  %v8303_v14 = vor.u32 %v10829_v3, %v8302_v57  ;;  %2903 = vmatpush.bf16.msrb.mxu0 %v8047_v19  ;;  %v8144_v57 = vld [vmem:[#allocation5 + $0x2e0] sm:$0xf0]  ;;  %v10750_v2 = vld [vmem:[#allocation5 + $0x1a4] sm:$0xf0] }
 0x352   :  { %v10893_v5 = vld [vmem:[#allocation5 + $0x61c] sm:$0xf0]  ;;  %2890 = vmatmul.bf16.vlgmr.msra.gmra.mxu3 %v12127_v31  ;;  %v8400_v3 = vld [vmem:[#allocation5 + $0x4e0] sm:$0xf0]  ;;  %v8147_v47 = vor.u32 %v10785_v60, %v8144_v57  ;;  %v8246_v60 = vld [vmem:[#allocation5 + $0x388] sm:$0xf] }
 0x353   :  { %v8559_v8 = vor.u32 %v10893_v5, %v8558_v4  ;;  %2917 = vmatpush.bf16.msrb.mxu1 %v8303_v14  ;;  %2938 = vmatpush.bf16.msrb.mxu3 %v8019_v16  ;;  %v10913_v4 = vld [vmem:[#allocation5 + $0x6c4] sm:$0xf]  ;;  %v8403_v56 = vor.u32 %v10849_v7, %v8400_v3  ;;  %v10814_v57 = vld [vmem:[#allocation5 + $0x3a4] sm:$0xf0] }
 0x354   :  { %2904 = vmatmul.bf16.vlgmr.msrb.gmra.mxu0 %v12129_v32  ;;  %v8656_v5 = vld [vmem:[#allocation5 + $0x6e0] sm:$0xf0]  ;;  %v8502_v7 = vld [vmem:[#allocation5 + $0x588] sm:$0xf] }
 0x355   :  { %2931 = vmatpush.bf16.msrb.mxu2 %v8559_v8  ;;  %2952 = vmatpush.bf16.msra.mxu0 %v8275_v17  ;;  %v10713_v10 = vld [vmem:[#allocation5 + $0x84] sm:$0xf]  ;;  %v8659_v12 = vor.u32 %v10913_v4, %v8656_v5  ;;  %v10878_v3 = vld [vmem:[#allocation5 + $0x5a4] sm:$0xf0] }
 0x356   :  { %2918 = vmatmul.bf16.vlgmr.msrb.gmra.mxu1 %v12131_v33  ;;  %v8112_v19 = vld [vmem:[#allocation5 + $0x2a0] sm:$0xf0]  ;;  %v7859_v16 = vor.u32 %v10713_v10, %v7856_v11  ;;  %v8758_v4 = vld [vmem:[#allocation5 + $0x788] sm:$0xf] }
 0x357   :  { %2966 = vmatpush.bf16.msra.mxu1 %v8531_v20  ;;  %2939 = vmatpush.bf16.msrb.mxu3 %v7987_v27  ;;  %v10841_v14 = vld [vmem:[#allocation5 + $0x484] sm:$0xf]  ;;  %v8115_v17 = vor.u32 %v10777_v18, %v8112_v19  ;;  %v10942_v5 = vld [vmem:[#allocation5 + $0x7a4] sm:$0xf0] }
 0x358   :  { %2932 = vmatmul.bf16.vlgmr.msrb.gmra.mxu2 %v12133_v34  ;;  %v8368_v0 = vld [vmem:[#allocation5 + $0x4a0] sm:$0xf0]  ;;  %v7958_v10 = vld [vmem:[#allocation5 + $0x148] sm:$0xf] }
 0x359   :  { %2980 = vmatpush.bf16.msra.mxu2 %v8787_v24  ;;  %2953 = vmatpush.bf16.msra.mxu0 %v8243_v28  ;;  %v10905_v15 = vld [vmem:[#allocation5 + $0x684] sm:$0xf]  ;;  %v8371_v20 = vor.u32 %v10841_v14, %v8368_v0  ;;  %v10742_v11 = vld [vmem:[#allocation5 + $0x164] sm:$0xf0] }
 0x35a   :  { %v8624_v8 = vld [vmem:[#allocation5 + $0x6a0] sm:$0xf0]  ;;  %v8214_v18 = vld [vmem:[#allocation5 + $0x348] sm:$0xf] }
 0x35b   :  { %2967 = vmatpush.bf16.msra.mxu1 %v8499_v29  ;;  %2940 = vmatpush.bf16.msrb.mxu3 %v7955_v43  ;;  %v10705_v21 = vld [vmem:[#allocation5 + $0x44] sm:$0xf]  ;;  %v8627_v24 = vor.u32 %v10905_v15, %v8624_v8  ;;  %v8022_v43 = vld [vmem:[#allocation5 + $0x1c8] sm:$0xf] }
 0x35c   :  { %v7824_v22 = vld [vmem:[#allocation5 + $0x60] sm:$0xf0]  ;;  %v10806_v19 = vld [vmem:[#allocation5 + $0x364] sm:$0xf0] }
 0x35d   :  { %2981 = vmatpush.bf16.msra.mxu2 %v8755_v36  ;;  %2954 = vmatpush.bf16.msra.mxu0 %v8211_v45  ;;  %v10769_v23 = vld [vmem:[#allocation5 + $0x244] sm:$0xf]  ;;  %v7827_v27 = vor.u32 %v10705_v21, %v7824_v22  ;;  %v10758_v45 = vld [vmem:[#allocation5 + $0x1e4] sm:$0xf0] }
 0x35e   :  { %v8080_v46 = vld [vmem:[#allocation5 + $0x260] sm:$0xf0]  ;;  %v8470_v14 = vld [vmem:[#allocation5 + $0x548] sm:$0xf] }
 0x35f   :  { %2968 = vmatpush.bf16.msra.mxu1 %v8467_v48  ;;  %2941 = vmatpush.bf16.msrb.mxu3 %v7923_v61  ;;  %v10833_v25 = vld [vmem:[#allocation5 + $0x444] sm:$0xf]  ;;  %v8083_v30 = vor.u32 %v10769_v23, %v8080_v46  ;;  %v8278_v48 = vld [vmem:[#allocation5 + $0x3c8] sm:$0xf]  ;;  %v8023_v61 = vor.u32 %v10758_v45, %v8022_v43 }
 0x360   :  { %v8336_v6 = vld [vmem:[#allocation5 + $0x460] sm:$0xf0]  ;;  %v10870_v0 = vld [vmem:[#allocation5 + $0x564] sm:$0xf0] }
 0x361   :  { %2982 = vmatpush.bf16.msra.mxu2 %v8723_v52  ;;  %2955 = vmatpush.bf16.msra.mxu0 %v8179_v62  ;;  %v10897_v26 = vld [vmem:[#allocation5 + $0x644] sm:$0xf]  ;;  %v8339_v35 = vor.u32 %v10833_v25, %v8336_v6  ;;  %v10886_v52 = vld [vmem:[#allocation5 + $0x5e4] sm:$0xf0]  ;;  %v8279_v62 = vor.u32 %v10822_v39, %v8278_v48 }
 0x362   :  { %v8592_v13 = vld [vmem:[#allocation5 + $0x660] sm:$0xf0]  ;;  %v8726_v15 = vld [vmem:[#allocation5 + $0x748] sm:$0xf] }
 0x363   :  { %2969 = vmatpush.bf16.msra.mxu1 %v8435_v63  ;;  %2942 = vmatpush.bf16.msrb.mxu3 %v7891_v44  ;;  %v10697_v28 = vld [vmem:[#allocation5 + $0x4] sm:$0xf]  ;;  %v8595_v38 = vor.u32 %v10897_v26, %v8592_v13  ;;  %v8535_v63 = vor.u32 %v10886_v52, %v8534_v51  ;;  %v7991_v44 = vor.u32 %v10750_v2, %v7990_v1  ;;  %v10934_v8 = vld [vmem:[#allocation5 + $0x764] sm:$0xf0] }
 0x364   :  { %v7792_v29 = vld [vmem:[#allocation5 + $0x20] sm:$0xf0]  ;;  %v7926_v21 = vld [vmem:[#allocation5 + $0x108] sm:$0xf] }
 0x365   :  { %2983 = vmatpush.bf16.msra.mxu2 %v8691_v49  ;;  %2956 = vmatpush.bf16.msra.mxu0 %v8147_v47  ;;  %v10761_v9 = vld [vmem:[#allocation5 + $0x204] sm:$0xf]  ;;  %v7795_v50 = vor.u32 %v10697_v28, %v7792_v29  ;;  %v8791_v49 = vor.u32 %v10950_v58, %v8790_v55  ;;  %v8247_v47 = vor.u32 %v10814_v57, %v8246_v60  ;;  %v10734_v22 = vld [vmem:[#allocation5 + $0x124] sm:$0xf0] }
 0x366   :  { %v8048_v36 = vld [vmem:[#allocation5 + $0x220] sm:$0xf0]  ;;  %v8182_v23 = vld [vmem:[#allocation5 + $0x308] sm:$0xf] }
 0x367   :  { %2970 = vmatpush.bf16.msra.mxu1 %v8403_v56  ;;  %2943 = vmatpush.bf16.msrb.mxu3 %v7859_v16  ;;  %v10825_v37 = vld [vmem:[#allocation5 + $0x404] sm:$0xf]  ;;  %v8051_v53 = vor.u32 %v10761_v9, %v8048_v36  ;;  %v8503_v56 = vor.u32 %v10878_v3, %v8502_v7  ;;  %v7959_v16 = vor.u32 %v10742_v11, %v7958_v10  ;;  %v10798_v46 = vld [vmem:[#allocation5 + $0x324] sm:$0xf0] }
 0x368   :  { %v8304_v40 = vld [vmem:[#allocation5 + $0x420] sm:$0xf0]  ;;  %v8438_v25 = vld [vmem:[#allocation5 + $0x508] sm:$0xf]  ;;  %v8183_v28 = vor.u32 %v10798_v46, %v8182_v23  ;;  %v10882_v23 = vld [vmem:[#allocation5 + $0x5cc] sm:$0xf] }
 0x369   :  { %2984 = vmatpush.bf16.msra.mxu2 %v8659_v12  ;;  %2957 = vmatpush.bf16.msra.mxu0 %v8115_v17  ;;  %v10889_v41 = vld [vmem:[#allocation5 + $0x604] sm:$0xf]  ;;  %v8307_v54 = vor.u32 %v10825_v37, %v8304_v40  ;;  %v8759_v12 = vor.u32 %v10942_v5, %v8758_v4  ;;  %v8215_v17 = vor.u32 %v10806_v19, %v8214_v18  ;;  %v10862_v6 = vld [vmem:[#allocation5 + $0x524] sm:$0xf0] }
 0x36a   :  { %v8560_v42 = vld [vmem:[#allocation5 + $0x620] sm:$0xf0]  ;;  %v8694_v26 = vld [vmem:[#allocation5 + $0x708] sm:$0xf]  ;;  %v8439_v29 = vor.u32 %v10862_v6, %v8438_v25  ;;  %v10946_v6 = vld [vmem:[#allocation5 + $0x7cc] sm:$0xf] }
 0x36b   :  { %2971 = vmatpush.bf16.msra.mxu1 %v8371_v20  ;;  %2944 = vmatpush.bf16.msrb.mxu3 %v7827_v27  ;;  %v8563_v59 = vor.u32 %v10889_v41, %v8560_v42  ;;  %v8471_v20 = vor.u32 %v10870_v0, %v8470_v14  ;;  %v10926_v13 = vld [vmem:[#allocation5 + $0x724] sm:$0xf0]  ;;  %v7927_v27 = vor.u32 %v10734_v22, %v7926_v21  ;;  %v8280_v22 = vld [vmem:[#allocation5 + $0x3e8] sm:$0xf0] }
 0x36c   :  { %v8150_v9 = vld [vmem:[#allocation5 + $0x2c8] sm:$0xf]  ;;  %v8695_v36 = vor.u32 %v10926_v13, %v8694_v26  ;;  %v8792_v26 = vld [vmem:[#allocation5 + $0x7e8] sm:$0xf0] }
 0x36d   :  { %2985 = vmatpush.bf16.msra.mxu2 %v8627_v24  ;;  %2958 = vmatpush.bf16.msra.mxu0 %v8083_v30  ;;  %v8727_v24 = vor.u32 %v10934_v8, %v8726_v15  ;;  %v7894_v30 = vld [vmem:[#allocation5 + $0xc8] sm:$0xf] }
 0x36e   :  { %v10790_v37 = vld [vmem:[#allocation5 + $0x2e4] sm:$0xf0] }
 0x36f   :  { %2972 = vmatpush.bf16.msra.mxu1 %v8339_v35  ;;  %2945 = vmatpush.bf16.msrb.mxu3 %v7795_v50  ;;  %v10726_v35 = vld [vmem:[#allocation5 + $0xe4] sm:$0xf0]  ;;  %v8151_v45 = vor.u32 %v10790_v37, %v8150_v9  ;;  %v10810_v9 = vld [vmem:[#allocation5 + $0x38c] sm:$0xf] }
 0x370   :  { %v10854_v40 = vld [vmem:[#allocation5 + $0x4e4] sm:$0xf0]  ;;  %v7895_v43 = vor.u32 %v10726_v35, %v7894_v30  ;;  %v10746_v30 = vld [vmem:[#allocation5 + $0x18c] sm:$0xf] }
 0x371   :  { %2986 = vmatpush.bf16.msra.mxu2 %v8595_v38  ;;  %2959 = vmatpush.bf16.msra.mxu0 %v8051_v53  ;;  %v8406_v38 = vld [vmem:[#allocation5 + $0x4c8] sm:$0xf]  ;;  %v7992_v35 = vld [vmem:[#allocation5 + $0x1a8] sm:$0xf0] }
 0x372   :  { %2946 = vmatmul.bf16.vlgmr.msrb.gmra.mxu3 %v12127_v31  ;;  %v8662_v41 = vld [vmem:[#allocation5 + $0x6c8] sm:$0xf]  ;;  %v8407_v48 = vor.u32 %v10854_v40, %v8406_v38  ;;  %v8248_v37 = vld [vmem:[#allocation5 + $0x3a8] sm:$0xf0] }
 0x373   :  { %2973 = vmatpush.bf16.msra.mxu1 %v8307_v54  ;;  %2994 = vmatpush.bf16.msra.mxu3 %v8023_v61  ;;  %v10918_v42 = vld [vmem:[#allocation5 + $0x6e4] sm:$0xf0]  ;;  %v10874_v38 = vld [vmem:[#allocation5 + $0x58c] sm:$0xf] }
 0x374   :  { %2960 = vmatmul.bf16.vlgmr.msra.gmra.mxu0 %v12129_v32  ;;  %v7862_v50 = vld [vmem:[#allocation5 + $0x88] sm:$0xf]  ;;  %v8663_v52 = vor.u32 %v10918_v42, %v8662_v41  ;;  %v8504_v40 = vld [vmem:[#allocation5 + $0x5a8] sm:$0xf0] }
 0x375   :  { %2987 = vmatpush.bf16.msra.mxu2 %v8563_v59  ;;  %3008 = vmatpush.bf16.msrb.mxu0 %v8279_v62  ;;  %v10718_v39 = vld [vmem:[#allocation5 + $0xa4] sm:$0xf0]  ;;  %v10938_v41 = vld [vmem:[#allocation5 + $0x78c] sm:$0xf] }
 0x376   :  { %2974 = vmatmul.bf16.vlgmr.msra.gmra.mxu1 %v12131_v33  ;;  %v8118_v51 = vld [vmem:[#allocation5 + $0x288] sm:$0xf]  ;;  %v7863_v61 = vor.u32 %v10718_v39, %v7862_v50  ;;  %v8760_v42 = vld [vmem:[#allocation5 + $0x7a8] sm:$0xf0] }
 0x377   :  { %3022 = vmatpush.bf16.msrb.mxu1 %v8535_v63  ;;  %2995 = vmatpush.bf16.msra.mxu3 %v7991_v44  ;;  %v10782_v53 = vld [vmem:[#allocation5 + $0x2a4] sm:$0xf0]  ;;  %v10738_v50 = vld [vmem:[#allocation5 + $0x14c] sm:$0xf] }
 0x378   :  { %2988 = vmatmul.bf16.vlgmr.msra.gmra.mxu2 %v12133_v34  ;;  %v8374_v54 = vld [vmem:[#allocation5 + $0x488] sm:$0xf]  ;;  %v8119_v62 = vor.u32 %v10782_v53, %v8118_v51  ;;  %v7960_v39 = vld [vmem:[#allocation5 + $0x168] sm:$0xf0] }
 0x379   :  { %3036 = vmatpush.bf16.msrb.mxu2 %v8791_v49  ;;  %3009 = vmatpush.bf16.msrb.mxu0 %v8247_v47  ;;  %v10846_v55 = vld [vmem:[#allocation5 + $0x4a4] sm:$0xf0]  ;;  %v10802_v51 = vld [vmem:[#allocation5 + $0x34c] sm:$0xf] }
 0x37a   :  { %v8630_v58 = vld [vmem:[#allocation5 + $0x688] sm:$0xf]  ;;  %v8375_v63 = vor.u32 %v10846_v55, %v8374_v54  ;;  %v8216_v53 = vld [vmem:[#allocation5 + $0x368] sm:$0xf0] }
 0x37b   :  { %3023 = vmatpush.bf16.msrb.mxu1 %v8503_v56  ;;  %2996 = vmatpush.bf16.msra.mxu3 %v7959_v16  ;;  %v10910_v59 = vld [vmem:[#allocation5 + $0x6a4] sm:$0xf0]  ;;  %v10754_v16 = vld [vmem:[#allocation5 + $0x1cc] sm:$0xf] }
 0x37c   :  { %v7830_v1 = vld [vmem:[#allocation5 + $0x48] sm:$0xf]  ;;  %v8631_v49 = vor.u32 %v10910_v59, %v8630_v58  ;;  %v10866_v54 = vld [vmem:[#allocation5 + $0x54c] sm:$0xf] }
 0x37d   :  { %3037 = vmatpush.bf16.msrb.mxu2 %v8759_v12  ;;  %3010 = vmatpush.bf16.msrb.mxu0 %v8215_v17  ;;  %v10710_v2 = vld [vmem:[#allocation5 + $0x64] sm:$0xf0]  ;;  %v8024_v17 = vld [vmem:[#allocation5 + $0x1e8] sm:$0xf0] }
 0x37e   :  { %v8086_v60 = vld [vmem:[#allocation5 + $0x248] sm:$0xf]  ;;  %v7831_v44 = vor.u32 %v10710_v2, %v7830_v1  ;;  %v8472_v55 = vld [vmem:[#allocation5 + $0x568] sm:$0xf0] }
 0x37f   :  { %3024 = vmatpush.bf16.msrb.mxu1 %v8471_v20  ;;  %2997 = vmatpush.bf16.msra.mxu3 %v7927_v27  ;;  %v10774_v57 = vld [vmem:[#allocation5 + $0x264] sm:$0xf0]  ;;  %v10818_v20 = vld [vmem:[#allocation5 + $0x3cc] sm:$0xf]  ;;  %v8027_v27 = vor.u32 %v10754_v16, %v8024_v17 }
 0x380   :  { %v8342_v7 = vld [vmem:[#allocation5 + $0x448] sm:$0xf]  ;;  %v8087_v10 = vor.u32 %v10774_v57, %v8086_v60  ;;  %v10930_v58 = vld [vmem:[#allocation5 + $0x74c] sm:$0xf] }
 0x381   :  { %3038 = vmatpush.bf16.msrb.mxu2 %v8727_v24  ;;  %3011 = vmatpush.bf16.msrb.mxu0 %v8183_v28  ;;  %v10838_v3 = vld [vmem:[#allocation5 + $0x464] sm:$0xf0]  ;;  %v8536_v24 = vld [vmem:[#allocation5 + $0x5e8] sm:$0xf0]  ;;  %v8283_v28 = vor.u32 %v10818_v20, %v8280_v22 }
 0x382   :  { %v8598_v4 = vld [vmem:[#allocation5 + $0x648] sm:$0xf]  ;;  %v8343_v11 = vor.u32 %v10838_v3, %v8342_v7  ;;  %v8728_v59 = vld [vmem:[#allocation5 + $0x768] sm:$0xf0] }
 0x383   :  { %3025 = vmatpush.bf16.msrb.mxu1 %v8439_v29  ;;  %2998 = vmatpush.bf16.msra.mxu3 %v7895_v43  ;;  %v10902_v5 = vld [vmem:[#allocation5 + $0x664] sm:$0xf0]  ;;  %v8539_v29 = vor.u32 %v10882_v23, %v8536_v24  ;;  %v7995_v43 = vor.u32 %v10746_v30, %v7992_v35  ;;  %v10730_v1 = vld [vmem:[#allocation5 + $0x10c] sm:$0xf] }
 0x384   :  { %v7798_v47 = vld [vmem:[#allocation5 + $0x8] sm:$0xf]  ;;  %v8599_v14 = vor.u32 %v10902_v5, %v8598_v4  ;;  %v7928_v2 = vld [vmem:[#allocation5 + $0x128] sm:$0xf0] }
 0x385   :  { %3039 = vmatpush.bf16.msrb.mxu2 %v8695_v36  ;;  %3012 = vmatpush.bf16.msrb.mxu0 %v8151_v45  ;;  %v10702_v56 = vld [vmem:[#allocation5 + $0x24] sm:$0xf0]  ;;  %v8795_v36 = vor.u32 %v10946_v6, %v8792_v26  ;;  %v8251_v45 = vor.u32 %v10810_v9, %v8248_v37  ;;  %v10794_v60 = vld [vmem:[#allocation5 + $0x30c] sm:$0xf] }
 0x386   :  { %v8054_v18 = vld [vmem:[#allocation5 + $0x208] sm:$0xf]  ;;  %v7799_v21 = vor.u32 %v10702_v56, %v7798_v47  ;;  %v8184_v57 = vld [vmem:[#allocation5 + $0x328] sm:$0xf0] }
 0x387   :  { %3026 = vmatpush.bf16.msrb.mxu1 %v8407_v48  ;;  %2999 = vmatpush.bf16.msra.mxu3 %v7863_v61  ;;  %v10766_v12 = vld [vmem:[#allocation5 + $0x224] sm:$0xf0]  ;;  %v8507_v48 = vor.u32 %v10874_v38, %v8504_v40  ;;  %v7963_v61 = vor.u32 %v10738_v50, %v7960_v39  ;;  %v10858_v7 = vld [vmem:[#allocation5 + $0x50c] sm:$0xf]  ;;  %v8187_v47 = vor.u32 %v10794_v60, %v8184_v57  ;;  %v8542_v60 = vld [vmem:[#allocation5 + $0x5d0] sm:$0xf] }
 0x388   :  { %v8310_v19 = vld [vmem:[#allocation5 + $0x408] sm:$0xf]  ;;  %v8055_v46 = vor.u32 %v10766_v12, %v8054_v18  ;;  %v8440_v3 = vld [vmem:[#allocation5 + $0x528] sm:$0xf0] }
 0x389   :  { %3040 = vmatpush.bf16.msrb.mxu2 %v8663_v52  ;;  %3013 = vmatpush.bf16.msrb.mxu0 %v8119_v62  ;;  %v10830_v0 = vld [vmem:[#allocation5 + $0x424] sm:$0xf0]  ;;  %v8763_v52 = vor.u32 %v10938_v41, %v8760_v42  ;;  %v8219_v62 = vor.u32 %v10802_v51, %v8216_v53  ;;  %v10922_v4 = vld [vmem:[#allocation5 + $0x70c] sm:$0xf]  ;;  %v8443_v56 = vor.u32 %v10858_v7, %v8440_v3  ;;  %v8798_v3 = vld [vmem:[#allocation5 + $0x7d0] sm:$0xf] }
 0x38a   :  { %v8566_v15 = vld [vmem:[#allocation5 + $0x608] sm:$0xf]  ;;  %v8311_v25 = vor.u32 %v10830_v0, %v8310_v19  ;;  %v8696_v5 = vld [vmem:[#allocation5 + $0x728] sm:$0xf0] }
 0x38b   :  { %3027 = vmatpush.bf16.msrb.mxu1 %v8375_v63  ;;  %v10894_v8 = vld [vmem:[#allocation5 + $0x624] sm:$0xf0]  ;;  %3000 = vmatpush.bf16.msra.mxu3 %v7831_v44  ;;  %v8475_v63 = vor.u32 %v10866_v54, %v8472_v55  ;;  %v7931_v44 = vor.u32 %v10730_v1, %v7928_v2  ;;  %v10786_v18 = vld [vmem:[#allocation5 + $0x2cc] sm:$0xf]  ;;  %v8699_v12 = vor.u32 %v10922_v4, %v8696_v5  ;;  %v10823_v2 = vld [vmem:[#allocation5 + $0x3ec] sm:$0xf0] }
 0x38c   :  { %v8567_v13 = vor.u32 %v10894_v8, %v8566_v15  ;;  %v8152_v19 = vld [vmem:[#allocation5 + $0x2e8] sm:$0xf0]  ;;  %v10951_v4 = vld [vmem:[#allocation5 + $0x7ec] sm:$0xf0] }
 0x38d   :  { %3041 = vmatpush.bf16.msrb.mxu2 %v8631_v49  ;;  %3014 = vmatpush.bf16.msrb.mxu0 %v8087_v10  ;;  %v8731_v49 = vor.u32 %v10930_v58, %v8728_v59  ;;  %v10722_v10 = vld [vmem:[#allocation5 + $0xcc] sm:$0xf]  ;;  %v8155_v17 = vor.u32 %v10786_v18, %v8152_v19  ;;  %v8254_v18 = vld [vmem:[#allocation5 + $0x390] sm:$0xf] }
 0x38e   :  { %v8408_v0 = vld [vmem:[#allocation5 + $0x4e8] sm:$0xf0]  ;;  %v10815_v19 = vld [vmem:[#allocation5 + $0x3ac] sm:$0xf0] }
 0x38f   :  { %3028 = vmatpush.bf16.msrb.mxu1 %v8343_v11  ;;  %3001 = vmatpush.bf16.msra.mxu3 %v7799_v21  ;;  %v7896_v11 = vld [vmem:[#allocation5 + $0xe8] sm:$0xf0] }
 0x390   :  { %v10914_v15 = vld [vmem:[#allocation5 + $0x6cc] sm:$0xf]  ;;  %v7899_v16 = vor.u32 %v10722_v10, %v7896_v11  ;;  %v7998_v10 = vld [vmem:[#allocation5 + $0x190] sm:$0xf] }
 0x391   :  { %3042 = vmatpush.bf16.msrb.mxu2 %v8599_v14  ;;  %3015 = vmatpush.bf16.msrb.mxu0 %v8055_v46  ;;  %v10850_v14 = vld [vmem:[#allocation5 + $0x4cc] sm:$0xf]  ;;  %v10751_v11 = vld [vmem:[#allocation5 + $0x1ac] sm:$0xf0] }
 0x392   :  { %3002 = vmatmul.bf16.vlgmr.msra.gmra.mxu3 %v12127_v31  ;;  %v8664_v8 = vld [vmem:[#allocation5 + $0x6e8] sm:$0xf0]  ;;  %v8411_v20 = vor.u32 %v10850_v14, %v8408_v0  ;;  %v8510_v14 = vld [vmem:[#allocation5 + $0x590] sm:$0xf] }
 0x393   :  { %3029 = vmatpush.bf16.msrb.mxu1 %v8311_v25  ;;  %3050 = vmatpush.bf16.msrb.mxu3 %v8027_v27  ;;  %v10714_v21 = vld [vmem:[#allocation5 + $0x8c] sm:$0xf]  ;;  %v8667_v24 = vor.u32 %v10914_v15, %v8664_v8  ;;  %v10879_v0 = vld [vmem:[#allocation5 + $0x5ac] sm:$0xf0] }
 0x394   :  { %3016 = vmatmul.bf16.vlgmr.msrb.gmra.mxu0 %v12129_v32  ;;  %v7864_v22 = vld [vmem:[#allocation5 + $0xa8] sm:$0xf0]  ;;  %v8766_v15 = vld [vmem:[#allocation5 + $0x790] sm:$0xf] }
 0x395   :  { %3043 = vmatpush.bf16.msrb.mxu2 %v8567_v13  ;;  %3064 = vmatpush.bf16.msra.mxu0 %v8283_v28  ;;  %v10778_v23 = vld [vmem:[#allocation5 + $0x28c] sm:$0xf]  ;;  %v7867_v27 = vor.u32 %v10714_v21, %v7864_v22  ;;  %v10943_v8 = vld [vmem:[#allocation5 + $0x7ac] sm:$0xf0] }
 0x396   :  { %3030 = vmatmul.bf16.vlgmr.msrb.gmra.mxu1 %v12131_v33  ;;  %v8120_v46 = vld [vmem:[#allocation5 + $0x2a8] sm:$0xf0]  ;;  %v7966_v21 = vld [vmem:[#allocation5 + $0x150] sm:$0xf] }
 0x397   :  { %3078 = vmatpush.bf16.msra.mxu1 %v8539_v29  ;;  %3051 = vmatpush.bf16.msrb.mxu3 %v7995_v43  ;;  %v10842_v25 = vld [vmem:[#allocation5 + $0x48c] sm:$0xf]  ;;  %v8123_v28 = vor.u32 %v10778_v23, %v8120_v46  ;;  %v10743_v22 = vld [vmem:[#allocation5 + $0x16c] sm:$0xf0] }
 0x398   :  { %3044 = vmatmul.bf16.vlgmr.msrb.gmra.mxu2 %v12133_v34  ;;  %v8376_v6 = vld [vmem:[#allocation5 + $0x4a8] sm:$0xf0]  ;;  %v8222_v23 = vld [vmem:[#allocation5 + $0x350] sm:$0xf] }
 0x399   :  { %3092 = vmatpush.bf16.msra.mxu2 %v8795_v36  ;;  %3065 = vmatpush.bf16.msra.mxu0 %v8251_v45  ;;  %v10906_v26 = vld [vmem:[#allocation5 + $0x68c] sm:$0xf]  ;;  %v8379_v29 = vor.u32 %v10842_v25, %v8376_v6  ;;  %v10807_v46 = vld [vmem:[#allocation5 + $0x36c] sm:$0xf0] }
 0x39a   :  { %v8632_v13 = vld [vmem:[#allocation5 + $0x6a8] sm:$0xf0]  ;;  %v8478_v25 = vld [vmem:[#allocation5 + $0x550] sm:$0xf] }
 0x39b   :  { %3079 = vmatpush.bf16.msra.mxu1 %v8507_v48  ;;  %3052 = vmatpush.bf16.msrb.mxu3 %v7963_v61  ;;  %v10706_v30 = vld [vmem:[#allocation5 + $0x4c] sm:$0xf]  ;;  %v8635_v36 = vor.u32 %v10906_v26, %v8632_v13  ;;  %v8030_v61 = vld [vmem:[#allocation5 + $0x1d0] sm:$0xf] }
 0x39c   :  { %v7832_v35 = vld [vmem:[#allocation5 + $0x68] sm:$0xf0]  ;;  %v10871_v6 = vld [vmem:[#allocation5 + $0x56c] sm:$0xf0] }
 0x39d   :  { %3093 = vmatpush.bf16.msra.mxu2 %v8763_v52  ;;  %3066 = vmatpush.bf16.msra.mxu0 %v8219_v62  ;;  %v10770_v9 = vld [vmem:[#allocation5 + $0x24c] sm:$0xf]  ;;  %v7835_v43 = vor.u32 %v10706_v30, %v7832_v35  ;;  %v10759_v62 = vld [vmem:[#allocation5 + $0x1ec] sm:$0xf0] }
 0x39e   :  { %v8088_v37 = vld [vmem:[#allocation5 + $0x268] sm:$0xf0]  ;;  %v8734_v26 = vld [vmem:[#allocation5 + $0x750] sm:$0xf] }
 0x39f   :  { %3080 = vmatpush.bf16.msra.mxu1 %v8475_v63  ;;  %3053 = vmatpush.bf16.msrb.mxu3 %v7931_v44  ;;  %v10834_v38 = vld [vmem:[#allocation5 + $0x44c] sm:$0xf]  ;;  %v8091_v50 = vor.u32 %v10770_v9, %v8088_v37  ;;  %v8286_v63 = vld [vmem:[#allocation5 + $0x3d0] sm:$0xf]  ;;  %v8031_v44 = vor.u32 %v10759_v62, %v8030_v61 }
 0x3a0   :  { %v8344_v40 = vld [vmem:[#allocation5 + $0x468] sm:$0xf0]  ;;  %v10935_v13 = vld [vmem:[#allocation5 + $0x76c] sm:$0xf0] }
 0x3a1   :  { %3094 = vmatpush.bf16.msra.mxu2 %v8731_v49  ;;  %3067 = vmatpush.bf16.msra.mxu0 %v8187_v47  ;;  %v10898_v41 = vld [vmem:[#allocation5 + $0x64c] sm:$0xf]  ;;  %v8347_v39 = vor.u32 %v10834_v38, %v8344_v40  ;;  %v10887_v49 = vld [vmem:[#allocation5 + $0x5ec] sm:$0xf0]  ;;  %v8287_v47 = vor.u32 %v10823_v2, %v8286_v63 }
 0x3a2   :  { %v8600_v42 = vld [vmem:[#allocation5 + $0x668] sm:$0xf0]  ;;  %v7934_v30 = vld [vmem:[#allocation5 + $0x110] sm:$0xf] }
 0x3a3   :  { %3081 = vmatpush.bf16.msra.mxu1 %v8443_v56  ;;  %3054 = vmatpush.bf16.msrb.mxu3 %v7899_v16  ;;  %v10698_v45 = vld [vmem:[#allocation5 + $0xc] sm:$0xf]  ;;  %v8603_v54 = vor.u32 %v10898_v41, %v8600_v42  ;;  %v8543_v56 = vor.u32 %v10887_v49, %v8542_v60  ;;  %v7999_v16 = vor.u32 %v10751_v11, %v7998_v10  ;;  %v10735_v35 = vld [vmem:[#allocation5 + $0x12c] sm:$0xf0] }
 0x3a4   :  { %v7800_v48 = vld [vmem:[#allocation5 + $0x28] sm:$0xf0]  ;;  %v8190_v9 = vld [vmem:[#allocation5 + $0x310] sm:$0xf] }
 0x3a5   :  { %3095 = vmatpush.bf16.msra.mxu2 %v8699_v12  ;;  %3068 = vmatpush.bf16.msra.mxu0 %v8155_v17  ;;  %v10762_v51 = vld [vmem:[#allocation5 + $0x20c] sm:$0xf]  ;;  %v7803_v1 = vor.u32 %v10698_v45, %v7800_v48  ;;  %v8799_v12 = vor.u32 %v10951_v4, %v8798_v3  ;;  %v8255_v17 = vor.u32 %v10815_v19, %v8254_v18  ;;  %v10799_v37 = vld [vmem:[#allocation5 + $0x32c] sm:$0xf0] }
 0x3a6   :  { %v8056_v52 = vld [vmem:[#allocation5 + $0x228] sm:$0xf0]  ;;  %v8446_v38 = vld [vmem:[#allocation5 + $0x510] sm:$0xf]  ;;  %v8191_v45 = vor.u32 %v10799_v37, %v8190_v9  ;;  %v10883_v9 = vld [vmem:[#allocation5 + $0x5d4] sm:$0xf] }
 0x3a7   :  { %3082 = vmatpush.bf16.msra.mxu1 %v8411_v20  ;;  %3055 = vmatpush.bf16.msrb.mxu3 %v7867_v27  ;;  %v10826_v53 = vld [vmem:[#allocation5 + $0x40c] sm:$0xf]  ;;  %v8059_v57 = vor.u32 %v10762_v51, %v8056_v52  ;;  %v8511_v20 = vor.u32 %v10879_v0, %v8510_v14  ;;  %v7967_v27 = vor.u32 %v10743_v22, %v7966_v21  ;;  %v10863_v40 = vld [vmem:[#allocation5 + $0x52c] sm:$0xf0] }
 0x3a8   :  { %v8312_v55 = vld [vmem:[#allocation5 + $0x428] sm:$0xf0]  ;;  %v8702_v41 = vld [vmem:[#allocation5 + $0x710] sm:$0xf]  ;;  %v8447_v48 = vor.u32 %v10863_v40, %v8446_v38  ;;  %v10947_v40 = vld [vmem:[#allocation5 + $0x7d4] sm:$0xf] }
 0x3a9   :  { %3096 = vmatpush.bf16.msra.mxu2 %v8667_v24  ;;  %3069 = vmatpush.bf16.msra.mxu0 %v8123_v28  ;;  %v10890_v58 = vld [vmem:[#allocation5 + $0x60c] sm:$0xf]  ;;  %v8315_v7 = vor.u32 %v10826_v53, %v8312_v55  ;;  %v8767_v24 = vor.u32 %v10943_v8, %v8766_v15  ;;  %v8223_v28 = vor.u32 %v10807_v46, %v8222_v23  ;;  %v10927_v42 = vld [vmem:[#allocation5 + $0x72c] sm:$0xf0] }
 0x3aa   :  { %v8568_v59 = vld [vmem:[#allocation5 + $0x628] sm:$0xf0]  ;;  %v8158_v51 = vld [vmem:[#allocation5 + $0x2d0] sm:$0xf]  ;;  %v8703_v52 = vor.u32 %v10927_v42, %v8702_v41  ;;  %v8800_v41 = vld [vmem:[#allocation5 + $0x7f0] sm:$0xf0] }
 0x3ab   :  { %3083 = vmatpush.bf16.msra.mxu1 %v8379_v29  ;;  %3056 = vmatpush.bf16.msrb.mxu3 %v7835_v43  ;;  %v8571_v5 = vor.u32 %v10890_v58, %v8568_v59  ;;  %v8479_v29 = vor.u32 %v10871_v6, %v8478_v25  ;;  %v7935_v43 = vor.u32 %v10735_v35, %v7934_v30  ;;  %v10791_v53 = vld [vmem:[#allocation5 + $0x2ec] sm:$0xf0]  ;;  %v8288_v35 = vld [vmem:[#allocation5 + $0x3f0] sm:$0xf0] }
 0x3ac   :  { %v10855_v55 = vld [vmem:[#allocation5 + $0x4ec] sm:$0xf0]  ;;  %v8159_v62 = vor.u32 %v10791_v53, %v8158_v51  ;;  %v10811_v51 = vld [vmem:[#allocation5 + $0x394] sm:$0xf] }
 0x3ad   :  { %3097 = vmatpush.bf16.msra.mxu2 %v8635_v36  ;;  %3070 = vmatpush.bf16.msra.mxu0 %v8091_v50  ;;  %v8735_v36 = vor.u32 %v10935_v13, %v8734_v26  ;;  %v7902_v50 = vld [vmem:[#allocation5 + $0xd0] sm:$0xf]  ;;  %v8256_v53 = vld [vmem:[#allocation5 + $0x3b0] sm:$0xf0] }
 0x3ae   :  { %v8670_v58 = vld [vmem:[#allocation5 + $0x6d0] sm:$0xf] }
 0x3af   :  { %3084 = vmatpush.bf16.msra.mxu1 %v8347_v39  ;;  %3057 = vmatpush.bf16.msrb.mxu3 %v7803_v1  ;;  %v10727_v39 = vld [vmem:[#allocation5 + $0xec] sm:$0xf0] }
 0x3b0   :  { %v10919_v59 = vld [vmem:[#allocation5 + $0x6ec] sm:$0xf0]  ;;  %v7903_v61 = vor.u32 %v10727_v39, %v7902_v50  ;;  %v10747_v50 = vld [vmem:[#allocation5 + $0x194] sm:$0xf] }
 0x3b1   :  { %3098 = vmatpush.bf16.msra.mxu2 %v8603_v54  ;;  %3071 = vmatpush.bf16.msra.mxu0 %v8059_v57  ;;  %v8414_v54 = vld [vmem:[#allocation5 + $0x4d0] sm:$0xf]  ;;  %v8671_v49 = vor.u32 %v10919_v59, %v8670_v58  ;;  %v8000_v39 = vld [vmem:[#allocation5 + $0x1b0] sm:$0xf0] }
 0x3b2   :  { %3058 = vmatmul.bf16.vlgmr.msrb.gmra.mxu3 %v12127_v31  ;;  %v8415_v63 = vor.u32 %v10855_v55, %v8414_v54  ;;  %v7870_v1 = vld [vmem:[#allocation5 + $0x90] sm:$0xf]  ;;  %v10875_v54 = vld [vmem:[#allocation5 + $0x594] sm:$0xf] }
 0x3b3   :  { %3085 = vmatpush.bf16.msra.mxu1 %v8315_v7  ;;  %3106 = vmatpush.bf16.msra.mxu3 %v8031_v44  ;;  %v10719_v2 = vld [vmem:[#allocation5 + $0xac] sm:$0xf0]  ;;  %v8512_v55 = vld [vmem:[#allocation5 + $0x5b0] sm:$0xf0] }
 0x3b4   :  { %3072 = vmatmul.bf16.vlgmr.msra.gmra.mxu0 %v12129_v32  ;;  %v8126_v60 = vld [vmem:[#allocation5 + $0x290] sm:$0xf]  ;;  %v7871_v44 = vor.u32 %v10719_v2, %v7870_v1  ;;  %v10939_v58 = vld [vmem:[#allocation5 + $0x794] sm:$0xf] }
 0x3b5   :  { %3099 = vmatpush.bf16.msra.mxu2 %v8571_v5  ;;  %3120 = vmatpush.bf16.msrb.mxu0 %v8287_v47  ;;  %v10783_v57 = vld [vmem:[#allocation5 + $0x2ac] sm:$0xf0]  ;;  %v8768_v59 = vld [vmem:[#allocation5 + $0x7b0] sm:$0xf0] }
 0x3b6   :  { %3086 = vmatmul.bf16.vlgmr.msra.gmra.mxu1 %v12131_v33  ;;  %v8382_v7 = vld [vmem:[#allocation5 + $0x490] sm:$0xf]  ;;  %v8127_v47 = vor.u32 %v10783_v57, %v8126_v60  ;;  %v10739_v1 = vld [vmem:[#allocation5 + $0x154] sm:$0xf] }
 0x3b7   :  { %3134 = vmatpush.bf16.msrb.mxu1 %v8543_v56  ;;  %3107 = vmatpush.bf16.msra.mxu3 %v7999_v16  ;;  %v10847_v3 = vld [vmem:[#allocation5 + $0x4ac] sm:$0xf0]  ;;  %v7968_v2 = vld [vmem:[#allocation5 + $0x170] sm:$0xf0] }
 0x3b8   :  { %3100 = vmatmul.bf16.vlgmr.msra.gmra.mxu2 %v12133_v34  ;;  %v8638_v4 = vld [vmem:[#allocation5 + $0x690] sm:$0xf]  ;;  %v8383_v56 = vor.u32 %v10847_v3, %v8382_v7  ;;  %v10803_v60 = vld [vmem:[#allocation5 + $0x354] sm:$0xf] }
 0x3b9   :  { %3148 = vmatpush.bf16.msrb.mxu2 %v8799_v12  ;;  %3121 = vmatpush.bf16.msrb.mxu0 %v8255_v17  ;;  %v10911_v5 = vld [vmem:[#allocation5 + $0x6ac] sm:$0xf0]  ;;  %v8224_v57 = vld [vmem:[#allocation5 + $0x370] sm:$0xf0] }
 0x3ba   :  { %v7838_v10 = vld [vmem:[#allocation5 + $0x50] sm:$0xf]  ;;  %v8639_v12 = vor.u32 %v10911_v5, %v8638_v4  ;;  %v10867_v7 = vld [vmem:[#allocation5 + $0x554] sm:$0xf] }
 0x3bb   :  { %3135 = vmatpush.bf16.msrb.mxu1 %v8511_v20  ;;  %3108 = vmatpush.bf16.msra.mxu3 %v7967_v27  ;;  %v10711_v11 = vld [vmem:[#allocation5 + $0x6c] sm:$0xf0]  ;;  %v10755_v27 = vld [vmem:[#allocation5 + $0x1d4] sm:$0xf] }
 0x3bc   :  { %v8094_v18 = vld [vmem:[#allocation5 + $0x250] sm:$0xf]  ;;  %v7839_v16 = vor.u32 %v10711_v11, %v7838_v10  ;;  %v8480_v3 = vld [vmem:[#allocation5 + $0x570] sm:$0xf0] }
 0x3bd   :  { %3149 = vmatpush.bf16.msrb.mxu2 %v8767_v24  ;;  %3122 = vmatpush.bf16.msrb.mxu0 %v8223_v28  ;;  %v10775_v19 = vld [vmem:[#allocation5 + $0x26c] sm:$0xf0]  ;;  %v8032_v28 = vld [vmem:[#allocation5 + $0x1f0] sm:$0xf0] }
 0x3be   :  { %v8350_v14 = vld [vmem:[#allocation5 + $0x450] sm:$0xf]  ;;  %v8095_v21 = vor.u32 %v10775_v19, %v8094_v18  ;;  %v10931_v4 = vld [vmem:[#allocation5 + $0x754] sm:$0xf] }
 0x3bf   :  { %3136 = vmatpush.bf16.msrb.mxu1 %v8479_v29  ;;  %3109 = vmatpush.bf16.msra.mxu3 %v7935_v43  ;;  %v10839_v0 = vld [vmem:[#allocation5 + $0x46c] sm:$0xf0]  ;;  %v10819_v29 = vld [vmem:[#allocation5 + $0x3d4] sm:$0xf]  ;;  %v8035_v43 = vor.u32 %v10755_v27, %v8032_v28 }
 0x3c0   :  { %v8606_v15 = vld [vmem:[#allocation5 + $0x650] sm:$0xf]  ;;  %v8351_v22 = vor.u32 %v10839_v0, %v8350_v14  ;;  %v8736_v5 = vld [vmem:[#allocation5 + $0x770] sm:$0xf0] }
 0x3c1   :  { %3150 = vmatpush.bf16.msrb.mxu2 %v8735_v36  ;;  %3123 = vmatpush.bf16.msrb.mxu0 %v8191_v45  ;;  %v10903_v8 = vld [vmem:[#allocation5 + $0x66c] sm:$0xf0]  ;;  %v8544_v36 = vld [vmem:[#allocation5 + $0x5f0] sm:$0xf0]  ;;  %v8291_v45 = vor.u32 %v10819_v29, %v8288_v35 }
 0x3c2   :  { %v7806_v17 = vld [vmem:[#allocation5 + $0x10] sm:$0xf]  ;;  %v8607_v25 = vor.u32 %v10903_v8, %v8606_v15  ;;  %v10731_v10 = vld [vmem:[#allocation5 + $0x114] sm:$0xf] }
 0x3c3   :  { %3137 = vmatpush.bf16.msrb.mxu1 %v8447_v48  ;;  %3110 = vmatpush.bf16.msra.mxu3 %v7903_v61  ;;  %v10703_v20 = vld [vmem:[#allocation5 + $0x2c] sm:$0xf0]  ;;  %v8547_v48 = vor.u32 %v10883_v9, %v8544_v36  ;;  %v8003_v61 = vor.u32 %v10747_v50, %v8000_v39  ;;  %v7936_v11 = vld [vmem:[#allocation5 + $0x130] sm:$0xf0] }
 0x3c4   :  { %v8062_v23 = vld [vmem:[#allocation5 + $0x210] sm:$0xf]  ;;  %v7807_v30 = vor.u32 %v10703_v20, %v7806_v17  ;;  %v10795_v18 = vld [vmem:[#allocation5 + $0x314] sm:$0xf] }
 0x3c5   :  { %3151 = vmatpush.bf16.msrb.mxu2 %v8703_v52  ;;  %3124 = vmatpush.bf16.msrb.mxu0 %v8159_v62  ;;  %v10767_v24 = vld [vmem:[#allocation5 + $0x22c] sm:$0xf0]  ;;  %v8803_v52 = vor.u32 %v10947_v40, %v8800_v41  ;;  %v8259_v62 = vor.u32 %v10811_v51, %v8256_v53  ;;  %v8192_v19 = vld [vmem:[#allocation5 + $0x330] sm:$0xf0] }
 0x3c6   :  { %v8318_v46 = vld [vmem:[#allocation5 + $0x410] sm:$0xf]  ;;  %v8063_v37 = vor.u32 %v10767_v24, %v8062_v23  ;;  %v10859_v14 = vld [vmem:[#allocation5 + $0x514] sm:$0xf]  ;;  %v8195_v17 = vor.u32 %v10795_v18, %v8192_v19 }
 0x3c7   :  { %3138 = vmatpush.bf16.msrb.mxu1 %v8415_v63  ;;  %3111 = vmatpush.bf16.msra.mxu3 %v7871_v44  ;;  %v10831_v6 = vld [vmem:[#allocation5 + $0x42c] sm:$0xf0]  ;;  %v8515_v63 = vor.u32 %v10875_v54, %v8512_v55  ;;  %v7971_v44 = vor.u32 %v10739_v1, %v7968_v2  ;;  %v8448_v0 = vld [vmem:[#allocation5 + $0x530] sm:$0xf0] }
 0x3c8   :  { %v8574_v26 = vld [vmem:[#allocation5 + $0x610] sm:$0xf]  ;;  %v8319_v38 = vor.u32 %v10831_v6, %v8318_v46  ;;  %v10923_v15 = vld [vmem:[#allocation5 + $0x714] sm:$0xf]  ;;  %v8451_v20 = vor.u32 %v10859_v14, %v8448_v0 }
 0x3c9   :  { %3152 = vmatpush.bf16.msrb.mxu2 %v8671_v49  ;;  %3125 = vmatpush.bf16.msrb.mxu0 %v8127_v47  ;;  %v10895_v13 = vld [vmem:[#allocation5 + $0x62c] sm:$0xf0]  ;;  %v8771_v49 = vor.u32 %v10939_v58, %v8768_v59  ;;  %v8227_v47 = vor.u32 %v10803_v60, %v8224_v57  ;;  %v8704_v8 = vld [vmem:[#allocation5 + $0x730] sm:$0xf0] }
 0x3ca   :  { %v8575_v42 = vor.u32 %v10895_v13, %v8574_v26  ;;  %v10787_v23 = vld [vmem:[#allocation5 + $0x2d4] sm:$0xf]  ;;  %v8707_v46 = vor.u32 %v10923_v15, %v8704_v8 }
 0x3cb   :  { %3139 = vmatpush.bf16.msrb.mxu1 %v8383_v56  ;;  %3112 = vmatpush.bf16.msra.mxu3 %v7839_v16  ;;  %v8483_v56 = vor.u32 %v10867_v7, %v8480_v3  ;;  %v7939_v16 = vor.u32 %v10731_v10, %v7936_v11  ;;  %v10851_v6 = vld [vmem:[#allocation5 + $0x4d4] sm:$0xf] }
 0x3cc   :  { %v8416_v26 = vld [vmem:[#allocation5 + $0x4f0] sm:$0xf0] }
 0x3cd   :  { %3153 = vmatpush.bf16.msrb.mxu2 %v8639_v12  ;;  %3126 = vmatpush.bf16.msrb.mxu0 %v8095_v21  ;;  %v8739_v12 = vor.u32 %v10931_v4, %v8736_v5  ;;  %v10723_v21 = vld [vmem:[#allocation5 + $0xd4] sm:$0xf]  ;;  %v8419_v35 = vor.u32 %v10851_v6, %v8416_v26  ;;  %v8806_v26 = vld [vmem:[#allocation5 + $0x7d8] sm:$0xf] }
 0x3ce   :  { %v10915_v13 = vld [vmem:[#allocation5 + $0x6d4] sm:$0xf] }
 0x3cf   :  { %3140 = vmatpush.bf16.msrb.mxu1 %v8351_v22  ;;  %3113 = vmatpush.bf16.msra.mxu3 %v7807_v30  ;;  %v7904_v22 = vld [vmem:[#allocation5 + $0xf0] sm:$0xf0] }
 0x3d0   :  { %v8672_v27 = vld [vmem:[#allocation5 + $0x6f0] sm:$0xf0]  ;;  %v7907_v29 = vor.u32 %v10723_v21, %v7904_v22 }
 0x3d1   :  { %3154 = vmatpush.bf16.msrb.mxu2 %v8607_v25  ;;  %3127 = vmatpush.bf16.msrb.mxu0 %v8063_v37  ;;  %v2905_v24 = vpop.f32.mrf.mxu0  ;;  %v8160_v25 = vld [vmem:[#allocation5 + $0x2f0] sm:$0xf0]  ;;  %v8675_v40 = vor.u32 %v10915_v13, %v8672_v27  ;;  %v10952_v13 = vld [vmem:[#allocation5 + $0x7f4] sm:$0xf0] }
 0x3d2   :  { %3114 = vmatmul.bf16.vlgmr.msra.gmra.mxu3 %v12127_v31  ;;  %v8163_v30 = vor.u32 %v10787_v23, %v8160_v25  ;;  %v10715_v36 = vld [vmem:[#allocation5 + $0x94] sm:$0xf]  ;;  %v10824_v23 = vld [vmem:[#allocation5 + $0x3f4] sm:$0xf0] }
 0x3d3   :  { %3141 = vmatpush.bf16.msrb.mxu1 %v8319_v38  ;;  %3162 = vmatpush.bf16.msrb.mxu3 %v8035_v43  ;;  %v2919_v28 = vpop.f32.mrf.mxu1  ;;  %v7872_v37 = vld [vmem:[#allocation5 + $0xb0] sm:$0xf0] }
 0x3d4   :  { %3128 = vmatmul.bf16.vlgmr.msrb.gmra.mxu0 %v12129_v32  ;;  %v10779_v38 = vld [vmem:[#allocation5 + $0x294] sm:$0xf] }
 0x3d5   :  { %3155 = vmatpush.bf16.msrb.mxu2 %v8575_v42  ;;  %3176 = vmatpush.bf16.msra.mxu0 %v8291_v45  ;;  %v2891_v9 = vpop.f32.mrf.mxu3  ;;  %v8128_v42 = vld [vmem:[#allocation5 + $0x2b0] sm:$0xf0] }
 0x3d6   :  { %3142 = vmatmul.bf16.vlgmr.msrb.gmra.mxu1 %v12131_v33  ;;  %v2906_v41 = vadd.f32 %v2905_v24, %v2891_v9  ;;  %v10843_v43 = vld [vmem:[#allocation5 + $0x494] sm:$0xf]  ;;  %v8131_v53 = vor.u32 %v10779_v38, %v8128_v42  ;;  %v8550_v24 = vld [vmem:[#allocation5 + $0x5d8] sm:$0xf]  ;;  %v8807_v42 = vor.u32 %v10952_v13, %v8806_v26 }
 0x3d7   :  { %3190 = vmatpush.bf16.msra.mxu1 %v8547_v48  ;;  %3163 = vmatpush.bf16.msrb.mxu3 %v8003_v61  ;;  %v8384_v45 = vld [vmem:[#allocation5 + $0x4b0] sm:$0xf0]  ;;  %v8262_v38 = vld [vmem:[#allocation5 + $0x398] sm:$0xf] }
 0x3d8   :  { %3156 = vmatmul.bf16.vlgmr.msrb.gmra.mxu2 %v12133_v34  ;;  %v10907_v50 = vld [vmem:[#allocation5 + $0x694] sm:$0xf]  ;;  %v2920_v51 = vadd.f32 %v2919_v28, %v2906_v41  ;;  %v8387_v54 = vor.u32 %v10843_v43, %v8384_v45  ;;  %v10816_v43 = vld [vmem:[#allocation5 + $0x3b4] sm:$0xf0] }
 0x3d9   :  { %3204 = vmatpush.bf16.msra.mxu2 %v8803_v52  ;;  %3177 = vmatpush.bf16.msra.mxu0 %v8259_v62  ;;  %v8640_v39 = vld [vmem:[#allocation5 + $0x6b0] sm:$0xf0]  ;;  %v7875_v52 = vor.u32 %v10715_v36, %v7872_v37  ;;  %v2907_v57 = vpop.f32.mrf.mxu0  ;;  %v8006_v36 = vld [vmem:[#allocation5 + $0x198] sm:$0xf] }
 0x3da   :  { %v10707_v55 = vld [vmem:[#allocation5 + $0x54] sm:$0xf]  ;;  %v8643_v61 = vor.u32 %v10907_v50, %v8640_v39  ;;  %v10752_v37 = vld [vmem:[#allocation5 + $0x1b4] sm:$0xf0] }
 0x3db   :  { %3191 = vmatpush.bf16.msra.mxu1 %v8515_v63  ;;  %3164 = vmatpush.bf16.msrb.mxu3 %v7971_v44  ;;  %v2933_v48 = vpop.f32.mrf.mxu2  ;;  %v7840_v58 = vld [vmem:[#allocation5 + $0x70] sm:$0xf0]  ;;  %v8518_v45 = vld [vmem:[#allocation5 + $0x598] sm:$0xf] }
 0x3dc   :  { %v10771_v59 = vld [vmem:[#allocation5 + $0x254] sm:$0xf]  ;;  %v12155_v62 = vadd.f32 %v2933_v48, %v2920_v51  ;;  %v7843_v7 = vor.u32 %v10707_v55, %v7840_v58  ;;  %v10880_v48 = vld [vmem:[#allocation5 + $0x5b4] sm:$0xf0]  ;;  %v8263_v55 = vor.u32 %v10816_v43, %v8262_v38 }
 0x3dd   :  { %3205 = vmatpush.bf16.msra.mxu2 %v8771_v49  ;;  %3178 = vmatpush.bf16.msra.mxu0 %v8227_v47  ;;  %v8096_v63 = vld [vmem:[#allocation5 + $0x270] sm:$0xf0]  ;;  %v2893_v47 = vpop.f32.mrf.mxu3  ;;  %v8774_v50 = vld [vmem:[#allocation5 + $0x798] sm:$0xf]  ;;  %v8519_v58 = vor.u32 %v10880_v48, %v8518_v45 }
 0x3de   :  { %v10835_v1 = vld [vmem:[#allocation5 + $0x454] sm:$0xf]  ;;  %v8099_v5 = vor.u32 %v10771_v59, %v8096_v63  ;;  %v2908_v19 = vadd.f32 %v2907_v57, %v2893_v47  ;;  %v3394_v27 = vmul.f32 %v12155_v62, %v12155_v62  ;;  %v10944_v39 = vld [vmem:[#allocation5 + $0x7b4] sm:$0xf0] }
 0x3df   :  { %3192 = vmatpush.bf16.msra.mxu1 %v8483_v56  ;;  %3165 = vmatpush.bf16.msrb.mxu3 %v7939_v16  ;;  %v8352_v2 = vld [vmem:[#allocation5 + $0x470] sm:$0xf0]  ;;  %v2921_v56 = vpop.f32.mrf.mxu1  ;;  %v8038_v16 = vld [vmem:[#allocation5 + $0x1d8] sm:$0xf] }
 0x3e0   :  { %v10899_v60 = vld [vmem:[#allocation5 + $0x654] sm:$0xf]  ;;  %v8355_v44 = vor.u32 %v10835_v1, %v8352_v2  ;;  %v2922_v21 = vadd.f32 %v2921_v56, %v2908_v19  ;;  %v10744_v59 = vld [vmem:[#allocation5 + $0x174] sm:$0xf0] }
 0x3e1   :  { %3206 = vmatpush.bf16.msra.mxu2 %v8739_v12  ;;  %3179 = vmatpush.bf16.msra.mxu0 %v8195_v17  ;;  %v8608_v49 = vld [vmem:[#allocation5 + $0x670] sm:$0xf0]  ;;  %v10760_v17 = vld [vmem:[#allocation5 + $0x1f4] sm:$0xf0] }
 0x3e2   :  { %v10699_v3 = vld [vmem:[#allocation5 + $0x14] sm:$0xf]  ;;  %v8611_v12 = vor.u32 %v10899_v60, %v8608_v49  ;;  %v10808_v63 = vld [vmem:[#allocation5 + $0x374] sm:$0xf0]  ;;  %v8775_v60 = vor.u32 %v10944_v39, %v8774_v50 }
 0x3e3   :  { %3193 = vmatpush.bf16.msra.mxu1 %v8451_v20  ;;  %3166 = vmatpush.bf16.msrb.mxu3 %v7907_v29  ;;  %v7808_v4 = vld [vmem:[#allocation5 + $0x30] sm:$0xf0]  ;;  %v2935_v8 = vpop.f32.mrf.mxu2  ;;  %v8294_v20 = vld [vmem:[#allocation5 + $0x3d8] sm:$0xf] }
 0x3e4   :  { %v10763_v10 = vld [vmem:[#allocation5 + $0x214] sm:$0xf]  ;;  %v7811_v22 = vor.u32 %v10699_v3, %v7808_v4  ;;  %v12159_v29 = vadd.f32 %v2935_v8, %v2922_v21  ;;  %v8486_v49 = vld [vmem:[#allocation5 + $0x558] sm:$0xf] }
 0x3e5   :  { %3207 = vmatpush.bf16.msra.mxu2 %v8707_v46  ;;  %3180 = vmatpush.bf16.msra.mxu0 %v8163_v30  ;;  %v8064_v11 = vld [vmem:[#allocation5 + $0x230] sm:$0xf0]  ;;  %v10888_v46 = vld [vmem:[#allocation5 + $0x5f4] sm:$0xf0]  ;;  %v8039_v30 = vor.u32 %v10760_v17, %v8038_v16 }
 0x3e6   :  { %v10827_v18 = vld [vmem:[#allocation5 + $0x414] sm:$0xf]  ;;  %v8067_v25 = vor.u32 %v10763_v10, %v8064_v11  ;;  %v8551_v9 = vor.u32 %v10888_v46, %v8550_v24  ;;  %v3402_v41 = vmul.f32 %v12159_v29, %v12159_v29  ;;  %v10872_v57 = vld [vmem:[#allocation5 + $0x574] sm:$0xf0] }
 0x3e7   :  { %3194 = vmatpush.bf16.msra.mxu1 %v8419_v35  ;;  %3167 = vmatpush.bf16.msrb.mxu3 %v7875_v52  ;;  %v8320_v14 = vld [vmem:[#allocation5 + $0x430] sm:$0xf0]  ;;  %v8295_v35 = vor.u32 %v10824_v23, %v8294_v20  ;;  %v10936_v3 = vld [vmem:[#allocation5 + $0x774] sm:$0xf0]  ;;  %v8487_v10 = vor.u32 %v10872_v57, %v8486_v49 }
 0x3e8   :  { %v10891_v0 = vld [vmem:[#allocation5 + $0x614] sm:$0xf]  ;;  %v8323_v6 = vor.u32 %v10827_v18, %v8320_v14  ;;  %v3410_v52 = vadd.f32 %v3402_v41, %v3394_v27  ;;  %v7942_v47 = vld [vmem:[#allocation5 + $0x118] sm:$0xf] }
 0x3e9   :  { %3208 = vmatpush.bf16.msra.mxu2 %v8675_v40  ;;  %3181 = vmatpush.bf16.msra.mxu0 %v8131_v53  ;;  %v8576_v15 = vld [vmem:[#allocation5 + $0x630] sm:$0xf0]  ;;  %v3330_v40 = vadd.f32 %v12159_v29, %v12155_v62  ;;  %v8007_v53 = vor.u32 %v10752_v37, %v8006_v36  ;;  %v10736_v11 = vld [vmem:[#allocation5 + $0x134] sm:$0xf0] }
 0x3ea   :  { %v8579_v28 = vor.u32 %v10891_v0, %v8576_v15  ;;  %v3411_v2 = vrot.slane %v3410_v52, 4  ;;  %v8198_v18 = vld [vmem:[#allocation5 + $0x318] sm:$0xf] }
 0x3eb   :  { %3195 = vmatpush.bf16.msra.mxu1 %v8387_v54  ;;  %3168 = vmatpush.bf16.msrb.mxu3 %v7843_v7  ;;  %v3331_v51 = vrot.slane %v3330_v40, 4  ;;  %v7974_v54 = vld [vmem:[#allocation5 + $0x158] sm:$0xf] }
 0x3ec   :  { %v8742_v7 = vld [vmem:[#allocation5 + $0x758] sm:$0xf] }
 0x3ed   :  { %3209 = vmatpush.bf16.msra.mxu2 %v8643_v61  ;;  %3182 = vmatpush.bf16.msra.mxu0 %v8099_v5  ;;  %v8230_v61 = vld [vmem:[#allocation5 + $0x358] sm:$0xf]  ;;  %v3332_v1 = vadd.f32 %v3331_v51, %v3330_v40  ;;  %v3412_v5 = vadd.f32 %v3411_v2, %v3410_v52  ;;  %v8743_v0 = vor.u32 %v10936_v3, %v8742_v7 }
 0x3ee   :  { %v8231_v56 = vor.u32 %v10808_v63, %v8230_v61  ;;  %v8454_v15 = vld [vmem:[#allocation5 + $0x518] sm:$0xf] }
 0x3ef   :  { %3196 = vmatpush.bf16.msra.mxu1 %v8355_v44  ;;  %3169 = vmatpush.bf16.msrb.mxu3 %v7811_v22  ;;  %v3333_v4 = vrot.slane %v3332_v1, 2  ;;  %v7975_v44 = vor.u32 %v10744_v59, %v7974_v54  ;;  %v3413_v14 = vrot.slane %v3412_v5, 2  ;;  %v10864_v8 = vld [vmem:[#allocation5 + $0x534] sm:$0xf0]  ;;  %v7943_v22 = vor.u32 %v10736_v11, %v7942_v47 }
 0x3f0   :  { %v8710_v16 = vld [vmem:[#allocation5 + $0x718] sm:$0xf]  ;;  %v8455_v46 = vor.u32 %v10864_v8, %v8454_v15 }
 0x3f1   :  { %3210 = vmatpush.bf16.msra.mxu2 %v8611_v12  ;;  %3183 = vmatpush.bf16.msra.mxu0 %v8067_v25  ;;  %v10800_v12 = vld [vmem:[#allocation5 + $0x334] sm:$0xf0]  ;;  %v3334_v19 = vadd.f32 %v3333_v4, %v3332_v1  ;;  %v3414_v21 = vadd.f32 %v3413_v14, %v3412_v5  ;;  %v2961_v13 = vpop.f32.mrf.mxu0 }
 0x3f2   :  { %3170 = vmatmul.bf16.vlgmr.msrb.gmra.mxu3 %v12127_v31  ;;  %v10928_v17 = vld [vmem:[#allocation5 + $0x734] sm:$0xf0]  ;;  %v8199_v24 = vor.u32 %v10800_v12, %v8198_v18 }
 0x3f3   :  { %3197 = vmatpush.bf16.msra.mxu1 %v8323_v6  ;;  %3218 = vmatpush.bf16.msra.mxu3 %v8039_v30  ;;  %v3335_v20 = vrot.slane %v3334_v19, 1  ;;  %v7910_v23 = vld [vmem:[#allocation5 + $0xd8] sm:$0xf]  ;;  %v8711_v30 = vor.u32 %v10928_v17, %v8710_v16  ;;  %v2975_v38 = vpop.f32.mrf.mxu1 }
 0x3f4   :  { %3184 = vmatmul.bf16.vlgmr.msra.gmra.mxu0 %v12129_v32  ;;  %v10728_v25 = vld [vmem:[#allocation5 + $0xf4] sm:$0xf0] }
 0x3f5   :  { %3211 = vmatpush.bf16.msra.mxu2 %v8579_v28  ;;  %3232 = vmatpush.bf16.msrb.mxu0 %v8295_v35  ;;  %v8166_v6 = vld [vmem:[#allocation5 + $0x2d8] sm:$0xf]  ;;  %v3336_v27 = vadd.f32 %v3335_v20, %v3334_v19  ;;  %v3415_v28 = vrot.slane %v3414_v21, 1  ;;  %v2947_v50 = vpop.f32.mrf.mxu3 }
 0x3f6   :  { %3198 = vmatmul.bf16.vlgmr.msra.gmra.mxu1 %v12131_v33  ;;  %v10792_v26 = vld [vmem:[#allocation5 + $0x2f4] sm:$0xf0] }
 0x3f7   :  { %3246 = vmatpush.bf16.msrb.mxu1 %v8551_v9  ;;  %3219 = vmatpush.bf16.msra.mxu3 %v8007_v53  ;;  %v8422_v35 = vld [vmem:[#allocation5 + $0x4d8] sm:$0xf]  ;;  %v12169_v40 = vmul.f32 0.0625, %v3336_v27  ;;  %v3416_v41 = vadd.f32 %v3415_v28, %v3414_v21  ;;  %v8167_v45 = vor.u32 %v10792_v26, %v8166_v6  ;;  %v10756_v28 = vld [vmem:[#allocation5 + $0x1dc] sm:$0xf] }
 0x3f8   :  { %3212 = vmatmul.bf16.vlgmr.msra.gmra.mxu2 %v12133_v34  ;;  %v10856_v9 = vld [vmem:[#allocation5 + $0x4f4] sm:$0xf0] }
 0x3f9   :  { %3260 = vmatpush.bf16.msrb.mxu2 %v8807_v42  ;;  %3233 = vmatpush.bf16.msrb.mxu0 %v8263_v55  ;;  %v8678_v36 = vld [vmem:[#allocation5 + $0x6d8] sm:$0xf]  ;;  %v7911_v42 = vor.u32 %v10728_v25, %v7910_v23  ;;  %v8423_v48 = vor.u32 %v10856_v9, %v8422_v35  ;;  %v12171_v53 = vmul.f32 0.0625, %v3416_v41  ;;  %v12175_v54 = vmul.f32 %v12169_v40, %v12169_v40  ;;  %v2963_v14 = vpop.f32.mrf.mxu0  ;;  %v10820_v35 = vld [vmem:[#allocation5 + $0x3dc] sm:$0xf] }
 0x3fa   :  { %v10920_v37 = vld [vmem:[#allocation5 + $0x6f4] sm:$0xf0]  ;;  %v8552_v41 = vld [vmem:[#allocation5 + $0x5f8] sm:$0xf0] }
 0x3fb   :  { %3247 = vmatpush.bf16.msrb.mxu1 %v8519_v58  ;;  %3220 = vmatpush.bf16.msra.mxu3 %v7975_v44  ;;  %v7878_v43 = vld [vmem:[#allocation5 + $0x98] sm:$0xf]  ;;  %v8679_v55 = vor.u32 %v10920_v37, %v8678_v36  ;;  %v2962_v58 = vadd.f32 %v2961_v13, %v2947_v50  ;;  %v2989_v63 = vpop.f32.mrf.mxu2  ;;  %v2977_v21 = vpop.f32.mrf.mxu1  ;;  %v8296_v37 = vld [vmem:[#allocation5 + $0x3f8] sm:$0xf0] }
 0x3fc   :  { %v10720_v39 = vld [vmem:[#allocation5 + $0xb4] sm:$0xf0] }
 0x3fd   :  { %3261 = vmatpush.bf16.msrb.mxu2 %v8775_v60  ;;  %3234 = vmatpush.bf16.msrb.mxu0 %v8231_v56  ;;  %v8134_v51 = vld [vmem:[#allocation5 + $0x298] sm:$0xf]  ;;  %v3482_v60 = vsub.f32 %v12171_v53, %v12175_v54  ;;  %v2976_v49 = vadd.f32 %v2975_v38, %v2962_v58  ;;  %v7879_v57 = vor.u32 %v10720_v39, %v7878_v43  ;;  %v2949_v20 = vpop.f32.mrf.mxu3  ;;  %v10884_v38 = vld [vmem:[#allocation5 + $0x5dc] sm:$0xf] }
 0x3fe   :  { %v10784_v52 = vld [vmem:[#allocation5 + $0x2b4] sm:$0xf0]  ;;  %v2964_v25 = vadd.f32 %v2963_v14, %v2949_v20  ;;  %v8555_v58 = vor.u32 %v10884_v38, %v8552_v41  ;;  %v10804_v14 = vld [vmem:[#allocation5 + $0x35c] sm:$0xf] }
 0x3ff   :  { %3248 = vmatpush.bf16.msrb.mxu1 %v8487_v10  ;;  %3221 = vmatpush.bf16.msra.mxu3 %v7943_v22  ;;  %v8390_v59 = vld [vmem:[#allocation5 + $0x498] sm:$0xf]  ;;  %v8135_v7 = vor.u32 %v10784_v52, %v8134_v51  ;;  %v12179_v56 = vadd.f32 %v2989_v63, %v2976_v49  ;;  %v10812_v63 = vld [vmem:[#allocation5 + $0x39c] sm:$0xf] }
 0x400   :  { %v10848_v61 = vld [vmem:[#allocation5 + $0x4b4] sm:$0xf0]  ;;  %v2978_v9 = vadd.f32 %v2977_v21, %v2964_v25  ;;  %v8488_v20 = vld [vmem:[#allocation5 + $0x578] sm:$0xf0] }
 0x401   :  { %3262 = vmatpush.bf16.msrb.mxu2 %v8743_v0  ;;  %3235 = vmatpush.bf16.msrb.mxu0 %v8199_v24  ;;  %v8646_v1 = vld [vmem:[#allocation5 + $0x698] sm:$0xf]  ;;  %v8391_v3 = vor.u32 %v10848_v61, %v8390_v59  ;;  %v3395_v50 = vmul.f32 %v12179_v56, %v12179_v56  ;;  %v10748_v59 = vld [vmem:[#allocation5 + $0x19c] sm:$0xf] }
 0x402   :  { %v10912_v2 = vld [vmem:[#allocation5 + $0x6b4] sm:$0xf0]  ;;  %v8008_v61 = vld [vmem:[#allocation5 + $0x1b8] sm:$0xf0] }
 0x403   :  { %3249 = vmatpush.bf16.msrb.mxu1 %v8455_v46  ;;  %3222 = vmatpush.bf16.msra.mxu3 %v7911_v42  ;;  %v7846_v4 = vld [vmem:[#allocation5 + $0x58] sm:$0xf]  ;;  %v8647_v47 = vor.u32 %v10912_v2, %v8646_v1  ;;  %v2991_v27 = vpop.f32.mrf.mxu2  ;;  %v10932_v21 = vld [vmem:[#allocation5 + $0x75c] sm:$0xf] }
 0x404   :  { %v10712_v5 = vld [vmem:[#allocation5 + $0x74] sm:$0xf0]  ;;  %v12183_v51 = vadd.f32 %v2991_v27, %v2978_v9  ;;  %v10732_v25 = vld [vmem:[#allocation5 + $0x11c] sm:$0xf] }
 0x405   :  { %3263 = vmatpush.bf16.msrb.mxu2 %v8711_v30  ;;  %3236 = vmatpush.bf16.msrb.mxu0 %v8167_v45  ;;  %v8102_v44 = vld [vmem:[#allocation5 + $0x258] sm:$0xf]  ;;  %v7847_v0 = vor.u32 %v10712_v5, %v7846_v4  ;;  %v8040_v30 = vld [vmem:[#allocation5 + $0x1f8] sm:$0xf0] }
 0x406   :  { %v10776_v10 = vld [vmem:[#allocation5 + $0x274] sm:$0xf0]  ;;  %v10948_v45 = vld [vmem:[#allocation5 + $0x7dc] sm:$0xf]  ;;  %v8043_v52 = vor.u32 %v10756_v28, %v8040_v30  ;;  %v3337_v1 = vadd.f32 %v12183_v51, %v12179_v56  ;;  %v3403_v2 = vmul.f32 %v12183_v51, %v12183_v51 }
 0x407   :  { %3250 = vmatpush.bf16.msrb.mxu1 %v8423_v48  ;;  %v8358_v11 = vld [vmem:[#allocation5 + $0x458] sm:$0xf]  ;;  %3223 = vmatpush.bf16.msra.mxu3 %v7879_v57  ;;  %v8103_v16 = vor.u32 %v10776_v10, %v8102_v44  ;;  %v8808_v48 = vld [vmem:[#allocation5 + $0x7f8] sm:$0xf0]  ;;  %v8011_v10 = vor.u32 %v10748_v59, %v8008_v61 }
 0x408   :  { %v10840_v18 = vld [vmem:[#allocation5 + $0x474] sm:$0xf0]  ;;  %v8811_v49 = vor.u32 %v10948_v45, %v8808_v48  ;;  %v8264_v57 = vld [vmem:[#allocation5 + $0x3b8] sm:$0xf0]  ;;  %v3338_v44 = vrot.slane %v3337_v1, 4 }
 0x409   :  { %3264 = vmatpush.bf16.msrb.mxu2 %v8679_v55  ;;  %v8614_v12 = vld [vmem:[#allocation5 + $0x658] sm:$0xf]  ;;  %3237 = vmatpush.bf16.msrb.mxu0 %v8135_v7  ;;  %v8359_v17 = vor.u32 %v10840_v18, %v8358_v11  ;;  %v8299_v55 = vor.u32 %v10820_v35, %v8296_v37  ;;  %v10876_v7 = vld [vmem:[#allocation5 + $0x59c] sm:$0xf]  ;;  %v8267_v18 = vor.u32 %v10812_v63, %v8264_v57  ;;  %v12196_v35 = vadd.f32 0.8, %v3482_v60 }
 0x40a   :  { %v10904_v19 = vld [vmem:[#allocation5 + $0x674] sm:$0xf0]  ;;  %v10940_v4 = vld [vmem:[#allocation5 + $0x79c] sm:$0xf] }
 0x40b   :  { %v7814_v15 = vld [vmem:[#allocation5 + $0x18] sm:$0xf]  ;;  %3251 = vmatpush.bf16.msrb.mxu1 %v8391_v3  ;;  %v8615_v46 = vor.u32 %v10904_v19, %v8614_v12  ;;  %3224 = vmatpush.bf16.msra.mxu3 %v7847_v0  ;;  %v8520_v3 = vld [vmem:[#allocation5 + $0x5b8] sm:$0xf0]  ;;  %11435 = vrsqrt.f32 %v12196_v35  ;;  %vm3505_vm12 = vweird.f32 %v12196_v35 }
 0x40c   :  { %v10704_v8 = vld [vmem:[#allocation5 + $0x34] sm:$0xf0]  ;;  %v8776_v5 = vld [vmem:[#allocation5 + $0x7b8] sm:$0xf0]  ;;  %v8523_v12 = vor.u32 %v10876_v7, %v8520_v3 }
 0x40d   :  { %v8070_v22 = vld [vmem:[#allocation5 + $0x218] sm:$0xf]  ;;  %3265 = vmatpush.bf16.msrb.mxu2 %v8647_v47  ;;  %v7815_v36 = vor.u32 %v10704_v8, %v7814_v15  ;;  %3238 = vmatpush.bf16.msrb.mxu0 %v8103_v16  ;;  %v3417_v47 = vadd.f32 %v3403_v2, %v3395_v50  ;;  %v10740_v11 = vld [vmem:[#allocation5 + $0x15c] sm:$0xf]  ;;  %v3339_v15 = vadd.f32 %v3338_v44, %v3337_v1 }
 0x40e   :  { %v10768_v23 = vld [vmem:[#allocation5 + $0x234] sm:$0xf0]  ;;  %v7976_v19 = vld [vmem:[#allocation5 + $0x178] sm:$0xf0]  ;;  %v8779_v16 = vor.u32 %v10940_v4, %v8776_v5 }
 0x40f   :  { %v8326_v24 = vld [vmem:[#allocation5 + $0x418] sm:$0xf]  ;;  %3252 = vmatpush.bf16.msrb.mxu1 %v8359_v17  ;;  %v8071_v42 = vor.u32 %v10768_v23, %v8070_v22  ;;  %3225 = vmatpush.bf16.msra.mxu3 %v7815_v36  ;;  %v8232_v0 = vld [vmem:[#allocation5 + $0x378] sm:$0xf0]  ;;  %v3418_v8 = vrot.slane %v3417_v47, 4  ;;  %v3340_v23 = vrot.slane %v3339_v15, 2 }
 0x410   :  { %v10832_v6 = vld [vmem:[#allocation5 + $0x434] sm:$0xf0]  ;;  %v10868_v17 = vld [vmem:[#allocation5 + $0x55c] sm:$0xf] }
 0x411   :  { %v8582_v26 = vld [vmem:[#allocation5 + $0x618] sm:$0xf]  ;;  %v8327_v43 = vor.u32 %v10832_v6, %v8326_v24  ;;  %3266 = vmatpush.bf16.msrb.mxu2 %v8615_v46  ;;  %3239 = vmatpush.bf16.msrb.mxu0 %v8071_v42  ;;  %v8744_v22 = vld [vmem:[#allocation5 + $0x778] sm:$0xf0]  ;;  %v3419_v24 = vadd.f32 %v3418_v8, %v3417_v47  ;;  %v7979_v46 = vor.u32 %v10740_v11, %v7976_v19  ;;  %v3017_v60 = vpop.f32.mrf.mxu0 }
 0x412   :  { %v10896_v13 = vld [vmem:[#allocation5 + $0x634] sm:$0xf0]  ;;  %3226 = vmatmul.bf16.vlgmr.msra.gmra.mxu3 %v12127_v31  ;;  %v7944_v6 = vld [vmem:[#allocation5 + $0x138] sm:$0xf0]  ;;  %v3341_v9 = vadd.f32 %v3340_v23, %v3339_v15  ;;  %v8747_v37 = vor.u32 %v10932_v21, %v8744_v22  ;;  %v12203_v22 = vpop.eup %11435 }
 0x413   :  { %v8583_v39 = vor.u32 %v10896_v13, %v8582_v26  ;;  %3253 = vmatpush.bf16.msrb.mxu1 %v8327_v43  ;;  %3274 = vmatpush.bf16.msrb.mxu3 %v8043_v52  ;;  %v8235_v26 = vor.u32 %v10804_v14, %v8232_v0  ;;  %v8491_v13 = vor.u32 %v10868_v17, %v8488_v20  ;;  %v10796_v27 = vld [vmem:[#allocation5 + $0x31c] sm:$0xf]  ;;  %v3420_v36 = vrot.slane %v3419_v24, 2  ;;  %v3031_v57 = vpop.f32.mrf.mxu1 }
 0x414   :  { %3240 = vmatmul.bf16.vlgmr.msrb.gmra.mxu0 %v12129_v32  ;;  %v8200_v28 = vld [vmem:[#allocation5 + $0x338] sm:$0xf0]  ;;  %v3342_v43 = vrot.slane %v3341_v9, 1  ;;  %v7947_v48 = vor.u32 %v10732_v25, %v7944_v6  ;;  %vm3506_vm13 = vweird.f32 %v12203_v22 }
 0x415   :  { %3267 = vmatpush.bf16.msrb.mxu2 %v8583_v39  ;;  %3288 = vmatpush.bf16.msra.mxu0 %v8299_v55  ;;  %v10860_v30 = vld [vmem:[#allocation5 + $0x51c] sm:$0xf]  ;;  %v3421_v45 = vadd.f32 %v3420_v36, %v3419_v24  ;;  %v8203_v39 = vor.u32 %v10796_v27, %v8200_v28  ;;  %vm3507_vm15 = vmor %vm3505_vm12, %vm3506_vm13 }
 0x416   :  { %3254 = vmatmul.bf16.vlgmr.msrb.gmra.mxu1 %v12131_v33  ;;  %v8456_v38 = vld [vmem:[#allocation5 + $0x538] sm:$0xf0] }
 0x417   :  { %3302 = vmatpush.bf16.msra.mxu1 %v8555_v58  ;;  %3275 = vmatpush.bf16.msrb.mxu3 %v8011_v10  ;;  %v10924_v41 = vld [vmem:[#allocation5 + $0x71c] sm:$0xf]  ;;  %v8459_v52 = vor.u32 %v10860_v30, %v8456_v38  ;;  %v3343_v58 = vadd.f32 %v3342_v43, %v3341_v9  ;;  %v3422_v59 = vrot.slane %v3421_v45, 1  ;;  %v3003_v10 = vpop.f32.mrf.mxu3 }
 0x418   :  { %3268 = vmatmul.bf16.vlgmr.msrb.gmra.mxu2 %v12133_v34  ;;  %v8712_v42 = vld [vmem:[#allocation5 + $0x738] sm:$0xf0]  ;;  %v3018_v15 = vadd.f32 %v3017_v60, %v3003_v10 }
 0x419   :  { %3316 = vmatpush.bf16.msra.mxu2 %v8811_v49  ;;  %3289 = vmatpush.bf16.msra.mxu0 %v8267_v18  ;;  %v10724_v50 = vld [vmem:[#allocation5 + $0xdc] sm:$0xf]  ;;  %v8715_v61 = vor.u32 %v10924_v41, %v8712_v42  ;;  %v12199_v7 = vmul.f32 0.0625, %v3343_v58  ;;  %v3423_v3 = vadd.f32 %v3422_v59, %v3421_v45  ;;  %v3500_v41 = vmul.f32 %v12203_v22, %v12196_v35  ;;  %v3019_v45 = vpop.f32.mrf.mxu0 }
 0x41a   :  { %v7912_v55 = vld [vmem:[#allocation5 + $0xf8] sm:$0xf0]  ;;  %v3032_v24 = vadd.f32 %v3031_v57, %v3018_v15 }
 0x41b   :  { %3303 = vmatpush.bf16.msra.mxu1 %v8523_v12  ;;  %3276 = vmatpush.bf16.msrb.mxu3 %v7979_v46  ;;  %v10788_v53 = vld [vmem:[#allocation5 + $0x2dc] sm:$0xf]  ;;  %v7915_v4 = vor.u32 %v10724_v50, %v7912_v55  ;;  %v3467_v19 = vmul.f32 0.0625, %v3423_v3  ;;  %v3475_v14 = vmul.f32 %v12199_v7, %v12199_v7  ;;  %v3045_v17 = vpop.f32.mrf.mxu2  ;;  %v3033_v55 = vpop.f32.mrf.mxu1 }
 0x41c   :  { %v8168_v54 = vld [vmem:[#allocation5 + $0x2f8] sm:$0xf0]  ;;  %v12207_v36 = vadd.f32 %v3045_v17, %v3032_v24 }
 0x41d   :  { %3317 = vmatpush.bf16.msra.mxu2 %v8779_v16  ;;  %3290 = vmatpush.bf16.msra.mxu0 %v8235_v26  ;;  %v10852_v63 = vld [vmem:[#allocation5 + $0x4dc] sm:$0xf]  ;;  %v8171_v44 = vor.u32 %v10788_v53, %v8168_v54  ;;  %v3483_v23 = vsub.f32 %v3467_v19, %v3475_v14 }
 0x41e   :  { %v8424_v1 = vld [vmem:[#allocation5 + $0x4f8] sm:$0xf0] }
 0x41f   :  { %3304 = vmatpush.bf16.msra.mxu1 %v8491_v13  ;;  %v10916_v2 = vld [vmem:[#allocation5 + $0x6dc] sm:$0xf]  ;;  %3277 = vmatpush.bf16.msrb.mxu3 %v7947_v48  ;;  %v8427_v47 = vor.u32 %v10852_v63, %v8424_v1  ;;  %v12205_v30 = vadd.f32 0.8, %v3483_v23 }
 0x420   :  { %v8680_v49 = vld [vmem:[#allocation5 + $0x6f8] sm:$0xf0] }
 0x421   :  { %3318 = vmatpush.bf16.msra.mxu2 %v8747_v37  ;;  %v10716_v5 = vld [vmem:[#allocation5 + $0x9c] sm:$0xf]  ;;  %3291 = vmatpush.bf16.msra.mxu0 %v8203_v39  ;;  %v8683_v0 = vor.u32 %v10916_v2, %v8680_v49  ;;  %11437 = vrsqrt.f32 %v12205_v30  ;;  %v3501_v2 = vmul.f32 %v12203_v22, %v3500_v41  ;;  %vm3515_vm10 = vweird.f32 %v12205_v30 }
 0x422   :  { %v7880_v11 = vld [vmem:[#allocation5 + $0xb8] sm:$0xf0] }
 0x423   :  { %3305 = vmatpush.bf16.msra.mxu1 %v8459_v52  ;;  %v10780_v18 = vld [vmem:[#allocation5 + $0x29c] sm:$0xf]  ;;  %3278 = vmatpush.bf16.msrb.mxu3 %v7915_v4  ;;  %v7883_v46 = vor.u32 %v10716_v5, %v7880_v11  ;;  %v3005_v52 = vpop.f32.mrf.mxu3  ;;  %v3047_v3 = vpop.f32.mrf.mxu2  ;;  %v3396_v11 = vmul.f32 %v12207_v36, %v12207_v36  ;;  %v3502_v19 = vmul.f32 0.5, %v3501_v2 }
 0x424   :  { %v8136_v12 = vld [vmem:[#allocation5 + $0x2b8] sm:$0xf0]  ;;  %v3020_v59 = vadd.f32 %v3019_v45, %v3005_v52 }
 0x425   :  { %3319 = vmatpush.bf16.msra.mxu2 %v8715_v61  ;;  %v10844_v8 = vld [vmem:[#allocation5 + $0x49c] sm:$0xf]  ;;  %3292 = vmatpush.bf16.msra.mxu0 %v8171_v44  ;;  %v8139_v6 = vor.u32 %v10780_v18, %v8136_v12 }
 0x426   :  { %v8392_v16 = vld [vmem:[#allocation5 + $0x4b8] sm:$0xf0]  ;;  %v3034_v4 = vadd.f32 %v3033_v55, %v3020_v59 }
 0x427   :  { %v10908_v20 = vld [vmem:[#allocation5 + $0x69c] sm:$0xf]  ;;  %3306 = vmatpush.bf16.msra.mxu1 %v8427_v47  ;;  %v8395_v26 = vor.u32 %v10844_v8, %v8392_v16  ;;  %3279 = vmatpush.bf16.msrb.mxu3 %v7883_v46  ;;  %v11438_v10 = vpop.eup %11437 }
 0x428   :  { %v8648_v21 = vld [vmem:[#allocation5 + $0x6b8] sm:$0xf0]  ;;  %v12215_v12 = vadd.f32 %v3047_v3, %v3034_v4  ;;  %v3510_v14 = vmul.f32 %v11438_v10, %v12205_v30  ;;  %vm3516_vm11 = vweird.f32 %v11438_v10 }
 0x429   :  { %v10708_v25 = vld [vmem:[#allocation5 + $0x5c] sm:$0xf]  ;;  %3320 = vmatpush.bf16.msra.mxu2 %v8683_v0  ;;  %v8651_v9 = vor.u32 %v10908_v20, %v8648_v21  ;;  %3293 = vmatpush.bf16.msra.mxu0 %v8139_v6  ;;  %v3503_v20 = vsub.f32 1.5, %v3502_v19  ;;  %vm3517_vm14 = vmor %vm3515_vm10, %vm3516_vm11 }
 0x42a   :  { %v7848_v13 = vld [vmem:[#allocation5 + $0x78] sm:$0xf0]  ;;  %v3344_v0 = vadd.f32 %v12215_v12, %v12207_v36  ;;  %v3404_v15 = vmul.f32 %v12215_v12, %v12215_v12  ;;  %v3511_v8 = vmul.f32 %v11438_v10, %v3510_v14 }
 0x42b   :  { %v10772_v27 = vld [vmem:[#allocation5 + $0x25c] sm:$0xf]  ;;  %v7851_v48 = vor.u32 %v10708_v25, %v7848_v13  ;;  %3307 = vmatpush.bf16.msra.mxu1 %v8395_v26  ;;  %v3504_v26 = vmul.f32 %v12203_v22, %v3503_v20 }
 0x42c   :  { %v8104_v28 = vld [vmem:[#allocation5 + $0x278] sm:$0xf0]  ;;  %v3345_v16 = vrot.slane %v3344_v0, 4  ;;  %v3424_v17 = vadd.f32 %v3404_v15, %v3396_v11  ;;  %v3512_v21 = vmul.f32 0.5, %v3511_v8 }
 0x42d   :  { %v10836_v37 = vld [vmem:[#allocation5 + $0x45c] sm:$0xf]  ;;  %v8107_v50 = vor.u32 %v10772_v27, %v8104_v28  ;;  %3321 = vmatpush.bf16.msra.mxu2 %v8651_v9  ;;  %3280 = vmatpush.bf16.msrb.mxu3 %v7851_v48  ;;  %v3508_v9 = vsel %vm3507_vm15, %v12203_v22, %v3504_v26 }
 0x42e   :  { %v8360_v38 = vld [vmem:[#allocation5 + $0x478] sm:$0xf0]  ;;  %v3346_v23 = vadd.f32 %v3345_v16, %v3344_v0  ;;  %v3425_v24 = vrot.slane %v3424_v17, 4  ;;  %v3513_v46 = vsub.f32 1.5, %v3512_v21 }
 0x42f   :  { %v10900_v42 = vld [vmem:[#allocation5 + $0x65c] sm:$0xf]  ;;  %v8363_v39 = vor.u32 %v10836_v37, %v8360_v38  ;;  %3294 = vmatpush.bf16.msra.mxu0 %v8107_v50 }
 0x430   :  { %v8616_v43 = vld [vmem:[#allocation5 + $0x678] sm:$0xf0]  ;;  %v3347_v25 = vrot.slane %v3346_v23, 2  ;;  %v3426_v6 = vadd.f32 %v3425_v24, %v3424_v17 }
 0x431   :  { %v10700_v53 = vld [vmem:[#allocation5 + $0x1c] sm:$0xf]  ;;  %v8619_v58 = vor.u32 %v10900_v42, %v8616_v43  ;;  %3308 = vmatpush.bf16.msra.mxu1 %v8363_v39 }
 0x432   :  { %v7816_v54 = vld [vmem:[#allocation5 + $0x38] sm:$0xf0]  ;;  %v3348_v13 = vadd.f32 %v3347_v25, %v3346_v23 }
 0x433   :  { %v10764_v60 = vld [vmem:[#allocation5 + $0x21c] sm:$0xf]  ;;  %v7819_v5 = vor.u32 %v10700_v53, %v7816_v54  ;;  %3322 = vmatpush.bf16.msra.mxu2 %v8619_v58  ;;  %v3087_v35 = vpop.f32.mrf.mxu1 }
 0x434   :  { %v8072_v61 = vld [vmem:[#allocation5 + $0x238] sm:$0xf0]  ;;  %v3349_v28 = vrot.slane %v3348_v13, 1 }
 0x435   :  { %v10828_v63 = vld [vmem:[#allocation5 + $0x41c] sm:$0xf]  ;;  %v8075_v44 = vor.u32 %v10764_v60, %v8072_v61  ;;  %3281 = vmatpush.bf16.msrb.mxu3 %v7819_v5  ;;  %v3059_v45 = vpop.f32.mrf.mxu3 }
 0x436   :  { %v8328_v1 = vld [vmem:[#allocation5 + $0x438] sm:$0xf0]  ;;  %v3350_v38 = vadd.f32 %v3349_v28, %v3348_v13 }
 0x437   :  { %v10892_v49 = vld [vmem:[#allocation5 + $0x61c] sm:$0xf]  ;;  %v8331_v47 = vor.u32 %v10828_v63, %v8328_v1  ;;  %3295 = vmatpush.bf16.msra.mxu0 %v8075_v44 }
 0x438   :  { %v8584_v57 = vld [vmem:[#allocation5 + $0x638] sm:$0xf0]  ;;  %3282 = vmatmul.bf16.vlgmr.msrb.gmra.mxu3 %v12127_v31  ;;  %v3514_v31 = vmul.f32 %v11438_v10, %v3513_v46  ;;  %v12234_v42 = vmul.f32 0.0625, %v3350_v38 }
 0x439   :  { %v8587_v18 = vor.u32 %v10892_v49, %v8584_v57  ;;  %3309 = vmatpush.bf16.msra.mxu1 %v8331_v47 }
 0x43a   :  { %3296 = vmatmul.bf16.vlgmr.msra.gmra.mxu0 %v12129_v32  ;;  %v3427_v32 = vrot.slane %v3426_v6, 2  ;;  %v3518_v27 = vsel %vm3517_vm14, %v11438_v10, %v3514_v31  ;;  %v3476_v50 = vmul.f32 %v12234_v42, %v12234_v42 }
 0x43b   :  { %3323 = vmatpush.bf16.msra.mxu2 %v8587_v18  ;;  %v3101_v52 = vpop.f32.mrf.mxu2  ;;  %v3089_v58 = vpop.f32.mrf.mxu1 }
 0x43c   :  { %3310 = vmatmul.bf16.vlgmr.msra.gmra.mxu1 %v12131_v33  ;;  %v3587_v33 = vrot.slane %v3518_v27, 7  ;;  %v3428_v30 = vadd.f32 %v3427_v32, %v3426_v6 }
 0x43d   :  { %v3061_v60 = vpop.f32.mrf.mxu3 }
 0x43e   :  { %3324 = vmatmul.bf16.vlgmr.msra.gmra.mxu2 %v12133_v34  ;;  %v3073_v34 = vpop.f32.mrf.mxu0  ;;  %v12232_v37 = vsel %vm591_vm9, %v3508_v9, %v3587_v33  ;;  %v3429_v41 = vrot.slane %v3428_v30, 1 }
 0x43f   :  { %v3074_v39 = vadd.f32 %v3073_v34, %v3059_v45 }
 0x440   :  { %v3430_v43 = vadd.f32 %v3429_v41, %v3428_v30 }
 0x441   :  { %v3088_v53 = vadd.f32 %v3087_v35, %v3074_v39 }
 0x442   :  { %v3468_v48 = vmul.f32 0.0625, %v3430_v43 }
 0x443   :  { %v12238_v22 = vadd.f32 %v3101_v52, %v3088_v53  ;;  %v3103_v61 = vpop.f32.mrf.mxu2 }
 0x444   :  { %v3484_v55 = vsub.f32 %v3468_v48, %v3476_v50 }
 0x445   :  { %v3397_v1 = vmul.f32 %v12238_v22, %v12238_v22 }
 0x446   :  { %v3075_v54 = vpop.f32.mrf.mxu0  ;;  %v3493_v5 = vadd.f32 0.8, %v3484_v55 }
 0x447   :  { %v3076_v59 = vadd.f32 %v3075_v54, %v3061_v60 }
 0x448   :  { %11439 = vrsqrt.f32 %v3493_v5  ;;  %vm3525_vm0 = vweird.f32 %v3493_v5 }
 0x449   :  { %v3090_v63 = vadd.f32 %v3089_v58, %v3076_v59 }
 0x44b   :  { %v12242_v2 = vadd.f32 %v3103_v61, %v3090_v63 }
 0x44d   :  { %v3351_v49 = vadd.f32 %v12242_v2, %v12238_v22  ;;  %v3405_v57 = vmul.f32 %v12242_v2, %v12242_v2 }
 0x44e   :  { %v11440_v16 = vpop.eup %11439 }
 0x44f   :  { %v3352_v3 = vrot.slane %v3351_v49, 4  ;;  %v3431_v4 = vadd.f32 %v3405_v57, %v3397_v1  ;;  %v3520_v24 = vmul.f32 %v11440_v16, %v3493_v5  ;;  %vm3526_vm1 = vweird.f32 %v11440_v16 }
 0x450   :  { %vm3527_vm4 = vmor %vm3525_vm0, %vm3526_vm1 }
 0x451   :  { %v3353_v44 = vadd.f32 %v3352_v3, %v3351_v49  ;;  %v3432_v47 = vrot.slane %v3431_v4, 4  ;;  %v3521_v6 = vmul.f32 %v11440_v16, %v3520_v24  ;;  %v3129_v9 = vpop.f32.mrf.mxu0 }
 0x453   :  { %v3354_v10 = vrot.slane %v3353_v44, 2  ;;  %v3433_v11 = vadd.f32 %v3432_v47, %v3431_v4  ;;  %v3522_v26 = vmul.f32 0.5, %v3521_v6  ;;  %v3143_v41 = vpop.f32.mrf.mxu1 }
 0x455   :  { %v3355_v18 = vadd.f32 %v3354_v10, %v3353_v44  ;;  %v3434_v19 = vrot.slane %v3433_v11, 2  ;;  %v3523_v13 = vsub.f32 1.5, %v3522_v26  ;;  %v3115_v35 = vpop.f32.mrf.mxu3 }
 0x456   :  { %v3130_v44 = vadd.f32 %v3129_v9, %v3115_v35 }
 0x457   :  { %v3356_v14 = vrot.slane %v3355_v18, 1  ;;  %v3435_v0 = vadd.f32 %v3434_v19, %v3433_v11  ;;  %v3524_v33 = vmul.f32 %v11440_v16, %v3523_v13 }
 0x458   :  { %v3144_v19 = vadd.f32 %v3143_v41, %v3130_v44 }
 0x459   :  { %v3357_v15 = vadd.f32 %v3356_v14, %v3355_v18  ;;  %v3436_v8 = vrot.slane %v3435_v0, 1  ;;  %v3528_v34 = vsel %vm3527_vm4, %v11440_v16, %v3524_v33  ;;  %v3131_v55 = vpop.f32.mrf.mxu0 }
 0x45a   :  { %v3588_v45 = vrot.slane %v3528_v34, 6 }
 0x45b   :  { %v12248_v17 = vmul.f32 0.0625, %v3357_v15  ;;  %v3437_v20 = vadd.f32 %v3436_v8, %v3435_v0  ;;  %v3157_v50 = vpop.f32.mrf.mxu2  ;;  %v3145_v53 = vpop.f32.mrf.mxu1 }
 0x45d   :  { %v3469_v21 = vmul.f32 0.0625, %v3437_v20  ;;  %v3477_v23 = vmul.f32 %v12248_v17, %v12248_v17  ;;  %v3117_v54 = vpop.f32.mrf.mxu3 }
 0x45e   :  { %v3132_v47 = vadd.f32 %v3131_v55, %v3117_v54 }
 0x45f   :  { %v3485_v46 = vsub.f32 %v3469_v21, %v3477_v23  ;;  %v12261_v21 = vadd.f32 %v3157_v50, %v3144_v19 }
 0x460   :  { %v3146_v14 = vadd.f32 %v3145_v53, %v3132_v47 }
 0x461   :  { %v3494_v25 = vadd.f32 0.8, %v3485_v46 }
 0x463   :  { %11441 = vrsqrt.f32 %v3494_v25  ;;  %vm3535_vm2 = vweird.f32 %v3494_v25  ;;  %v3159_v60 = vpop.f32.mrf.mxu2 }
 0x464   :  { %v12263_v23 = vadd.f32 %v3159_v60, %v3146_v14 }
 0x466   :  { %v3358_v13 = vadd.f32 %v12263_v23, %v12261_v21 }
 0x468   :  { %v3359_v41 = vrot.slane %v3358_v13, 4 }
 0x469   :  { %v11442_v31 = vpop.eup %11441 }
 0x46a   :  { %v3530_v32 = vmul.f32 %v11442_v31, %v3494_v25  ;;  %vm3536_vm3 = vweird.f32 %v11442_v31  ;;  %v3360_v55 = vadd.f32 %v3359_v41, %v3358_v13 }
 0x46b   :  { %vm3537_vm5 = vmor %vm3535_vm2, %vm3536_vm3 }
 0x46c   :  { %v3531_v27 = vmul.f32 %v11442_v31, %v3530_v32  ;;  %v3406_v32 = vmul.f32 %v12263_v23, %v12263_v23 }
 0x46e   :  { %v3532_v28 = vmul.f32 0.5, %v3531_v27 }
 0x470   :  { %v3533_v30 = vsub.f32 1.5, %v3532_v28 }
 0x471   :  { %v3185_v58 = vpop.f32.mrf.mxu0 }
 0x472   :  { %v3534_v38 = vmul.f32 %v11442_v31, %v3533_v30 }
 0x473   :  { %v3199_v59 = vpop.f32.mrf.mxu1 }
 0x474   :  { %v3538_v43 = vsel %vm3537_vm5, %v11442_v31, %v3534_v38  ;;  %v3398_v31 = vmul.f32 %v12261_v21, %v12261_v21  ;;  %vm3597_vm5 = vcmask 1044484  }
 0x475   :  { %v3589_v48 = vrot.slane %v3538_v43, 5  ;;  %v3171_v61 = vpop.f32.mrf.mxu3 }
 0x476   :  { %v3186_v4 = vadd.f32 %v3185_v58, %v3171_v61  ;;  %v3438_v35 = vadd.f32 %v3406_v32, %v3398_v31 }
 0x477   :  { %v3595_v39 = vsel %vm12545_vm6, %v3588_v45, %v3589_v48  ;;  %vm3601_vm6 = vcmask 1045508  }
 0x478   :  { %v12255_v52 = vsel %vm12544_vm8, %v12232_v37, %v3595_v39  ;;  %v3200_v11 = vadd.f32 %v3199_v59, %v3186_v4  ;;  %v3439_v53 = vrot.slane %v3438_v35, 4  ;;  %vm3599_vm8 = vcmask 1046534  }
 0x479   :  { %v3187_v1 = vpop.f32.mrf.mxu0 }
 0x47b   :  { %v3213_v63 = vpop.f32.mrf.mxu2  ;;  %v3201_v49 = vpop.f32.mrf.mxu1 }
 0x47c   :  { %v12257_v16 = vadd.f32 %v3213_v63, %v3200_v11 }
 0x47d   :  { %v3173_v57 = vpop.f32.mrf.mxu3 }
 0x47e   :  { %v3188_v5 = vadd.f32 %v3187_v1, %v3173_v57  ;;  %v3399_v46 = vmul.f32 %v12257_v16, %v12257_v16  ;;  %v3361_v1 = vrot.slane %v3360_v55, 2 }
 0x480   :  { %v3202_v37 = vadd.f32 %v3201_v49, %v3188_v5  ;;  %v3440_v49 = vadd.f32 %v3439_v53, %v3438_v35 }
 0x482   :  { %v3441_v11 = vrot.slane %v3440_v49, 2 }
 0x483   :  { %v3215_v3 = vpop.f32.mrf.mxu2 }
 0x484   :  { %v12259_v20 = vadd.f32 %v3215_v3, %v3202_v37 }
 0x486   :  { %v3365_v25 = vadd.f32 %v12259_v20, %v12257_v16  ;;  %v3407_v6 = vmul.f32 %v12259_v20, %v12259_v20 }
 0x488   :  { %v3366_v9 = vrot.slane %v3365_v25, 4  ;;  %v3445_v34 = vadd.f32 %v3407_v6, %v3399_v46 }
 0x48a   :  { %v3367_v50 = vadd.f32 %v3366_v9, %v3365_v25  ;;  %v3446_v39 = vrot.slane %v3445_v34, 4 }
 0x48c   :  { %v3368_v61 = vrot.slane %v3367_v50, 2  ;;  %v3447_v63 = vadd.f32 %v3446_v39, %v3445_v34 }
 0x48e   :  { %v3369_v44 = vadd.f32 %v3368_v61, %v3367_v50  ;;  %v3448_v47 = vrot.slane %v3447_v63, 2 }
 0x490   :  { %v3370_v19 = vrot.slane %v3369_v44, 1  ;;  %v3449_v14 = vadd.f32 %v3448_v47, %v3447_v63 }
 0x491   :  { %v3241_v10 = vpop.f32.mrf.mxu0 }
 0x492   :  { %v3450_v31 = vrot.slane %v3449_v14, 1 }
 0x493   :  { %v3255_v18 = vpop.f32.mrf.mxu1 }
 0x495   :  { %v3227_v0 = vpop.f32.mrf.mxu3 }
 0x496   :  { %v3242_v15 = vadd.f32 %v3241_v10, %v3227_v0  ;;  %v3362_v10 = vadd.f32 %v3361_v1, %v3360_v55 }
 0x498   :  { %v3256_v24 = vadd.f32 %v3255_v18, %v3242_v15  ;;  %v3363_v0 = vrot.slane %v3362_v10, 1  ;;  %v3442_v15 = vadd.f32 %v3441_v11, %v3440_v49 }
 0x499   :  { %v3243_v26 = vpop.f32.mrf.mxu0 }
 0x49a   :  { %v3364_v13 = vadd.f32 %v3363_v0, %v3362_v10  ;;  %v3443_v32 = vrot.slane %v3442_v15, 1 }
 0x49b   :  { %v3269_v8 = vpop.f32.mrf.mxu2  ;;  %v3257_v33 = vpop.f32.mrf.mxu1 }
 0x49c   :  { %v12277_v28 = vadd.f32 %v3269_v8, %v3256_v24  ;;  %v12289_v41 = vmul.f32 0.0625, %v3364_v13  ;;  %v3444_v35 = vadd.f32 %v3443_v32, %v3442_v15 }
 0x49d   :  { %v3229_v27 = vpop.f32.mrf.mxu3 }
 0x49e   :  { %v3244_v30 = vadd.f32 %v3243_v26, %v3229_v27  ;;  %v3400_v45 = vmul.f32 %v12277_v28, %v12277_v28  ;;  %v3371_v26 = vadd.f32 %v3370_v19, %v3369_v44 }
 0x4a0   :  { %v3258_v43 = vadd.f32 %v3257_v33, %v3244_v30  ;;  %v12287_v34 = vmul.f32 0.0625, %v3371_v26 }
 0x4a3   :  { %v3271_v38 = vpop.f32.mrf.mxu2 }
 0x4a4   :  { %v12281_v48 = vadd.f32 %v3271_v38, %v3258_v43  ;;  %v3451_v38 = vadd.f32 %v3450_v31, %v3449_v14 }
 0x4a6   :  { %v3372_v54 = vadd.f32 %v12281_v48, %v12277_v28  ;;  %v3408_v60 = vmul.f32 %v12281_v48, %v12281_v48  ;;  %v3471_v53 = vmul.f32 0.0625, %v3451_v38 }
 0x4a8   :  { %v3373_v58 = vrot.slane %v3372_v54, 4  ;;  %v3452_v59 = vadd.f32 %v3408_v60, %v3400_v45 }
 0x4aa   :  { %v3374_v57 = vadd.f32 %v3373_v58, %v3372_v54  ;;  %v3453_v3 = vrot.slane %v3452_v59, 4  ;;  %v3479_v54 = vmul.f32 %v12287_v34, %v12287_v34  ;;  %v3470_v58 = vmul.f32 0.0625, %v3444_v35 }
 0x4ac   :  { %v3375_v4 = vrot.slane %v3374_v57, 2  ;;  %v3454_v5 = vadd.f32 %v3453_v3, %v3452_v59  ;;  %v3478_v59 = vmul.f32 %v12289_v41, %v12289_v41 }
 0x4ae   :  { %v3376_v37 = vadd.f32 %v3375_v4, %v3374_v57  ;;  %v3455_v18 = vrot.slane %v3454_v5, 2  ;;  %v3487_v4 = vsub.f32 %v3471_v53, %v3479_v54  ;;  %v3486_v44 = vsub.f32 %v3470_v58, %v3478_v59 }
 0x4b0   :  { %v3377_v24 = vrot.slane %v3376_v37, 1  ;;  %v3456_v46 = vadd.f32 %v3455_v18, %v3454_v5  ;;  %v3496_v18 = vadd.f32 0.8, %v3487_v4  ;;  %v3495_v0 = vadd.f32 0.8, %v3486_v44 }
 0x4b2   :  { %v3378_v33 = vadd.f32 %v3377_v24, %v3376_v37  ;;  %v3457_v30 = vrot.slane %v3456_v46, 1  ;;  %11443 = vrsqrt.f32 %v3496_v18  ;;  %vm3555_vm7 = vweird.f32 %v3496_v18 }
 0x4b3   :  { %11445 = vrsqrt.f32 %v3495_v0  ;;  %vm3545_vm11 = vweird.f32 %v3495_v0 }
 0x4b4   :  { %v12291_v43 = vmul.f32 0.0625, %v3378_v33  ;;  %v3458_v45 = vadd.f32 %v3457_v30, %v3456_v46 }
 0x4b6   :  { %v3472_v63 = vmul.f32 0.0625, %v3458_v45  ;;  %v3480_v1 = vmul.f32 %v12291_v43, %v12291_v43 }
 0x4b7   :  { %v3297_v8 = vpop.f32.mrf.mxu0 }
 0x4b8   :  { %v3488_v47 = vsub.f32 %v3472_v63, %v3480_v1  ;;  %v11444_v32 = vpop.eup %11443 }
 0x4b9   :  { %v3311_v25 = vpop.f32.mrf.mxu1  ;;  %v11446_v30 = vpop.eup %11445  ;;  %v3550_v45 = vmul.f32 %v11444_v32, %v3496_v18  ;;  %vm3556_vm10 = vweird.f32 %v11444_v32 }
 0x4ba   :  { %v3497_v15 = vadd.f32 0.8, %v3488_v47  ;;  %vm3546_vm12 = vweird.f32 %v11446_v30  ;;  %vm3557_vm14 = vmor %vm3555_vm7, %vm3556_vm10  ;;  %vm3603_vm7 = vcmask 1043456   ;;  %vm12546_vm10 = vcmask 1042434  }
 0x4bb   :  { %v3283_v6 = vpop.f32.mrf.mxu3  ;;  %vm3547_vm15 = vmor %vm3545_vm11, %vm3546_vm12  ;;  %vm12547_vm11 = vcmask 1041408  }
 0x4bc   :  { %v3298_v9 = vadd.f32 %v3297_v8, %v3283_v6  ;;  %11447 = vrsqrt.f32 %v3497_v15  ;;  %vm3565_vm0 = vweird.f32 %v3497_v15 }
 0x4be   :  { %v3312_v50 = vadd.f32 %v3311_v25, %v3298_v9 }
 0x4bf   :  { %v3299_v39 = vpop.f32.mrf.mxu0 }
 0x4c1   :  { %v3325_v27 = vpop.f32.mrf.mxu2  ;;  %v3313_v61 = vpop.f32.mrf.mxu1 }
 0x4c2   :  { %v12299_v49 = vadd.f32 %v3325_v27, %v3312_v50  ;;  %v11448_v9 = vpop.eup %11447 }
 0x4c3   :  { %v3285_v55 = vpop.f32.mrf.mxu3  ;;  %v3560_v53 = vmul.f32 %v11448_v9, %v3497_v15  ;;  %vm3566_vm13 = vweird.f32 %v11448_v9 }
 0x4c4   :  { %v3300_v60 = vadd.f32 %v3299_v39, %v3285_v55  ;;  %v3401_v10 = vmul.f32 %v12299_v49, %v12299_v49  ;;  %v3540_v55 = vmul.f32 %v11446_v30, %v3495_v0  ;;  %vm3567_vm2 = vmor %vm3565_vm0, %vm3566_vm13 }
 0x4c6   :  { %v3314_v57 = vadd.f32 %v3313_v61, %v3300_v60  ;;  %v3551_v60 = vmul.f32 %v11444_v32, %v3550_v45  ;;  %v3541_v59 = vmul.f32 %v11446_v30, %v3540_v55  ;;  %v3561_v61 = vmul.f32 %v11448_v9, %v3560_v53 }
 0x4c8   :  { %v3552_v63 = vmul.f32 0.5, %v3551_v60  ;;  %v3542_v1 = vmul.f32 0.5, %v3541_v59 }
 0x4c9   :  { %v3327_v3 = vpop.f32.mrf.mxu2 }
 0x4ca   :  { %v12301_v5 = vadd.f32 %v3327_v3, %v3314_v57  ;;  %v3562_v57 = vmul.f32 0.5, %v3561_v61  ;;  %v3553_v3 = vsub.f32 1.5, %v3552_v63  ;;  %v3543_v44 = vsub.f32 1.5, %v3542_v1 }
 0x4cc   :  { %v3379_v11 = vadd.f32 %v12301_v5, %v12299_v49  ;;  %v3409_v37 = vmul.f32 %v12301_v5, %v12301_v5  ;;  %v3563_v47 = vsub.f32 1.5, %v3562_v57 }
 0x4ce   :  { %v3380_v19 = vrot.slane %v3379_v11, 4  ;;  %v3459_v14 = vadd.f32 %v3409_v37, %v3401_v10 }
 0x4d0   :  { %v3381_v8 = vadd.f32 %v3380_v19, %v3379_v11  ;;  %v3460_v24 = vrot.slane %v3459_v14, 4  ;;  %v3554_v11 = vmul.f32 %v11444_v32, %v3553_v3  ;;  %v3544_v19 = vmul.f32 %v11446_v30, %v3543_v44 }
 0x4d2   :  { %v3382_v46 = vrot.slane %v3381_v8, 2  ;;  %v3461_v25 = vadd.f32 %v3460_v24, %v3459_v14  ;;  %v3564_v14 = vmul.f32 %v11448_v9, %v3563_v47  ;;  %v3558_v24 = vsel %vm3557_vm14, %v11444_v32, %v3554_v11 }
 0x4d3   :  { %v3591_v18 = vrot.slane %v3558_v24, 3 }
 0x4d4   :  { %v3383_v6 = vadd.f32 %v3382_v46, %v3381_v8  ;;  %v3462_v26 = vrot.slane %v3461_v25, 2 }
 0x4d6   :  { %v3384_v31 = vrot.slane %v3383_v6, 1  ;;  %v3463_v13 = vadd.f32 %v3462_v26, %v3461_v25  ;;  %v3548_v25 = vsel %vm3547_vm15, %v11446_v30, %v3544_v19 }
 0x4d7   :  { %v3590_v0 = vrot.slane %v3548_v25, 4 }
 0x4d8   :  { %v3385_v27 = vadd.f32 %v3384_v31, %v3383_v6  ;;  %v3464_v33 = vrot.slane %v3463_v13, 1  ;;  %v3568_v6 = vsel %vm3567_vm2, %v11448_v9, %v3564_v14 }
 0x4d9   :  { %v3598_v15 = vsel %vm3597_vm5, %v3590_v0, %v3591_v18 }
 0x4da   :  { %v12309_v38 = vmul.f32 0.0625, %v3385_v27  ;;  %v3465_v35 = vadd.f32 %v3464_v33, %v3463_v13  ;;  %v3592_v13 = vrot.slane %v3568_v6, 2  ;;  %v3490_v33 = vld [vmem:[#allocation21] sm:$0xff] }
 0x4dc   :  { %v3473_v50 = vmul.f32 0.0625, %v3465_v35  ;;  %v3481_v39 = vmul.f32 %v12309_v38, %v12309_v38 }
 0x4de   :  { %v3489_v54 = vsub.f32 %v3473_v50, %v3481_v39 }
 0x4e0   :  { %v3498_v58 = vadd.f32 0.8, %v3489_v54 }
 0x4e2   :  { %11449 = vrsqrt.f32 %v3498_v58  ;;  %vm3575_vm3 = vweird.f32 %v3498_v58 }
 0x4e8   :  { %v11450_v4 = vpop.eup %11449 }
 0x4e9   :  { %v3570_v10 = vmul.f32 %v11450_v4, %v3498_v58  ;;  %vm3576_vm1 = vweird.f32 %v11450_v4 }
 0x4ea   :  { %vm3577_vm4 = vmor %vm3575_vm3, %vm3576_vm1 }
 0x4eb   :  { %v3571_v37 = vmul.f32 %v11450_v4, %v3570_v10 }
 0x4ed   :  { %v3572_v8 = vmul.f32 0.5, %v3571_v37 }
 0x4ef   :  { %v3573_v46 = vsub.f32 1.5, %v3572_v8 }
 0x4f1   :  { %v3574_v26 = vmul.f32 %v11450_v4, %v3573_v46 }
 0x4f3   :  { %v3578_v31 = vsel %vm3577_vm4, %v11450_v4, %v3574_v26 }
 0x4f4   :  { %v3593_v27 = vrot.slane %v3578_v31, 1 }
 0x4f6   :  { %v3600_v32 = vsel %vm3599_vm8, %v3592_v13, %v3593_v27 }
 0x4f7   :  { %v3602_v30 = vsel %vm3601_vm6, %v3598_v15, %v3600_v32 }
 0x4f8   :  { %v3604_v9 = vsel %vm3603_vm7, %v12255_v52, %v3602_v30 }
 0x4f9   :  { %v3606_v35 = vmul.f32 %v3604_v9, %v3490_v33 }
 0x4fb   :  { %v3609_v45 = vperm.slane %v3606_v35, 0  ;;  %v3610_v50 = vperm.slane %v3606_v35, 1  ;;  %v3611_v39 = vperm.slane %v3606_v35, 2  ;;  %v3612_v55 = vperm.slane %v3606_v35, 3 }
 0x4fc   :  { %v3613_v53 = vperm.slane %v3606_v35, 4  ;;  %v3614_v54 = vperm.slane %v3606_v35, 5  ;;  %v3615_v60 = vperm.slane %v3606_v35, 6  ;;  %v3616_v58 = vperm.slane %v3606_v35, 7 }
 0x4fd   :  { %v3625_v59 = vmul.f32 %v3609_v45, %v12169_v40  ;;  %v3626_v61 = vmul.f32 %v3610_v50, %v12199_v7  ;;  %v3627_v63 = vmul.f32 %v3611_v39, %v12234_v42  ;;  %v3628_v1 = vmul.f32 %v3612_v55, %v12248_v17 }
 0x4fe   :  { %v3629_v57 = vmul.f32 %v3613_v53, %v12289_v41  ;;  %v3630_v52 = vmul.f32 %v3614_v54, %v12287_v34  ;;  %v3631_v3 = vmul.f32 %v3615_v60, %v12291_v43  ;;  %v3632_v4 = vmul.f32 %v3616_v58, %v12309_v38  ;;  %v3607_v43 = vld [vmem:[#allocation22] sm:$0xff] }
 0x4ff   :  { %v3641_v44 = vrot.slane %v3626_v61, 7  ;;  %v3642_v47 = vrot.slane %v3627_v63, 6  ;;  %v3643_v10 = vrot.slane %v3628_v1, 5  ;;  %v3657_v11 = vmul.f32 %v3609_v45, %v12155_v62 }
 0x500   :  { %v3644_v40 = vrot.slane %v3629_v57, 4  ;;  %v3645_v37 = vrot.slane %v3630_v52, 3  ;;  %v3646_v7 = vrot.slane %v3631_v3, 2  ;;  %v3647_v19 = vrot.slane %v3632_v4, 1 }
 0x501   :  { %v3648_v42 = vsel %vm591_vm9, %v3625_v59, %v3641_v44  ;;  %v3649_v17 = vsel %vm12546_vm10, %v3642_v47, %v3643_v10  ;;  %v3658_v41 = vmul.f32 %v3610_v50, %v12179_v56  ;;  %v3659_v34 = vmul.f32 %v3611_v39, %v12207_v36 }
 0x502   :  { %v3650_v38 = vsel %vm12547_vm11, %v3648_v42, %v3649_v17  ;;  %v3651_v14 = vsel %vm3597_vm5, %v3644_v40, %v3645_v37  ;;  %v3652_v8 = vsel %vm3599_vm8, %v3646_v7, %v3647_v19  ;;  %v3660_v62 = vmul.f32 %v3612_v55, %v12238_v22 }
 0x503   :  { %v3653_v24 = vsel %vm3601_vm6, %v3651_v14, %v3652_v8  ;;  %v3661_v46 = vmul.f32 %v3613_v53, %v12261_v21  ;;  %v3662_v25 = vmul.f32 %v3614_v54, %v12257_v16  ;;  %v3663_v56 = vmul.f32 %v3615_v60, %v12277_v28 }
 0x504   :  { %v3654_v6 = vsel %vm3603_vm7, %v3650_v38, %v3653_v24  ;;  %v3665_v36 = vmul.f32 %v3609_v45, %v12159_v29  ;;  %v3666_v26 = vmul.f32 %v3610_v50, %v12183_v51  ;;  %v3664_v31 = vmul.f32 %v3616_v58, %v12299_v49 }
 0x505   :  { %v3656_v18 = vsub.f32 %v3607_v43, %v3654_v6  ;;  %v3667_v0 = vmul.f32 %v3611_v39, %v12215_v12  ;;  %v3668_v22 = vmul.f32 %v3612_v55, %v12242_v2  ;;  %v3669_v13 = vmul.f32 %v3613_v53, %v12263_v23 }
 0x506   :  { %v3670_v21 = vmul.f32 %v3614_v54, %v12259_v20  ;;  %v3671_v16 = vmul.f32 %v3615_v60, %v12281_v48  ;;  %v3672_v27 = vmul.f32 %v3616_v58, %v12301_v5 }
 0x507   :  { %v3674_v28 = vperm.slane %v3656_v18, 0  ;;  %v3675_v33 = vperm.slane %v3656_v18, 1  ;;  %v3676_v29 = vperm.slane %v3656_v18, 2  ;;  %v3677_v15 = vperm.slane %v3656_v18, 3 }
 0x508   :  { %v3678_v51 = vperm.slane %v3656_v18, 4  ;;  %v3679_v32 = vperm.slane %v3656_v18, 5  ;;  %v3680_v30 = vperm.slane %v3656_v18, 6  ;;  %v3681_v49 = vperm.slane %v3656_v18, 7 }
 0x509   :  { %v3690_v9 = vadd.f32 %v3674_v28, %v3657_v11  ;;  %v3691_v12 = vadd.f32 %v3675_v33, %v3658_v41  ;;  %v3692_v35 = vadd.f32 %v3676_v29, %v3659_v34  ;;  %v3693_v2 = vadd.f32 %v3677_v15, %v3660_v62 }
 0x50a   :  { %v3694_v45 = vadd.f32 %v3678_v51, %v3661_v46  ;;  %v3695_v23 = vadd.f32 %v3679_v32, %v3662_v25  ;;  %v3696_v50 = vadd.f32 %v3680_v30, %v3663_v56  ;;  %v3697_v20 = vadd.f32 %v3681_v49, %v3664_v31 }
 0x50b   :  { %v3698_v39 = vadd.f32 %v3674_v28, %v3665_v36  ;;  %v3699_v48 = vadd.f32 %v3675_v33, %v3666_v26  ;;  %v3700_v55 = vadd.f32 %v3676_v29, %v3667_v0  ;;  %v3701_v5 = vadd.f32 %v3677_v15, %v3668_v22 }
 0x50c   :  { %v3702_v53 = vadd.f32 %v3678_v51, %v3669_v13  ;;  %v3703_v54 = vadd.f32 %v3679_v32, %v3670_v21  ;;  %v3704_v60 = vadd.f32 %v3680_v30, %v3671_v16  ;;  %v3705_v58 = vadd.f32 %v3681_v49, %v3672_v27 }
 0x50d   :  { %v3706_v59 = vmul.f32 0.2, %v3690_v9  ;;  %v3707_v61 = vmul.f32 0.2, %v3691_v12  ;;  %v3708_v63 = vmul.f32 0.2, %v3692_v35 }
 0x50e   :  { %v3709_v1 = vmul.f32 0.2, %v3693_v2  ;;  %v3710_v57 = vmul.f32 0.2, %v3694_v45  ;;  %v3711_v52 = vmul.f32 0.2, %v3695_v23 }
 0x50f   :  { %v3712_v3 = vmul.f32 0.2, %v3696_v50  ;;  %v3713_v4 = vmul.f32 0.2, %v3697_v20  ;;  %v3714_v44 = vmul.f32 0.2, %v3698_v39  ;;  %v3722_v47 = vmax.f32 %v3690_v9, %v3706_v59 }
 0x510   :  { %v3715_v10 = vmul.f32 0.2, %v3699_v48  ;;  %v3716_v11 = vmul.f32 0.2, %v3700_v55  ;;  %v3717_v40 = vmul.f32 0.2, %v3701_v5  ;;  %v3723_v37 = vmax.f32 %v3691_v12, %v3707_v61 }
 0x511   :  { %v3718_v7 = vmul.f32 0.2, %v3702_v53  ;;  %v3719_v19 = vmul.f32 0.2, %v3703_v54  ;;  %v3720_v42 = vmul.f32 0.2, %v3704_v60  ;;  %v3724_v17 = vmax.f32 %v3692_v35, %v3708_v63 }
 0x512   :  { %v3721_v41 = vmul.f32 0.2, %v3705_v58  ;;  %v3725_v34 = vmax.f32 %v3693_v2, %v3709_v1  ;;  %v3726_v43 = vmax.f32 %v3694_v45, %v3710_v57  ;;  %v3727_v38 = vmax.f32 %v3695_v23, %v3711_v52 }
 0x513   :  { %v3728_v14 = vmax.f32 %v3696_v50, %v3712_v3  ;;  %v3729_v8 = vmax.f32 %v3697_v20, %v3713_v4  ;;  %v3730_v62 = vmax.f32 %v3698_v39, %v3714_v44  ;;  %v3731_v24 = vmax.f32 %v3699_v48, %v3715_v10 }
 0x514   :  { %v3732_v46 = vmax.f32 %v3700_v55, %v3716_v11  ;;  %v3733_v25 = vmax.f32 %v3701_v5, %v3717_v40  ;;  %v3734_v6 = vmax.f32 %v3702_v53, %v3718_v7  ;;  %v3735_v56 = vmax.f32 %v3703_v54, %v3719_v19 }
 0x515   :  { %v3736_v36 = vmax.f32 %v3704_v60, %v3720_v42  ;;  %v3737_v26 = vmax.f32 %v3705_v58, %v3721_v41  ;;  %v12349_v18 = vpack.c.bf16 %v3730_v62, %v3722_v47  ;;  %v12351_v31 = vpack.c.bf16 %v3731_v24, %v3723_v37 }
 0x516   :  { %v12353_v0 = vpack.c.bf16 %v3732_v46, %v3724_v17  ;;  %v12355_v22 = vpack.c.bf16 %v3733_v25, %v3725_v34  ;;  %v12357_v13 = vpack.c.bf16 %v3734_v6, %v3726_v43  ;;  %v12359_v21 = vpack.c.bf16 %v3735_v56, %v3727_v38 }
 0x517   :  { %v12361_v16 = vpack.c.bf16 %v3736_v36, %v3728_v14  ;;  %v12363_v27 = vpack.c.bf16 %v3737_v26, %v3729_v8 }
 0x518   :  { %11859 = dma.done.wait [#allocation7 + $0x3], 57344 }
 0x519   :  { %11860 = vsyncadd [#allocation7 + $0x3], 4294909952  ;;  %v9010_v28 = vld [vmem:[#allocation6 + $0x188] sm:$0xf]  ;;  %v11005_v33 = vld [vmem:[#allocation6 + $0x1a0] sm:$0xf0] }
 0x51a   :  { %v9234_v29 = vld [vmem:[#allocation6 + $0x348] sm:$0xf]  ;;  %v9011_v15 = vor.u32 %v11005_v33, %v9010_v28  ;;  %v11061_v51 = vld [vmem:[#allocation6 + $0x360] sm:$0xf0]  ;;  %v8982_v2 = vld [vmem:[#allocation6 + $0x150] sm:$0xf] }
 0x51b   :  { %v9682_v32 = vld [vmem:[#allocation6 + $0x6c8] sm:$0xf]  ;;  %v11173_v30 = vld [vmem:[#allocation6 + $0x6e0] sm:$0xf0]  ;;  %v9235_v49 = vor.u32 %v11061_v51, %v9234_v29  ;;  %v10998_v23 = vld [vmem:[#allocation6 + $0x168] sm:$0xf0] }
 0x51c   :  { %v9683_v9 = vor.u32 %v11173_v30, %v9682_v32  ;;  %v9458_v12 = vld [vmem:[#allocation6 + $0x508] sm:$0xf]  ;;  %v11117_v35 = vld [vmem:[#allocation6 + $0x520] sm:$0xf0]  ;;  %6582 = vmatpush.bf16.msra.mxu3 %v9011_v15  ;;  %v9206_v50 = vld [vmem:[#allocation6 + $0x310] sm:$0xf]  ;;  %v8983_v39 = vor.u32 %v10998_v23, %v8982_v2 }
 0x51d   :  { %v9459_v45 = vor.u32 %v11117_v35, %v9458_v12  ;;  %v11054_v20 = vld [vmem:[#allocation6 + $0x328] sm:$0xf0]  ;;  %6596 = vmatpush.bf16.msrb.mxu0 %v9235_v49  ;;  %v9654_v55 = vld [vmem:[#allocation6 + $0x690] sm:$0xf]  ;;  %v8954_v58 = vld [vmem:[#allocation6 + $0x118] sm:$0xf] }
 0x51e   :  { %6624 = vmatpush.bf16.msrb.mxu2 %v9683_v9  ;;  %v9207_v48 = vor.u32 %v11054_v20, %v9206_v50  ;;  %v11166_v5 = vld [vmem:[#allocation6 + $0x6a8] sm:$0xf0]  ;;  %v9430_v53 = vld [vmem:[#allocation6 + $0x4d0] sm:$0xf]  ;;  %v10991_v59 = vld [vmem:[#allocation6 + $0x130] sm:$0xf0] }
 0x51f   :  { %6610 = vmatpush.bf16.msrb.mxu1 %v9459_v45  ;;  %v9655_v54 = vor.u32 %v11166_v5, %v9654_v55  ;;  %v11110_v60 = vld [vmem:[#allocation6 + $0x4e8] sm:$0xf0]  ;;  %v9178_v63 = vld [vmem:[#allocation6 + $0x2d8] sm:$0xf]  ;;  %v11047_v1 = vld [vmem:[#allocation6 + $0x2f0] sm:$0xf0]  ;;  %v8955_v52 = vor.u32 %v10991_v59, %v8954_v58 }
 0x520   :  { %v9431_v61 = vor.u32 %v11110_v60, %v9430_v53  ;;  %v9626_v57 = vld [vmem:[#allocation6 + $0x658] sm:$0xf]  ;;  %6583 = vmatpush.bf16.msra.mxu3 %v8983_v39  ;;  %v11159_v3 = vld [vmem:[#allocation6 + $0x670] sm:$0xf0]  ;;  %v9179_v47 = vor.u32 %v11047_v1, %v9178_v63  ;;  %v8926_v11 = vld [vmem:[#allocation6 + $0xe0] sm:$0xf] }
 0x521   :  { %v9402_v4 = vld [vmem:[#allocation6 + $0x498] sm:$0xf]  ;;  %v11103_v44 = vld [vmem:[#allocation6 + $0x4b0] sm:$0xf0]  ;;  %6597 = vmatpush.bf16.msrb.mxu0 %v9207_v48  ;;  %v9627_v10 = vor.u32 %v11159_v3, %v9626_v57  ;;  %v10984_v40 = vld [vmem:[#allocation6 + $0xf8] sm:$0xf0] }
 0x522   :  { %6625 = vmatpush.bf16.msrb.mxu2 %v9655_v54  ;;  %v9150_v37 = vld [vmem:[#allocation6 + $0x2a0] sm:$0xf]  ;;  %v9403_v7 = vor.u32 %v11103_v44, %v9402_v4  ;;  %v11040_v19 = vld [vmem:[#allocation6 + $0x2b8] sm:$0xf0]  ;;  %v8927_v43 = vor.u32 %v10984_v40, %v8926_v11  ;;  %v8898_v8 = vld [vmem:[#allocation6 + $0xa8] sm:$0xf] }
 0x523   :  { %6611 = vmatpush.bf16.msrb.mxu1 %v9431_v61  ;;  %v9598_v42 = vld [vmem:[#allocation6 + $0x620] sm:$0xf]  ;;  %v11152_v17 = vld [vmem:[#allocation6 + $0x638] sm:$0xf0]  ;;  %v9151_v38 = vor.u32 %v11040_v19, %v9150_v37  ;;  %v10977_v62 = vld [vmem:[#allocation6 + $0xc0] sm:$0xf0] }
 0x524   :  { %v9374_v41 = vld [vmem:[#allocation6 + $0x460] sm:$0xf]  ;;  %v11096_v34 = vld [vmem:[#allocation6 + $0x478] sm:$0xf0]  ;;  %6584 = vmatpush.bf16.msra.mxu3 %v8955_v52  ;;  %v9599_v14 = vor.u32 %v11152_v17, %v9598_v42  ;;  %v9122_v24 = vld [vmem:[#allocation6 + $0x268] sm:$0xf]  ;;  %v8899_v28 = vor.u32 %v10977_v62, %v8898_v8 }
 0x525   :  { %6598 = vmatpush.bf16.msrb.mxu0 %v9179_v47  ;;  %v9375_v46 = vor.u32 %v11096_v34, %v9374_v41  ;;  %v11033_v25 = vld [vmem:[#allocation6 + $0x280] sm:$0xf0]  ;;  %v9570_v6 = vld [vmem:[#allocation6 + $0x5e8] sm:$0xf]  ;;  %v8870_v15 = vld [vmem:[#allocation6 + $0x70] sm:$0xf] }
 0x526   :  { %6626 = vmatpush.bf16.msrb.mxu2 %v9627_v10  ;;  %v11145_v56 = vld [vmem:[#allocation6 + $0x600] sm:$0xf0]  ;;  %v9346_v36 = vld [vmem:[#allocation6 + $0x428] sm:$0xf]  ;;  %v9123_v33 = vor.u32 %v11033_v25, %v9122_v24  ;;  %v10970_v51 = vld [vmem:[#allocation6 + $0x88] sm:$0xf0] }
 0x527   :  { %6612 = vmatpush.bf16.msrb.mxu1 %v9403_v7  ;;  %v11089_v26 = vld [vmem:[#allocation6 + $0x440] sm:$0xf0]  ;;  %v9571_v29 = vor.u32 %v11145_v56, %v9570_v6  ;;  %v9094_v32 = vld [vmem:[#allocation6 + $0x230] sm:$0xf]  ;;  %v11026_v49 = vld [vmem:[#allocation6 + $0x248] sm:$0xf0]  ;;  %v8871_v45 = vor.u32 %v10970_v51, %v8870_v15 }
 0x528   :  { %6585 = vmatpush.bf16.msra.mxu3 %v8927_v43  ;;  %v9347_v30 = vor.u32 %v11089_v26, %v9346_v36  ;;  %v9542_v9 = vld [vmem:[#allocation6 + $0x5b0] sm:$0xf]  ;;  %v11138_v12 = vld [vmem:[#allocation6 + $0x5c8] sm:$0xf0]  ;;  %v9095_v23 = vor.u32 %v11026_v49, %v9094_v32  ;;  %v8842_v20 = vld [vmem:[#allocation6 + $0x38] sm:$0xf] }
 0x529   :  { %6599 = vmatpush.bf16.msrb.mxu0 %v9151_v38  ;;  %v9318_v35 = vld [vmem:[#allocation6 + $0x3f0] sm:$0xf]  ;;  %v11082_v2 = vld [vmem:[#allocation6 + $0x408] sm:$0xf0]  ;;  %v9543_v50 = vor.u32 %v11138_v12, %v9542_v9  ;;  %v10963_v39 = vld [vmem:[#allocation6 + $0x50] sm:$0xf0] }
 0x52a   :  { %6627 = vmatpush.bf16.msrb.mxu2 %v9599_v14  ;;  %v9066_v48 = vld [vmem:[#allocation6 + $0x1f8] sm:$0xf]  ;;  %v9319_v55 = vor.u32 %v11082_v2, %v9318_v35  ;;  %v11019_v5 = vld [vmem:[#allocation6 + $0x210] sm:$0xf0]  ;;  %v8843_v59 = vor.u32 %v10963_v39, %v8842_v20  ;;  %v8814_v61 = vld [vmem:[#allocation6] sm:$0xf] }
 0x52b   :  { %6613 = vmatpush.bf16.msrb.mxu1 %v9375_v46  ;;  %v9514_v53 = vld [vmem:[#allocation6 + $0x578] sm:$0xf]  ;;  %v11131_v54 = vld [vmem:[#allocation6 + $0x590] sm:$0xf0]  ;;  %v10956_v63 = vld [vmem:[#allocation6 + $0x18] sm:$0xf0]  ;;  %v9067_v1 = vor.u32 %v11019_v5, %v9066_v48 }
 0x52c   :  { %6586 = vmatpush.bf16.msra.mxu3 %v8899_v28  ;;  %v9290_v60 = vld [vmem:[#allocation6 + $0x3b8] sm:$0xf]  ;;  %v11075_v58 = vld [vmem:[#allocation6 + $0x3d0] sm:$0xf0]  ;;  %v9515_v57 = vor.u32 %v11131_v54, %v9514_v53  ;;  %v9038_v52 = vld [vmem:[#allocation6 + $0x1c0] sm:$0xf]  ;;  %v8815_v19 = vor.u32 %v10956_v63, %v8814_v61 }
 0x52d   :  { %6600 = vmatpush.bf16.msrb.mxu0 %v9123_v33  ;;  %v11012_v3 = vld [vmem:[#allocation6 + $0x1d8] sm:$0xf0]  ;;  %v9486_v4 = vld [vmem:[#allocation6 + $0x540] sm:$0xf]  ;;  %v9291_v44 = vor.u32 %v11075_v58, %v9290_v60  ;;  %v9906_v10 = vld [vmem:[#allocation6 + $0x888] sm:$0xf] }
 0x52e   :  { %6628 = vmatpush.bf16.msrb.mxu2 %v9571_v29  ;;  %v11124_v47 = vld [vmem:[#allocation6 + $0x558] sm:$0xf0]  ;;  %v11229_v11 = vld [vmem:[#allocation6 + $0x8a0] sm:$0xf0]  ;;  %v10130_v40 = vld [vmem:[#allocation6 + $0xa48] sm:$0xf]  ;;  %v9039_v34 = vor.u32 %v11012_v3, %v9038_v52 }
 0x52f   :  { %6614 = vmatpush.bf16.msrb.mxu1 %v9347_v30  ;;  %v11285_v37 = vld [vmem:[#allocation6 + $0xa60] sm:$0xf0]  ;;  %v10578_v7 = vld [vmem:[#allocation6 + $0xdc8] sm:$0xf]  ;;  %v9262_v17 = vld [vmem:[#allocation6 + $0x380] sm:$0xf]  ;;  %v9487_v43 = vor.u32 %v11124_v47, %v9486_v4  ;;  %v9907_v8 = vor.u32 %v11229_v11, %v9906_v10 }
 0x530   :  { %6587 = vmatpush.bf16.msra.mxu3 %v8871_v45  ;;  %v11397_v42 = vld [vmem:[#allocation6 + $0xde0] sm:$0xf0]  ;;  %v11068_v41 = vld [vmem:[#allocation6 + $0x398] sm:$0xf0]  ;;  %v10354_v38 = vld [vmem:[#allocation6 + $0xc08] sm:$0xf]  ;;  %v10131_v62 = vor.u32 %v11285_v37, %v10130_v40 }
 0x531   :  { %6601 = vmatpush.bf16.msrb.mxu0 %v9095_v23  ;;  %v11341_v14 = vld [vmem:[#allocation6 + $0xc20] sm:$0xf0]  ;;  %v9878_v24 = vld [vmem:[#allocation6 + $0x850] sm:$0xf]  ;;  %v10579_v46 = vor.u32 %v11397_v42, %v10578_v7  ;;  %v9263_v25 = vor.u32 %v11068_v41, %v9262_v17  ;;  %v11222_v6 = vld [vmem:[#allocation6 + $0x868] sm:$0xf0] }
 0x532   :  { %6629 = vmatpush.bf16.msrb.mxu2 %v9543_v50  ;;  %v10102_v56 = vld [vmem:[#allocation6 + $0xa10] sm:$0xf]  ;;  %v11278_v36 = vld [vmem:[#allocation6 + $0xa28] sm:$0xf0]  ;;  %v10355_v26 = vor.u32 %v11341_v14, %v10354_v38  ;;  %v9879_v51 = vor.u32 %v11222_v6, %v9878_v24  ;;  %v9850_v30 = vld [vmem:[#allocation6 + $0x818] sm:$0xf] }
 0x533   :  { %6615 = vmatpush.bf16.msrb.mxu1 %v9319_v55  ;;  %v10550_v28 = vld [vmem:[#allocation6 + $0xd90] sm:$0xf]  ;;  %v11390_v33 = vld [vmem:[#allocation6 + $0xda8] sm:$0xf0]  ;;  %v10103_v32 = vor.u32 %v11278_v36, %v10102_v56  ;;  %v11215_v9 = vld [vmem:[#allocation6 + $0x830] sm:$0xf0] }
 0x534   :  { %6588 = vmatpush.bf16.msra.mxu3 %v8843_v59  ;;  %v10326_v29 = vld [vmem:[#allocation6 + $0xbd0] sm:$0xf]  ;;  %v11334_v15 = vld [vmem:[#allocation6 + $0xbe8] sm:$0xf0]  ;;  %v10551_v49 = vor.u32 %v11390_v33, %v10550_v28  ;;  %v10074_v12 = vld [vmem:[#allocation6 + $0x9d8] sm:$0xf]  ;;  %v9851_v39 = vor.u32 %v11215_v9, %v9850_v30 }
 0x535   :  { %6602 = vmatpush.bf16.msrb.mxu0 %v9067_v1  ;;  %v11271_v35 = vld [vmem:[#allocation6 + $0x9f0] sm:$0xf0]  ;;  %v10327_v2 = vor.u32 %v11334_v15, %v10326_v29  ;;  %v10522_v45 = vld [vmem:[#allocation6 + $0xd58] sm:$0xf]  ;;  %v9822_v55 = vld [vmem:[#allocation6 + $0x7e0] sm:$0xf] }
 0x536   :  { %6630 = vmatpush.bf16.msrb.mxu2 %v9515_v57  ;;  %v11383_v23 = vld [vmem:[#allocation6 + $0xd70] sm:$0xf0]  ;;  %v10298_v50 = vld [vmem:[#allocation6 + $0xb98] sm:$0xf]  ;;  %v10075_v48 = vor.u32 %v11271_v35, %v10074_v12  ;;  %v11208_v53 = vld [vmem:[#allocation6 + $0x7f8] sm:$0xf0] }
 0x537   :  { %6616 = vmatpush.bf16.msrb.mxu1 %v9291_v44  ;;  %v11327_v20 = vld [vmem:[#allocation6 + $0xbb0] sm:$0xf0]  ;;  %v10523_v5 = vor.u32 %v11383_v23, %v10522_v45  ;;  %v10046_v54 = vld [vmem:[#allocation6 + $0x9a0] sm:$0xf]  ;;  %v11264_v60 = vld [vmem:[#allocation6 + $0x9b8] sm:$0xf0]  ;;  %v9823_v57 = vor.u32 %v11208_v53, %v9822_v55 }
 0x538   :  { %6589 = vmatpush.bf16.msra.mxu3 %v8815_v19  ;;  %v10299_v58 = vor.u32 %v11327_v20, %v10298_v50  ;;  %v10494_v59 = vld [vmem:[#allocation6 + $0xd20] sm:$0xf]  ;;  %v11376_v61 = vld [vmem:[#allocation6 + $0xd38] sm:$0xf0]  ;;  %v10047_v52 = vor.u32 %v11264_v60, %v10046_v54  ;;  %v9794_v3 = vld [vmem:[#allocation6 + $0x7a8] sm:$0xf] }
 0x539   :  { %6603 = vmatpush.bf16.msrb.mxu0 %v9039_v34  ;;  %v10270_v63 = vld [vmem:[#allocation6 + $0xb60] sm:$0xf]  ;;  %v11320_v1 = vld [vmem:[#allocation6 + $0xb78] sm:$0xf0]  ;;  %v10495_v4 = vor.u32 %v11376_v61, %v10494_v59  ;;  %v11201_v44 = vld [vmem:[#allocation6 + $0x7c0] sm:$0xf0] }
 0x53a   :  { %6631 = vmatpush.bf16.msrb.mxu2 %v9487_v43  ;;  %v10018_v47 = vld [vmem:[#allocation6 + $0x968] sm:$0xf]  ;;  %v11257_v10 = vld [vmem:[#allocation6 + $0x980] sm:$0xf0]  ;;  %v10271_v11 = vor.u32 %v11320_v1, %v10270_v63  ;;  %v9795_v42 = vor.u32 %v11201_v44, %v9794_v3  ;;  %v9766_v41 = vld [vmem:[#allocation6 + $0x770] sm:$0xf] }
 0x53b   :  { %6617 = vmatpush.bf16.msrb.mxu1 %v9263_v25  ;;  %6590 = vmatmul.bf16.vlgmr.msra.gmra.mxu3 %v12349_v18  ;;  %v10466_v40 = vld [vmem:[#allocation6 + $0xce8] sm:$0xf]  ;;  %v11369_v37 = vld [vmem:[#allocation6 + $0xd00] sm:$0xf0]  ;;  %v10019_v17 = vor.u32 %v11257_v10, %v10018_v47  ;;  %v11194_v43 = vld [vmem:[#allocation6 + $0x788] sm:$0xf0] }
 0x53c   :  { %6638 = vmatpush.bf16.msrb.mxu3 %v9907_v8  ;;  %6604 = vmatmul.bf16.vlgmr.msrb.gmra.mxu0 %v12351_v31  ;;  %v10242_v7 = vld [vmem:[#allocation6 + $0xb28] sm:$0xf]  ;;  %v11313_v19 = vld [vmem:[#allocation6 + $0xb40] sm:$0xf0]  ;;  %v10467_v34 = vor.u32 %v11369_v37, %v10466_v40  ;;  %v9990_v38 = vld [vmem:[#allocation6 + $0x930] sm:$0xf]  ;;  %v9767_v6 = vor.u32 %v11194_v43, %v9766_v41 }
 0x53d   :  { %6652 = vmatpush.bf16.msra.mxu0 %v10131_v62  ;;  %6632 = vmatmul.bf16.vlgmr.msrb.gmra.mxu2 %v12355_v22  ;;  %v11250_v14 = vld [vmem:[#allocation6 + $0x948] sm:$0xf0]  ;;  %v10243_v8 = vor.u32 %v11313_v19, %v10242_v7  ;;  %v10438_v62 = vld [vmem:[#allocation6 + $0xcb0] sm:$0xf]  ;;  %v9738_v36 = vld [vmem:[#allocation6 + $0x738] sm:$0xf] }
 0x53e   :  { %6680 = vmatpush.bf16.msra.mxu2 %v10579_v46  ;;  %6618 = vmatmul.bf16.vlgmr.msrb.gmra.mxu1 %v12353_v0  ;;  %v11362_v24 = vld [vmem:[#allocation6 + $0xcc8] sm:$0xf0]  ;;  %v10214_v46 = vld [vmem:[#allocation6 + $0xaf0] sm:$0xf]  ;;  %v9991_v56 = vor.u32 %v11250_v14, %v9990_v38  ;;  %v11187_v28 = vld [vmem:[#allocation6 + $0x750] sm:$0xf0] }
 0x53f   :  { %6666 = vmatpush.bf16.msra.mxu1 %v10355_v26  ;;  %v11306_v25 = vld [vmem:[#allocation6 + $0xb08] sm:$0xf0]  ;;  %v10439_v26 = vor.u32 %v11362_v24, %v10438_v62  ;;  %v9962_v33 = vld [vmem:[#allocation6 + $0x8f8] sm:$0xf]  ;;  %v11243_v29 = vld [vmem:[#allocation6 + $0x910] sm:$0xf0]  ;;  %v9739_v9 = vor.u32 %v11187_v28, %v9738_v36 }
 0x540   :  { %6639 = vmatpush.bf16.msrb.mxu3 %v9879_v51  ;;  %v10215_v15 = vor.u32 %v11306_v25, %v10214_v46  ;;  %v10410_v51 = vld [vmem:[#allocation6 + $0xc78] sm:$0xf]  ;;  %v9963_v12 = vor.u32 %v11243_v29, %v9962_v33  ;;  %v9710_v35 = vld [vmem:[#allocation6 + $0x700] sm:$0xf]  ;;  %v11236_v50 = vld [vmem:[#allocation6 + $0x8d8] sm:$0xf0] }
 0x541   :  { %6653 = vmatpush.bf16.msra.mxu0 %v10103_v32  ;;  %v11355_v32 = vld [vmem:[#allocation6 + $0xc90] sm:$0xf0]  ;;  %v10186_v30 = vld [vmem:[#allocation6 + $0xab8] sm:$0xf]  ;;  %v9934_v45 = vld [vmem:[#allocation6 + $0x8c0] sm:$0xf] }
 0x542   :  { %6681 = vmatpush.bf16.msra.mxu2 %v10551_v49  ;;  %v11299_v49 = vld [vmem:[#allocation6 + $0xad0] sm:$0xf0]  ;;  %v10411_v23 = vor.u32 %v11355_v32, %v10410_v51  ;;  %v10382_v20 = vld [vmem:[#allocation6 + $0xc40] sm:$0xf]  ;;  %v11002_v55 = vld [vmem:[#allocation6 + $0x18c] sm:$0xf]  ;;  %v9935_v61 = vor.u32 %v11236_v50, %v9934_v45 }
 0x543   :  { %6667 = vmatpush.bf16.msra.mxu1 %v10327_v2  ;;  %v11180_v2 = vld [vmem:[#allocation6 + $0x718] sm:$0xf0]  ;;  %v11058_v53 = vld [vmem:[#allocation6 + $0x34c] sm:$0xf]  ;;  %v9236_v54 = vld [vmem:[#allocation6 + $0x364] sm:$0xf0] }
 0x544   :  { %6640 = vmatpush.bf16.msrb.mxu3 %v9851_v39  ;;  %v11348_v39 = vld [vmem:[#allocation6 + $0xc58] sm:$0xf0]  ;;  %v11170_v60 = vld [vmem:[#allocation6 + $0x6cc] sm:$0xf]  ;;  %v9711_v59 = vor.u32 %v11180_v2, %v9710_v35  ;;  %v10158_v63 = vld [vmem:[#allocation6 + $0xa80] sm:$0xf]  ;;  %v9239_v44 = vor.u32 %v11058_v53, %v9236_v54 }
 0x545   :  { %6654 = vmatpush.bf16.msra.mxu0 %v10075_v48  ;;  %v10187_v48 = vor.u32 %v11299_v49, %v10186_v30  ;;  %v11292_v1 = vld [vmem:[#allocation6 + $0xa98] sm:$0xf0]  ;;  %v11114_v3 = vld [vmem:[#allocation6 + $0x50c] sm:$0xf]  ;;  %v10995_v10 = vld [vmem:[#allocation6 + $0x154] sm:$0xf] }
 0x546   :  { %6682 = vmatpush.bf16.msra.mxu2 %v10523_v5  ;;  %v9012_v5 = vld [vmem:[#allocation6 + $0x1a4] sm:$0xf0]  ;;  %v11051_v40 = vld [vmem:[#allocation6 + $0x314] sm:$0xf]  ;;  %v10159_v37 = vor.u32 %v11292_v1, %v10158_v63  ;;  %v9208_v7 = vld [vmem:[#allocation6 + $0x32c] sm:$0xf0] }
 0x547   :  { %6668 = vmatpush.bf16.msra.mxu1 %v10299_v58  ;;  %v9684_v58 = vld [vmem:[#allocation6 + $0x6e4] sm:$0xf0]  ;;  %v11163_v19 = vld [vmem:[#allocation6 + $0x694] sm:$0xf]  ;;  %v9432_v43 = vld [vmem:[#allocation6 + $0x4ec] sm:$0xf0]  ;;  %v9211_v38 = vor.u32 %v11051_v40, %v9208_v7 }
 0x548   :  { %6641 = vmatpush.bf16.msrb.mxu3 %v9823_v57  ;;  %v10383_v57 = vor.u32 %v11348_v39, %v10382_v20  ;;  %v9687_v47 = vor.u32 %v11170_v60, %v9684_v58  ;;  %v8956_v62 = vld [vmem:[#allocation6 + $0x134] sm:$0xf0]  ;;  %v11044_v24 = vld [vmem:[#allocation6 + $0x2dc] sm:$0xf]  ;;  %v8928_v51 = vld [vmem:[#allocation6 + $0xfc] sm:$0xf0] }
 0x549   :  { %6655 = vmatpush.bf16.msra.mxu0 %v10047_v52  ;;  %v9015_v52 = vor.u32 %v11002_v55, %v9012_v5  ;;  %v9180_v46 = vld [vmem:[#allocation6 + $0x2f4] sm:$0xf0]  ;;  %v11156_v25 = vld [vmem:[#allocation6 + $0x65c] sm:$0xf]  ;;  %v11037_v32 = vld [vmem:[#allocation6 + $0x2a4] sm:$0xf] }
 0x54a   :  { %6683 = vmatpush.bf16.msra.mxu2 %v10495_v4  ;;  %v9460_v4 = vld [vmem:[#allocation6 + $0x524] sm:$0xf0]  ;;  %v9404_v28 = vld [vmem:[#allocation6 + $0x4b4] sm:$0xf0]  ;;  %v9183_v33 = vor.u32 %v11044_v24, %v9180_v46  ;;  %v9152_v30 = vld [vmem:[#allocation6 + $0x2bc] sm:$0xf0] }
 0x54b   :  { %6669 = vmatpush.bf16.msra.mxu1 %v10271_v11  ;;  %v8984_v11 = vld [vmem:[#allocation6 + $0x16c] sm:$0xf0]  ;;  %v11149_v49 = vld [vmem:[#allocation6 + $0x624] sm:$0xf]  ;;  %v9376_v45 = vld [vmem:[#allocation6 + $0x47c] sm:$0xf0] }
 0x54c   :  { %6642 = vmatpush.bf16.msrb.mxu3 %v9795_v42  ;;  %v9656_v42 = vld [vmem:[#allocation6 + $0x6ac] sm:$0xf0]  ;;  %v8987_v41 = vor.u32 %v10995_v10, %v8984_v11  ;;  %v11093_v2 = vld [vmem:[#allocation6 + $0x464] sm:$0xf]  ;;  %v10974_v20 = vld [vmem:[#allocation6 + $0xac] sm:$0xf] }
 0x54d   :  { %6656 = vmatpush.bf16.msra.mxu0 %v10019_v17  ;;  %v9463_v17 = vor.u32 %v11114_v3, %v9460_v4  ;;  %v9659_v14 = vor.u32 %v11163_v19, %v9656_v42  ;;  %v8900_v39 = vld [vmem:[#allocation6 + $0xc4] sm:$0xf0]  ;;  %v11142_v5 = vld [vmem:[#allocation6 + $0x5ec] sm:$0xf]  ;;  %v9379_v54 = vor.u32 %v11093_v2, %v9376_v45  ;;  %v10967_v1 = vld [vmem:[#allocation6 + $0x74] sm:$0xf] }
 0x54e   :  { %6684 = vmatpush.bf16.msra.mxu2 %v10467_v34  ;;  %v11107_v34 = vld [vmem:[#allocation6 + $0x4d4] sm:$0xf]  ;;  %v9124_v55 = vld [vmem:[#allocation6 + $0x284] sm:$0xf0]  ;;  %v8903_v60 = vor.u32 %v10974_v20, %v8900_v39  ;;  %v11086_v58 = vld [vmem:[#allocation6 + $0x42c] sm:$0xf] }
 0x54f   :  { %6670 = vmatpush.bf16.msra.mxu1 %v10243_v8  ;;  %v10988_v8 = vld [vmem:[#allocation6 + $0x11c] sm:$0xf]  ;;  %v9572_v53 = vld [vmem:[#allocation6 + $0x604] sm:$0xf0]  ;;  %v9096_v3 = vld [vmem:[#allocation6 + $0x24c] sm:$0xf0] }
 0x550   :  { %6643 = vmatpush.bf16.msrb.mxu3 %v9767_v6  ;;  %v9628_v6 = vld [vmem:[#allocation6 + $0x674] sm:$0xf0]  ;;  %v8959_v36 = vor.u32 %v10988_v8, %v8956_v62  ;;  %v9575_v63 = vor.u32 %v11142_v5, %v9572_v53  ;;  %v11135_v4 = vld [vmem:[#allocation6 + $0x5b4] sm:$0xf]  ;;  %v9320_v40 = vld [vmem:[#allocation6 + $0x40c] sm:$0xf0] }
 0x551   :  { %6657 = vmatpush.bf16.msra.mxu0 %v9991_v56  ;;  %v9435_v56 = vor.u32 %v11107_v34, %v9432_v43  ;;  %v9631_v29 = vor.u32 %v11156_v25, %v9628_v6  ;;  %v11079_v11 = vld [vmem:[#allocation6 + $0x3f4] sm:$0xf]  ;;  %v10960_v19 = vld [vmem:[#allocation6 + $0x3c] sm:$0xf]  ;;  %v8844_v42 = vld [vmem:[#allocation6 + $0x54] sm:$0xf0] }
 0x552   :  { %6685 = vmatpush.bf16.msra.mxu2 %v10439_v26  ;;  %v11100_v26 = vld [vmem:[#allocation6 + $0x49c] sm:$0xf]  ;;  %v9516_v43 = vld [vmem:[#allocation6 + $0x594] sm:$0xf0]  ;;  %v8847_v8 = vor.u32 %v10960_v19, %v8844_v42  ;;  %v10953_v24 = vld [vmem:[#allocation6 + $0x4] sm:$0xf] }
 0x553   :  { %6671 = vmatpush.bf16.msra.mxu1 %v10215_v15  ;;  %v10981_v15 = vld [vmem:[#allocation6 + $0xe4] sm:$0xf]  ;;  %v11128_v34 = vld [vmem:[#allocation6 + $0x57c] sm:$0xf]  ;;  %v9292_v62 = vld [vmem:[#allocation6 + $0x3d4] sm:$0xf0] }
 0x554   :  { %6644 = vmatpush.bf16.msrb.mxu3 %v9739_v9  ;;  %v9600_v9 = vld [vmem:[#allocation6 + $0x63c] sm:$0xf0]  ;;  %v8931_v35 = vor.u32 %v10981_v15, %v8928_v51  ;;  %v9519_v6 = vor.u32 %v11128_v34, %v9516_v43  ;;  %v11282_v51 = vld [vmem:[#allocation6 + $0xa4c] sm:$0xf]  ;;  %v9880_v53 = vld [vmem:[#allocation6 + $0x86c] sm:$0xf0] }
 0x555   :  { %6658 = vmatpush.bf16.msra.mxu0 %v9963_v12  ;;  %v9407_v12 = vor.u32 %v11100_v26, %v9404_v28  ;;  %v9603_v50 = vor.u32 %v11149_v49, %v9600_v9  ;;  %v8816_v46 = vld [vmem:[#allocation6 + $0x1c] sm:$0xf0]  ;;  %v11121_v26 = vld [vmem:[#allocation6 + $0x544] sm:$0xf]  ;;  %v10580_v9 = vld [vmem:[#allocation6 + $0xde4] sm:$0xf0] }
 0x556   :  { %6686 = vmatpush.bf16.msra.mxu2 %v10411_v23  ;;  %v9155_v23 = vor.u32 %v11037_v32, %v9152_v30  ;;  %v9488_v28 = vld [vmem:[#allocation6 + $0x55c] sm:$0xf0]  ;;  %v10132_v32 = vld [vmem:[#allocation6 + $0xa64] sm:$0xf0]  ;;  %v11394_v30 = vld [vmem:[#allocation6 + $0xdcc] sm:$0xf]  ;;  %v8819_v49 = vor.u32 %v10953_v24, %v8816_v46 }
 0x557   :  { %6672 = vmatpush.bf16.msra.mxu1 %v10187_v48  ;;  %v11030_v48 = vld [vmem:[#allocation6 + $0x26c] sm:$0xf]  ;;  %v9491_v45 = vor.u32 %v11121_v26, %v9488_v28  ;;  %v10135_v39 = vor.u32 %v11282_v51, %v10132_v32  ;;  %v10300_v19 = vld [vmem:[#allocation6 + $0xbb4] sm:$0xf0]  ;;  %v9824_v43 = vld [vmem:[#allocation6 + $0x7fc] sm:$0xf0] }
 0x558   :  { %6645 = vmatpush.bf16.msrb.mxu3 %v9711_v59  ;;  %v9348_v59 = vld [vmem:[#allocation6 + $0x444] sm:$0xf0]  ;;  %v10496_v24 = vld [vmem:[#allocation6 + $0xd3c] sm:$0xf0]  ;;  %v11317_v46 = vld [vmem:[#allocation6 + $0xb64] sm:$0xf] }
 0x559   :  { %6659 = vmatpush.bf16.msra.mxu0 %v9935_v61  ;;  %v9127_v61 = vor.u32 %v11030_v48, %v9124_v55  ;;  %v11219_v48 = vld [vmem:[#allocation6 + $0x854] sm:$0xf]  ;;  %v10583_v55 = vor.u32 %v11394_v30, %v10580_v9  ;;  %v9796_v28 = vld [vmem:[#allocation6 + $0x7c4] sm:$0xf0]  ;;  %v11366_v51 = vld [vmem:[#allocation6 + $0xcec] sm:$0xf] }
 0x55a   :  { %6687 = vmatpush.bf16.msra.mxu2 %v10383_v57  ;;  %v8872_v57 = vld [vmem:[#allocation6 + $0x8c] sm:$0xf0]  ;;  %v10468_v32 = vld [vmem:[#allocation6 + $0xd04] sm:$0xf0]  ;;  %v11310_v30 = vld [vmem:[#allocation6 + $0xb2c] sm:$0xf] }
 0x55b   :  { %6673 = vmatpush.bf16.msra.mxu1 %v10159_v37  ;;  %6646 = vmatmul.bf16.vlgmr.msrb.gmra.mxu3 %v12357_v13  ;;  %v8875_v10 = vor.u32 %v10967_v1, %v8872_v57  ;;  %v10328_v1 = vld [vmem:[#allocation6 + $0xbec] sm:$0xf0]  ;;  %v9883_v57 = vor.u32 %v11219_v48, %v9880_v53  ;;  %vm7386_vm9 = vcmask 130048  }
 0x55c   :  { %6694 = vmatpush.bf16.msra.mxu3 %v9015_v52  ;;  %6660 = vmatmul.bf16.vlgmr.msra.gmra.mxu0 %v12359_v21  ;;  %v11023_v52 = vld [vmem:[#allocation6 + $0x234] sm:$0xf]  ;;  %v10440_v48 = vld [vmem:[#allocation6 + $0xccc] sm:$0xf0] }
 0x55d   :  { %6708 = vmatpush.bf16.msrb.mxu0 %v9239_v44  ;;  %6688 = vmatmul.bf16.vlgmr.msra.gmra.mxu2 %v12363_v27  ;;  %v9544_v44 = vld [vmem:[#allocation6 + $0x5cc] sm:$0xf0]  ;;  %v9099_v37 = vor.u32 %v11023_v52, %v9096_v3  ;;  %v11212_v3 = vld [vmem:[#allocation6 + $0x81c] sm:$0xf] }
 0x55e   :  { %6736 = vmatpush.bf16.msrb.mxu2 %v9687_v47  ;;  %6674 = vmatmul.bf16.vlgmr.msra.gmra.mxu1 %v12361_v16  ;;  %v9351_v47 = vor.u32 %v11086_v58, %v9348_v59  ;;  %v9547_v7 = vor.u32 %v11135_v4, %v9544_v44  ;;  %v11387_v59 = vld [vmem:[#allocation6 + $0xd94] sm:$0xf]  ;;  %v9852_v44 = vld [vmem:[#allocation6 + $0x834] sm:$0xf0] }
 0x55f   :  { %6722 = vmatpush.bf16.msrb.mxu1 %v9463_v17  ;;  %v11016_v17 = vld [vmem:[#allocation6 + $0x1fc] sm:$0xf]  ;;  %v9855_v42 = vor.u32 %v11212_v3, %v9852_v44 }
 0x560   :  { %6695 = vmatpush.bf16.msra.mxu3 %v8987_v41  ;;  %v9068_v41 = vld [vmem:[#allocation6 + $0x214] sm:$0xf0]  ;;  %v11296_v3 = vld [vmem:[#allocation6 + $0xabc] sm:$0xf] }
 0x561   :  { %6709 = vmatpush.bf16.msrb.mxu0 %v9211_v38  ;;  %v9323_v38 = vor.u32 %v11079_v11, %v9320_v40  ;;  %v9071_v25 = vor.u32 %v11016_v17, %v9068_v41  ;;  %v11380_v40 = vld [vmem:[#allocation6 + $0xd5c] sm:$0xf]  ;;  %v11205_v41 = vld [vmem:[#allocation6 + $0x7e4] sm:$0xf] }
 0x562   :  { %6737 = vmatpush.bf16.msrb.mxu2 %v9659_v14  ;;  %v11072_v14 = vld [vmem:[#allocation6 + $0x3bc] sm:$0xf] }
 0x563   :  { %6723 = vmatpush.bf16.msrb.mxu1 %v9435_v56  ;;  %v11009_v56 = vld [vmem:[#allocation6 + $0x1c4] sm:$0xf]  ;;  %v9295_v15 = vor.u32 %v11072_v14, %v9292_v62  ;;  %v10048_v14 = vld [vmem:[#allocation6 + $0x9bc] sm:$0xf0] }
 0x564   :  { %6696 = vmatpush.bf16.msra.mxu3 %v8959_v36  ;;  %v9040_v36 = vld [vmem:[#allocation6 + $0x1dc] sm:$0xf0]  ;;  %v11373_v62 = vld [vmem:[#allocation6 + $0xd24] sm:$0xf] }
 0x565   :  { %6710 = vmatpush.bf16.msrb.mxu0 %v9183_v33  ;;  %v11226_v33 = vld [vmem:[#allocation6 + $0x88c] sm:$0xf]  ;;  %v9043_v2 = vor.u32 %v11009_v56, %v9040_v36  ;;  %v10499_v26 = vor.u32 %v11373_v62, %v10496_v24 }
 0x566   :  { %6738 = vmatpush.bf16.msrb.mxu2 %v9631_v29  ;;  %v9908_v29 = vld [vmem:[#allocation6 + $0x8a4] sm:$0xf0]  ;;  %v11198_v36 = vld [vmem:[#allocation6 + $0x7ac] sm:$0xf] }
 0x567   :  { %6724 = vmatpush.bf16.msrb.mxu1 %v9407_v12  ;;  %v11065_v12 = vld [vmem:[#allocation6 + $0x384] sm:$0xf]  ;;  %v9911_v20 = vor.u32 %v11226_v33, %v9908_v29  ;;  %v11254_v33 = vld [vmem:[#allocation6 + $0x96c] sm:$0xf]  ;;  %v10020_v29 = vld [vmem:[#allocation6 + $0x984] sm:$0xf0]  ;;  %v9799_v9 = vor.u32 %v11198_v36, %v9796_v28 }
 0x568   :  { %6697 = vmatpush.bf16.msra.mxu3 %v8931_v35  ;;  %v9264_v35 = vld [vmem:[#allocation6 + $0x39c] sm:$0xf0]  ;;  %v9466_v36 = vld [vmem:[#allocation6 + $0x510] sm:$0xf] }
 0x569   :  { %6711 = vmatpush.bf16.msrb.mxu0 %v9155_v23  ;;  %v11338_v23 = vld [vmem:[#allocation6 + $0xc0c] sm:$0xf]  ;;  %v9267_v5 = vor.u32 %v11065_v12, %v9264_v35  ;;  %v10023_v12 = vor.u32 %v11254_v33, %v10020_v29  ;;  %v11191_v35 = vld [vmem:[#allocation6 + $0x774] sm:$0xf]  ;;  %v8990_v29 = vld [vmem:[#allocation6 + $0x158] sm:$0xf] }
 0x56a   :  { %6739 = vmatpush.bf16.msrb.mxu2 %v9603_v50  ;;  %v10356_v50 = vld [vmem:[#allocation6 + $0xc24] sm:$0xf0] }
 0x56b   :  { %6725 = vmatpush.bf16.msrb.mxu1 %v9379_v54  ;;  %v11275_v54 = vld [vmem:[#allocation6 + $0xa14] sm:$0xf]  ;;  %v10359_v58 = vor.u32 %v11338_v23, %v10356_v50  ;;  %v9992_v50 = vld [vmem:[#allocation6 + $0x94c] sm:$0xf0] }
 0x56c   :  { %6698 = vmatpush.bf16.msra.mxu3 %v8903_v60  ;;  %v10104_v60 = vld [vmem:[#allocation6 + $0xa2c] sm:$0xf0]  ;;  %v11247_v23 = vld [vmem:[#allocation6 + $0x934] sm:$0xf] }
 0x56d   :  { %6712 = vmatpush.bf16.msrb.mxu0 %v9127_v61  ;;  %v10552_v61 = vld [vmem:[#allocation6 + $0xdac] sm:$0xf0]  ;;  %v10107_v52 = vor.u32 %v11275_v54, %v10104_v60  ;;  %v9995_v54 = vor.u32 %v11247_v23, %v9992_v50  ;;  %v11184_v60 = vld [vmem:[#allocation6 + $0x73c] sm:$0xf] }
 0x56e   :  { %6740 = vmatpush.bf16.msrb.mxu2 %v9575_v63  ;;  %v11331_v63 = vld [vmem:[#allocation6 + $0xbd4] sm:$0xf]  ;;  %v10555_v4 = vor.u32 %v11387_v59, %v10552_v61  ;;  %v9740_v59 = vld [vmem:[#allocation6 + $0x754] sm:$0xf0]  ;;  %v11240_v61 = vld [vmem:[#allocation6 + $0x8fc] sm:$0xf] }
 0x56f   :  { %6726 = vmatpush.bf16.msrb.mxu1 %v9351_v47  ;;  %v11268_v47 = vld [vmem:[#allocation6 + $0x9dc] sm:$0xf]  ;;  %v10331_v11 = vor.u32 %v11331_v63, %v10328_v1  ;;  %v9964_v63 = vld [vmem:[#allocation6 + $0x914] sm:$0xf0]  ;;  %v9743_v44 = vor.u32 %v11184_v60, %v9740_v59 }
 0x570   :  { %6699 = vmatpush.bf16.msra.mxu3 %v8875_v10  ;;  %v10076_v10 = vld [vmem:[#allocation6 + $0x9f4] sm:$0xf0]  ;;  %v11104_v59 = vld [vmem:[#allocation6 + $0x4b8] sm:$0xf0] }
 0x571   :  { %6713 = vmatpush.bf16.msrb.mxu0 %v9099_v37  ;;  %v10524_v37 = vld [vmem:[#allocation6 + $0xd74] sm:$0xf0]  ;;  %v10079_v17 = vor.u32 %v11268_v47, %v10076_v10  ;;  %v9967_v47 = vor.u32 %v11240_v61, %v9964_v63  ;;  %v11177_v10 = vld [vmem:[#allocation6 + $0x704] sm:$0xf] }
 0x572   :  { %6741 = vmatpush.bf16.msrb.mxu2 %v9547_v7  ;;  %v11324_v7 = vld [vmem:[#allocation6 + $0xb9c] sm:$0xf]  ;;  %v10527_v34 = vor.u32 %v11380_v40, %v10524_v37  ;;  %v11233_v40 = vld [vmem:[#allocation6 + $0x8c4] sm:$0xf] }
 0x573   :  { %6727 = vmatpush.bf16.msrb.mxu1 %v9323_v38  ;;  %v11261_v38 = vld [vmem:[#allocation6 + $0x9a4] sm:$0xf] }
 0x574   :  { %6700 = vmatpush.bf16.msra.mxu3 %v8847_v8  ;;  %v10303_v8 = vor.u32 %v11324_v7, %v10300_v19  ;;  %v10051_v56 = vor.u32 %v11261_v38, %v10048_v14  ;;  %v9936_v7 = vld [vmem:[#allocation6 + $0x8dc] sm:$0xf0]  ;;  %v11345_v19 = vld [vmem:[#allocation6 + $0xc44] sm:$0xf]  ;;  %v11062_v38 = vld [vmem:[#allocation6 + $0x368] sm:$0xf0] }
 0x575   :  { %6714 = vmatpush.bf16.msrb.mxu0 %v9071_v25  ;;  %v10272_v25 = vld [vmem:[#allocation6 + $0xb7c] sm:$0xf0]  ;;  %v9690_v14 = vld [vmem:[#allocation6 + $0x6d0] sm:$0xf]  ;;  %v9939_v24 = vor.u32 %v11233_v40, %v9936_v7  ;;  %v11097_v40 = vld [vmem:[#allocation6 + $0x480] sm:$0xf0] }
 0x576   :  { %6742 = vmatpush.bf16.msrb.mxu2 %v9519_v6  ;;  %v9827_v6 = vor.u32 %v11205_v41, %v9824_v43  ;;  %v9018_v41 = vld [vmem:[#allocation6 + $0x190] sm:$0xf] }
 0x577   :  { %6728 = vmatpush.bf16.msrb.mxu1 %v9295_v15  ;;  %v10275_v15 = vor.u32 %v11317_v46, %v10272_v25  ;;  %v9242_v43 = vld [vmem:[#allocation6 + $0x350] sm:$0xf]  ;;  %v11289_v46 = vld [vmem:[#allocation6 + $0xa84] sm:$0xf]  ;;  %v10160_v25 = vld [vmem:[#allocation6 + $0xa9c] sm:$0xf0] }
 0x578   :  { %6701 = vmatpush.bf16.msra.mxu3 %v8819_v49  ;;  %v10244_v49 = vld [vmem:[#allocation6 + $0xb44] sm:$0xf0]  ;;  %v9243_v28 = vor.u32 %v11062_v38, %v9242_v43  ;;  %v11146_v43 = vld [vmem:[#allocation6 + $0x608] sm:$0xf0] }
 0x579   :  { %6715 = vmatpush.bf16.msrb.mxu0 %v9043_v2  ;;  %v10471_v2 = vor.u32 %v11366_v51, %v10468_v32  ;;  %v9214_v51 = vld [vmem:[#allocation6 + $0x318] sm:$0xf]  ;;  %v10163_v32 = vor.u32 %v11289_v46, %v10160_v25 }
 0x57a   :  { %6743 = vmatpush.bf16.msrb.mxu2 %v9491_v45  ;;  %v9768_v45 = vld [vmem:[#allocation6 + $0x78c] sm:$0xf0]  ;;  %v8878_v25 = vld [vmem:[#allocation6 + $0x78] sm:$0xf] }
 0x57b   :  { %6729 = vmatpush.bf16.msrb.mxu1 %v9267_v5  ;;  %6702 = vmatmul.bf16.vlgmr.msra.gmra.mxu3 %v12349_v18  ;;  %v10216_v5 = vld [vmem:[#allocation6 + $0xb0c] sm:$0xf0]  ;;  %v9771_v53 = vor.u32 %v11191_v35, %v9768_v45  ;;  %v11111_v45 = vld [vmem:[#allocation6 + $0x4f0] sm:$0xf0] }
 0x57c   :  { %6750 = vmatpush.bf16.msrb.mxu3 %v9911_v20  ;;  %6716 = vmatmul.bf16.vlgmr.msrb.gmra.mxu0 %v12351_v31  ;;  %v10247_v20 = vor.u32 %v11310_v30, %v10244_v49  ;;  %v11055_v30 = vld [vmem:[#allocation6 + $0x330] sm:$0xf0]  ;;  %v9662_v49 = vld [vmem:[#allocation6 + $0x698] sm:$0xf] }
 0x57d   :  { %6764 = vmatpush.bf16.msra.mxu0 %v10135_v39  ;;  %6744 = vmatmul.bf16.vlgmr.msrb.gmra.mxu2 %v12355_v22  ;;  %v11359_v39 = vld [vmem:[#allocation6 + $0xcb4] sm:$0xf]  ;;  %v9215_v23 = vor.u32 %v11055_v30, %v9214_v51 }
 0x57e   :  { %6792 = vmatpush.bf16.msra.mxu2 %v10583_v55  ;;  %6730 = vmatmul.bf16.vlgmr.msrb.gmra.mxu1 %v12353_v0  ;;  %v11303_v55 = vld [vmem:[#allocation6 + $0xaf4] sm:$0xf] }
 0x57f   :  { %6778 = vmatpush.bf16.msra.mxu1 %v10359_v58  ;;  %v10443_v58 = vor.u32 %v11359_v39, %v10440_v48  ;;  %v10219_v1 = vor.u32 %v11303_v55, %v10216_v5  ;;  %v10992_v39 = vld [vmem:[#allocation6 + $0x138] sm:$0xf0]  ;;  %v9186_v48 = vld [vmem:[#allocation6 + $0x2e0] sm:$0xf]  ;;  %v11083_v51 = vld [vmem:[#allocation6 + $0x410] sm:$0xf0] }
 0x580   :  { %6751 = vmatpush.bf16.msrb.mxu3 %v9883_v57  ;;  %v11352_v57 = vld [vmem:[#allocation6 + $0xc7c] sm:$0xf]  ;;  %v9634_v5 = vld [vmem:[#allocation6 + $0x660] sm:$0xf] }
 0x581   :  { %6765 = vmatpush.bf16.msra.mxu0 %v10107_v52  ;;  %v10412_v52 = vld [vmem:[#allocation6 + $0xc94] sm:$0xf0]  ;;  %v11048_v55 = vld [vmem:[#allocation6 + $0x2f8] sm:$0xf0] }
 0x582   :  { %6793 = vmatpush.bf16.msra.mxu2 %v10555_v4  ;;  %v10188_v4 = vld [vmem:[#allocation6 + $0xad4] sm:$0xf0]  ;;  %v10415_v37 = vor.u32 %v11352_v57, %v10412_v52  ;;  %v9187_v61 = vor.u32 %v11048_v55, %v9186_v48  ;;  %v10985_v57 = vld [vmem:[#allocation6 + $0x100] sm:$0xf0]  ;;  %v9158_v52 = vld [vmem:[#allocation6 + $0x2a8] sm:$0xf] }
 0x583   :  { %6779 = vmatpush.bf16.msra.mxu1 %v10331_v11  ;;  %v9712_v11 = vld [vmem:[#allocation6 + $0x71c] sm:$0xf0]  ;;  %v8822_v48 = vld [vmem:[#allocation6 + $0x8] sm:$0xf]  ;;  %v10957_v55 = vld [vmem:[#allocation6 + $0x20] sm:$0xf0] }
 0x584   :  { %6752 = vmatpush.bf16.msrb.mxu3 %v9855_v42  ;;  %v10384_v42 = vld [vmem:[#allocation6 + $0xc5c] sm:$0xf0]  ;;  %v9715_v62 = vor.u32 %v11177_v10, %v9712_v11  ;;  %v9382_v11 = vld [vmem:[#allocation6 + $0x468] sm:$0xf] }
 0x585   :  { %6766 = vmatpush.bf16.msra.mxu0 %v10079_v17  ;;  %v10191_v17 = vor.u32 %v11296_v3, %v10188_v4  ;;  %v11041_v3 = vld [vmem:[#allocation6 + $0x2c0] sm:$0xf0]  ;;  %v9606_v4 = vld [vmem:[#allocation6 + $0x628] sm:$0xf]  ;;  %v9383_v38 = vor.u32 %v11097_v40, %v9382_v11 }
 0x586   :  { %6794 = vmatpush.bf16.msra.mxu2 %v10527_v34  ;;  %v11006_v34 = vld [vmem:[#allocation6 + $0x1a8] sm:$0xf0] }
 0x587   :  { %6780 = vmatpush.bf16.msra.mxu1 %v10303_v8  ;;  %v11174_v8 = vld [vmem:[#allocation6 + $0x6e8] sm:$0xf0] }
 0x588   :  { %6753 = vmatpush.bf16.msrb.mxu3 %v9827_v6  ;;  %v10387_v6 = vor.u32 %v11345_v19, %v10384_v42  ;;  %v9691_v33 = vor.u32 %v11174_v8, %v9690_v14  ;;  %v8906_v19 = vld [vmem:[#allocation6 + $0xb0] sm:$0xf]  ;;  %v10978_v42 = vld [vmem:[#allocation6 + $0xc8] sm:$0xf0] }
 0x589   :  { %6767 = vmatpush.bf16.msra.mxu0 %v10051_v56  ;;  %v9019_v56 = vor.u32 %v11006_v34, %v9018_v41  ;;  %v11034_v41 = vld [vmem:[#allocation6 + $0x288] sm:$0xf0]  ;;  %v9578_v34 = vld [vmem:[#allocation6 + $0x5f0] sm:$0xf]  ;;  %v8907_v14 = vor.u32 %v10978_v42, %v8906_v19 }
 0x58a   :  { %6795 = vmatpush.bf16.msra.mxu2 %v10499_v26  ;;  %v11118_v26 = vld [vmem:[#allocation6 + $0x528] sm:$0xf0]  ;;  %v9354_v8 = vld [vmem:[#allocation6 + $0x430] sm:$0xf]  ;;  %v9579_v46 = vor.u32 %v11146_v43, %v9578_v34  ;;  %v11223_v43 = vld [vmem:[#allocation6 + $0x870] sm:$0xf0] }
 0x58b   :  { %6781 = vmatpush.bf16.msra.mxu1 %v10275_v15  ;;  %v10999_v15 = vld [vmem:[#allocation6 + $0x170] sm:$0xf0] }
 0x58c   :  { %6754 = vmatpush.bf16.msrb.mxu3 %v9799_v9  ;;  %v11167_v9 = vld [vmem:[#allocation6 + $0x6b0] sm:$0xf0]  ;;  %v8991_v35 = vor.u32 %v10999_v15, %v8990_v29  ;;  %v9326_v15 = vld [vmem:[#allocation6 + $0x3f8] sm:$0xf] }
 0x58d   :  { %6768 = vmatpush.bf16.msra.mxu0 %v10023_v12  ;;  %v9467_v12 = vor.u32 %v11118_v26, %v9466_v36  ;;  %v9663_v50 = vor.u32 %v11167_v9, %v9662_v49  ;;  %v11027_v36 = vld [vmem:[#allocation6 + $0x250] sm:$0xf0]  ;;  %v9550_v26 = vld [vmem:[#allocation6 + $0x5b8] sm:$0xf]  ;;  %v8850_v49 = vld [vmem:[#allocation6 + $0x40] sm:$0xf] }
 0x58e   :  { %6796 = vmatpush.bf16.msra.mxu2 %v10471_v2  ;;  %v9438_v2 = vld [vmem:[#allocation6 + $0x4d8] sm:$0xf]  ;;  %v10964_v9 = vld [vmem:[#allocation6 + $0x58] sm:$0xf0] }
 0x58f   :  { %6782 = vmatpush.bf16.msra.mxu1 %v10247_v20  ;;  %v8962_v20 = vld [vmem:[#allocation6 + $0x120] sm:$0xf] }
 0x590   :  { %6755 = vmatpush.bf16.msrb.mxu3 %v9771_v53  ;;  %v11160_v53 = vld [vmem:[#allocation6 + $0x678] sm:$0xf0]  ;;  %v8963_v60 = vor.u32 %v10992_v39, %v8962_v20  ;;  %v8851_v20 = vor.u32 %v10964_v9, %v8850_v49 }
 0x591   :  { %6769 = vmatpush.bf16.msra.mxu0 %v9995_v54  ;;  %v9439_v54 = vor.u32 %v11111_v45, %v9438_v2  ;;  %v9635_v63 = vor.u32 %v11160_v53, %v9634_v5  ;;  %v9522_v2 = vld [vmem:[#allocation6 + $0x580] sm:$0xf]  ;;  %v11132_v45 = vld [vmem:[#allocation6 + $0x598] sm:$0xf0] }
 0x592   :  { %6797 = vmatpush.bf16.msra.mxu2 %v10443_v58  ;;  %v9410_v58 = vld [vmem:[#allocation6 + $0x4a0] sm:$0xf]  ;;  %v11076_v39 = vld [vmem:[#allocation6 + $0x3d8] sm:$0xf0]  ;;  %v9523_v53 = vor.u32 %v11132_v45, %v9522_v2  ;;  %v11209_v45 = vld [vmem:[#allocation6 + $0x800] sm:$0xf0] }
 0x593   :  { %6783 = vmatpush.bf16.msra.mxu1 %v10219_v1  ;;  %v8934_v1 = vld [vmem:[#allocation6 + $0xe8] sm:$0xf]  ;;  %v11328_v49 = vld [vmem:[#allocation6 + $0xbb8] sm:$0xf0] }
 0x594   :  { %6756 = vmatpush.bf16.msrb.mxu3 %v9743_v44  ;;  %v11153_v44 = vld [vmem:[#allocation6 + $0x640] sm:$0xf0]  ;;  %v8935_v10 = vor.u32 %v10985_v57, %v8934_v1  ;;  %v10138_v57 = vld [vmem:[#allocation6 + $0xa50] sm:$0xf] }
 0x595   :  { %6770 = vmatpush.bf16.msra.mxu0 %v9967_v47  ;;  %v9411_v47 = vor.u32 %v11104_v59, %v9410_v58  ;;  %v9607_v7 = vor.u32 %v11153_v44, %v9606_v4  ;;  %v9494_v58 = vld [vmem:[#allocation6 + $0x548] sm:$0xf]  ;;  %v11125_v59 = vld [vmem:[#allocation6 + $0x560] sm:$0xf0]  ;;  %v8823_v4 = vor.u32 %v10957_v55, %v8822_v48  ;;  %v11398_v44 = vld [vmem:[#allocation6 + $0xde8] sm:$0xf0] }
 0x596   :  { %6798 = vmatpush.bf16.msra.mxu2 %v10415_v37  ;;  %v9159_v37 = vor.u32 %v11041_v3, %v9158_v52  ;;  %v11286_v52 = vld [vmem:[#allocation6 + $0xa68] sm:$0xf0]  ;;  %v10586_v3 = vld [vmem:[#allocation6 + $0xdd0] sm:$0xf]  ;;  %v9495_v40 = vor.u32 %v11125_v59, %v9494_v58  ;;  %v11377_v48 = vld [vmem:[#allocation6 + $0xd40] sm:$0xf0] }
 0x597   :  { %6784 = vmatpush.bf16.msra.mxu1 %v10191_v17  ;;  %v9130_v17 = vld [vmem:[#allocation6 + $0x270] sm:$0xf]  ;;  %v10139_v42 = vor.u32 %v11286_v52, %v10138_v57  ;;  %v10278_v55 = vld [vmem:[#allocation6 + $0xb68] sm:$0xf]  ;;  %v11202_v59 = vld [vmem:[#allocation6 + $0x7c8] sm:$0xf0] }
 0x598   :  { %6757 = vmatpush.bf16.msrb.mxu3 %v9715_v62  ;;  %v11090_v62 = vld [vmem:[#allocation6 + $0x448] sm:$0xf0]  ;;  %v10474_v57 = vld [vmem:[#allocation6 + $0xcf0] sm:$0xf] }
 0x599   :  { %6771 = vmatpush.bf16.msra.mxu0 %v9939_v24  ;;  %v9131_v24 = vor.u32 %v11034_v41, %v9130_v17  ;;  %v9886_v17 = vld [vmem:[#allocation6 + $0x858] sm:$0xf]  ;;  %v10587_v41 = vor.u32 %v11398_v44, %v10586_v3  ;;  %v11370_v52 = vld [vmem:[#allocation6 + $0xd08] sm:$0xf0]  ;;  %v10250_v3 = vld [vmem:[#allocation6 + $0xb30] sm:$0xf] }
 0x59a   :  { %6799 = vmatpush.bf16.msra.mxu2 %v10387_v6  ;;  %v10971_v6 = vld [vmem:[#allocation6 + $0x90] sm:$0xf0] }
 0x59b   :  { %6785 = vmatpush.bf16.msra.mxu1 %v10163_v32  ;;  %6758 = vmatmul.bf16.vlgmr.msrb.gmra.mxu3 %v12357_v13  ;;  %v8879_v29 = vor.u32 %v10971_v6, %v8878_v25  ;;  %v11335_v25 = vld [vmem:[#allocation6 + $0xbf0] sm:$0xf0]  ;;  %v9887_v6 = vor.u32 %v11223_v43, %v9886_v17 }
 0x59c   :  { %6806 = vmatpush.bf16.msra.mxu3 %v9019_v56  ;;  %6772 = vmatmul.bf16.vlgmr.msra.gmra.mxu0 %v12359_v21  ;;  %v9102_v56 = vld [vmem:[#allocation6 + $0x238] sm:$0xf]  ;;  %v11363_v17 = vld [vmem:[#allocation6 + $0xcd0] sm:$0xf0] }
 0x59d   :  { %6820 = vmatpush.bf16.msrb.mxu0 %v9243_v28  ;;  %6800 = vmatmul.bf16.vlgmr.msra.gmra.mxu2 %v12363_v27  ;;  %v11139_v28 = vld [vmem:[#allocation6 + $0x5d0] sm:$0xf0]  ;;  %v9103_v32 = vor.u32 %v11027_v36, %v9102_v56  ;;  %v9858_v36 = vld [vmem:[#allocation6 + $0x820] sm:$0xf] }
 0x59e   :  { %6848 = vmatpush.bf16.msrb.mxu2 %v9691_v33  ;;  %6786 = vmatmul.bf16.vlgmr.msra.gmra.mxu1 %v12361_v16  ;;  %v9355_v33 = vor.u32 %v11090_v62, %v9354_v8  ;;  %v9551_v30 = vor.u32 %v11139_v28, %v9550_v26  ;;  %v10558_v62 = vld [vmem:[#allocation6 + $0xd98] sm:$0xf]  ;;  %v11216_v28 = vld [vmem:[#allocation6 + $0x838] sm:$0xf0] }
 0x59f   :  { %6834 = vmatpush.bf16.msrb.mxu1 %v9467_v12  ;;  %v9074_v12 = vld [vmem:[#allocation6 + $0x200] sm:$0xf]  ;;  %v9859_v9 = vor.u32 %v11216_v28, %v9858_v36  ;;  %v9718_v28 = vld [vmem:[#allocation6 + $0x708] sm:$0xf] }
 0x5a0   :  { %6807 = vmatpush.bf16.msra.mxu3 %v8991_v35  ;;  %v11020_v35 = vld [vmem:[#allocation6 + $0x218] sm:$0xf0]  ;;  %v10194_v36 = vld [vmem:[#allocation6 + $0xac0] sm:$0xf] }
 0x5a1   :  { %6821 = vmatpush.bf16.msrb.mxu0 %v9215_v23  ;;  %v9327_v23 = vor.u32 %v11083_v51, %v9326_v15  ;;  %v9075_v5 = vor.u32 %v11020_v35, %v9074_v12  ;;  %v10530_v51 = vld [vmem:[#allocation6 + $0xd60] sm:$0xf]  ;;  %v9830_v35 = vld [vmem:[#allocation6 + $0x7e8] sm:$0xf] }
 0x5a2   :  { %6849 = vmatpush.bf16.msrb.mxu2 %v9663_v50  ;;  %v9298_v50 = vld [vmem:[#allocation6 + $0x3c0] sm:$0xf] }
 0x5a3   :  { %6835 = vmatpush.bf16.msrb.mxu1 %v9439_v54  ;;  %v9046_v54 = vld [vmem:[#allocation6 + $0x1c8] sm:$0xf]  ;;  %v9299_v1 = vor.u32 %v11076_v39, %v9298_v50  ;;  %v11265_v50 = vld [vmem:[#allocation6 + $0x9c0] sm:$0xf0] }
 0x5a4   :  { %6808 = vmatpush.bf16.msra.mxu3 %v8963_v60  ;;  %v11013_v60 = vld [vmem:[#allocation6 + $0x1e0] sm:$0xf0]  ;;  %v10502_v39 = vld [vmem:[#allocation6 + $0xd28] sm:$0xf] }
 0x5a5   :  { %6822 = vmatpush.bf16.msrb.mxu0 %v9187_v61  ;;  %v9914_v61 = vld [vmem:[#allocation6 + $0x890] sm:$0xf]  ;;  %v9047_v11 = vor.u32 %v11013_v60, %v9046_v54  ;;  %v10503_v58 = vor.u32 %v11377_v48, %v10502_v39  ;;  %v11171_v39 = vld [vmem:[#allocation6 + $0x6d4] sm:$0xf] }
 0x5a6   :  { %6850 = vmatpush.bf16.msrb.mxu2 %v9635_v63  ;;  %v11230_v63 = vld [vmem:[#allocation6 + $0x8a8] sm:$0xf0]  ;;  %v9802_v60 = vld [vmem:[#allocation6 + $0x7b0] sm:$0xf] }
 0x5a7   :  { %6836 = vmatpush.bf16.msrb.mxu1 %v9411_v47  ;;  %v9270_v47 = vld [vmem:[#allocation6 + $0x388] sm:$0xf]  ;;  %v9915_v19 = vor.u32 %v11230_v63, %v9914_v61  ;;  %v10026_v61 = vld [vmem:[#allocation6 + $0x970] sm:$0xf]  ;;  %v11258_v63 = vld [vmem:[#allocation6 + $0x988] sm:$0xf0]  ;;  %v9803_v44 = vor.u32 %v11202_v59, %v9802_v60 }
 0x5a8   :  { %6809 = vmatpush.bf16.msra.mxu3 %v8935_v10  ;;  %v11069_v10 = vld [vmem:[#allocation6 + $0x3a0] sm:$0xf0]  ;;  %v9692_v48 = vld [vmem:[#allocation6 + $0x6ec] sm:$0xf0] }
 0x5a9   :  { %6823 = vmatpush.bf16.msrb.mxu0 %v9159_v37  ;;  %v10362_v37 = vld [vmem:[#allocation6 + $0xc10] sm:$0xf]  ;;  %v9271_v34 = vor.u32 %v11069_v10, %v9270_v47  ;;  %v10027_v47 = vor.u32 %v11258_v63, %v10026_v61  ;;  %v9774_v10 = vld [vmem:[#allocation6 + $0x778] sm:$0xf]  ;;  %v11293_v60 = vld [vmem:[#allocation6 + $0xaa0] sm:$0xf0] }
 0x5aa   :  { %6851 = vmatpush.bf16.msrb.mxu2 %v9607_v7  ;;  %v11342_v7 = vld [vmem:[#allocation6 + $0xc28] sm:$0xf0] }
 0x5ab   :  { %6837 = vmatpush.bf16.msrb.mxu1 %v9383_v38  ;;  %v10110_v38 = vld [vmem:[#allocation6 + $0xa18] sm:$0xf]  ;;  %v10363_v8 = vor.u32 %v11342_v7, %v10362_v37  ;;  %v11251_v7 = vld [vmem:[#allocation6 + $0x950] sm:$0xf0] }
 0x5ac   :  { %6810 = vmatpush.bf16.msra.mxu3 %v8907_v14  ;;  %v11279_v14 = vld [vmem:[#allocation6 + $0xa30] sm:$0xf0]  ;;  %v9998_v37 = vld [vmem:[#allocation6 + $0x938] sm:$0xf] }
 0x5ad   :  { %6824 = vmatpush.bf16.msrb.mxu0 %v9131_v24  ;;  %v11391_v24 = vld [vmem:[#allocation6 + $0xdb0] sm:$0xf0]  ;;  %v10111_v56 = vor.u32 %v11279_v14, %v10110_v38  ;;  %v9999_v38 = vor.u32 %v11251_v7, %v9998_v37  ;;  %v9746_v14 = vld [vmem:[#allocation6 + $0x740] sm:$0xf]  ;;  %v11164_v37 = vld [vmem:[#allocation6 + $0x69c] sm:$0xf] }
 0x5ae   :  { %6852 = vmatpush.bf16.msrb.mxu2 %v9579_v46  ;;  %v10334_v46 = vld [vmem:[#allocation6 + $0xbd8] sm:$0xf]  ;;  %v10559_v26 = vor.u32 %v11391_v24, %v10558_v62  ;;  %v11188_v62 = vld [vmem:[#allocation6 + $0x758] sm:$0xf0]  ;;  %v9970_v24 = vld [vmem:[#allocation6 + $0x900] sm:$0xf] }
 0x5af   :  { %6838 = vmatpush.bf16.msrb.mxu1 %v9355_v33  ;;  %v10082_v33 = vld [vmem:[#allocation6 + $0x9e0] sm:$0xf]  ;;  %v10335_v15 = vor.u32 %v11335_v25, %v10334_v46  ;;  %v11244_v46 = vld [vmem:[#allocation6 + $0x918] sm:$0xf0]  ;;  %v9664_v7 = vld [vmem:[#allocation6 + $0x6b4] sm:$0xf0] }
 0x5b0   :  { %6811 = vmatpush.bf16.msra.mxu3 %v8879_v29  ;;  %v11272_v29 = vld [vmem:[#allocation6 + $0x9f8] sm:$0xf0] }
 0x5b1   :  { %6825 = vmatpush.bf16.msrb.mxu0 %v9103_v32  ;;  %v11384_v32 = vld [vmem:[#allocation6 + $0xd78] sm:$0xf0]  ;;  %v10083_v12 = vor.u32 %v11272_v29, %v10082_v33  ;;  %v9747_v33 = vor.u32 %v11188_v62, %v9746_v14  ;;  %v9971_v29 = vor.u32 %v11244_v46, %v9970_v24  ;;  %v10989_v14 = vld [vmem:[#allocation6 + $0x124] sm:$0xf]  ;;  %v9188_v24 = vld [vmem:[#allocation6 + $0x2fc] sm:$0xf0] }
 0x5b2   :  { %6853 = vmatpush.bf16.msrb.mxu2 %v9551_v30  ;;  %v10306_v30 = vld [vmem:[#allocation6 + $0xba0] sm:$0xf]  ;;  %v10531_v2 = vor.u32 %v11384_v32, %v10530_v51  ;;  %v9942_v51 = vld [vmem:[#allocation6 + $0x8c8] sm:$0xf]  ;;  %v11237_v32 = vld [vmem:[#allocation6 + $0x8e0] sm:$0xf0] }
 0x5b3   :  { %6839 = vmatpush.bf16.msrb.mxu1 %v9327_v23  ;;  %v10054_v23 = vld [vmem:[#allocation6 + $0x9a8] sm:$0xf]  ;;  %v11045_v62 = vld [vmem:[#allocation6 + $0x2e4] sm:$0xf] }
 0x5b4   :  { %6812 = vmatpush.bf16.msra.mxu3 %v8851_v20  ;;  %v10307_v20 = vor.u32 %v11328_v49, %v10306_v30  ;;  %v10055_v54 = vor.u32 %v11265_v50, %v10054_v23  ;;  %v10390_v49 = vld [vmem:[#allocation6 + $0xc48] sm:$0xf]  ;;  %v12385_v23 = vld [vmem:[#allocation24] sm:$0xff]  ;;  %v11157_v46 = vld [vmem:[#allocation6 + $0x664] sm:$0xf] }
 0x5b5   :  { %6826 = vmatpush.bf16.msrb.mxu0 %v9075_v5  ;;  %v11321_v5 = vld [vmem:[#allocation6 + $0xb80] sm:$0xf0]  ;;  %v4264_v63 = vperm.slane %v12385_v23, 0 }
 0x5b6   :  { %6854 = vmatpush.bf16.msrb.mxu2 %v9523_v53  ;;  %v9831_v53 = vor.u32 %v11209_v45, %v9830_v35  ;;  %v11059_v45 = vld [vmem:[#allocation6 + $0x354] sm:$0xf] }
 0x5b7   :  { %6840 = vmatpush.bf16.msrb.mxu1 %v9299_v1  ;;  %v10279_v1 = vor.u32 %v11321_v5, %v10278_v55  ;;  %v9943_v5 = vor.u32 %v11237_v32, %v9942_v51  ;;  %v10982_v32 = vld [vmem:[#allocation6 + $0xec] sm:$0xf] }
 0x5b8   :  { %6813 = vmatpush.bf16.msra.mxu3 %v8823_v4  ;;  %v11314_v4 = vld [vmem:[#allocation6 + $0xb48] sm:$0xf0] }
 0x5b9   :  { %6827 = vmatpush.bf16.msrb.mxu0 %v9047_v11  ;;  %v10475_v11 = vor.u32 %v11370_v52, %v10474_v57  ;;  %v6605_v50 = vpop.f32.mrf.mxu0  ;;  %v9468_v57 = vld [vmem:[#allocation6 + $0x52c] sm:$0xf0] }
 0x5ba   :  { %6855 = vmatpush.bf16.msrb.mxu2 %v9495_v40  ;;  %v11195_v40 = vld [vmem:[#allocation6 + $0x790] sm:$0xf0] }
 0x5bb   :  { %6841 = vmatpush.bf16.msrb.mxu1 %v9271_v34  ;;  %6814 = vmatmul.bf16.vlgmr.msra.gmra.mxu3 %v12349_v18  ;;  %v11307_v34 = vld [vmem:[#allocation6 + $0xb10] sm:$0xf0]  ;;  %v9775_v43 = vor.u32 %v11195_v40, %v9774_v10  ;;  %v9216_v40 = vld [vmem:[#allocation6 + $0x334] sm:$0xf0] }
 0x5bc   :  { %6862 = vmatpush.bf16.msrb.mxu3 %v9915_v19  ;;  %6828 = vmatmul.bf16.vlgmr.msrb.gmra.mxu0 %v12351_v31  ;;  %v10251_v19 = vor.u32 %v11314_v4, %v10250_v3  ;;  %v9695_v3 = vor.u32 %v11171_v39, %v9692_v48  ;;  %v10996_v4 = vld [vmem:[#allocation6 + $0x15c] sm:$0xf]  ;;  %v11094_v48 = vld [vmem:[#allocation6 + $0x46c] sm:$0xf] }
 0x5bd   :  { %6876 = vmatpush.bf16.msra.mxu0 %v10139_v42  ;;  %6856 = vmatmul.bf16.vlgmr.msrb.gmra.mxu2 %v12355_v22  ;;  %v10446_v42 = vld [vmem:[#allocation6 + $0xcb8] sm:$0xf] }
 0x5be   :  { %6904 = vmatpush.bf16.msra.mxu2 %v10587_v41  ;;  %6842 = vmatmul.bf16.vlgmr.msrb.gmra.mxu1 %v12353_v0  ;;  %v10222_v41 = vld [vmem:[#allocation6 + $0xaf8] sm:$0xf] }
 0x5bf   :  { %6890 = vmatpush.bf16.msra.mxu1 %v10363_v8  ;;  %v10447_v8 = vor.u32 %v11363_v17, %v10446_v42  ;;  %v10223_v25 = vor.u32 %v11307_v34, %v10222_v41  ;;  %v11108_v41 = vld [vmem:[#allocation6 + $0x4dc] sm:$0xf]  ;;  %v9440_v34 = vld [vmem:[#allocation6 + $0x4f4] sm:$0xf0] }
 0x5c0   :  { %6863 = vmatpush.bf16.msrb.mxu3 %v9887_v6  ;;  %v10418_v6 = vld [vmem:[#allocation6 + $0xc80] sm:$0xf]  ;;  %v12390_v10 = vpop.f32.mrf.mxu2 }
 0x5c1   :  { %6877 = vmatpush.bf16.msra.mxu0 %v10111_v56  ;;  %v11356_v56 = vld [vmem:[#allocation6 + $0xc98] sm:$0xf0] }
 0x5c2   :  { %6905 = vmatpush.bf16.msra.mxu2 %v10559_v26  ;;  %v11300_v26 = vld [vmem:[#allocation6 + $0xad8] sm:$0xf0]  ;;  %v10419_v30 = vor.u32 %v11356_v56, %v10418_v6  ;;  %v9443_v6 = vor.u32 %v11108_v41, %v9440_v34  ;;  %v6607_v56 = vpop.f32.mrf.mxu0  ;;  %v9552_v34 = vld [vmem:[#allocation6 + $0x5d4] sm:$0xf0] }
 0x5c3   :  { %6891 = vmatpush.bf16.msra.mxu1 %v10335_v15  ;;  %v11181_v15 = vld [vmem:[#allocation6 + $0x720] sm:$0xf0]  ;;  %v10195_v35 = vor.u32 %v11300_v26, %v10194_v36  ;;  %v11136_v41 = vld [vmem:[#allocation6 + $0x5bc] sm:$0xf] }
 0x5c4   :  { %6864 = vmatpush.bf16.msrb.mxu3 %v9859_v9  ;;  %v11349_v9 = vld [vmem:[#allocation6 + $0xc60] sm:$0xf0]  ;;  %v9719_v55 = vor.u32 %v11181_v15, %v9718_v28 }
 0x5c5   :  { %6878 = vmatpush.bf16.msra.mxu0 %v10083_v12  ;;  %v11003_v12 = vld [vmem:[#allocation6 + $0x194] sm:$0xf]  ;;  %v10391_v59 = vor.u32 %v11349_v9, %v10390_v49  ;;  %v11101_v28 = vld [vmem:[#allocation6 + $0x4a4] sm:$0xf]  ;;  %v11038_v49 = vld [vmem:[#allocation6 + $0x2ac] sm:$0xf] }
 0x5c6   :  { %6906 = vmatpush.bf16.msra.mxu2 %v10531_v2  ;;  %v9020_v2 = vld [vmem:[#allocation6 + $0x1ac] sm:$0xf0] }
 0x5c7   :  { %6892 = vmatpush.bf16.msra.mxu1 %v10307_v20  ;;  %v9244_v20 = vld [vmem:[#allocation6 + $0x36c] sm:$0xf0]  ;;  %v9023_v61 = vor.u32 %v11003_v12, %v9020_v2  ;;  %v9160_v12 = vld [vmem:[#allocation6 + $0x2c4] sm:$0xf0] }
 0x5c8   :  { %6865 = vmatpush.bf16.msrb.mxu3 %v9831_v53  ;;  %v6591_v53 = vpop.f32.mrf.mxu3  ;;  %v9247_v52 = vor.u32 %v11059_v45, %v9244_v20  ;;  %v9608_v2 = vld [vmem:[#allocation6 + $0x644] sm:$0xf0] }
 0x5c9   :  { %6879 = vmatpush.bf16.msra.mxu0 %v10055_v54  ;;  %v10166_v54 = vld [vmem:[#allocation6 + $0xa88] sm:$0xf]  ;;  %v6592_v42 = vadd.f32 %v6591_v53, %v4264_v63 }
 0x5ca   :  { %6907 = vmatpush.bf16.msra.mxu2 %v10503_v58  ;;  %v12387_v58 = vpop.f32.mrf.mxu1 }
 0x5cb   :  { %6893 = vmatpush.bf16.msra.mxu1 %v10279_v1  ;;  %v11115_v1 = vld [vmem:[#allocation6 + $0x514] sm:$0xf]  ;;  %v6606_v36 = vadd.f32 %v6605_v50, %v6592_v42  ;;  %v12398_v50 = vpop.f32.mrf.mxu2  ;;  %v11024_v42 = vld [vmem:[#allocation6 + $0x23c] sm:$0xf] }
 0x5cc   :  { %6866 = vmatpush.bf16.msrb.mxu3 %v9803_v44  ;;  %v8992_v44 = vld [vmem:[#allocation6 + $0x174] sm:$0xf0] }
 0x5cd   :  { %6880 = vmatpush.bf16.msra.mxu0 %v10027_v47  ;;  %v11052_v47 = vld [vmem:[#allocation6 + $0x31c] sm:$0xf]  ;;  %v8995_v17 = vor.u32 %v10996_v4, %v8992_v44  ;;  %v6620_v20 = vadd.f32 %v12387_v58, %v6606_v36  ;;  %v11087_v44 = vld [vmem:[#allocation6 + $0x434] sm:$0xf]  ;;  %v10961_v36 = vld [vmem:[#allocation6 + $0x44] sm:$0xf] }
 0x5ce   :  { %6908 = vmatpush.bf16.msra.mxu2 %v10475_v11  ;;  %v10167_v11 = vor.u32 %v11293_v60, %v10166_v54  ;;  %v10975_v54 = vld [vmem:[#allocation6 + $0xb4] sm:$0xf]  ;;  %v8908_v60 = vld [vmem:[#allocation6 + $0xcc] sm:$0xf0] }
 0x5cf   :  { %6894 = vmatpush.bf16.msra.mxu1 %v10251_v19  ;;  %v9471_v19 = vor.u32 %v11115_v1, %v9468_v57  ;;  %v9132_v1 = vld [vmem:[#allocation6 + $0x28c] sm:$0xf0]  ;;  %v11143_v57 = vld [vmem:[#allocation6 + $0x5f4] sm:$0xf]  ;;  %v6634_v58 = vadd.f32 %v12390_v10, %v6620_v20  ;;  %v8911_v4 = vor.u32 %v10975_v54, %v8908_v60  ;;  %v9496_v54 = vld [vmem:[#allocation6 + $0x564] sm:$0xf0] }
 0x5d0   :  { %6867 = vmatpush.bf16.msrb.mxu3 %v9775_v43  ;;  %v9219_v43 = vor.u32 %v11052_v47, %v9216_v40  ;;  %v6593_v51 = vpop.f32.mrf.mxu3  ;;  %v9356_v47 = vld [vmem:[#allocation6 + $0x44c] sm:$0xf0]  ;;  %v11227_v60 = vld [vmem:[#allocation6 + $0x894] sm:$0xf] }
 0x5d1   :  { %6881 = vmatpush.bf16.msra.mxu0 %v9999_v38  ;;  %v9667_v38 = vor.u32 %v11164_v37, %v9664_v7  ;;  %v10968_v7 = vld [vmem:[#allocation6 + $0x7c] sm:$0xf] }
 0x5d2   :  { %6909 = vmatpush.bf16.msra.mxu2 %v10447_v8  ;;  %v8964_v8 = vld [vmem:[#allocation6 + $0x13c] sm:$0xf0]  ;;  %v6621_v9 = vpop.f32.mrf.mxu1 }
 0x5d3   :  { %6895 = vmatpush.bf16.msra.mxu1 %v10223_v25  ;;  %v9636_v25 = vld [vmem:[#allocation6 + $0x67c] sm:$0xf0]  ;;  %v8967_v26 = vor.u32 %v10989_v14, %v8964_v8 }
 0x5d4   :  { %6868 = vmatpush.bf16.msrb.mxu3 %v9747_v33  ;;  %v9412_v33 = vld [vmem:[#allocation6 + $0x4bc] sm:$0xf0]  ;;  %v9639_v15 = vor.u32 %v11157_v46, %v9636_v25  ;;  %v9555_v25 = vor.u32 %v11136_v41, %v9552_v34  ;;  %v11220_v34 = vld [vmem:[#allocation6 + $0x85c] sm:$0xf] }
 0x5d5   :  { %6882 = vmatpush.bf16.msra.mxu0 %v9971_v29  ;;  %v9191_v29 = vor.u32 %v11045_v62, %v9188_v24  ;;  %v9415_v45 = vor.u32 %v11101_v28, %v9412_v33  ;;  %v11080_v62 = vld [vmem:[#allocation6 + $0x3fc] sm:$0xf]  ;;  %v9328_v24 = vld [vmem:[#allocation6 + $0x414] sm:$0xf0] }
 0x5d6   :  { %6910 = vmatpush.bf16.msra.mxu2 %v10419_v30  ;;  %v8936_v30 = vld [vmem:[#allocation6 + $0x104] sm:$0xf0] }
 0x5d7   :  { %6896 = vmatpush.bf16.msra.mxu1 %v10195_v35  ;;  %v11150_v35 = vld [vmem:[#allocation6 + $0x62c] sm:$0xf]  ;;  %v8939_v39 = vor.u32 %v10982_v32, %v8936_v30  ;;  %v9331_v32 = vor.u32 %v11080_v62, %v9328_v24  ;;  %v11073_v30 = vld [vmem:[#allocation6 + $0x3c4] sm:$0xf]  ;;  %v10112_v62 = vld [vmem:[#allocation6 + $0xa34] sm:$0xf0] }
 0x5d8   :  { %6869 = vmatpush.bf16.msrb.mxu3 %v9719_v55  ;;  %v9384_v55 = vld [vmem:[#allocation6 + $0x484] sm:$0xf0]  ;;  %v9611_v53 = vor.u32 %v11150_v35, %v9608_v2  ;;  %v9300_v35 = vld [vmem:[#allocation6 + $0x3dc] sm:$0xf0]  ;;  %v10954_v2 = vld [vmem:[#allocation6 + $0xc] sm:$0xf] }
 0x5d9   :  { %6883 = vmatpush.bf16.msra.mxu0 %v9943_v5  ;;  %v9163_v5 = vor.u32 %v11038_v49, %v9160_v12  ;;  %v6661_v37 = vpop.f32.mrf.mxu0 }
 0x5da   :  { %6911 = vmatpush.bf16.msra.mxu2 %v10391_v59  ;;  %v11031_v59 = vld [vmem:[#allocation6 + $0x274] sm:$0xf] }
 0x5db   :  { %6897 = vmatpush.bf16.msra.mxu1 %v10167_v11  ;;  %6870 = vmatmul.bf16.vlgmr.msrb.gmra.mxu3 %v12357_v13  ;;  %v9135_v11 = vor.u32 %v11031_v59, %v9132_v1  ;;  %v6675_v10 = vpop.f32.mrf.mxu1  ;;  %v9916_v59 = vld [vmem:[#allocation6 + $0x8ac] sm:$0xf0]  ;;  %v9303_v1 = vor.u32 %v11073_v30, %v9300_v35  ;;  %v11269_v30 = vld [vmem:[#allocation6 + $0x9e4] sm:$0xf] }
 0x5dc   :  { %6918 = vmatpush.bf16.msra.mxu3 %v9023_v61  ;;  %6884 = vmatmul.bf16.vlgmr.msra.gmra.mxu0 %v12359_v21  ;;  %v6594_v61 = vadd.f32 %v6593_v51, %v4264_v63  ;;  %v9524_v51 = vld [vmem:[#allocation6 + $0x59c] sm:$0xf0]  ;;  %v11381_v35 = vld [vmem:[#allocation6 + $0xd64] sm:$0xf] }
 0x5dd   :  { %6932 = vmatpush.bf16.msrb.mxu0 %v9247_v52  ;;  %6912 = vmatmul.bf16.vlgmr.msra.gmra.mxu2 %v12363_v27  ;;  %v9580_v52 = vld [vmem:[#allocation6 + $0x60c] sm:$0xf0] }
 0x5de   :  { %6960 = vmatpush.bf16.msrb.mxu2 %v9695_v3  ;;  %6898 = vmatmul.bf16.vlgmr.msra.gmra.mxu1 %v12361_v16  ;;  %v9387_v3 = vor.u32 %v11094_v48, %v9384_v55  ;;  %v9583_v40 = vor.u32 %v11143_v57, %v9580_v52  ;;  %v6608_v63 = vadd.f32 %v6607_v56, %v6594_v61  ;;  %v11017_v56 = vld [vmem:[#allocation6 + $0x204] sm:$0xf]  ;;  %v11010_v48 = vld [vmem:[#allocation6 + $0x1cc] sm:$0xf]  ;;  %v9048_v55 = vld [vmem:[#allocation6 + $0x1e4] sm:$0xf0] }
 0x5df   :  { %6946 = vmatpush.bf16.msrb.mxu1 %v9471_v19  ;;  %v8880_v19 = vld [vmem:[#allocation6 + $0x94] sm:$0xf0]  ;;  %v11283_v52 = vld [vmem:[#allocation6 + $0xa54] sm:$0xf] }
 0x5e0   :  { %6919 = vmatpush.bf16.msra.mxu3 %v8995_v17  ;;  %v9104_v17 = vld [vmem:[#allocation6 + $0x254] sm:$0xf0]  ;;  %v8883_v8 = vor.u32 %v10968_v7, %v8880_v19  ;;  %v6622_v28 = vadd.f32 %v6621_v9, %v6608_v63  ;;  %v11122_v9 = vld [vmem:[#allocation6 + $0x54c] sm:$0xf]  ;;  %v11339_v19 = vld [vmem:[#allocation6 + $0xc14] sm:$0xf] }
 0x5e1   :  { %6933 = vmatpush.bf16.msrb.mxu0 %v9219_v43  ;;  %v6647_v43 = vpop.f32.mrf.mxu3  ;;  %v9107_v46 = vor.u32 %v11024_v42, %v9104_v17  ;;  %v6663_v57 = vpop.f32.mrf.mxu0  ;;  %v10364_v42 = vld [vmem:[#allocation6 + $0xc2c] sm:$0xf0]  ;;  %v9919_v17 = vor.u32 %v11227_v60, %v9916_v59  ;;  %v11374_v59 = vld [vmem:[#allocation6 + $0xd2c] sm:$0xf] }
 0x5e2   :  { %6961 = vmatpush.bf16.msrb.mxu2 %v9667_v38  ;;  %v9359_v38 = vor.u32 %v11087_v44, %v9356_v47  ;;  %v6648_v14 = vadd.f32 %v6647_v43, %v6634_v58  ;;  %v11395_v58 = vld [vmem:[#allocation6 + $0xdd4] sm:$0xf]  ;;  %v10588_v47 = vld [vmem:[#allocation6 + $0xdec] sm:$0xf0] }
 0x5e3   :  { %6947 = vmatpush.bf16.msrb.mxu1 %v9443_v6  ;;  %v6689_v6 = vpop.f32.mrf.mxu2  ;;  %v6677_v7 = vpop.f32.mrf.mxu1  ;;  %v10591_v43 = vor.u32 %v11395_v58, %v10588_v47 }
 0x5e4   :  { %6920 = vmatpush.bf16.msra.mxu3 %v8967_v26  ;;  %v8852_v26 = vld [vmem:[#allocation6 + $0x5c] sm:$0xf0]  ;;  %v6662_v33 = vadd.f32 %v6661_v37, %v6648_v14  ;;  %v9499_v37 = vor.u32 %v11122_v9, %v9496_v54  ;;  %v9888_v14 = vld [vmem:[#allocation6 + $0x874] sm:$0xf0]  ;;  %v10056_v54 = vld [vmem:[#allocation6 + $0x9c4] sm:$0xf0] }
 0x5e5   :  { %6934 = vmatpush.bf16.msrb.mxu0 %v9191_v29  ;;  %v9076_v29 = vld [vmem:[#allocation6 + $0x21c] sm:$0xf0]  ;;  %v8855_v12 = vor.u32 %v10961_v36, %v8852_v26  ;;  %v11332_v36 = vld [vmem:[#allocation6 + $0xbdc] sm:$0xf]  ;;  %v10336_v26 = vld [vmem:[#allocation6 + $0xbf4] sm:$0xf0] }
 0x5e6   :  { %6962 = vmatpush.bf16.msrb.mxu2 %v9639_v15  ;;  %v11129_v15 = vld [vmem:[#allocation6 + $0x584] sm:$0xf]  ;;  %v6676_v49 = vadd.f32 %v6675_v10, %v6662_v33  ;;  %v9079_v20 = vor.u32 %v11017_v56, %v9076_v29  ;;  %v9891_v33 = vor.u32 %v11220_v34, %v9888_v14 }
 0x5e7   :  { %6948 = vmatpush.bf16.msrb.mxu1 %v9415_v45  ;;  %v8824_v45 = vld [vmem:[#allocation6 + $0x24] sm:$0xf0] }
 0x5e8   :  { %6921 = vmatpush.bf16.msra.mxu3 %v8939_v39  ;;  %v9527_v39 = vor.u32 %v11129_v15, %v9524_v51  ;;  %v8827_v44 = vor.u32 %v10954_v2, %v8824_v45  ;;  %v11213_v15 = vld [vmem:[#allocation6 + $0x824] sm:$0xf]  ;;  %v10532_v2 = vld [vmem:[#allocation6 + $0xd7c] sm:$0xf0] }
 0x5e9   :  { %6935 = vmatpush.bf16.msrb.mxu0 %v9163_v5  ;;  %v6636_v5 = vadd.f32 %v12398_v50, %v6622_v28  ;;  %v6649_v61 = vpop.f32.mrf.mxu3  ;;  %v9051_v50 = vor.u32 %v11010_v48, %v9048_v55  ;;  %v11325_v45 = vld [vmem:[#allocation6 + $0xba4] sm:$0xf]  ;;  %v11206_v55 = vld [vmem:[#allocation6 + $0x7ec] sm:$0xf]  ;;  %v10535_v9 = vor.u32 %v11381_v35, %v10532_v2  ;;  %v9720_v2 = vld [vmem:[#allocation6 + $0x724] sm:$0xf0] }
 0x5ea   :  { %6963 = vmatpush.bf16.msrb.mxu2 %v9611_v53  ;;  %v6690_v53 = vadd.f32 %v6689_v6, %v6676_v49  ;;  %v10560_v6 = vld [vmem:[#allocation6 + $0xdb4] sm:$0xf0]  ;;  %v10084_v49 = vld [vmem:[#allocation6 + $0x9fc] sm:$0xf0]  ;;  %v11178_v35 = vld [vmem:[#allocation6 + $0x70c] sm:$0xf] }
 0x5eb   :  { %6949 = vmatpush.bf16.msrb.mxu1 %v9387_v3  ;;  %v10140_v3 = vld [vmem:[#allocation6 + $0xa6c] sm:$0xf0]  ;;  %v6691_v10 = vpop.f32.mrf.mxu2  ;;  %v10087_v48 = vor.u32 %v11269_v30, %v10084_v49  ;;  %v10196_v30 = vld [vmem:[#allocation6 + $0xadc] sm:$0xf0] }
 0x5ec   :  { %6922 = vmatpush.bf16.msra.mxu3 %v8911_v4  ;;  %11451 = vtanh.f32 %v6690_v53  ;;  %v6650_v4 = vadd.f32 %v6649_v61, %v6636_v5  ;;  %v10143_v41 = vor.u32 %v11283_v52, %v10140_v3  ;;  %v9832_v5 = vld [vmem:[#allocation6 + $0x804] sm:$0xf0]  ;;  %v11262_v53 = vld [vmem:[#allocation6 + $0x9ac] sm:$0xf] }
 0x5ed   :  { %6936 = vmatpush.bf16.msrb.mxu0 %v9135_v11  ;;  %v11066_v11 = vld [vmem:[#allocation6 + $0x38c] sm:$0xf]  ;;  %v10504_v61 = vld [vmem:[#allocation6 + $0xd44] sm:$0xf0]  ;;  %v9835_v3 = vor.u32 %v11206_v55, %v9832_v5  ;;  %v10059_v58 = vor.u32 %v11262_v53, %v10056_v54  ;;  %v9026_v5 = vld [vmem:[#allocation6 + $0x198] sm:$0xf] }
 0x5ee   :  { %6964 = vmatpush.bf16.msrb.mxu2 %v9583_v40  ;;  %v9272_v40 = vld [vmem:[#allocation6 + $0x3a4] sm:$0xf0]  ;;  %v6664_v63 = vadd.f32 %v6663_v57, %v6650_v4  ;;  %v11199_v4 = vld [vmem:[#allocation6 + $0x7b4] sm:$0xf]  ;;  %v10507_v47 = vor.u32 %v11374_v59, %v10504_v61  ;;  %v9250_v54 = vld [vmem:[#allocation6 + $0x358] sm:$0xf] }
 0x5ef   :  { %6950 = vmatpush.bf16.msrb.mxu1 %v9359_v38  ;;  %v9275_v38 = vor.u32 %v11066_v11, %v9272_v40  ;;  %v10280_v57 = vld [vmem:[#allocation6 + $0xb84] sm:$0xf0]  ;;  %v11255_v11 = vld [vmem:[#allocation6 + $0x974] sm:$0xf]  ;;  %v10028_v40 = vld [vmem:[#allocation6 + $0x98c] sm:$0xf0] }
 0x5f0   :  { %6923 = vmatpush.bf16.msra.mxu3 %v8883_v8  ;;  %v11276_v8 = vld [vmem:[#allocation6 + $0xa1c] sm:$0xf]  ;;  %v6678_v24 = vadd.f32 %v6677_v7, %v6664_v63  ;;  %v10476_v7 = vld [vmem:[#allocation6 + $0xd0c] sm:$0xf0]  ;;  %v10392_v55 = vld [vmem:[#allocation6 + $0xc64] sm:$0xf0] }
 0x5f1   :  { %6937 = vmatpush.bf16.msrb.mxu0 %v9107_v46  ;;  %v10367_v46 = vor.u32 %v11339_v19, %v10364_v42  ;;  %v10115_v29 = vor.u32 %v11276_v8, %v10112_v62  ;;  %v11311_v19 = vld [vmem:[#allocation6 + $0xb34] sm:$0xf]  ;;  %v10252_v42 = vld [vmem:[#allocation6 + $0xb4c] sm:$0xf0]  ;;  %v11360_v8 = vld [vmem:[#allocation6 + $0xcbc] sm:$0xf] }
 0x5f2   :  { %6965 = vmatpush.bf16.msrb.mxu2 %v9555_v25  ;;  %v11388_v25 = vld [vmem:[#allocation6 + $0xd9c] sm:$0xf]  ;;  %v11452_v56 = vpop.eup %11451  ;;  %v6692_v28 = vadd.f32 %v6691_v10, %v6678_v24  ;;  %v10000_v10 = vld [vmem:[#allocation6 + $0x954] sm:$0xf0]  ;;  %v10255_v14 = vor.u32 %v11311_v19, %v10252_v42  ;;  %v11007_v53 = vld [vmem:[#allocation6 + $0x1b0] sm:$0xf0] }
 0x5f3   :  { %6951 = vmatpush.bf16.msrb.mxu1 %v9331_v32  ;;  %7380 = vst [vmem:[%s12543_s15] sm:$0xff] %v11452_v56  ;;  %v10563_v51 = vor.u32 %v11388_v25, %v10560_v6  ;;  %v9860_v32 = vld [vmem:[#allocation6 + $0x83c] sm:$0xf0]  ;;  %v10448_v62 = vld [vmem:[#allocation6 + $0xcd4] sm:$0xf0]  ;;  %v11304_v24 = vld [vmem:[#allocation6 + $0xafc] sm:$0xf] }
 0x5f4   :  { %6924 = vmatpush.bf16.msra.mxu3 %v8855_v12  ;;  %11453 = vtanh.f32 %v6692_v28  ;;  %v10339_v12 = vor.u32 %v11332_v36, %v10336_v26  ;;  %v11185_v36 = vld [vmem:[#allocation6 + $0x744] sm:$0xf]  ;;  %v10451_v26 = vor.u32 %v11360_v8, %v10448_v62  ;;  %v9748_v56 = vld [vmem:[#allocation6 + $0x75c] sm:$0xf0]  ;;  %v11063_v59 = vld [vmem:[#allocation6 + $0x370] sm:$0xf0] }
 0x5f5   :  { %6938 = vmatpush.bf16.msrb.mxu0 %v9079_v20  ;;  %v10308_v20 = vld [vmem:[#allocation6 + $0xbbc] sm:$0xf0]  ;;  %v11241_v28 = vld [vmem:[#allocation6 + $0x904] sm:$0xf]  ;;  %v9751_v49 = vor.u32 %v11185_v36, %v9748_v56  ;;  %v9698_v61 = vld [vmem:[#allocation6 + $0x6d8] sm:$0xf] }
 0x5f6   :  { %6966 = vmatpush.bf16.msrb.mxu2 %v9527_v39  ;;  %v9863_v39 = vor.u32 %v11213_v15, %v9860_v32  ;;  %v10311_v60 = vor.u32 %v11325_v45, %v10308_v20  ;;  %v11353_v15 = vld [vmem:[#allocation6 + $0xc84] sm:$0xf]  ;;  %v11234_v45 = vld [vmem:[#allocation6 + $0x8cc] sm:$0xf]  ;;  %v8998_v42 = vld [vmem:[#allocation6 + $0x160] sm:$0xf] }
 0x5f7   :  { %6952 = vmatpush.bf16.msrb.mxu1 %v9303_v1  ;;  %v11318_v1 = vld [vmem:[#allocation6 + $0xb6c] sm:$0xf]  ;;  %v11297_v32 = vld [vmem:[#allocation6 + $0xac4] sm:$0xf]  ;;  %v8970_v36 = vld [vmem:[#allocation6 + $0x128] sm:$0xf] }
 0x5f8   :  { %6925 = vmatpush.bf16.msra.mxu3 %v8827_v44  ;;  %v9804_v44 = vld [vmem:[#allocation6 + $0x7cc] sm:$0xf0]  ;;  %v9194_v56 = vld [vmem:[#allocation6 + $0x2e8] sm:$0xf] }
 0x5f9   :  { %6939 = vmatpush.bf16.msrb.mxu0 %v9051_v50  ;;  %v10283_v50 = vor.u32 %v11318_v1, %v10280_v57  ;;  %v9807_v63 = vor.u32 %v11199_v4, %v9804_v44  ;;  %v11175_v1 = vld [vmem:[#allocation6 + $0x6f0] sm:$0xf0]  ;;  %v9723_v57 = vor.u32 %v11178_v35, %v9720_v2  ;;  %v10168_v4 = vld [vmem:[#allocation6 + $0xaa4] sm:$0xf0] }
 0x5fa   :  { %6967 = vmatpush.bf16.msrb.mxu2 %v9499_v37  ;;  %v11454_v52 = vpop.eup %11453  ;;  %v11367_v37 = vld [vmem:[#allocation6 + $0xcf4] sm:$0xf]  ;;  %v9699_v19 = vor.u32 %v11175_v1, %v9698_v61  ;;  %v9390_v1 = vld [vmem:[#allocation6 + $0x470] sm:$0xf] }
 0x5fb   :  { %6953 = vmatpush.bf16.msrb.mxu1 %v9275_v38  ;;  %6926 = vmatmul.bf16.vlgmr.msra.gmra.mxu3 %v12349_v18  ;;  %7388 = vst [vmem:[%s12543_s15 + $0x38] sm:$0xff] %v11454_v52  ;;  %v10479_v34 = vor.u32 %v11367_v37, %v10476_v7  ;;  %v11248_v38 = vld [vmem:[#allocation6 + $0x93c] sm:$0xf]  ;;  %v12415_v44 = vpop.f32.mrf.mxu1  ;;  %v11119_v37 = vld [vmem:[#allocation6 + $0x530] sm:$0xf0]  ;;  %v9251_v7 = vor.u32 %v11063_v59, %v9250_v54 }
 0x5fc   :  { %6974 = vmatpush.bf16.msrb.mxu3 %v9919_v17  ;;  %6940 = vmatmul.bf16.vlgmr.msrb.gmra.mxu0 %v12351_v31  ;;  %v10031_v17 = vor.u32 %v11255_v11, %v10028_v40  ;;  %v10003_v6 = vor.u32 %v11248_v38, %v10000_v10  ;;  %v9027_v11 = vor.u32 %v11007_v53, %v9026_v5  ;;  %v4265_v40 = vperm.slane %v12385_v23, 1  ;;  %v9670_v38 = vld [vmem:[#allocation6 + $0x6a0] sm:$0xf]  ;;  %v11168_v10 = vld [vmem:[#allocation6 + $0x6b8] sm:$0xf0] }
 0x5fd   :  { %6988 = vmatpush.bf16.msra.mxu0 %v10143_v41  ;;  %6968 = vmatmul.bf16.vlgmr.msrb.gmra.mxu2 %v12355_v22  ;;  %v11192_v41 = vld [vmem:[#allocation6 + $0x77c] sm:$0xf]  ;;  %v9614_v5 = vld [vmem:[#allocation6 + $0x630] sm:$0xf]  ;;  %v11154_v53 = vld [vmem:[#allocation6 + $0x648] sm:$0xf0] }
 0x5fe   :  { %7016 = vmatpush.bf16.msra.mxu2 %v10591_v43  ;;  %6954 = vmatmul.bf16.vlgmr.msrb.gmra.mxu1 %v12353_v0  ;;  %v9776_v43 = vld [vmem:[#allocation6 + $0x794] sm:$0xf0]  ;;  %v9110_v23 = vld [vmem:[#allocation6 + $0x240] sm:$0xf] }
 0x5ff   :  { %7002 = vmatpush.bf16.msra.mxu1 %v10367_v46  ;;  %v10224_v46 = vld [vmem:[#allocation6 + $0xb14] sm:$0xf0]  ;;  %v9779_v25 = vor.u32 %v11192_v41, %v9776_v43  ;;  %v11056_v43 = vld [vmem:[#allocation6 + $0x338] sm:$0xf0] }
 0x600   :  { %6975 = vmatpush.bf16.msrb.mxu3 %v9891_v33  ;;  %v9972_v33 = vld [vmem:[#allocation6 + $0x91c] sm:$0xf0]  ;;  %v12418_v41 = vpop.f32.mrf.mxu2 }
 0x601   :  { %6989 = vmatpush.bf16.msra.mxu0 %v10115_v29  ;;  %v10227_v29 = vor.u32 %v11304_v24, %v10224_v46  ;;  %v9446_v24 = vld [vmem:[#allocation6 + $0x4e0] sm:$0xf]  ;;  %v11112_v46 = vld [vmem:[#allocation6 + $0x4f8] sm:$0xf0] }
 0x602   :  { %7017 = vmatpush.bf16.msra.mxu2 %v10563_v51  ;;  %v10420_v51 = vld [vmem:[#allocation6 + $0xc9c] sm:$0xf0] }
 0x603   :  { %7003 = vmatpush.bf16.msra.mxu1 %v10339_v12  ;;  %v9975_v12 = vor.u32 %v11241_v28, %v9972_v33  ;;  %v10423_v20 = vor.u32 %v11353_v15, %v10420_v51  ;;  %v11049_v28 = vld [vmem:[#allocation6 + $0x300] sm:$0xf0]  ;;  %v9642_v33 = vld [vmem:[#allocation6 + $0x668] sm:$0xf]  ;;  %v9447_v15 = vor.u32 %v11112_v46, %v9446_v24  ;;  %v11140_v24 = vld [vmem:[#allocation6 + $0x5d8] sm:$0xf0] }
 0x604   :  { %6976 = vmatpush.bf16.msrb.mxu3 %v9863_v39  ;;  %v9944_v39 = vld [vmem:[#allocation6 + $0x8e4] sm:$0xf0]  ;;  %v9195_v35 = vor.u32 %v11049_v28, %v9194_v56  ;;  %v11084_v56 = vld [vmem:[#allocation6 + $0x418] sm:$0xf0] }
 0x605   :  { %6990 = vmatpush.bf16.msra.mxu0 %v10087_v48  ;;  %v11346_v48 = vld [vmem:[#allocation6 + $0xc4c] sm:$0xf]  ;;  %v9947_v52 = vor.u32 %v11234_v45, %v9944_v39 }
 0x606   :  { %7018 = vmatpush.bf16.msra.mxu2 %v10535_v9  ;;  %v10199_v9 = vor.u32 %v11297_v32, %v10196_v30  ;;  %v10986_v39 = vld [vmem:[#allocation6 + $0x108] sm:$0xf0] }
 0x607   :  { %7004 = vmatpush.bf16.msra.mxu1 %v10311_v60  ;;  %v6717_v60 = vpop.f32.mrf.mxu0 }
 0x608   :  { %6977 = vmatpush.bf16.msrb.mxu3 %v9835_v3  ;;  %v6703_v3 = vpop.f32.mrf.mxu3 }
 0x609   :  { %6991 = vmatpush.bf16.msra.mxu0 %v10059_v58  ;;  %v11290_v58 = vld [vmem:[#allocation6 + $0xa8c] sm:$0xf]  ;;  %v6704_v8 = vadd.f32 %v6703_v3, %v4265_v40  ;;  %v9615_v3 = vor.u32 %v11154_v53, %v9614_v5  ;;  %v8830_v5 = vld [vmem:[#allocation6 + $0x10] sm:$0xf] }
 0x60a   :  { %7019 = vmatpush.bf16.msra.mxu2 %v10507_v47  ;;  %v10395_v47 = vor.u32 %v11346_v48, %v10392_v55  ;;  %v9166_v48 = vld [vmem:[#allocation6 + $0x2b0] sm:$0xf]  ;;  %v6733_v55 = vpop.f32.mrf.mxu1  ;;  %v10958_v53 = vld [vmem:[#allocation6 + $0x28] sm:$0xf0] }
 0x60b   :  { %7005 = vmatpush.bf16.msra.mxu1 %v10283_v50  ;;  %v9474_v50 = vld [vmem:[#allocation6 + $0x518] sm:$0xf]  ;;  %v6718_v32 = vadd.f32 %v6717_v60, %v6704_v8  ;;  %v12426_v60 = vpop.f32.mrf.mxu2  ;;  %v11028_v8 = vld [vmem:[#allocation6 + $0x258] sm:$0xf0] }
 0x60c   :  { %6978 = vmatpush.bf16.msrb.mxu3 %v9807_v63  ;;  %v11000_v63 = vld [vmem:[#allocation6 + $0x178] sm:$0xf0]  ;;  %v9111_v28 = vor.u32 %v11028_v8, %v9110_v23 }
 0x60d   :  { %6992 = vmatpush.bf16.msra.mxu0 %v10031_v17  ;;  %v9222_v17 = vld [vmem:[#allocation6 + $0x320] sm:$0xf]  ;;  %v8999_v62 = vor.u32 %v11000_v63, %v8998_v42  ;;  %v6732_v59 = vadd.f32 %v12415_v44, %v6718_v32  ;;  %v9362_v63 = vld [vmem:[#allocation6 + $0x438] sm:$0xf]  ;;  %v10965_v32 = vld [vmem:[#allocation6 + $0x60] sm:$0xf0] }
 0x60e   :  { %7020 = vmatpush.bf16.msra.mxu2 %v10479_v34  ;;  %v10171_v34 = vor.u32 %v11290_v58, %v10168_v4  ;;  %v8914_v58 = vld [vmem:[#allocation6 + $0xb8] sm:$0xf]  ;;  %v10979_v4 = vld [vmem:[#allocation6 + $0xd0] sm:$0xf0] }
 0x60f   :  { %7006 = vmatpush.bf16.msra.mxu1 %v10255_v14  ;;  %v9475_v14 = vor.u32 %v11119_v37, %v9474_v50  ;;  %v6719_v51 = vpop.f32.mrf.mxu0  ;;  %v11035_v50 = vld [vmem:[#allocation6 + $0x290] sm:$0xf0]  ;;  %v9586_v37 = vld [vmem:[#allocation6 + $0x5f8] sm:$0xf]  ;;  %v6746_v44 = vadd.f32 %v12418_v41, %v6732_v59  ;;  %v8915_v42 = vor.u32 %v10979_v4, %v8914_v58 }
 0x610   :  { %6979 = vmatpush.bf16.msrb.mxu3 %v9779_v25  ;;  %v9223_v25 = vor.u32 %v11056_v43, %v9222_v17  ;;  %v6705_v45 = vpop.f32.mrf.mxu3  ;;  %v11091_v17 = vld [vmem:[#allocation6 + $0x450] sm:$0xf0]  ;;  %v9922_v58 = vld [vmem:[#allocation6 + $0x898] sm:$0xf] }
 0x611   :  { %6993 = vmatpush.bf16.msra.mxu0 %v10003_v6  ;;  %v9671_v6 = vor.u32 %v11168_v10, %v9670_v38  ;;  %v8886_v10 = vld [vmem:[#allocation6 + $0x80] sm:$0xf]  ;;  %v11231_v4 = vld [vmem:[#allocation6 + $0x8b0] sm:$0xf0] }
 0x612   :  { %7021 = vmatpush.bf16.msra.mxu2 %v10451_v26  ;;  %v10993_v26 = vld [vmem:[#allocation6 + $0x140] sm:$0xf0] }
 0x613   :  { %7007 = vmatpush.bf16.msra.mxu1 %v10227_v29  ;;  %v11161_v29 = vld [vmem:[#allocation6 + $0x680] sm:$0xf0]  ;;  %v8971_v30 = vor.u32 %v10993_v26, %v8970_v36  ;;  %v9334_v26 = vld [vmem:[#allocation6 + $0x400] sm:$0xf] }
 0x614   :  { %6980 = vmatpush.bf16.msrb.mxu3 %v9751_v49  ;;  %v9418_v49 = vld [vmem:[#allocation6 + $0x4a8] sm:$0xf]  ;;  %v9643_v2 = vor.u32 %v11161_v29, %v9642_v33 }
 0x615   :  { %6994 = vmatpush.bf16.msra.mxu0 %v9975_v12  ;;  %v11105_v12 = vld [vmem:[#allocation6 + $0x4c0] sm:$0xf0] }
 0x616   :  { %7022 = vmatpush.bf16.msra.mxu2 %v10423_v20  ;;  %v8942_v20 = vld [vmem:[#allocation6 + $0xf0] sm:$0xf]  ;;  %v9419_v54 = vor.u32 %v11105_v12, %v9418_v49  ;;  %v11021_v12 = vld [vmem:[#allocation6 + $0x220] sm:$0xf0] }
 0x617   :  { %7008 = vmatpush.bf16.msra.mxu1 %v10199_v9  ;;  %v11042_v9 = vld [vmem:[#allocation6 + $0x2c8] sm:$0xf0]  ;;  %v8943_v61 = vor.u32 %v10986_v39, %v8942_v20  ;;  %v9306_v20 = vld [vmem:[#allocation6 + $0x3c8] sm:$0xf] }
 0x618   :  { %6981 = vmatpush.bf16.msrb.mxu3 %v9723_v57  ;;  %v11098_v57 = vld [vmem:[#allocation6 + $0x488] sm:$0xf0] }
 0x619   :  { %6995 = vmatpush.bf16.msra.mxu0 %v9947_v52  ;;  %v9167_v52 = vor.u32 %v11042_v9, %v9166_v48  ;;  %v6773_v38 = vpop.f32.mrf.mxu0  ;;  %v11077_v9 = vld [vmem:[#allocation6 + $0x3e0] sm:$0xf0] }
 0x61a   :  { %7023 = vmatpush.bf16.msra.mxu2 %v10395_v47  ;;  %v9138_v47 = vld [vmem:[#allocation6 + $0x278] sm:$0xf] }
 0x61b   :  { %7009 = vmatpush.bf16.msra.mxu1 %v10171_v34  ;;  %6982 = vmatmul.bf16.vlgmr.msrb.gmra.mxu3 %v12357_v13  ;;  %v9139_v34 = vor.u32 %v11035_v50, %v9138_v47  ;;  %v6787_v41 = vpop.f32.mrf.mxu1 }
 0x61c   :  { %7030 = vmatpush.bf16.msra.mxu3 %v9027_v11  ;;  %6996 = vmatmul.bf16.vlgmr.msra.gmra.mxu0 %v12359_v21  ;;  %v6706_v11 = vadd.f32 %v6705_v45, %v4265_v40  ;;  %v9335_v45 = vor.u32 %v11084_v56, %v9334_v26 }
 0x61d   :  { %7044 = vmatpush.bf16.msrb.mxu0 %v9251_v7  ;;  %7024 = vmatmul.bf16.vlgmr.msra.gmra.mxu2 %v12363_v27  ;;  %v11147_v7 = vld [vmem:[#allocation6 + $0x610] sm:$0xf0] }
 0x61e   :  { %7072 = vmatpush.bf16.msrb.mxu2 %v9699_v19  ;;  %7010 = vmatmul.bf16.vlgmr.msra.gmra.mxu1 %v12361_v16  ;;  %v9391_v19 = vor.u32 %v11098_v57, %v9390_v1  ;;  %v9587_v43 = vor.u32 %v11147_v7, %v9586_v37  ;;  %v6720_v40 = vadd.f32 %v6719_v51, %v6706_v11  ;;  %v6759_v46 = vpop.f32.mrf.mxu3  ;;  %v9082_v51 = vld [vmem:[#allocation6 + $0x208] sm:$0xf]  ;;  %v11014_v1 = vld [vmem:[#allocation6 + $0x1e8] sm:$0xf0]  ;;  %v10146_v37 = vld [vmem:[#allocation6 + $0xa58] sm:$0xf] }
 0x61f   :  { %7058 = vmatpush.bf16.msrb.mxu1 %v9475_v14  ;;  %v10972_v14 = vld [vmem:[#allocation6 + $0x98] sm:$0xf0]  ;;  %v9307_v11 = vor.u32 %v11077_v9, %v9306_v20  ;;  %v11287_v7 = vld [vmem:[#allocation6 + $0xa70] sm:$0xf0]  ;;  %v11273_v20 = vld [vmem:[#allocation6 + $0xa00] sm:$0xf0] }
 0x620   :  { %7031 = vmatpush.bf16.msra.mxu3 %v8999_v62  ;;  %v9558_v62 = vld [vmem:[#allocation6 + $0x5c0] sm:$0xf]  ;;  %v8887_v36 = vor.u32 %v10972_v14, %v8886_v10  ;;  %v6801_v29 = vpop.f32.mrf.mxu2  ;;  %v10370_v10 = vld [vmem:[#allocation6 + $0xc18] sm:$0xf]  ;;  %v11343_v14 = vld [vmem:[#allocation6 + $0xc30] sm:$0xf0]  ;;  %v10147_v8 = vor.u32 %v11287_v7, %v10146_v37 }
 0x621   :  { %7045 = vmatpush.bf16.msrb.mxu0 %v9223_v25  ;;  %v9363_v25 = vor.u32 %v11091_v17, %v9362_v63  ;;  %v9559_v33 = vor.u32 %v11140_v24, %v9558_v62  ;;  %v6775_v50 = vpop.f32.mrf.mxu0  ;;  %v11399_v63 = vld [vmem:[#allocation6 + $0xdf0] sm:$0xf0]  ;;  %v9278_v17 = vld [vmem:[#allocation6 + $0x390] sm:$0xf]  ;;  %v9894_v62 = vld [vmem:[#allocation6 + $0x860] sm:$0xf]  ;;  %v10371_v56 = vor.u32 %v11343_v14, %v10370_v10 }
 0x622   :  { %7073 = vmatpush.bf16.msrb.mxu2 %v9671_v6  ;;  %v6760_v6 = vadd.f32 %v6759_v46, %v6746_v44  ;;  %v11385_v9 = vld [vmem:[#allocation6 + $0xd80] sm:$0xf0]  ;;  %v11315_v10 = vld [vmem:[#allocation6 + $0xb50] sm:$0xf0] }
 0x623   :  { %7059 = vmatpush.bf16.msrb.mxu1 %v9447_v15  ;;  %v8858_v15 = vld [vmem:[#allocation6 + $0x48] sm:$0xf] }
 0x624   :  { %7032 = vmatpush.bf16.msra.mxu3 %v8971_v30  ;;  %v6734_v30 = vadd.f32 %v6733_v55, %v6720_v40  ;;  %v6774_v49 = vadd.f32 %v6773_v38, %v6760_v6  ;;  %v8859_v48 = vor.u32 %v10965_v32, %v8858_v15  ;;  %v9502_v55 = vld [vmem:[#allocation6 + $0x550] sm:$0xf]  ;;  %v6789_v38 = vpop.f32.mrf.mxu1  ;;  %v9923_v40 = vor.u32 %v11231_v4, %v9922_v58  ;;  %v10118_v6 = vld [vmem:[#allocation6 + $0xa20] sm:$0xf]  ;;  %v11336_v15 = vld [vmem:[#allocation6 + $0xbf8] sm:$0xf0] }
 0x625   :  { %7046 = vmatpush.bf16.msrb.mxu0 %v9195_v35  ;;  %v9530_v35 = vld [vmem:[#allocation6 + $0x588] sm:$0xf]  ;;  %v10510_v58 = vld [vmem:[#allocation6 + $0xd30] sm:$0xf]  ;;  %v11378_v4 = vld [vmem:[#allocation6 + $0xd48] sm:$0xf0] }
 0x626   :  { %7074 = vmatpush.bf16.msrb.mxu2 %v9643_v2  ;;  %v11133_v2 = vld [vmem:[#allocation6 + $0x5a0] sm:$0xf0]  ;;  %v6788_v39 = vadd.f32 %v6787_v41, %v6774_v49  ;;  %v6748_v57 = vadd.f32 %v12426_v60, %v6734_v30  ;;  %v6761_v47 = vpop.f32.mrf.mxu3  ;;  %v11224_v41 = vld [vmem:[#allocation6 + $0x878] sm:$0xf0] }
 0x627   :  { %7060 = vmatpush.bf16.msrb.mxu1 %v9419_v54  ;;  %v9083_v54 = vor.u32 %v11021_v12, %v9082_v51  ;;  %v9531_v59 = vor.u32 %v11133_v2, %v9530_v35  ;;  %v9895_v30 = vor.u32 %v11224_v41, %v9894_v62  ;;  %v9866_v12 = vld [vmem:[#allocation6 + $0x828] sm:$0xf]  ;;  %v11217_v35 = vld [vmem:[#allocation6 + $0x840] sm:$0xf0]  ;;  %v11196_v62 = vld [vmem:[#allocation6 + $0x798] sm:$0xf0] }
 0x628   :  { %7033 = vmatpush.bf16.msra.mxu3 %v8943_v61  ;;  %v9054_v61 = vld [vmem:[#allocation6 + $0x1d0] sm:$0xf]  ;;  %v6762_v44 = vadd.f32 %v6761_v47, %v6748_v57  ;;  %v10454_v41 = vld [vmem:[#allocation6 + $0xcc0] sm:$0xf] }
 0x629   :  { %7047 = vmatpush.bf16.msrb.mxu0 %v9167_v52  ;;  %v6802_v52 = vadd.f32 %v6801_v29, %v6788_v39  ;;  %v9055_v60 = vor.u32 %v11014_v1, %v9054_v61  ;;  %v10342_v29 = vld [vmem:[#allocation6 + $0xbe0] sm:$0xf]  ;;  %v9838_v61 = vld [vmem:[#allocation6 + $0x7f0] sm:$0xf] }
 0x62a   :  { %7075 = vmatpush.bf16.msrb.mxu2 %v9615_v3  ;;  %v11126_v3 = vld [vmem:[#allocation6 + $0x568] sm:$0xf0]  ;;  %v6776_v23 = vadd.f32 %v6775_v50, %v6762_v44  ;;  %v10343_v39 = vor.u32 %v11336_v15, %v10342_v29  ;;  %v10062_v57 = vld [vmem:[#allocation6 + $0x9b0] sm:$0xf]  ;;  %v11203_v44 = vld [vmem:[#allocation6 + $0x7d0] sm:$0xf0] }
 0x62b   :  { %7061 = vmatpush.bf16.msrb.mxu1 %v9391_v19  ;;  %v10594_v19 = vld [vmem:[#allocation6 + $0xdd8] sm:$0xf]  ;;  %11455 = vtanh.f32 %v6802_v52  ;;  %v11266_v52 = vld [vmem:[#allocation6 + $0x9c8] sm:$0xf0]  ;;  %v10286_v47 = vld [vmem:[#allocation6 + $0xb70] sm:$0xf] }
 0x62c   :  { %7034 = vmatpush.bf16.msra.mxu3 %v8915_v42  ;;  %v8831_v42 = vor.u32 %v10958_v53, %v8830_v5  ;;  %v10595_v24 = vor.u32 %v11399_v63, %v10594_v19  ;;  %v6790_v26 = vadd.f32 %v6789_v38, %v6776_v23  ;;  %v10314_v5 = vld [vmem:[#allocation6 + $0xba8] sm:$0xf]  ;;  %v11329_v53 = vld [vmem:[#allocation6 + $0xbc0] sm:$0xf0]  ;;  %v10063_v7 = vor.u32 %v11266_v52, %v10062_v57  ;;  %v9810_v19 = vld [vmem:[#allocation6 + $0x7b8] sm:$0xf] }
 0x62d   :  { %7048 = vmatpush.bf16.msrb.mxu0 %v9139_v34  ;;  %v11070_v34 = vld [vmem:[#allocation6 + $0x3a8] sm:$0xf0]  ;;  %v10034_v63 = vld [vmem:[#allocation6 + $0x978] sm:$0xf]  ;;  %v9811_v14 = vor.u32 %v11203_v44, %v9810_v19  ;;  %v11189_v15 = vld [vmem:[#allocation6 + $0x760] sm:$0xf0] }
 0x62e   :  { %7076 = vmatpush.bf16.msrb.mxu2 %v9587_v43  ;;  %v9503_v43 = vor.u32 %v11126_v3, %v9502_v55  ;;  %v9279_v46 = vor.u32 %v11070_v34, %v9278_v17  ;;  %v11210_v55 = vld [vmem:[#allocation6 + $0x808] sm:$0xf0]  ;;  %v10315_v3 = vor.u32 %v11329_v53, %v10314_v5  ;;  %v11259_v17 = vld [vmem:[#allocation6 + $0x990] sm:$0xf0]  ;;  %v10258_v38 = vld [vmem:[#allocation6 + $0xb38] sm:$0xf] }
 0x62f   :  { %7062 = vmatpush.bf16.msrb.mxu1 %v9363_v25  ;;  %v6803_v25 = vpop.f32.mrf.mxu2  ;;  %v9839_v37 = vor.u32 %v11210_v55, %v9838_v61  ;;  %v10035_v23 = vor.u32 %v11259_v17, %v10034_v63  ;;  %v11238_v53 = vld [vmem:[#allocation6 + $0x8e8] sm:$0xf0]  ;;  %v9028_v55 = vld [vmem:[#allocation6 + $0x1b4] sm:$0xf0]  ;;  %v11060_v57 = vld [vmem:[#allocation6 + $0x35c] sm:$0xf] }
 0x630   :  { %7035 = vmatpush.bf16.msra.mxu3 %v8887_v36  ;;  %v11280_v36 = vld [vmem:[#allocation6 + $0xa38] sm:$0xf0]  ;;  %v6804_v51 = vadd.f32 %v6803_v25, %v6790_v26  ;;  %v10259_v25 = vor.u32 %v11315_v10, %v10258_v38  ;;  %v12445_v63 = vld [vmem:[#allocation24] sm:$0xff]  ;;  %v10997_v10 = vld [vmem:[#allocation6 + $0x164] sm:$0xf] }
 0x631   :  { %7049 = vmatpush.bf16.msrb.mxu0 %v9111_v28  ;;  %v10566_v28 = vld [vmem:[#allocation6 + $0xda0] sm:$0xf]  ;;  %v11456_v32 = vpop.eup %11455  ;;  %v10119_v49 = vor.u32 %v11280_v36, %v10118_v6  ;;  %v11364_v6 = vld [vmem:[#allocation6 + $0xcd8] sm:$0xf0]  ;;  %v4266_v17 = vperm.slane %v12445_v63, 2 }
 0x632   :  { %7077 = vmatpush.bf16.msrb.mxu2 %v9559_v33  ;;  %v11392_v33 = vld [vmem:[#allocation6 + $0xdb8] sm:$0xf0]  ;;  %7381 = vst [vmem:[%s12543_s15 + $0x8] sm:$0xff] %v11456_v32  ;;  %11457 = vtanh.f32 %v6804_v51  ;;  %v10230_v36 = vld [vmem:[#allocation6 + $0xb00] sm:$0xf]  ;;  %v10455_v29 = vor.u32 %v11364_v6, %v10454_v41 }
 0x633   :  { %7063 = vmatpush.bf16.msrb.mxu1 %v9335_v45  ;;  %v10567_v2 = vor.u32 %v11392_v33, %v10566_v28  ;;  %v10090_v45 = vld [vmem:[#allocation6 + $0x9e8] sm:$0xf]  ;;  %v11308_v26 = vld [vmem:[#allocation6 + $0xb18] sm:$0xf0]  ;;  %v11245_v51 = vld [vmem:[#allocation6 + $0x920] sm:$0xf0] }
 0x634   :  { %7036 = vmatpush.bf16.msra.mxu3 %v8859_v48  ;;  %v10538_v48 = vld [vmem:[#allocation6 + $0xd68] sm:$0xf] }
 0x635   :  { %7050 = vmatpush.bf16.msrb.mxu0 %v9083_v54  ;;  %v9867_v54 = vor.u32 %v11217_v35, %v9866_v12  ;;  %v10539_v1 = vor.u32 %v11385_v9, %v10538_v48  ;;  %v9754_v33 = vld [vmem:[#allocation6 + $0x748] sm:$0xf]  ;;  %v11357_v12 = vld [vmem:[#allocation6 + $0xca0] sm:$0xf0]  ;;  %v11182_v48 = vld [vmem:[#allocation6 + $0x728] sm:$0xf0] }
 0x636   :  { %7078 = vmatpush.bf16.msrb.mxu2 %v9531_v59  ;;  %v10091_v59 = vor.u32 %v11273_v20, %v10090_v45  ;;  %v9978_v32 = vld [vmem:[#allocation6 + $0x908] sm:$0xf]  ;;  %v9755_v45 = vor.u32 %v11189_v15, %v9754_v33  ;;  %v9950_v9 = vld [vmem:[#allocation6 + $0x8d0] sm:$0xf]  ;;  %v10990_v33 = vld [vmem:[#allocation6 + $0x12c] sm:$0xf] }
 0x637   :  { %7064 = vmatpush.bf16.msrb.mxu1 %v9307_v11  ;;  %v11322_v11 = vld [vmem:[#allocation6 + $0xb88] sm:$0xf0]  ;;  %v10202_v35 = vld [vmem:[#allocation6 + $0xac8] sm:$0xf]  ;;  %v9979_v20 = vor.u32 %v11245_v51, %v9978_v32 }
 0x638   :  { %7037 = vmatpush.bf16.msra.mxu3 %v8831_v42  ;;  %v11458_v50 = vpop.eup %11457  ;;  %v10511_v42 = vor.u32 %v11378_v4, %v10510_v58  ;;  %v10287_v34 = vor.u32 %v11322_v11, %v10286_v47  ;;  %v11172_v58 = vld [vmem:[#allocation6 + $0x6dc] sm:$0xf]  ;;  %v9700_v4 = vld [vmem:[#allocation6 + $0x6f4] sm:$0xf0]  ;;  %v9951_v11 = vor.u32 %v11238_v53, %v9950_v9  ;;  %v11046_v15 = vld [vmem:[#allocation6 + $0x2ec] sm:$0xf] }
 0x639   :  { %7051 = vmatpush.bf16.msrb.mxu0 %v9055_v60  ;;  %7389 = vst [vmem:[%s12543_s15 + $0x40] sm:$0xff] %v11458_v50  ;;  %v10482_v60 = vld [vmem:[#allocation6 + $0xcf8] sm:$0xf]  ;;  %v6829_v52 = vpop.f32.mrf.mxu0  ;;  %v9703_v38 = vor.u32 %v11172_v58, %v9700_v4  ;;  %v9196_v32 = vld [vmem:[#allocation6 + $0x304] sm:$0xf0] }
 0x63a   :  { %7079 = vmatpush.bf16.msrb.mxu2 %v9503_v43  ;;  %v11371_v43 = vld [vmem:[#allocation6 + $0xd10] sm:$0xf0]  ;;  %v11158_v51 = vld [vmem:[#allocation6 + $0x66c] sm:$0xf]  ;;  %v8944_v53 = vld [vmem:[#allocation6 + $0x10c] sm:$0xf0] }
 0x63b   :  { %7065 = vmatpush.bf16.msrb.mxu1 %v9279_v46  ;;  %7038 = vmatmul.bf16.vlgmr.msra.gmra.mxu3 %v12349_v18  ;;  %v11252_v46 = vld [vmem:[#allocation6 + $0x958] sm:$0xf0]  ;;  %v12443_v19 = vpop.f32.mrf.mxu1  ;;  %v11095_v4 = vld [vmem:[#allocation6 + $0x474] sm:$0xf] }
 0x63c   :  { %7086 = vmatpush.bf16.msrb.mxu3 %v9923_v40  ;;  %7052 = vmatmul.bf16.vlgmr.msrb.gmra.mxu0 %v12351_v31  ;;  %v9782_v40 = vld [vmem:[#allocation6 + $0x780] sm:$0xf] }
 0x63d   :  { %7100 = vmatpush.bf16.msra.mxu0 %v10147_v8  ;;  %7080 = vmatmul.bf16.vlgmr.msrb.gmra.mxu2 %v12355_v22  ;;  %v10483_v8 = vor.u32 %v11371_v43, %v10482_v60  ;;  %v9476_v60 = vld [vmem:[#allocation6 + $0x534] sm:$0xf0] }
 0x63e   :  { %7128 = vmatpush.bf16.msra.mxu2 %v10595_v24  ;;  %7066 = vmatmul.bf16.vlgmr.msrb.gmra.mxu1 %v12353_v0  ;;  %v10006_v24 = vld [vmem:[#allocation6 + $0x940] sm:$0xf]  ;;  %v6815_v50 = vpop.f32.mrf.mxu3 }
 0x63f   :  { %7114 = vmatpush.bf16.msra.mxu1 %v10371_v56  ;;  %v9783_v56 = vor.u32 %v11196_v62, %v9782_v40  ;;  %v10007_v28 = vor.u32 %v11252_v46, %v10006_v24  ;;  %v9224_v62 = vld [vmem:[#allocation6 + $0x33c] sm:$0xf0]  ;;  %v11165_v24 = vld [vmem:[#allocation6 + $0x6a4] sm:$0xf]  ;;  %v6816_v41 = vadd.f32 %v6815_v50, %v4266_v17 }
 0x640   :  { %7087 = vmatpush.bf16.msrb.mxu3 %v9895_v30  ;;  %v10231_v30 = vor.u32 %v11308_v26, %v10230_v36  ;;  %v12448_v40 = vpop.f32.mrf.mxu2  ;;  %v9672_v46 = vld [vmem:[#allocation6 + $0x6bc] sm:$0xf0]  ;;  %v11109_v36 = vld [vmem:[#allocation6 + $0x4e4] sm:$0xf] }
 0x641   :  { %7101 = vmatpush.bf16.msra.mxu0 %v10119_v49  ;;  %v10426_v49 = vld [vmem:[#allocation6 + $0xc88] sm:$0xf]  ;;  %v9448_v26 = vld [vmem:[#allocation6 + $0x4fc] sm:$0xf0] }
 0x642   :  { %7129 = vmatpush.bf16.msra.mxu2 %v10567_v2  ;;  %v11301_v2 = vld [vmem:[#allocation6 + $0xae0] sm:$0xf0]  ;;  %v10427_v5 = vor.u32 %v11357_v12, %v10426_v49  ;;  %v9451_v49 = vor.u32 %v11109_v36, %v9448_v26  ;;  %v6831_v12 = vpop.f32.mrf.mxu0  ;;  %v9560_v26 = vld [vmem:[#allocation6 + $0x5dc] sm:$0xf0] }
 0x643   :  { %7115 = vmatpush.bf16.msra.mxu1 %v10343_v39  ;;  %v9726_v39 = vld [vmem:[#allocation6 + $0x710] sm:$0xf]  ;;  %v10203_v61 = vor.u32 %v11301_v2, %v10202_v35  ;;  %v6830_v35 = vadd.f32 %v6829_v52, %v6816_v41  ;;  %v11025_v41 = vld [vmem:[#allocation6 + $0x244] sm:$0xf] }
 0x644   :  { %7088 = vmatpush.bf16.msrb.mxu3 %v9867_v54  ;;  %v10398_v54 = vld [vmem:[#allocation6 + $0xc50] sm:$0xf]  ;;  %v9727_v47 = vor.u32 %v11182_v48, %v9726_v39  ;;  %v9199_v39 = vor.u32 %v11046_v15, %v9196_v32  ;;  %v11137_v36 = vld [vmem:[#allocation6 + $0x5c4] sm:$0xf]  ;;  %v9336_v32 = vld [vmem:[#allocation6 + $0x41c] sm:$0xf0] }
 0x645   :  { %7102 = vmatpush.bf16.msra.mxu0 %v10091_v59  ;;  %v11350_v59 = vld [vmem:[#allocation6 + $0xc68] sm:$0xf0]  ;;  %v11081_v15 = vld [vmem:[#allocation6 + $0x404] sm:$0xf] }
 0x646   :  { %7130 = vmatpush.bf16.msra.mxu2 %v10539_v1  ;;  %v11004_v1 = vld [vmem:[#allocation6 + $0x19c] sm:$0xf]  ;;  %v10399_v44 = vor.u32 %v11350_v59, %v10398_v54  ;;  %v6817_v9 = vpop.f32.mrf.mxu3  ;;  %v11039_v54 = vld [vmem:[#allocation6 + $0x2b4] sm:$0xf]  ;;  %v6845_v59 = vpop.f32.mrf.mxu1 }
 0x647   :  { %7116 = vmatpush.bf16.msra.mxu1 %v10315_v3  ;;  %v9252_v3 = vld [vmem:[#allocation6 + $0x374] sm:$0xf0] }
 0x648   :  { %7089 = vmatpush.bf16.msrb.mxu3 %v9839_v37  ;;  %v10174_v37 = vld [vmem:[#allocation6 + $0xa90] sm:$0xf]  ;;  %v9255_v43 = vor.u32 %v11060_v57, %v9252_v3  ;;  %v12456_v52 = vpop.f32.mrf.mxu2  ;;  %v6844_v3 = vadd.f32 %v12443_v19, %v6830_v35  ;;  %v10962_v35 = vld [vmem:[#allocation6 + $0x4c] sm:$0xf] }
 0x649   :  { %7103 = vmatpush.bf16.msra.mxu0 %v10063_v7  ;;  %v11294_v7 = vld [vmem:[#allocation6 + $0xaa8] sm:$0xf0] }
 0x64a   :  { %7131 = vmatpush.bf16.msra.mxu2 %v10511_v42  ;;  %v9031_v42 = vor.u32 %v11004_v1, %v9028_v55  ;;  %v11151_v1 = vld [vmem:[#allocation6 + $0x634] sm:$0xf]  ;;  %v9616_v55 = vld [vmem:[#allocation6 + $0x64c] sm:$0xf0]  ;;  %v6858_v19 = vadd.f32 %v12448_v40, %v6844_v3 }
 0x64b   :  { %7117 = vmatpush.bf16.msra.mxu1 %v10287_v34  ;;  %v11116_v34 = vld [vmem:[#allocation6 + $0x51c] sm:$0xf]  ;;  %v9619_v50 = vor.u32 %v11151_v1, %v9616_v55  ;;  %v9308_v1 = vld [vmem:[#allocation6 + $0x3e4] sm:$0xf0]  ;;  %v10955_v55 = vld [vmem:[#allocation6 + $0x14] sm:$0xf] }
 0x64c   :  { %7090 = vmatpush.bf16.msrb.mxu3 %v9811_v14  ;;  %v9000_v14 = vld [vmem:[#allocation6 + $0x17c] sm:$0xf0] }
 0x64d   :  { %7104 = vmatpush.bf16.msra.mxu0 %v10035_v23  ;;  %v11053_v23 = vld [vmem:[#allocation6 + $0x324] sm:$0xf]  ;;  %v9003_v6 = vor.u32 %v10997_v10, %v9000_v14  ;;  %v11088_v14 = vld [vmem:[#allocation6 + $0x43c] sm:$0xf] }
 0x64e   :  { %7132 = vmatpush.bf16.msra.mxu2 %v10483_v8  ;;  %v10175_v8 = vor.u32 %v11294_v7, %v10174_v37  ;;  %v10976_v37 = vld [vmem:[#allocation6 + $0xbc] sm:$0xf]  ;;  %v8916_v7 = vld [vmem:[#allocation6 + $0xd4] sm:$0xf0] }
 0x64f   :  { %7118 = vmatpush.bf16.msra.mxu1 %v10259_v25  ;;  %v9479_v25 = vor.u32 %v11116_v34, %v9476_v60  ;;  %v9140_v34 = vld [vmem:[#allocation6 + $0x294] sm:$0xf0]  ;;  %v11144_v60 = vld [vmem:[#allocation6 + $0x5fc] sm:$0xf]  ;;  %v8919_v10 = vor.u32 %v10976_v37, %v8916_v7  ;;  %v9504_v37 = vld [vmem:[#allocation6 + $0x56c] sm:$0xf0] }
 0x650   :  { %7091 = vmatpush.bf16.msrb.mxu3 %v9783_v56  ;;  %v9227_v56 = vor.u32 %v11053_v23, %v9224_v62  ;;  %v9364_v23 = vld [vmem:[#allocation6 + $0x454] sm:$0xf0]  ;;  %v11228_v7 = vld [vmem:[#allocation6 + $0x89c] sm:$0xf] }
 0x651   :  { %7105 = vmatpush.bf16.msra.mxu0 %v10007_v28  ;;  %v9675_v28 = vor.u32 %v11165_v24, %v9672_v46  ;;  %v10969_v46 = vld [vmem:[#allocation6 + $0x84] sm:$0xf] }
 0x652   :  { %7133 = vmatpush.bf16.msra.mxu2 %v10455_v29  ;;  %v8972_v29 = vld [vmem:[#allocation6 + $0x144] sm:$0xf0] }
 0x653   :  { %7119 = vmatpush.bf16.msra.mxu1 %v10231_v30  ;;  %v9644_v30 = vld [vmem:[#allocation6 + $0x684] sm:$0xf0]  ;;  %v8975_v2 = vor.u32 %v10990_v33, %v8972_v29 }
 0x654   :  { %7092 = vmatpush.bf16.msrb.mxu3 %v9755_v45  ;;  %v11102_v45 = vld [vmem:[#allocation6 + $0x4ac] sm:$0xf]  ;;  %v9647_v48 = vor.u32 %v11158_v51, %v9644_v30  ;;  %v9563_v30 = vor.u32 %v11137_v36, %v9560_v26  ;;  %v11221_v26 = vld [vmem:[#allocation6 + $0x864] sm:$0xf] }
 0x655   :  { %7106 = vmatpush.bf16.msra.mxu0 %v9979_v20  ;;  %v9420_v20 = vld [vmem:[#allocation6 + $0x4c4] sm:$0xf0] }
 0x656   :  { %7134 = vmatpush.bf16.msra.mxu2 %v10427_v5  ;;  %v10983_v5 = vld [vmem:[#allocation6 + $0xf4] sm:$0xf]  ;;  %v9423_v57 = vor.u32 %v11102_v45, %v9420_v20 }
 0x657   :  { %7120 = vmatpush.bf16.msra.mxu1 %v10203_v61  ;;  %v9168_v61 = vld [vmem:[#allocation6 + $0x2cc] sm:$0xf0]  ;;  %v8947_v58 = vor.u32 %v10983_v5, %v8944_v53  ;;  %v9339_v5 = vor.u32 %v11081_v15, %v9336_v32  ;;  %v11074_v53 = vld [vmem:[#allocation6 + $0x3cc] sm:$0xf]  ;;  %v10120_v15 = vld [vmem:[#allocation6 + $0xa3c] sm:$0xf0] }
 0x658   :  { %7093 = vmatpush.bf16.msrb.mxu3 %v9727_v47  ;;  %v9392_v47 = vld [vmem:[#allocation6 + $0x48c] sm:$0xf0] }
 0x659   :  { %7107 = vmatpush.bf16.msra.mxu0 %v9951_v11  ;;  %v9171_v11 = vor.u32 %v11039_v54, %v9168_v61  ;;  %v6885_v24 = vpop.f32.mrf.mxu0 }
 0x65a   :  { %7135 = vmatpush.bf16.msra.mxu2 %v10399_v44  ;;  %v11032_v44 = vld [vmem:[#allocation6 + $0x27c] sm:$0xf] }
 0x65b   :  { %7121 = vmatpush.bf16.msra.mxu1 %v10175_v8  ;;  %7094 = vmatmul.bf16.vlgmr.msrb.gmra.mxu3 %v12357_v13  ;;  %v9143_v8 = vor.u32 %v11032_v44, %v9140_v34  ;;  %v6899_v40 = vpop.f32.mrf.mxu1  ;;  %v9924_v44 = vld [vmem:[#allocation6 + $0x8b4] sm:$0xf0]  ;;  %v9311_v34 = vor.u32 %v11074_v53, %v9308_v1  ;;  %v11270_v53 = vld [vmem:[#allocation6 + $0x9ec] sm:$0xf] }
 0x65c   :  { %7142 = vmatpush.bf16.msra.mxu3 %v9031_v42  ;;  %7108 = vmatmul.bf16.vlgmr.msra.gmra.mxu0 %v12359_v21  ;;  %v6818_v42 = vadd.f32 %v6817_v9, %v4266_v17  ;;  %v9532_v9 = vld [vmem:[#allocation6 + $0x5a4] sm:$0xf0]  ;;  %v11382_v1 = vld [vmem:[#allocation6 + $0xd6c] sm:$0xf] }
 0x65d   :  { %7156 = vmatpush.bf16.msrb.mxu0 %v9255_v43  ;;  %7136 = vmatmul.bf16.vlgmr.msra.gmra.mxu2 %v12363_v27  ;;  %v9588_v43 = vld [vmem:[#allocation6 + $0x614] sm:$0xf0] }
 0x65e   :  { %7184 = vmatpush.bf16.msrb.mxu2 %v9703_v38  ;;  %7122 = vmatmul.bf16.vlgmr.msra.gmra.mxu1 %v12361_v16  ;;  %v9395_v38 = vor.u32 %v11095_v4, %v9392_v47  ;;  %v9591_v62 = vor.u32 %v11144_v60, %v9588_v43  ;;  %v6832_v17 = vadd.f32 %v6831_v12, %v6818_v42  ;;  %v11018_v12 = vld [vmem:[#allocation6 + $0x20c] sm:$0xf]  ;;  %v11011_v4 = vld [vmem:[#allocation6 + $0x1d4] sm:$0xf]  ;;  %v9056_v47 = vld [vmem:[#allocation6 + $0x1ec] sm:$0xf0] }
 0x65f   :  { %7170 = vmatpush.bf16.msrb.mxu1 %v9479_v25  ;;  %v8888_v25 = vld [vmem:[#allocation6 + $0x9c] sm:$0xf0]  ;;  %v11284_v43 = vld [vmem:[#allocation6 + $0xa5c] sm:$0xf] }
 0x660   :  { %7143 = vmatpush.bf16.msra.mxu3 %v9003_v6  ;;  %v9112_v6 = vld [vmem:[#allocation6 + $0x25c] sm:$0xf0]  ;;  %v8891_v29 = vor.u32 %v10969_v46, %v8888_v25  ;;  %v6846_v45 = vadd.f32 %v6845_v59, %v6832_v17  ;;  %v11123_v59 = vld [vmem:[#allocation6 + $0x554] sm:$0xf]  ;;  %v11340_v25 = vld [vmem:[#allocation6 + $0xc1c] sm:$0xf] }
 0x661   :  { %7157 = vmatpush.bf16.msrb.mxu0 %v9227_v56  ;;  %v6871_v56 = vpop.f32.mrf.mxu3  ;;  %v9115_v51 = vor.u32 %v11025_v41, %v9112_v6  ;;  %v6887_v60 = vpop.f32.mrf.mxu0  ;;  %v10372_v41 = vld [vmem:[#allocation6 + $0xc34] sm:$0xf0]  ;;  %v9927_v6 = vor.u32 %v11228_v7, %v9924_v44  ;;  %v11375_v44 = vld [vmem:[#allocation6 + $0xd34] sm:$0xf] }
 0x662   :  { %7185 = vmatpush.bf16.msrb.mxu2 %v9675_v28  ;;  %v9367_v28 = vor.u32 %v11088_v14, %v9364_v23  ;;  %v6872_v33 = vadd.f32 %v6871_v56, %v6858_v19  ;;  %v11396_v19 = vld [vmem:[#allocation6 + $0xddc] sm:$0xf]  ;;  %v10596_v23 = vld [vmem:[#allocation6 + $0xdf4] sm:$0xf0] }
 0x663   :  { %7171 = vmatpush.bf16.msrb.mxu1 %v9451_v49  ;;  %v6913_v49 = vpop.f32.mrf.mxu2  ;;  %v6901_v46 = vpop.f32.mrf.mxu1  ;;  %v10599_v56 = vor.u32 %v11396_v19, %v10596_v23 }
 0x664   :  { %7144 = vmatpush.bf16.msra.mxu3 %v8975_v2  ;;  %v8860_v2 = vld [vmem:[#allocation6 + $0x64] sm:$0xf0]  ;;  %v6886_v20 = vadd.f32 %v6885_v24, %v6872_v33  ;;  %v9507_v24 = vor.u32 %v11123_v59, %v9504_v37  ;;  %v9896_v33 = vld [vmem:[#allocation6 + $0x87c] sm:$0xf0]  ;;  %v10064_v37 = vld [vmem:[#allocation6 + $0x9cc] sm:$0xf0] }
 0x665   :  { %7158 = vmatpush.bf16.msrb.mxu0 %v9199_v39  ;;  %v9084_v39 = vld [vmem:[#allocation6 + $0x224] sm:$0xf0]  ;;  %v8863_v61 = vor.u32 %v10962_v35, %v8860_v2  ;;  %v11333_v35 = vld [vmem:[#allocation6 + $0xbe4] sm:$0xf]  ;;  %v10344_v2 = vld [vmem:[#allocation6 + $0xbfc] sm:$0xf0] }
 0x666   :  { %7186 = vmatpush.bf16.msrb.mxu2 %v9647_v48  ;;  %v11130_v48 = vld [vmem:[#allocation6 + $0x58c] sm:$0xf]  ;;  %v6900_v54 = vadd.f32 %v6899_v40, %v6886_v20  ;;  %v9087_v3 = vor.u32 %v11018_v12, %v9084_v39  ;;  %v9899_v20 = vor.u32 %v11221_v26, %v9896_v33 }
 0x667   :  { %7172 = vmatpush.bf16.msrb.mxu1 %v9423_v57  ;;  %v8832_v57 = vld [vmem:[#allocation6 + $0x2c] sm:$0xf0] }
 0x668   :  { %7145 = vmatpush.bf16.msra.mxu3 %v8947_v58  ;;  %v9535_v58 = vor.u32 %v11130_v48, %v9532_v9  ;;  %v8835_v14 = vor.u32 %v10955_v55, %v8832_v57  ;;  %v11214_v48 = vld [vmem:[#allocation6 + $0x82c] sm:$0xf]  ;;  %v9868_v9 = vld [vmem:[#allocation6 + $0x844] sm:$0xf0] }
 0x669   :  { %7159 = vmatpush.bf16.msrb.mxu0 %v9171_v11  ;;  %v6860_v11 = vadd.f32 %v12456_v52, %v6846_v45  ;;  %v6873_v42 = vpop.f32.mrf.mxu3  ;;  %v9059_v52 = vor.u32 %v11011_v4, %v9056_v47  ;;  %v10540_v55 = vld [vmem:[#allocation6 + $0xd84] sm:$0xf0]  ;;  %v11326_v57 = vld [vmem:[#allocation6 + $0xbac] sm:$0xf]  ;;  %v11207_v47 = vld [vmem:[#allocation6 + $0x7f4] sm:$0xf] }
 0x66a   :  { %7187 = vmatpush.bf16.msrb.mxu2 %v9619_v50  ;;  %v6914_v50 = vadd.f32 %v6913_v49, %v6900_v54  ;;  %v10568_v49 = vld [vmem:[#allocation6 + $0xdbc] sm:$0xf0]  ;;  %v10092_v54 = vld [vmem:[#allocation6 + $0xa04] sm:$0xf0]  ;;  %v10543_v59 = vor.u32 %v11382_v1, %v10540_v55  ;;  %v11179_v1 = vld [vmem:[#allocation6 + $0x714] sm:$0xf] }
 0x66b   :  { %7173 = vmatpush.bf16.msrb.mxu1 %v9395_v38  ;;  %v10148_v38 = vld [vmem:[#allocation6 + $0xa74] sm:$0xf0]  ;;  %v6915_v40 = vpop.f32.mrf.mxu2  ;;  %v10095_v4 = vor.u32 %v11270_v53, %v10092_v54  ;;  %v10204_v53 = vld [vmem:[#allocation6 + $0xae4] sm:$0xf0]  ;;  %v9728_v55 = vld [vmem:[#allocation6 + $0x72c] sm:$0xf0] }
 0x66c   :  { %7146 = vmatpush.bf16.msra.mxu3 %v8919_v10  ;;  %11459 = vtanh.f32 %v6914_v50  ;;  %v6874_v10 = vadd.f32 %v6873_v42, %v6860_v11  ;;  %v10151_v36 = vor.u32 %v11284_v43, %v10148_v38  ;;  %v9840_v11 = vld [vmem:[#allocation6 + $0x80c] sm:$0xf0]  ;;  %v11263_v50 = vld [vmem:[#allocation6 + $0x9b4] sm:$0xf] }
 0x66d   :  { %7160 = vmatpush.bf16.msrb.mxu0 %v9143_v8  ;;  %v11067_v8 = vld [vmem:[#allocation6 + $0x394] sm:$0xf]  ;;  %v10512_v42 = vld [vmem:[#allocation6 + $0xd4c] sm:$0xf0]  ;;  %v9843_v38 = vor.u32 %v11207_v47, %v9840_v11  ;;  %v10067_v19 = vor.u32 %v11263_v50, %v10064_v37  ;;  %v9034_v11 = vld [vmem:[#allocation6 + $0x1a0] sm:$0xf] }
 0x66e   :  { %7188 = vmatpush.bf16.msrb.mxu2 %v9591_v62  ;;  %v9280_v62 = vld [vmem:[#allocation6 + $0x3ac] sm:$0xf0]  ;;  %v6888_v17 = vadd.f32 %v6887_v60, %v6874_v10  ;;  %v11200_v10 = vld [vmem:[#allocation6 + $0x7bc] sm:$0xf]  ;;  %v10515_v23 = vor.u32 %v11375_v44, %v10512_v42  ;;  %v9258_v37 = vld [vmem:[#allocation6 + $0x360] sm:$0xf] }
 0x66f   :  { %7174 = vmatpush.bf16.msrb.mxu1 %v9367_v28  ;;  %v9283_v28 = vor.u32 %v11067_v8, %v9280_v62  ;;  %v10288_v60 = vld [vmem:[#allocation6 + $0xb8c] sm:$0xf0]  ;;  %v11256_v8 = vld [vmem:[#allocation6 + $0x97c] sm:$0xf]  ;;  %v10036_v62 = vld [vmem:[#allocation6 + $0x994] sm:$0xf0] }
 0x670   :  { %7147 = vmatpush.bf16.msra.mxu3 %v8891_v29  ;;  %v11277_v29 = vld [vmem:[#allocation6 + $0xa24] sm:$0xf]  ;;  %v6902_v32 = vadd.f32 %v6901_v46, %v6888_v17  ;;  %v10484_v46 = vld [vmem:[#allocation6 + $0xd14] sm:$0xf0]  ;;  %v10400_v47 = vld [vmem:[#allocation6 + $0xc6c] sm:$0xf0] }
 0x671   :  { %7161 = vmatpush.bf16.msrb.mxu0 %v9115_v51  ;;  %v10375_v51 = vor.u32 %v11340_v25, %v10372_v41  ;;  %v10123_v39 = vor.u32 %v11277_v29, %v10120_v15  ;;  %v11312_v25 = vld [vmem:[#allocation6 + $0xb3c] sm:$0xf]  ;;  %v10260_v41 = vld [vmem:[#allocation6 + $0xb54] sm:$0xf0]  ;;  %v11361_v29 = vld [vmem:[#allocation6 + $0xcc4] sm:$0xf] }
 0x672   :  { %7189 = vmatpush.bf16.msrb.mxu2 %v9563_v30  ;;  %v11389_v30 = vld [vmem:[#allocation6 + $0xda4] sm:$0xf]  ;;  %v11460_v12 = vpop.eup %11459  ;;  %v6916_v45 = vadd.f32 %v6915_v40, %v6902_v32  ;;  %v10008_v40 = vld [vmem:[#allocation6 + $0x95c] sm:$0xf0]  ;;  %v10263_v33 = vor.u32 %v11312_v25, %v10260_v41  ;;  %v11008_v50 = vld [vmem:[#allocation6 + $0x1b8] sm:$0xf0] }
 0x673   :  { %7175 = vmatpush.bf16.msrb.mxu1 %v9339_v5  ;;  %7382 = vst [vmem:[%s12543_s15 + $0x10] sm:$0xff] %v11460_v12  ;;  %v10571_v5 = vor.u32 %v11389_v30, %v10568_v49  ;;  %v10456_v15 = vld [vmem:[#allocation6 + $0xcdc] sm:$0xf0]  ;;  %v11305_v32 = vld [vmem:[#allocation6 + $0xb04] sm:$0xf] }
 0x674   :  { %7148 = vmatpush.bf16.msra.mxu3 %v8863_v61  ;;  %11461 = vtanh.f32 %v6916_v45  ;;  %v10347_v61 = vor.u32 %v11333_v35, %v10344_v2  ;;  %v11186_v35 = vld [vmem:[#allocation6 + $0x74c] sm:$0xf]  ;;  %v10459_v2 = vor.u32 %v11361_v29, %v10456_v15  ;;  %v9756_v12 = vld [vmem:[#allocation6 + $0x764] sm:$0xf0]  ;;  %v11064_v44 = vld [vmem:[#allocation6 + $0x378] sm:$0xf0] }
 0x675   :  { %7162 = vmatpush.bf16.msrb.mxu0 %v9087_v3  ;;  %v10316_v3 = vld [vmem:[#allocation6 + $0xbc4] sm:$0xf0]  ;;  %v11242_v45 = vld [vmem:[#allocation6 + $0x90c] sm:$0xf]  ;;  %v9759_v54 = vor.u32 %v11186_v35, %v9756_v12  ;;  %v9706_v42 = vld [vmem:[#allocation6 + $0x6e0] sm:$0xf] }
 0x676   :  { %7190 = vmatpush.bf16.msrb.mxu2 %v9535_v58  ;;  %v9871_v58 = vor.u32 %v11214_v48, %v9868_v9  ;;  %v10319_v7 = vor.u32 %v11326_v57, %v10316_v3  ;;  %v11354_v48 = vld [vmem:[#allocation6 + $0xc8c] sm:$0xf]  ;;  %v10428_v9 = vld [vmem:[#allocation6 + $0xca4] sm:$0xf0]  ;;  %v11235_v57 = vld [vmem:[#allocation6 + $0x8d4] sm:$0xf] }
 0x677   :  { %7176 = vmatpush.bf16.msrb.mxu1 %v9311_v34  ;;  %v11319_v34 = vld [vmem:[#allocation6 + $0xb74] sm:$0xf]  ;;  %v10431_v3 = vor.u32 %v11354_v48, %v10428_v9  ;;  %v9006_v41 = vld [vmem:[#allocation6 + $0x168] sm:$0xf]  ;;  %v8978_v35 = vld [vmem:[#allocation6 + $0x130] sm:$0xf] }
 0x678   :  { %7149 = vmatpush.bf16.msra.mxu3 %v8835_v14  ;;  %v9812_v14 = vld [vmem:[#allocation6 + $0x7d4] sm:$0xf0]  ;;  %v9202_v12 = vld [vmem:[#allocation6 + $0x2f0] sm:$0xf] }
 0x679   :  { %7163 = vmatpush.bf16.msrb.mxu0 %v9059_v52  ;;  %v10291_v52 = vor.u32 %v11319_v34, %v10288_v60  ;;  %v9815_v17 = vor.u32 %v11200_v10, %v9812_v14  ;;  %v11176_v34 = vld [vmem:[#allocation6 + $0x6f8] sm:$0xf0]  ;;  %v9731_v60 = vor.u32 %v11179_v1, %v9728_v55  ;;  %v10176_v10 = vld [vmem:[#allocation6 + $0xaac] sm:$0xf0] }
 0x67a   :  { %7191 = vmatpush.bf16.msrb.mxu2 %v9507_v24  ;;  %v11462_v43 = vpop.eup %11461  ;;  %v11368_v24 = vld [vmem:[#allocation6 + $0xcfc] sm:$0xf]  ;;  %v9707_v25 = vor.u32 %v11176_v34, %v9706_v42  ;;  %v9398_v34 = vld [vmem:[#allocation6 + $0x478] sm:$0xf] }
 0x67b   :  { %7177 = vmatpush.bf16.msrb.mxu1 %v9283_v28  ;;  %7150 = vmatmul.bf16.vlgmr.msra.gmra.mxu3 %v12349_v18  ;;  %7390 = vst [vmem:[%s12543_s15 + $0x48] sm:$0xff] %v11462_v43  ;;  %v10487_v26 = vor.u32 %v11368_v24, %v10484_v46  ;;  %v11249_v28 = vld [vmem:[#allocation6 + $0x944] sm:$0xf]  ;;  %v12473_v14 = vpop.f32.mrf.mxu1  ;;  %v11120_v24 = vld [vmem:[#allocation6 + $0x538] sm:$0xf0]  ;;  %v9259_v46 = vor.u32 %v11064_v44, %v9258_v37 }
 0x67c   :  { %7198 = vmatpush.bf16.msrb.mxu3 %v9927_v6  ;;  %7164 = vmatmul.bf16.vlgmr.msrb.gmra.mxu0 %v12351_v31  ;;  %v10039_v6 = vor.u32 %v11256_v8, %v10036_v62  ;;  %v10011_v49 = vor.u32 %v11249_v28, %v10008_v40  ;;  %v9035_v8 = vor.u32 %v11008_v50, %v9034_v11  ;;  %v4267_v62 = vperm.slane %v12445_v63, 3  ;;  %v9678_v28 = vld [vmem:[#allocation6 + $0x6a8] sm:$0xf]  ;;  %v11169_v40 = vld [vmem:[#allocation6 + $0x6c0] sm:$0xf0] }
 0x67d   :  { %7212 = vmatpush.bf16.msra.mxu0 %v10151_v36  ;;  %7192 = vmatmul.bf16.vlgmr.msrb.gmra.mxu2 %v12355_v22  ;;  %v11193_v36 = vld [vmem:[#allocation6 + $0x784] sm:$0xf]  ;;  %v9622_v11 = vld [vmem:[#allocation6 + $0x638] sm:$0xf]  ;;  %v11155_v50 = vld [vmem:[#allocation6 + $0x650] sm:$0xf0] }
 0x67e   :  { %7240 = vmatpush.bf16.msra.mxu2 %v10599_v56  ;;  %7178 = vmatmul.bf16.vlgmr.msrb.gmra.mxu1 %v12353_v0  ;;  %v9784_v56 = vld [vmem:[#allocation6 + $0x79c] sm:$0xf0]  ;;  %v9118_v63 = vld [vmem:[#allocation6 + $0x248] sm:$0xf] }
 0x67f   :  { %7226 = vmatpush.bf16.msra.mxu1 %v10375_v51  ;;  %v10232_v51 = vld [vmem:[#allocation6 + $0xb1c] sm:$0xf0]  ;;  %v9787_v30 = vor.u32 %v11193_v36, %v9784_v56  ;;  %v11057_v56 = vld [vmem:[#allocation6 + $0x340] sm:$0xf0] }
 0x680   :  { %7199 = vmatpush.bf16.msrb.mxu3 %v9899_v20  ;;  %v9980_v20 = vld [vmem:[#allocation6 + $0x924] sm:$0xf0]  ;;  %v12476_v36 = vpop.f32.mrf.mxu2 }
 0x681   :  { %7213 = vmatpush.bf16.msra.mxu0 %v10123_v39  ;;  %v10235_v39 = vor.u32 %v11305_v32, %v10232_v51  ;;  %v9454_v32 = vld [vmem:[#allocation6 + $0x4e8] sm:$0xf]  ;;  %v11113_v51 = vld [vmem:[#allocation6 + $0x500] sm:$0xf0] }
 0x682   :  { %7241 = vmatpush.bf16.msra.mxu2 %v10571_v5  ;;  %v11298_v5 = vld [vmem:[#allocation6 + $0xacc] sm:$0xf]  ;;  %v9455_v48 = vor.u32 %v11113_v51, %v9454_v32  ;;  %v11141_v32 = vld [vmem:[#allocation6 + $0x5e0] sm:$0xf0] }
 0x683   :  { %7227 = vmatpush.bf16.msra.mxu1 %v10347_v61  ;;  %v9983_v61 = vor.u32 %v11242_v45, %v9980_v20  ;;  %v11050_v45 = vld [vmem:[#allocation6 + $0x308] sm:$0xf0]  ;;  %v9650_v20 = vld [vmem:[#allocation6 + $0x670] sm:$0xf] }
 0x684   :  { %7200 = vmatpush.bf16.msrb.mxu3 %v9871_v58  ;;  %v9952_v58 = vld [vmem:[#allocation6 + $0x8ec] sm:$0xf0]  ;;  %v9203_v1 = vor.u32 %v11050_v45, %v9202_v12  ;;  %v11085_v12 = vld [vmem:[#allocation6 + $0x420] sm:$0xf0] }
 0x685   :  { %7214 = vmatpush.bf16.msra.mxu0 %v10095_v4  ;;  %v11347_v4 = vld [vmem:[#allocation6 + $0xc54] sm:$0xf]  ;;  %v9955_v43 = vor.u32 %v11235_v57, %v9952_v58 }
 0x686   :  { %7242 = vmatpush.bf16.msra.mxu2 %v10543_v59  ;;  %v10207_v59 = vor.u32 %v11298_v5, %v10204_v53  ;;  %v10987_v58 = vld [vmem:[#allocation6 + $0x110] sm:$0xf0] }
 0x687   :  { %7228 = vmatpush.bf16.msra.mxu1 %v10319_v7  ;;  %v6941_v7 = vpop.f32.mrf.mxu0 }
 0x688   :  { %7201 = vmatpush.bf16.msrb.mxu3 %v9843_v38  ;;  %v6927_v38 = vpop.f32.mrf.mxu3 }
 0x689   :  { %7215 = vmatpush.bf16.msra.mxu0 %v10067_v19  ;;  %v11291_v19 = vld [vmem:[#allocation6 + $0xa94] sm:$0xf]  ;;  %v6928_v29 = vadd.f32 %v6927_v38, %v4267_v62  ;;  %v9623_v38 = vor.u32 %v11155_v50, %v9622_v11  ;;  %v8838_v11 = vld [vmem:[#allocation6 + $0x18] sm:$0xf] }
 0x68a   :  { %7243 = vmatpush.bf16.msra.mxu2 %v10515_v23  ;;  %v10403_v23 = vor.u32 %v11347_v4, %v10400_v47  ;;  %v9174_v4 = vld [vmem:[#allocation6 + $0x2b8] sm:$0xf]  ;;  %v6957_v47 = vpop.f32.mrf.mxu1  ;;  %v10959_v50 = vld [vmem:[#allocation6 + $0x30] sm:$0xf0] }
 0x68b   :  { %7229 = vmatpush.bf16.msra.mxu1 %v10291_v52  ;;  %v9482_v52 = vld [vmem:[#allocation6 + $0x520] sm:$0xf]  ;;  %v6942_v5 = vadd.f32 %v6941_v7, %v6928_v29  ;;  %v12484_v7 = vpop.f32.mrf.mxu2  ;;  %v11029_v29 = vld [vmem:[#allocation6 + $0x260] sm:$0xf0] }
 0x68c   :  { %7202 = vmatpush.bf16.msrb.mxu3 %v9815_v17  ;;  %v11001_v17 = vld [vmem:[#allocation6 + $0x180] sm:$0xf0]  ;;  %v9119_v45 = vor.u32 %v11029_v29, %v9118_v63 }
 0x68d   :  { %7216 = vmatpush.bf16.msra.mxu0 %v10039_v6  ;;  %v9230_v6 = vld [vmem:[#allocation6 + $0x328] sm:$0xf]  ;;  %v9007_v15 = vor.u32 %v11001_v17, %v9006_v41  ;;  %v6956_v44 = vadd.f32 %v12473_v14, %v6942_v5  ;;  %v9370_v17 = vld [vmem:[#allocation6 + $0x440] sm:$0xf]  ;;  %v10966_v5 = vld [vmem:[#allocation6 + $0x68] sm:$0xf0] }
 0x68e   :  { %7244 = vmatpush.bf16.msra.mxu2 %v10487_v26  ;;  %v10179_v26 = vor.u32 %v11291_v19, %v10176_v10  ;;  %v8922_v19 = vld [vmem:[#allocation6 + $0xc0] sm:$0xf]  ;;  %v10980_v10 = vld [vmem:[#allocation6 + $0xd8] sm:$0xf0] }
 0x68f   :  { %7230 = vmatpush.bf16.msra.mxu1 %v10263_v33  ;;  %v9483_v33 = vor.u32 %v11120_v24, %v9482_v52  ;;  %v6943_v9 = vpop.f32.mrf.mxu0  ;;  %v11036_v52 = vld [vmem:[#allocation6 + $0x298] sm:$0xf0]  ;;  %v9594_v24 = vld [vmem:[#allocation6 + $0x600] sm:$0xf]  ;;  %v6970_v14 = vadd.f32 %v12476_v36, %v6956_v44  ;;  %v8923_v41 = vor.u32 %v10980_v10, %v8922_v19 }
 0x690   :  { %7203 = vmatpush.bf16.msrb.mxu3 %v9787_v30  ;;  %v9231_v30 = vor.u32 %v11057_v56, %v9230_v6  ;;  %v6929_v57 = vpop.f32.mrf.mxu3  ;;  %v11092_v6 = vld [vmem:[#allocation6 + $0x458] sm:$0xf0]  ;;  %v9930_v19 = vld [vmem:[#allocation6 + $0x8a0] sm:$0xf] }
 0x691   :  { %7217 = vmatpush.bf16.msra.mxu0 %v10011_v49  ;;  %v9679_v49 = vor.u32 %v11169_v40, %v9678_v28  ;;  %v8894_v40 = vld [vmem:[#allocation6 + $0x88] sm:$0xf]  ;;  %v11232_v10 = vld [vmem:[#allocation6 + $0x8b8] sm:$0xf0] }
 0x692   :  { %7245 = vmatpush.bf16.msra.mxu2 %v10459_v2  ;;  %v10994_v2 = vld [vmem:[#allocation6 + $0x148] sm:$0xf0] }
 0x693   :  { %7231 = vmatpush.bf16.msra.mxu1 %v10235_v39  ;;  %v11162_v39 = vld [vmem:[#allocation6 + $0x688] sm:$0xf0]  ;;  %v8979_v53 = vor.u32 %v10994_v2, %v8978_v35  ;;  %v9342_v2 = vld [vmem:[#allocation6 + $0x408] sm:$0xf] }
 0x694   :  { %7204 = vmatpush.bf16.msrb.mxu3 %v9759_v54  ;;  %v9426_v54 = vld [vmem:[#allocation6 + $0x4b0] sm:$0xf]  ;;  %v9651_v55 = vor.u32 %v11162_v39, %v9650_v20 }
 0x695   :  { %7218 = vmatpush.bf16.msra.mxu0 %v9983_v61  ;;  %v11106_v61 = vld [vmem:[#allocation6 + $0x4c8] sm:$0xf0] }
 0x696   :  { %7246 = vmatpush.bf16.msra.mxu2 %v10431_v3  ;;  %v8950_v3 = vld [vmem:[#allocation6 + $0xf8] sm:$0xf]  ;;  %v9427_v37 = vor.u32 %v11106_v61, %v9426_v54  ;;  %v11022_v61 = vld [vmem:[#allocation6 + $0x228] sm:$0xf0] }
 0x697   :  { %7232 = vmatpush.bf16.msra.mxu1 %v10207_v59  ;;  %v11043_v59 = vld [vmem:[#allocation6 + $0x2d0] sm:$0xf0]  ;;  %v8951_v42 = vor.u32 %v10987_v58, %v8950_v3  ;;  %v9314_v3 = vld [vmem:[#allocation6 + $0x3d0] sm:$0xf] }
 0x698   :  { %7205 = vmatpush.bf16.msrb.mxu3 %v9731_v60  ;;  %v11099_v60 = vld [vmem:[#allocation6 + $0x490] sm:$0xf0] }
 0x699   :  { %7219 = vmatpush.bf16.msra.mxu0 %v9955_v43  ;;  %v9175_v43 = vor.u32 %v11043_v59, %v9174_v4  ;;  %v6997_v28 = vpop.f32.mrf.mxu0  ;;  %v11078_v59 = vld [vmem:[#allocation6 + $0x3e8] sm:$0xf0] }
 0x69a   :  { %7247 = vmatpush.bf16.msra.mxu2 %v10403_v23  ;;  %v9146_v23 = vld [vmem:[#allocation6 + $0x280] sm:$0xf] }
 0x69b   :  { %7233 = vmatpush.bf16.msra.mxu1 %v10179_v26  ;;  %7206 = vmatmul.bf16.vlgmr.msrb.gmra.mxu3 %v12357_v13  ;;  %v9147_v26 = vor.u32 %v11036_v52, %v9146_v23  ;;  %v7011_v36 = vpop.f32.mrf.mxu1 }
 0x69c   :  { %7254 = vmatpush.bf16.msra.mxu3 %v9035_v8  ;;  %7220 = vmatmul.bf16.vlgmr.msra.gmra.mxu0 %v12359_v21  ;;  %v6930_v8 = vadd.f32 %v6929_v57, %v4267_v62  ;;  %v9343_v57 = vor.u32 %v11085_v12, %v9342_v2 }
 0x69d   :  { %7268 = vmatpush.bf16.msrb.mxu0 %v9259_v46  ;;  %7248 = vmatmul.bf16.vlgmr.msra.gmra.mxu2 %v12363_v27  ;;  %v11148_v46 = vld [vmem:[#allocation6 + $0x618] sm:$0xf0] }
 0x69e   :  { %7296 = vmatpush.bf16.msrb.mxu2 %v9707_v25  ;;  %7234 = vmatmul.bf16.vlgmr.msra.gmra.mxu1 %v12361_v16  ;;  %v9399_v25 = vor.u32 %v11099_v60, %v9398_v34  ;;  %v9595_v56 = vor.u32 %v11148_v46, %v9594_v24  ;;  %v6944_v62 = vadd.f32 %v6943_v9, %v6930_v8  ;;  %v6983_v51 = vpop.f32.mrf.mxu3  ;;  %v9090_v9 = vld [vmem:[#allocation6 + $0x210] sm:$0xf]  ;;  %v11015_v34 = vld [vmem:[#allocation6 + $0x1f0] sm:$0xf0]  ;;  %v10154_v24 = vld [vmem:[#allocation6 + $0xa60] sm:$0xf] }
 0x69f   :  { %7282 = vmatpush.bf16.msrb.mxu1 %v9483_v33  ;;  %v10973_v33 = vld [vmem:[#allocation6 + $0xa0] sm:$0xf0]  ;;  %v9315_v8 = vor.u32 %v11078_v59, %v9314_v3  ;;  %v11288_v46 = vld [vmem:[#allocation6 + $0xa78] sm:$0xf0]  ;;  %v11274_v3 = vld [vmem:[#allocation6 + $0xa08] sm:$0xf0] }
 0x6a0   :  { %7255 = vmatpush.bf16.msra.mxu3 %v9007_v15  ;;  %v9566_v15 = vld [vmem:[#allocation6 + $0x5c8] sm:$0xf]  ;;  %v8895_v35 = vor.u32 %v10973_v33, %v8894_v40  ;;  %v7025_v39 = vpop.f32.mrf.mxu2  ;;  %v10378_v40 = vld [vmem:[#allocation6 + $0xc20] sm:$0xf]  ;;  %v11344_v33 = vld [vmem:[#allocation6 + $0xc38] sm:$0xf0]  ;;  %v10155_v29 = vor.u32 %v11288_v46, %v10154_v24 }
 0x6a1   :  { %7269 = vmatpush.bf16.msrb.mxu0 %v9231_v30  ;;  %v9371_v30 = vor.u32 %v11092_v6, %v9370_v17  ;;  %v9567_v20 = vor.u32 %v11141_v32, %v9566_v15  ;;  %v6999_v52 = vpop.f32.mrf.mxu0  ;;  %v11400_v17 = vld [vmem:[#allocation6 + $0xdf8] sm:$0xf0]  ;;  %v9286_v6 = vld [vmem:[#allocation6 + $0x398] sm:$0xf]  ;;  %v9902_v15 = vld [vmem:[#allocation6 + $0x868] sm:$0xf]  ;;  %v10379_v12 = vor.u32 %v11344_v33, %v10378_v40 }
 0x6a2   :  { %7297 = vmatpush.bf16.msrb.mxu2 %v9679_v49  ;;  %v6984_v49 = vadd.f32 %v6983_v51, %v6970_v14  ;;  %v11386_v59 = vld [vmem:[#allocation6 + $0xd88] sm:$0xf0]  ;;  %v11204_v24 = vld [vmem:[#allocation6 + $0x7d8] sm:$0xf0]  ;;  %v11197_v33 = vld [vmem:[#allocation6 + $0x7a0] sm:$0xf0] }
 0x6a3   :  { %7283 = vmatpush.bf16.msrb.mxu1 %v9455_v48  ;;  %v8866_v48 = vld [vmem:[#allocation6 + $0x50] sm:$0xf] }
 0x6a4   :  { %7256 = vmatpush.bf16.msra.mxu3 %v8979_v53  ;;  %v6958_v53 = vadd.f32 %v6957_v47, %v6944_v62  ;;  %v6998_v54 = vadd.f32 %v6997_v28, %v6984_v49  ;;  %v8867_v4 = vor.u32 %v10966_v5, %v8866_v48  ;;  %v9510_v47 = vld [vmem:[#allocation6 + $0x558] sm:$0xf]  ;;  %v7013_v28 = vpop.f32.mrf.mxu1  ;;  %v9931_v62 = vor.u32 %v11232_v10, %v9930_v19  ;;  %v10126_v49 = vld [vmem:[#allocation6 + $0xa28] sm:$0xf]  ;;  %v11337_v48 = vld [vmem:[#allocation6 + $0xc00] sm:$0xf0] }
 0x6a5   :  { %7270 = vmatpush.bf16.msrb.mxu0 %v9203_v1  ;;  %v9538_v1 = vld [vmem:[#allocation6 + $0x590] sm:$0xf]  ;;  %v11379_v19 = vld [vmem:[#allocation6 + $0xd50] sm:$0xf0]  ;;  %v10294_v10 = vld [vmem:[#allocation6 + $0xb78] sm:$0xf] }
 0x6a6   :  { %7298 = vmatpush.bf16.msrb.mxu2 %v9651_v55  ;;  %v11134_v55 = vld [vmem:[#allocation6 + $0x5a8] sm:$0xf0]  ;;  %v7012_v58 = vadd.f32 %v7011_v36, %v6998_v54  ;;  %v6972_v60 = vadd.f32 %v12484_v7, %v6958_v53  ;;  %v6985_v23 = vpop.f32.mrf.mxu3  ;;  %v11225_v36 = vld [vmem:[#allocation6 + $0x880] sm:$0xf0] }
 0x6a7   :  { %7284 = vmatpush.bf16.msrb.mxu1 %v9427_v37  ;;  %v9091_v37 = vor.u32 %v11022_v61, %v9090_v9  ;;  %v9539_v44 = vor.u32 %v11134_v55, %v9538_v1  ;;  %v9903_v53 = vor.u32 %v11225_v36, %v9902_v15  ;;  %v9874_v61 = vld [vmem:[#allocation6 + $0x830] sm:$0xf]  ;;  %v11218_v1 = vld [vmem:[#allocation6 + $0x848] sm:$0xf0]  ;;  %v10462_v15 = vld [vmem:[#allocation6 + $0xcc8] sm:$0xf] }
 0x6a8   :  { %7257 = vmatpush.bf16.msra.mxu3 %v8951_v42  ;;  %v9062_v42 = vld [vmem:[#allocation6 + $0x1d8] sm:$0xf]  ;;  %v6986_v14 = vadd.f32 %v6985_v23, %v6972_v60 }
 0x6a9   :  { %7271 = vmatpush.bf16.msrb.mxu0 %v9175_v43  ;;  %v7026_v43 = vadd.f32 %v7025_v39, %v7012_v58  ;;  %v9063_v7 = vor.u32 %v11015_v34, %v9062_v42  ;;  %v10350_v39 = vld [vmem:[#allocation6 + $0xbe8] sm:$0xf]  ;;  %v9846_v42 = vld [vmem:[#allocation6 + $0x7f8] sm:$0xf] }
 0x6aa   :  { %7299 = vmatpush.bf16.msrb.mxu2 %v9623_v38  ;;  %v11127_v38 = vld [vmem:[#allocation6 + $0x570] sm:$0xf0]  ;;  %v7000_v63 = vadd.f32 %v6999_v52, %v6986_v14  ;;  %v10351_v58 = vor.u32 %v11337_v48, %v10350_v39  ;;  %v10070_v60 = vld [vmem:[#allocation6 + $0x9b8] sm:$0xf]  ;;  %v9818_v52 = vld [vmem:[#allocation6 + $0x7c0] sm:$0xf] }
 0x6ab   :  { %7285 = vmatpush.bf16.msrb.mxu1 %v9399_v25  ;;  %v10602_v25 = vld [vmem:[#allocation6 + $0xde0] sm:$0xf]  ;;  %11463 = vtanh.f32 %v7026_v43  ;;  %v11267_v43 = vld [vmem:[#allocation6 + $0x9d0] sm:$0xf0]  ;;  %v10434_v48 = vld [vmem:[#allocation6 + $0xc90] sm:$0xf] }
 0x6ac   :  { %7258 = vmatpush.bf16.msra.mxu3 %v8923_v41  ;;  %v8839_v41 = vor.u32 %v10959_v50, %v8838_v11  ;;  %v10603_v32 = vor.u32 %v11400_v17, %v10602_v25  ;;  %v7014_v2 = vadd.f32 %v7013_v28, %v7000_v63  ;;  %v10322_v11 = vld [vmem:[#allocation6 + $0xbb0] sm:$0xf]  ;;  %v11330_v50 = vld [vmem:[#allocation6 + $0xbc8] sm:$0xf0]  ;;  %v11260_v25 = vld [vmem:[#allocation6 + $0x998] sm:$0xf0] }
 0x6ad   :  { %7272 = vmatpush.bf16.msrb.mxu0 %v9147_v26  ;;  %v11071_v26 = vld [vmem:[#allocation6 + $0x3b0] sm:$0xf0]  ;;  %v11372_v17 = vld [vmem:[#allocation6 + $0xd18] sm:$0xf0]  ;;  %v9790_v28 = vld [vmem:[#allocation6 + $0x788] sm:$0xf] }
 0x6ae   :  { %7300 = vmatpush.bf16.msrb.mxu2 %v9595_v56  ;;  %v9511_v56 = vor.u32 %v11127_v38, %v9510_v47  ;;  %v9287_v51 = vor.u32 %v11071_v26, %v9286_v6  ;;  %v11211_v47 = vld [vmem:[#allocation6 + $0x810] sm:$0xf0]  ;;  %v10518_v38 = vld [vmem:[#allocation6 + $0xd38] sm:$0xf]  ;;  %v10266_v6 = vld [vmem:[#allocation6 + $0xb40] sm:$0xf]  ;;  %v9791_v36 = vor.u32 %v11197_v33, %v9790_v28 }
 0x6af   :  { %7286 = vmatpush.bf16.msrb.mxu1 %v9371_v30  ;;  %v7027_v30 = vpop.f32.mrf.mxu2  ;;  %v10519_v46 = vor.u32 %v11379_v19, %v10518_v38  ;;  %v11316_v26 = vld [vmem:[#allocation6 + $0xb58] sm:$0xf0]  ;;  %v10014_v63 = vld [vmem:[#allocation6 + $0x948] sm:$0xf] }
 0x6b0   :  { %7259 = vmatpush.bf16.msra.mxu3 %v8895_v35  ;;  %v11281_v35 = vld [vmem:[#allocation6 + $0xa40] sm:$0xf0]  ;;  %v7028_v9 = vadd.f32 %v7027_v30, %v7014_v2 }
 0x6b1   :  { %7273 = vmatpush.bf16.msrb.mxu0 %v9119_v45  ;;  %v10574_v45 = vld [vmem:[#allocation6 + $0xda8] sm:$0xf]  ;;  %v11464_v5 = vpop.eup %11463  ;;  %v10127_v54 = vor.u32 %v11281_v35, %v10126_v49  ;;  %v11309_v30 = vld [vmem:[#allocation6 + $0xb20] sm:$0xf0]  ;;  %v9762_v35 = vld [vmem:[#allocation6 + $0x750] sm:$0xf] }
 0x6b2   :  { %7301 = vmatpush.bf16.msrb.mxu2 %v9567_v20  ;;  %v11393_v20 = vld [vmem:[#allocation6 + $0xdc0] sm:$0xf0]  ;;  %7383 = vst [vmem:[%s12543_s15 + $0x18] sm:$0xff] %v11464_v5  ;;  %11465 = vtanh.f32 %v7028_v9  ;;  %v11358_v5 = vld [vmem:[#allocation6 + $0xca8] sm:$0xf0] }
 0x6b3   :  { %7287 = vmatpush.bf16.msrb.mxu1 %v9343_v57  ;;  %v10575_v55 = vor.u32 %v11393_v20, %v10574_v45  ;;  %v10098_v57 = vld [vmem:[#allocation6 + $0x9f0] sm:$0xf]  ;;  %v11246_v20 = vld [vmem:[#allocation6 + $0x928] sm:$0xf0] }
 0x6b4   :  { %7260 = vmatpush.bf16.msra.mxu3 %v8867_v4  ;;  %v10546_v4 = vld [vmem:[#allocation6 + $0xd70] sm:$0xf] }
 0x6b5   :  { %7274 = vmatpush.bf16.msrb.mxu0 %v9091_v37  ;;  %v9875_v37 = vor.u32 %v11218_v1, %v9874_v61  ;;  %v10547_v34 = vor.u32 %v11386_v59, %v10546_v4  ;;  %v9986_v45 = vld [vmem:[#allocation6 + $0x910] sm:$0xf]  ;;  %v9734_v1 = vld [vmem:[#allocation6 + $0x718] sm:$0xf] }
 0x6b6   :  { %7302 = vmatpush.bf16.msrb.mxu2 %v9539_v44  ;;  %v10099_v44 = vor.u32 %v11274_v3, %v10098_v57  ;;  %v10210_v9 = vld [vmem:[#allocation6 + $0xad0] sm:$0xf]  ;;  %v9987_v61 = vor.u32 %v11246_v20, %v9986_v45  ;;  %v11183_v57 = vld [vmem:[#allocation6 + $0x730] sm:$0xf0]  ;;  %v9958_v3 = vld [vmem:[#allocation6 + $0x8d8] sm:$0xf] }
 0x6b7   :  { %7288 = vmatpush.bf16.msrb.mxu1 %v9315_v8  ;;  %v10071_v8 = vor.u32 %v11267_v43, %v10070_v60  ;;  %v10406_v59 = vld [vmem:[#allocation6 + $0xc58] sm:$0xf] }
 0x6b8   :  { %7261 = vmatpush.bf16.msra.mxu3 %v8839_v41  ;;  %v11466_v23 = vpop.eup %11465  ;;  %v10490_v41 = vld [vmem:[#allocation6 + $0xd00] sm:$0xf] }
 0x6b9   :  { %7275 = vmatpush.bf16.msrb.mxu0 %v9063_v7  ;;  %7391 = vst [vmem:[%s12543_s15 + $0x50] sm:$0xff] %v11466_v23  ;;  %v9819_v7 = vor.u32 %v11204_v24, %v9818_v52  ;;  %v10491_v40 = vor.u32 %v11372_v17, %v10490_v41 }
 0x6ba   :  { %7303 = vmatpush.bf16.msrb.mxu2 %v9511_v56 }
 0x6bb   :  { %7289 = vmatpush.bf16.msrb.mxu1 %v9287_v51  ;;  %7262 = vmatmul.bf16.vlgmr.msra.gmra.mxu3 %v12349_v18  ;;  %v10323_v18 = vor.u32 %v11330_v50, %v10322_v11  ;;  %v10238_v51 = vld [vmem:[#allocation6 + $0xb08] sm:$0xf]  ;;  %v11351_v11 = vld [vmem:[#allocation6 + $0xc70] sm:$0xf0]  ;;  %v7053_v50 = vpop.f32.mrf.mxu0  ;;  %v7067_v60 = vpop.f32.mrf.mxu1 }
 0x6bc   :  { %7310 = vmatpush.bf16.msrb.mxu3 %v9931_v62  ;;  %7276 = vmatmul.bf16.vlgmr.msrb.gmra.mxu0 %v12351_v31  ;;  %v9847_v31 = vor.u32 %v11211_v47, %v9846_v42  ;;  %v11253_v62 = vld [vmem:[#allocation6 + $0x960] sm:$0xf0]  ;;  %v10239_v39 = vor.u32 %v11309_v30, %v10238_v51  ;;  %v9735_v42 = vor.u32 %v11183_v57, %v9734_v1 }
 0x6bd   :  { %7324 = vmatpush.bf16.msra.mxu0 %v10155_v29  ;;  %7304 = vmatmul.bf16.vlgmr.msrb.gmra.mxu2 %v12355_v22  ;;  %v11323_v22 = vld [vmem:[#allocation6 + $0xb90] sm:$0xf0]  ;;  %v10267_v29 = vor.u32 %v11316_v26, %v10266_v6  ;;  %v10015_v49 = vor.u32 %v11253_v62, %v10014_v63  ;;  %v10407_v43 = vor.u32 %v11351_v11, %v10406_v59 }
 0x6be   :  { %7352 = vmatpush.bf16.msra.mxu2 %v10603_v32  ;;  %7290 = vmatmul.bf16.vlgmr.msrb.gmra.mxu1 %v12353_v0  ;;  %v10042_v0 = vld [vmem:[#allocation6 + $0x980] sm:$0xf]  ;;  %v10295_v14 = vor.u32 %v11323_v22, %v10294_v10  ;;  %v11365_v32 = vld [vmem:[#allocation6 + $0xce0] sm:$0xf0]  ;;  %v7039_v47 = vpop.f32.mrf.mxu3 }
 0x6bf   :  { %7338 = vmatpush.bf16.msra.mxu1 %v10379_v12  ;;  %v10043_v56 = vor.u32 %v11260_v25, %v10042_v0  ;;  %v10463_v2 = vor.u32 %v11365_v32, %v10462_v15  ;;  %v11190_v12 = vld [vmem:[#allocation6 + $0x768] sm:$0xf0] }
 0x6c0   :  { %7311 = vmatpush.bf16.msrb.mxu3 %v9903_v53  ;;  %v11302_v53 = vld [vmem:[#allocation6 + $0xae8] sm:$0xf0]  ;;  %v7081_v10 = vpop.f32.mrf.mxu2 }
 0x6c1   :  { %7325 = vmatpush.bf16.msra.mxu0 %v10127_v54  ;;  %v9763_v54 = vor.u32 %v11190_v12, %v9762_v35  ;;  %v10211_v4 = vor.u32 %v11302_v53, %v10210_v9 }
 0x6c2   :  { %7353 = vmatpush.bf16.msra.mxu2 %v10575_v55  ;;  %v10435_v55 = vor.u32 %v11358_v5, %v10434_v48 }
 0x6c3   :  { %7339 = vmatpush.bf16.msra.mxu1 %v10351_v58  ;;  %v11239_v58 = vld [vmem:[#allocation6 + $0x8f0] sm:$0xf0]  ;;  %v7055_v23 = vpop.f32.mrf.mxu0  ;;  %v7069_v52 = vpop.f32.mrf.mxu1 }
 0x6c4   :  { %7312 = vmatpush.bf16.msrb.mxu3 %v9875_v37  ;;  %v10182_v37 = vld [vmem:[#allocation6 + $0xa98] sm:$0xf] }
 0x6c5   :  { %7326 = vmatpush.bf16.msra.mxu0 %v10099_v44  ;;  %v11295_v44 = vld [vmem:[#allocation6 + $0xab0] sm:$0xf0] }
 0x6c6   :  { %7354 = vmatpush.bf16.msra.mxu2 %v10547_v34  ;;  %v9959_v34 = vor.u32 %v11239_v58, %v9958_v3  ;;  %v10183_v19 = vor.u32 %v11295_v44, %v10182_v37 }
 0x6c7   :  { %7340 = vmatpush.bf16.msra.mxu1 %v10323_v18  ;;  %v12501_v18 = vld [vmem:[#allocation24] sm:$0xff] }
 0x6c8   :  { %7313 = vmatpush.bf16.msrb.mxu3 %v9847_v31  ;;  %v4268_v38 = vperm.slane %v12501_v18, 4  ;;  %v7083_v24 = vpop.f32.mrf.mxu2 }
 0x6c9   :  { %7327 = vmatpush.bf16.msra.mxu0 %v10071_v8  ;;  %v7041_v8 = vpop.f32.mrf.mxu3 }
 0x6ca   :  { %7355 = vmatpush.bf16.msra.mxu2 %v10519_v46  ;;  %v7040_v22 = vadd.f32 %v7039_v47, %v4268_v38  ;;  %v7042_v0 = vadd.f32 %v7041_v8, %v4268_v38 }
 0x6cb   :  { %7341 = vmatpush.bf16.msra.mxu1 %v10295_v14 }
 0x6cc   :  { %7314 = vmatpush.bf16.msrb.mxu3 %v9819_v7  ;;  %v7054_v31 = vadd.f32 %v7053_v50, %v7040_v22  ;;  %v7056_v41 = vadd.f32 %v7055_v23, %v7042_v0 }
 0x6cd   :  { %7328 = vmatpush.bf16.msra.mxu0 %v10043_v56 }
 0x6ce   :  { %7356 = vmatpush.bf16.msra.mxu2 %v10491_v40  ;;  %v7068_v46 = vadd.f32 %v7067_v60, %v7054_v31  ;;  %v7070_v7 = vadd.f32 %v7069_v52, %v7056_v41 }
 0x6cf   :  { %7342 = vmatpush.bf16.msra.mxu1 %v10267_v29 }
 0x6d0   :  { %7315 = vmatpush.bf16.msrb.mxu3 %v9791_v36  ;;  %v7082_v25 = vadd.f32 %v7081_v10, %v7068_v46 }
 0x6d1   :  { %7329 = vmatpush.bf16.msra.mxu0 %v10015_v49 }
 0x6d2   :  { %7357 = vmatpush.bf16.msra.mxu2 %v10463_v2  ;;  %v4269_v2 = vperm.slane %v12501_v18, 5 }
 0x6d3   :  { %7343 = vmatpush.bf16.msra.mxu1 %v10239_v39 }
 0x6d4   :  { %7316 = vmatpush.bf16.msrb.mxu3 %v9763_v54 }
 0x6d5   :  { %7330 = vmatpush.bf16.msra.mxu0 %v9987_v61 }
 0x6d6   :  { %7358 = vmatpush.bf16.msra.mxu2 %v10435_v55 }
 0x6d7   :  { %7344 = vmatpush.bf16.msra.mxu1 %v10211_v4 }
 0x6d8   :  { %7317 = vmatpush.bf16.msrb.mxu3 %v9735_v42 }
 0x6d9   :  { %7331 = vmatpush.bf16.msra.mxu0 %v9959_v34  ;;  %v7109_v14 = vpop.f32.mrf.mxu0 }
 0x6da   :  { %7359 = vmatpush.bf16.msra.mxu2 %v10407_v43 }
 0x6db   :  { %7345 = vmatpush.bf16.msra.mxu1 %v10183_v19  ;;  %7318 = vmatmul.bf16.vlgmr.msrb.gmra.mxu3 %v12357_v13  ;;  %v7123_v6 = vpop.f32.mrf.mxu1 }
 0x6dc   :  { %7332 = vmatmul.bf16.vlgmr.msra.gmra.mxu0 %v12359_v21 }
 0x6dd   :  { %7360 = vmatmul.bf16.vlgmr.msra.gmra.mxu2 %v12363_v27  ;;  %v7084_v27 = vadd.f32 %v7083_v24, %v7070_v7  ;;  %v4270_v24 = vperm.slane %v12501_v18, 6 }
 0x6de   :  { %7346 = vmatmul.bf16.vlgmr.msra.gmra.mxu1 %v12361_v16  ;;  %v7095_v17 = vpop.f32.mrf.mxu3 }
 0x6df   :  { %v7096_v26 = vadd.f32 %v7095_v17, %v7082_v25 }
 0x6e0   :  { %v7137_v13 = vpop.f32.mrf.mxu2 }
 0x6e1   :  { %v7110_v21 = vadd.f32 %v7109_v14, %v7096_v26  ;;  %v7111_v33 = vpop.f32.mrf.mxu0 }
 0x6e3   :  { %v7124_v56 = vadd.f32 %v7123_v6, %v7110_v21  ;;  %v7125_v63 = vpop.f32.mrf.mxu1 }
 0x6e5   :  { %v7138_v28 = vadd.f32 %v7137_v13, %v7124_v56 }
 0x6e6   :  { %v7097_v40 = vpop.f32.mrf.mxu3 }
 0x6e7   :  { %11467 = vtanh.f32 %v7138_v28  ;;  %v7098_v16 = vadd.f32 %v7097_v40, %v7084_v27 }
 0x6e8   :  { %v7139_v29 = vpop.f32.mrf.mxu2 }
 0x6e9   :  { %v7112_v62 = vadd.f32 %v7111_v33, %v7098_v16 }
 0x6eb   :  { %v7126_v15 = vadd.f32 %v7125_v63, %v7112_v62 }
 0x6ed   :  { %v11468_v32 = vpop.eup %11467  ;;  %v7140_v51 = vadd.f32 %v7139_v29, %v7126_v15 }
 0x6ee   :  { %7384 = vst [vmem:[%s12543_s15 + $0x20] sm:$0xff] %v11468_v32 }
 0x6ef   :  { %11469 = vtanh.f32 %v7140_v51 }
 0x6f5   :  { %v11470_v30 = vpop.eup %11469 }
 0x6f6   :  { %7392 = vst [vmem:[%s12543_s15 + $0x58] sm:$0xff] %v11470_v30 }
 0x6f9   :  { %v7165_v36 = vpop.f32.mrf.mxu0 }
 0x6fb   :  { %v7179_v35 = vpop.f32.mrf.mxu1 }
 0x6fe   :  { %v7151_v49 = vpop.f32.mrf.mxu3 }
 0x6ff   :  { %v7152_v45 = vadd.f32 %v7151_v49, %v4269_v2 }
 0x700   :  { %v7193_v12 = vpop.f32.mrf.mxu2 }
 0x701   :  { %v7167_v20 = vpop.f32.mrf.mxu0  ;;  %v7166_v39 = vadd.f32 %v7165_v36, %v7152_v45 }
 0x703   :  { %v7181_v5 = vpop.f32.mrf.mxu1  ;;  %v7180_v53 = vadd.f32 %v7179_v35, %v7166_v39 }
 0x705   :  { %v7194_v61 = vadd.f32 %v7193_v12, %v7180_v53 }
 0x706   :  { %v7153_v48 = vpop.f32.mrf.mxu3 }
 0x707   :  { %v7154_v54 = vadd.f32 %v7153_v48, %v4269_v2 }
 0x708   :  { %v7195_v9 = vpop.f32.mrf.mxu2 }
 0x709   :  { %v7168_v55 = vadd.f32 %v7167_v20, %v7154_v54 }
 0x70b   :  { %v7182_v59 = vadd.f32 %v7181_v5, %v7168_v55 }
 0x70d   :  { %v7196_v37 = vadd.f32 %v7195_v9, %v7182_v59 }
 0x719   :  { %v7221_v1 = vpop.f32.mrf.mxu0 }
 0x71b   :  { %v7235_v3 = vpop.f32.mrf.mxu1 }
 0x71e   :  { %v7207_v57 = vpop.f32.mrf.mxu3 }
 0x71f   :  { %v7208_v58 = vadd.f32 %v7207_v57, %v7194_v61 }
 0x720   :  { %v7249_v4 = vpop.f32.mrf.mxu2 }
 0x721   :  { %v7222_v11 = vadd.f32 %v7221_v1, %v7208_v58  ;;  %v7223_v34 = vpop.f32.mrf.mxu0 }
 0x723   :  { %v7236_v50 = vadd.f32 %v7235_v3, %v7222_v11  ;;  %v7237_v60 = vpop.f32.mrf.mxu1 }
 0x725   :  { %v7250_v44 = vadd.f32 %v7249_v4, %v7236_v50 }
 0x726   :  { %v7209_v42 = vpop.f32.mrf.mxu3 }
 0x727   :  { %11471 = vtanh.f32 %v7250_v44  ;;  %v7210_v47 = vadd.f32 %v7209_v42, %v7196_v37 }
 0x728   :  { %v7251_v38 = vpop.f32.mrf.mxu2 }
 0x729   :  { %v7224_v43 = vadd.f32 %v7223_v34, %v7210_v47 }
 0x72b   :  { %v7238_v19 = vadd.f32 %v7237_v60, %v7224_v43 }
 0x72d   :  { %v11472_v10 = vpop.eup %11471  ;;  %v7252_v22 = vadd.f32 %v7251_v38, %v7238_v19 }
 0x72e   :  { %7385 = vst [vmem:[%s12543_s15 + $0x28] sm:$0xff] %v11472_v10 }
 0x72f   :  { %11473 = vtanh.f32 %v7252_v22 }
 0x735   :  { %v11474_v23 = vpop.eup %11473 }
 0x736   :  { %7393 = vst [vmem:[%s12543_s15 + $0x60] sm:$0xff] %v11474_v23 }
 0x739   :  { %v7277_v31 = vpop.f32.mrf.mxu0 }
 0x73b   :  { %v7291_v52 = vpop.f32.mrf.mxu1 }
 0x73e   :  { %v7263_v8 = vpop.f32.mrf.mxu3 }
 0x73f   :  { %v7264_v0 = vadd.f32 %v7263_v8, %v4270_v24 }
 0x740   :  { %v7305_v46 = vpop.f32.mrf.mxu2 }
 0x741   :  { %v7279_v25 = vpop.f32.mrf.mxu0  ;;  %v7278_v14 = vadd.f32 %v7277_v31, %v7264_v0 }
 0x743   :  { %v7293_v17 = vpop.f32.mrf.mxu1  ;;  %v7292_v6 = vadd.f32 %v7291_v52, %v7278_v14 }
 0x745   :  { %v7306_v7 = vadd.f32 %v7305_v46, %v7292_v6 }
 0x746   :  { %v7265_v41 = vpop.f32.mrf.mxu3 }
 0x747   :  { %v7266_v26 = vadd.f32 %v7265_v41, %v4270_v24 }
 0x748   :  { %v7307_v13 = vpop.f32.mrf.mxu2 }
 0x749   :  { %v7280_v21 = vadd.f32 %v7279_v25, %v7266_v26 }
 0x74b   :  { %v7294_v33 = vadd.f32 %v7293_v17, %v7280_v21 }
 0x74d   :  { %v7308_v18 = vadd.f32 %v7307_v13, %v7294_v33 }
 0x759   :  { %v7333_v56 = vpop.f32.mrf.mxu0 }
 0x75b   :  { %v7347_v40 = vpop.f32.mrf.mxu1 }
 0x75e   :  { %v7319_v27 = vpop.f32.mrf.mxu3 }
 0x75f   :  { %v7320_v28 = vadd.f32 %v7319_v27, %v7306_v7 }
 0x760   :  { %v7361_v63 = vpop.f32.mrf.mxu2 }
 0x761   :  { %v7334_v16 = vadd.f32 %v7333_v56, %v7320_v28  ;;  %v7335_v51 = vpop.f32.mrf.mxu0 }
 0x763   :  { %v7348_v62 = vadd.f32 %v7347_v40, %v7334_v16  ;;  %v7349_v36 = vpop.f32.mrf.mxu1 }
 0x765   :  { %v7362_v29 = vadd.f32 %v7361_v63, %v7348_v62 }
 0x766   :  { %v7321_v15 = vpop.f32.mrf.mxu3 }
 0x767   :  { %11475 = vtanh.f32 %v7362_v29  ;;  %v7322_v32 = vadd.f32 %v7321_v15, %v7308_v18 }
 0x768   :  { %v7363_v35 = vpop.f32.mrf.mxu2 }
 0x769   :  { %v7336_v30 = vadd.f32 %v7335_v51, %v7322_v32 }
 0x76b   :  { %v7350_v49 = vadd.f32 %v7349_v36, %v7336_v30 }
 0x76d   :  { %v11476_v2 = vpop.eup %11475  ;;  %v7364_v12 = vadd.f32 %v7363_v35, %v7350_v49 }
 0x76e   :  { %7387 = vst.msk [vmem:[%s12543_s15 + $0x30] sm:$0xff] %vm7386_vm9, %v11476_v2 }
 0x76f   :  { %11477 = vtanh.f32 %v7364_v12 }
 0x775   :  { %v11478_v45 = vpop.eup %11477 }
 0x776   :  { %7394 = vst.msk [vmem:[%s12543_s15 + $0x68] sm:$0xff] %vm7386_vm9, %v11478_v45 }
 0x777   :  { %7399 = vsyncpa [#allocation9], 1 }
 0x778   :  { %7400 = vsyncpa [#allocation11], 1 }
 0x779   :  { %7401 = vsyncpa [#allocation14], 1 }
 0x77a   :  { %7402 = vsyncpa [#allocation17], 1 }
 0x77b   :  { %7403 = vsyncpa [#allocation20], 1 }
 0x77c   :  { %7404 = vsyncpa [#allocation23], 1 }
 0x77d   :  { %7405 = vsyncmov [#allocation7] }
 0x780   :  { %s7406_s7 = vpop.sfrf %7405 }
 0x781   :  { %p10604_p0 = scmp.ne.s32.totalorder %s7406_s7, 0 }
 0x783   :  { %7410 = shalt.err (%p10604_p0)  }
 0x784   :  { %7412 = vsyncmov [#allocation7 + $0x1] }
 0x787   :  { %s7413_s28 = vpop.sfrf %7412 }
 0x788   :  { %p10605_p1 = scmp.ne.s32.totalorder %s7413_s28, 0 }
 0x78a   :  { %7417 = shalt.err (%p10605_p1)  }
 0x78b   :  { %7419 = vsyncmov [#allocation7 + $0x2] }
 0x78e   :  { %s7420_s10 = vpop.sfrf %7419 }
 0x78f   :  { %p10606_p2 = scmp.ne.s32.totalorder %s7420_s10, 0 }
 0x791   :  { %7424 = shalt.err (%p10606_p2)  }
 0x792   :  { %7426 = vsyncmov [#allocation7 + $0x3] }
 0x795   :  { %s7427_s15 = vpop.sfrf %7426 }
 0x796   :  { %p10607_p3 = scmp.ne.s32.totalorder %s7427_s15, 0 }
 0x798   :  { %7431 = shalt.err (%p10607_p3)  }

</bundles_post_ra>
